<compile_context>
chip_gen: v5e
topology: v5e:2x2
jax: 0.10.0
libtpu: 0.0.40
codegen_flags: <defaults>
</compile_context>

<pallas_src>
import functools

import jax
import jax.numpy as jnp
from jax.experimental import pallas as pl

# ---------------- configuration (small, consistent with the module) --------
BATCH = 2
SEQ = 8
VOCAB = 64
MAX_SEQ_LEN = 16
EMB_DIM = 32          # embedding_dim
NUM_LATENTS = 16      # num_latents
LATENT_DIM = 64       # latent_dim
NUM_SELF_ATTN_HEADS = 8
NUM_SELF_ATTN_PER_BLOCK = 2
NUM_BLOCKS = 1
CROSS_WIDENING = 1
SELF_WIDENING = 1

_SLAB_WIDTH = 3 * LATENT_DIM   # 192 lanes: widest packed matrix (fused QKV)


# ---------------- static slab loads ------------------------------------------
def _wl(ref, s, rows=None):
    """Load a packed parameter: spec s = (row_offset, rows, cols), all static."""
    off, r, c = s
    if rows is not None:
        r = rows
    return ref[pl.ds(off, r), pl.ds(0, c)]


# ---------------- in-kernel building blocks ----------------------------------
def _layer_norm(x, g, b):
    mean = jnp.mean(x, axis=-1, keepdims=True)
    cx = x - mean
    var = jnp.mean(cx * cx, axis=-1, keepdims=True)
    return cx * jax.lax.rsqrt(var + 1e-5) * g + b


def _erf(x):
    # Abramowitz & Stegun 7.1.26 (|abs err| < 1.5e-7 ~ f32 eps).
    ax = jnp.abs(x)
    t = 1.0 / (1.0 + 0.3275911 * ax)
    poly = ((((1.061405429 * t - 1.453152027) * t + 1.421413741) * t
             - 0.284496736) * t + 0.254829592) * t
    y = 1.0 - poly * jnp.exp(-ax * ax)
    return jnp.where(x >= 0.0, y, -y)


def _gelu(x):
    # exact-erf GELU (matches torch nn.GELU default).
    return 0.5 * x * (1.0 + _erf(x * 0.7071067811865476))


def _softmax_attend(q, k, v, scale):
    # dot_general contracting last dims of q and k: no activation transpose.
    s = jax.lax.dot_general(q, k, (((1,), (1,)), ((), ())),
                            preferred_element_type=jnp.float32) * scale
    s = s - jnp.max(s, axis=-1, keepdims=True)
    p = jnp.exp(s)
    inv = pl.reciprocal(jnp.sum(p, axis=-1, keepdims=True), approx=True)
    return jnp.dot(p * inv, v, preferred_element_type=jnp.float32)


def _ffn(x, wr, vr, sp):
    h = jnp.dot(x, _wl(wr, sp["w1"]),
                preferred_element_type=jnp.float32) + _wl(vr, sp["b1"])
    h = _gelu(h)
    return jnp.dot(h, _wl(wr, sp["w2"]),
                   preferred_element_type=jnp.float32) + _wl(vr, sp["b2"])


def _self_block(x, wr, vr, sp, num_heads, length, batch):
    d = x.shape[1]
    hd = d // num_heads
    scale = float(hd) ** -0.5
    xn = _layer_norm(x, _wl(vr, sp["ln_g"]), _wl(vr, sp["ln_b"]))
    # ONE fused QKV matmul on the full (B*len, d) slab.
    qkv = jnp.dot(xn, _wl(wr, sp["wqkv"]),
                  preferred_element_type=jnp.float32) + _wl(vr, sp["bqkv"])
    q, k, v = qkv[:, :d], qkv[:, d:2 * d], qkv[:, 2 * d:3 * d]
    rows = []
    for b in range(batch):
        r0 = b * length
        heads = []
        for h in range(num_heads):
            c0 = h * hd
            heads.append(_softmax_attend(q[r0:r0 + length, c0:c0 + hd],
                                         k[r0:r0 + length, c0:c0 + hd],
                                         v[r0:r0 + length, c0:c0 + hd],
                                         scale))
        rows.append(jnp.concatenate(heads, axis=-1))        # (len, d)
    o = jnp.concatenate(rows, axis=0)                       # (B*len, d)
    # ONE output projection (concat_h(o_h) @ Wo == sum_h o_h @ Wo_h).
    attn = jnp.dot(o, _wl(wr, sp["wo"]),
                   preferred_element_type=jnp.float32) + _wl(vr, sp["bo"])
    x = x + attn
    xn2 = _layer_norm(x, _wl(vr, sp["qkv_ln_g"]), _wl(vr, sp["qkv_ln_b"]))
    return x + _ffn(xn2, wr, vr, sp)


def _cross_block(xq, xkv, wr, vr, sp, len_q, len_kv, batch, query_residual):
    d = sp["wq"][2]                 # single cross-attention head of width d
    scale = float(d) ** -0.5
    qn = _layer_norm(xq, _wl(vr, sp["q_ln_g"]), _wl(vr, sp["q_ln_b"]))
    kvn = _layer_norm(xkv, _wl(vr, sp["kv_ln_g"]), _wl(vr, sp["kv_ln_b"]))
    q = jnp.dot(qn, _wl(wr, sp["wq"]),
                preferred_element_type=jnp.float32) + _wl(vr, sp["bq"])
    kv = jnp.dot(kvn, _wl(wr, sp["wkv"]),               # fused K|V matmul
                 preferred_element_type=jnp.float32) + _wl(vr, sp["bkv"])
    k, v = kv[:, :d], kv[:, d:2 * d]
    rows = []
    for b in range(batch):
        rows.append(_softmax_attend(q[b * len_q:(b + 1) * len_q, :],
                                    k[b * len_kv:(b + 1) * len_kv, :],
                                    v[b * len_kv:(b + 1) * len_kv, :],
                                    scale))
    o = jnp.concatenate(rows, axis=0)
    attn = jnp.dot(o, _wl(wr, sp["wo"]),
                   preferred_element_type=jnp.float32) + _wl(vr, sp["bo"])
    x = xq + attn if query_residual else attn
    xn2 = _layer_norm(x, _wl(vr, sp["qkv_ln_g"]), _wl(vr, sp["qkv_ln_b"]))
    return x + _ffn(xn2, wr, vr, sp)


# ---------------- the single fused kernel ------------------------------------
def _fused_kernel(tok_ref, w_ref, v_ref, out_ref, *, spec, batch, seq):
    vocab = spec["tok_emb"][1]
    n_lat = spec["latents"][1]

    # --- embedding gather (one-hot MXU matmul) + fused positional add ---
    tok = tok_ref[...]                                             # (B*S, 1)
    vocab_iota = jax.lax.broadcasted_iota(jnp.int32, (batch * seq, vocab), 1)
    onehot = (vocab_iota == tok).astype(jnp.float32)               # (B*S, V)
    tok_emb = jnp.dot(onehot, _wl(w_ref, spec["tok_emb"]),
                      preferred_element_type=jnp.float32)          # (B*S, E)
    pos = _wl(w_ref, spec["pos_emb"], rows=seq)                    # (S, E)
    pos_bs = jnp.tile(pos, (batch, 1))                             # (B*S, E)
    emb = tok_emb + pos_bs

    # --- encoder: cross-attn into latents, then self-attn stack ---
    x = jnp.tile(_wl(w_ref, spec["latents"]), (batch, 1))          # (B*L, D)
    x = _cross_block(x, emb, w_ref, v_ref, spec["enc_cross"],
                     n_lat, seq, batch, query_residual=True)
    for _ in range(NUM_BLOCKS):
        for sp in spec["enc_self"]:
            x = _self_block(x, w_ref, v_ref, sp, NUM_SELF_ATTN_HEADS,
                            n_lat, batch)

    # --- decoder cross-attn (pos-emb query, no query residual) + vocab proj ---
    y = _cross_block(pos_bs, x, w_ref, v_ref, spec["dec_cross"],
                     seq, n_lat, batch, query_residual=False)
    out_ref[...] = (jnp.dot(y, _wl(w_ref, spec["proj_w"]),
                            preferred_element_type=jnp.float32)
                    + _wl(v_ref, spec["proj_b"]))


# ---------------- wrapper: pack params into two lane-dense slabs -------------
class _SlabPacker:
    """Packs 1-/2-D f32 params into a single lane-padded (rows, width) slab."""

    def __init__(self, width):
        self.width = width
        self.parts = []
        self.rows = 0

    def add(self, arr):
        arr = jnp.asarray(arr, jnp.float32)
        if arr.ndim == 1:
            arr = arr.reshape(1, -1)
        r, c = arr.shape
        off = self.rows
        self.parts.append(jnp.pad(arr, ((0, 0), (0, self.width - c))))
        self.rows += r
        return (off, r, c)

    def slab(self):
        return jnp.concatenate(self.parts, axis=0)


def _pack_params(params):
    wp = _SlabPacker(_SLAB_WIDTH)    # matrices (row counts are all 8-aligned)
    vp = _SlabPacker(_SLAB_WIDTH)    # LN gammas/betas + biases, one row each

    def pack_cross(p):
        a, m = p["attn"], p["mlp"]
        return {
            "q_ln_g": vp.add(p["q_ln_g"]), "q_ln_b": vp.add(p["q_ln_b"]),
            "kv_ln_g": vp.add(p["kv_ln_g"]), "kv_ln_b": vp.add(p["kv_ln_b"]),
            "qkv_ln_g": vp.add(p["qkv_ln_g"]), "qkv_ln_b": vp.add(p["qkv_ln_b"]),
            "wq": wp.add(a["wq"]), "bq": vp.add(a["bq"]),
            "wkv": wp.add(jnp.concatenate([a["wk"], a["wv"]], axis=1)),
            "bkv": vp.add(jnp.concatenate([a["bk"], a["bv"]], axis=0)),
            "wo": wp.add(a["wo"]), "bo": vp.add(a["bo"]),
            "w1": wp.add(m["w1"]), "b1": vp.add(m["b1"]),
            "w2": wp.add(m["w2"]), "b2": vp.add(m["b2"]),
        }

    def pack_self(p):
        a, m = p["attn"], p["mlp"]
        return {
            "ln_g": vp.add(p["ln_g"]), "ln_b": vp.add(p["ln_b"]),
            "qkv_ln_g": vp.add(p["qkv_ln_g"]), "qkv_ln_b": vp.add(p["qkv_ln_b"]),
            "wqkv": wp.add(jnp.concatenate([a["wq"], a["wk"], a["wv"]], axis=1)),
            "bqkv": vp.add(jnp.concatenate([a["bq"], a["bk"], a["bv"]], axis=0)),
            "wo": wp.add(a["wo"]), "bo": vp.add(a["bo"]),
            "w1": wp.add(m["w1"]), "b1": vp.add(m["b1"]),
            "w2": wp.add(m["w2"]), "b2": vp.add(m["b2"]),
        }

    spec = {
        "tok_emb": wp.add(params["token_embedding"]),        # (V, E)
        "pos_emb": wp.add(params["position_embedding"]),     # (MAX_SEQ_LEN, E)
        "latents": wp.add(params["latents"]),                # (L, D)
        "enc_cross": pack_cross(params["enc_cross"]),
        "enc_self": tuple(pack_self(p) for p in params["enc_self"]),
        "dec_cross": pack_cross(params["dec_cross"]),
        "proj_w": wp.add(params["proj_w"]),
        "proj_b": vp.add(params["proj_b"]),
    }
    return spec, wp.slab(), vp.slab()


def perceiver_lm_forward(params, tokens):
    """tokens: (B, S) int32 -> logits (B, S, VOCAB) via ONE fused pallas_call."""
    # TODO(synk): mask=None path only; on v7x a grid=(B,) with
    # dimension_semantics=("parallel",) would light up the second TensorCore.
    B, S = tokens.shape
    spec, w_slab, v_slab = _pack_params(params)
    kernel = functools.partial(_fused_kernel, spec=spec, batch=B, seq=S)
    logits = pl.pallas_call(
        kernel,
        out_shape=jax.ShapeDtypeStruct((B * S, VOCAB), jnp.float32),
    )(tokens.reshape(B * S, 1).astype(jnp.int32), w_slab, v_slab)
    return logits.reshape(B, S, VOCAB)


# ---------------- deterministic parameter init --------------------------------
def _w(key, i, o):
    return jax.random.normal(key, (i, o), jnp.float32) * 0.02


def init_mha(key, kv_dim, q_dim, qk_out, v_out, out_dim):
    k1, k2, k3, k4 = jax.random.split(key, 4)
    return {
        "wk": _w(k1, kv_dim, qk_out), "bk": jnp.zeros((qk_out,), jnp.float32),
        "wq": _w(k2, q_dim, qk_out), "bq": jnp.zeros((qk_out,), jnp.float32),
        "wv": _w(k3, kv_dim, v_out), "bv": jnp.zeros((v_out,), jnp.float32),
        "wo": _w(k4, v_out, out_dim), "bo": jnp.zeros((out_dim,), jnp.float32),
    }


def init_mlp(key, dim, widening):
    k1, k2 = jax.random.split(key)
    hidden = dim * widening
    return {
        "w1": _w(k1, dim, hidden), "b1": jnp.zeros((hidden,), jnp.float32),
        "w2": _w(k2, hidden, dim), "b2": jnp.zeros((dim,), jnp.float32),
    }


def init_cross(key, kv_dim, q_dim, widening):
    k1, k2 = jax.random.split(key)
    return {
        "kv_ln_g": jnp.ones((kv_dim,), jnp.float32),
        "kv_ln_b": jnp.zeros((kv_dim,), jnp.float32),
        "q_ln_g": jnp.ones((q_dim,), jnp.float32),
        "q_ln_b": jnp.zeros((q_dim,), jnp.float32),
        "qkv_ln_g": jnp.ones((q_dim,), jnp.float32),
        "qkv_ln_b": jnp.zeros((q_dim,), jnp.float32),
        "attn": init_mha(k1, kv_dim, q_dim, q_dim, q_dim, q_dim),
        "mlp": init_mlp(k2, q_dim, widening),
    }


def init_self(key, dim, widening):
    k1, k2 = jax.random.split(key)
    return {
        "ln_g": jnp.ones((dim,), jnp.float32),
        "ln_b": jnp.zeros((dim,), jnp.float32),
        "qkv_ln_g": jnp.ones((dim,), jnp.float32),
        "qkv_ln_b": jnp.zeros((dim,), jnp.float32),
        "attn": init_mha(k1, dim, dim, dim, dim, dim),
        "mlp": init_mlp(k2, dim, widening),
    }


def init_params(key):
    keys = jax.random.split(key, 6 + NUM_SELF_ATTN_PER_BLOCK)
    return {
        "token_embedding": jax.random.normal(
            keys[0], (VOCAB, EMB_DIM), jnp.float32) * 0.02,
        "position_embedding": jax.random.normal(
            keys[1], (MAX_SEQ_LEN, EMB_DIM), jnp.float32) * 0.02,
        "latents": jax.random.normal(
            keys[2], (NUM_LATENTS, LATENT_DIM), jnp.float32),
        "enc_cross": init_cross(keys[3], EMB_DIM, LATENT_DIM, CROSS_WIDENING),
        "enc_self": [
            init_self(keys[6 + i], LATENT_DIM, SELF_WIDENING)
            for i in range(NUM_SELF_ATTN_PER_BLOCK)
        ],
        "dec_cross": init_cross(keys[4], LATENT_DIM, EMB_DIM, CROSS_WIDENING),
        "proj_w": _w(keys[5], EMB_DIM, VOCAB),
        "proj_b": jnp.zeros((VOCAB,), jnp.float32),
    }


# ---------------- main ---------------------------------------------------------
if __name__ == "__main__":
    key = jax.random.PRNGKey(0)
    kparam, ktok = jax.random.split(key)
    params = init_params(kparam)
    tokens = jax.random.randint(ktok, (BATCH, SEQ), 0, VOCAB, dtype=jnp.int32)

    fwd = jax.jit(functools.partial(perceiver_lm_forward, params))
    out = jax.block_until_ready(fwd(tokens))

    assert out.shape == (BATCH, SEQ, VOCAB), out.shape
    assert out.dtype == jnp.float32
    assert bool(jnp.all(jnp.isfinite(out)))
    print("KERNEL_OK")
</pallas_src>

<mosaic_0001>
module attributes {stable_mosaic.version = 11 : i64} {
  func.func @_fused_kernel(%arg0: memref<16x1xi32, #tpu.memory_space<vmem>>, %arg1: memref<1120x192xf32, #tpu.memory_space<vmem>>, %arg2: memref<39x192xf32, #tpu.memory_space<vmem>>, %arg3: memref<16x64xf32, #tpu.memory_space<vmem>>) attributes {dimension_semantics = [], scalar_prefetch = 0 : i64, scratch_operands = 0 : i64, tpu.core_type = #tpu.core_type<tc>} {
    %c0 = arith.constant 0 : index
    %c0_0 = arith.constant 0 : index
    %0 = vector.load %arg0[%c0, %c0_0] : memref<16x1xi32, #tpu.memory_space<vmem>>, vector<16x1xi32>
    %1 = tpu.iota {dimensions = array<i32: 1>} : vector<16x64xi32>
    %2 = vector.broadcast %0 : vector<16x1xi32> to vector<16x64xi32>
    %3 = arith.cmpi eq, %1, %2 : vector<16x64xi32>
    %4 = arith.extui %3 : vector<16x64xi1> to vector<16x64xi32>
    %5 = arith.sitofp %4 : vector<16x64xi32> to vector<16x64xf32>
    %c0_1 = arith.constant 0 : index
    %c0_2 = arith.constant 0 : index
    %6 = vector.load %arg1[%c0_1, %c0_2] : memref<1120x192xf32, #tpu.memory_space<vmem>>, vector<64x32xf32>
    %cst = arith.constant dense<0.000000e+00> : vector<16x32xf32>
    %7 = tpu.matmul %5, %6, %cst {dimension_numbers = #tpu.dot_dimension_numbers<[1], [0], [0], [1], [0, 0, 1, 1], [], []>} : vector<16x64xf32>, vector<64x32xf32>, vector<16x32xf32> -> vector<16x32xf32>
    %c64 = arith.constant 64 : index
    %c0_3 = arith.constant 0 : index
    %8 = vector.load %arg1[%c64, %c0_3] : memref<1120x192xf32, #tpu.memory_space<vmem>>, vector<8x32xf32>
    %9 = tpu.concatenate %8, %8 in 0 : vector<8x32xf32>, vector<8x32xf32> -> vector<16x32xf32>
    %10 = arith.addf %7, %9 : vector<16x32xf32>
    %c80 = arith.constant 80 : index
    %c0_4 = arith.constant 0 : index
    %11 = vector.load %arg1[%c80, %c0_4] : memref<1120x192xf32, #tpu.memory_space<vmem>>, vector<16x64xf32>
    %12 = tpu.concatenate %11, %11 in 0 : vector<16x64xf32>, vector<16x64xf32> -> vector<32x64xf32>
    %c0_5 = arith.constant 0 : index
    %c0_6 = arith.constant 0 : index
    %13 = vector.load %arg2[%c0_5, %c0_6] : memref<39x192xf32, #tpu.memory_space<vmem>>, vector<1x64xf32>
    %c1 = arith.constant 1 : index
    %c0_7 = arith.constant 0 : index
    %14 = vector.load %arg2[%c1, %c0_7] : memref<39x192xf32, #tpu.memory_space<vmem>>, vector<1x64xf32>
    %cst_8 = arith.constant dense<0.000000e+00> : vector<32xf32>
    %15 = vector.multi_reduction <add>, %12, %cst_8 [1] : vector<32x64xf32> to vector<32xf32>
    %16 = vector.shape_cast %15 : vector<32xf32> to vector<32x1xf32>
    %cst_9 = arith.constant 6.400000e+01 : f32
    %17 = vector.broadcast %cst_9 : f32 to vector<32x1xf32>
    %18 = arith.divf %16, %17 : vector<32x1xf32>
    %19 = vector.broadcast %18 : vector<32x1xf32> to vector<32x64xf32>
    %20 = arith.subf %12, %19 : vector<32x64xf32>
    %21 = arith.mulf %20, %20 : vector<32x64xf32>
    %cst_10 = arith.constant dense<0.000000e+00> : vector<32xf32>
    %22 = vector.multi_reduction <add>, %21, %cst_10 [1] : vector<32x64xf32> to vector<32xf32>
    %23 = vector.shape_cast %22 : vector<32xf32> to vector<32x1xf32>
    %cst_11 = arith.constant 6.400000e+01 : f32
    %24 = vector.broadcast %cst_11 : f32 to vector<32x1xf32>
    %25 = arith.divf %23, %24 : vector<32x1xf32>
    %cst_12 = arith.constant 9.99999974E-6 : f32
    %26 = vector.broadcast %cst_12 : f32 to vector<32x1xf32>
    %27 = arith.addf %25, %26 : vector<32x1xf32>
    %28 = math.rsqrt %27 : vector<32x1xf32>
    %29 = vector.broadcast %28 : vector<32x1xf32> to vector<32x64xf32>
    %30 = arith.mulf %20, %29 : vector<32x64xf32>
    %31 = vector.broadcast %13 : vector<1x64xf32> to vector<32x64xf32>
    %32 = arith.mulf %30, %31 : vector<32x64xf32>
    %33 = vector.broadcast %14 : vector<1x64xf32> to vector<32x64xf32>
    %34 = arith.addf %32, %33 : vector<32x64xf32>
    %c2 = arith.constant 2 : index
    %c0_13 = arith.constant 0 : index
    %35 = vector.load %arg2[%c2, %c0_13] : memref<39x192xf32, #tpu.memory_space<vmem>>, vector<1x32xf32>
    %c3 = arith.constant 3 : index
    %c0_14 = arith.constant 0 : index
    %36 = vector.load %arg2[%c3, %c0_14] : memref<39x192xf32, #tpu.memory_space<vmem>>, vector<1x32xf32>
    %cst_15 = arith.constant dense<0.000000e+00> : vector<16xf32>
    %37 = vector.multi_reduction <add>, %10, %cst_15 [1] : vector<16x32xf32> to vector<16xf32>
    %38 = vector.shape_cast %37 : vector<16xf32> to vector<16x1xf32>
    %cst_16 = arith.constant 3.200000e+01 : f32
    %39 = vector.broadcast %cst_16 : f32 to vector<16x1xf32>
    %40 = arith.divf %38, %39 : vector<16x1xf32>
    %41 = vector.broadcast %40 : vector<16x1xf32> to vector<16x32xf32>
    %42 = arith.subf %10, %41 : vector<16x32xf32>
    %43 = arith.mulf %42, %42 : vector<16x32xf32>
    %cst_17 = arith.constant dense<0.000000e+00> : vector<16xf32>
    %44 = vector.multi_reduction <add>, %43, %cst_17 [1] : vector<16x32xf32> to vector<16xf32>
    %45 = vector.shape_cast %44 : vector<16xf32> to vector<16x1xf32>
    %cst_18 = arith.constant 3.200000e+01 : f32
    %46 = vector.broadcast %cst_18 : f32 to vector<16x1xf32>
    %47 = arith.divf %45, %46 : vector<16x1xf32>
    %cst_19 = arith.constant 9.99999974E-6 : f32
    %48 = vector.broadcast %cst_19 : f32 to vector<16x1xf32>
    %49 = arith.addf %47, %48 : vector<16x1xf32>
    %50 = math.rsqrt %49 : vector<16x1xf32>
    %51 = vector.broadcast %50 : vector<16x1xf32> to vector<16x32xf32>
    %52 = arith.mulf %42, %51 : vector<16x32xf32>
    %53 = vector.broadcast %35 : vector<1x32xf32> to vector<16x32xf32>
    %54 = arith.mulf %52, %53 : vector<16x32xf32>
    %55 = vector.broadcast %36 : vector<1x32xf32> to vector<16x32xf32>
    %56 = arith.addf %54, %55 : vector<16x32xf32>
    %c96 = arith.constant 96 : index
    %c0_20 = arith.constant 0 : index
    %57 = vector.load %arg1[%c96, %c0_20] : memref<1120x192xf32, #tpu.memory_space<vmem>>, vector<64x64xf32>
    %cst_21 = arith.constant dense<0.000000e+00> : vector<32x64xf32>
    %58 = tpu.matmul %34, %57, %cst_21 {dimension_numbers = #tpu.dot_dimension_numbers<[1], [0], [0], [1], [0, 0, 1, 1], [], []>} : vector<32x64xf32>, vector<64x64xf32>, vector<32x64xf32> -> vector<32x64xf32>
    %c6 = arith.constant 6 : index
    %c0_22 = arith.constant 0 : index
    %59 = vector.load %arg2[%c6, %c0_22] : memref<39x192xf32, #tpu.memory_space<vmem>>, vector<1x64xf32>
    %60 = vector.broadcast %59 : vector<1x64xf32> to vector<32x64xf32>
    %61 = arith.addf %58, %60 : vector<32x64xf32>
    %c160 = arith.constant 160 : index
    %c0_23 = arith.constant 0 : index
    %62 = vector.load %arg1[%c160, %c0_23] : memref<1120x192xf32, #tpu.memory_space<vmem>>, vector<32x128xf32>
    %cst_24 = arith.constant dense<0.000000e+00> : vector<16x128xf32>
    %63 = tpu.matmul %56, %62, %cst_24 {dimension_numbers = #tpu.dot_dimension_numbers<[1], [0], [0], [1], [0, 0, 1, 1], [], []>} : vector<16x32xf32>, vector<32x128xf32>, vector<16x128xf32> -> vector<16x128xf32>
    %c7 = arith.constant 7 : index
    %c0_25 = arith.constant 0 : index
    %64 = vector.load %arg2[%c7, %c0_25] : memref<39x192xf32, #tpu.memory_space<vmem>>, vector<1x128xf32>
    %65 = vector.broadcast %64 : vector<1x128xf32> to vector<16x128xf32>
    %66 = arith.addf %63, %65 : vector<16x128xf32>
    %67 = vector.extract_strided_slice %66 {offsets = [0, 0], sizes = [16, 64], strides = [1, 1]} : vector<16x128xf32> to vector<16x64xf32>
    %68 = vector.extract_strided_slice %66 {offsets = [0, 64], sizes = [16, 64], strides = [1, 1]} : vector<16x128xf32> to vector<16x64xf32>
    %69 = vector.extract_strided_slice %61 {offsets = [0, 0], sizes = [16, 64], strides = [1, 1]} : vector<32x64xf32> to vector<16x64xf32>
    %70 = vector.extract_strided_slice %67 {offsets = [0, 0], sizes = [8, 64], strides = [1, 1]} : vector<16x64xf32> to vector<8x64xf32>
    %71 = vector.extract_strided_slice %68 {offsets = [0, 0], sizes = [8, 64], strides = [1, 1]} : vector<16x64xf32> to vector<8x64xf32>
    %cst_26 = arith.constant dense<0.000000e+00> : vector<16x8xf32>
    %72 = tpu.matmul %69, %70, %cst_26 {dimension_numbers = #tpu.dot_dimension_numbers<[1], [1], [0], [0], [0, 0, 1, 0], [], []>} : vector<16x64xf32>, vector<8x64xf32>, vector<16x8xf32> -> vector<16x8xf32>
    %cst_27 = arith.constant 1.250000e-01 : f32
    %73 = vector.broadcast %cst_27 : f32 to vector<16x8xf32>
    %74 = arith.mulf %72, %73 : vector<16x8xf32>
    %cst_28 = arith.constant dense<0xFF800000> : vector<16xf32>
    %75 = vector.multi_reduction <maximumf>, %74, %cst_28 [1] : vector<16x8xf32> to vector<16xf32>
    %76 = vector.shape_cast %75 : vector<16xf32> to vector<16x1xf32>
    %77 = vector.broadcast %76 : vector<16x1xf32> to vector<16x8xf32>
    %78 = arith.subf %74, %77 : vector<16x8xf32>
    %79 = math.exp %78 : vector<16x8xf32>
    %cst_29 = arith.constant dense<0.000000e+00> : vector<16xf32>
    %80 = vector.multi_reduction <add>, %79, %cst_29 [1] : vector<16x8xf32> to vector<16xf32>
    %81 = vector.shape_cast %80 : vector<16xf32> to vector<16x1xf32>
    %82 = tpu.reciprocal %81 {approx = true} : vector<16x1xf32> -> vector<16x1xf32>
    %83 = vector.broadcast %82 : vector<16x1xf32> to vector<16x8xf32>
    %84 = arith.mulf %79, %83 : vector<16x8xf32>
    %cst_30 = arith.constant dense<0.000000e+00> : vector<16x64xf32>
    %85 = tpu.matmul %84, %71, %cst_30 {dimension_numbers = #tpu.dot_dimension_numbers<[1], [0], [0], [1], [0, 0, 1, 1], [], []>} : vector<16x8xf32>, vector<8x64xf32>, vector<16x64xf32> -> vector<16x64xf32>
    %86 = vector.extract_strided_slice %61 {offsets = [16, 0], sizes = [16, 64], strides = [1, 1]} : vector<32x64xf32> to vector<16x64xf32>
    %87 = vector.extract_strided_slice %67 {offsets = [8, 0], sizes = [8, 64], strides = [1, 1]} : vector<16x64xf32> to vector<8x64xf32>
    %88 = vector.extract_strided_slice %68 {offsets = [8, 0], sizes = [8, 64], strides = [1, 1]} : vector<16x64xf32> to vector<8x64xf32>
    %cst_31 = arith.constant dense<0.000000e+00> : vector<16x8xf32>
    %89 = tpu.matmul %86, %87, %cst_31 {dimension_numbers = #tpu.dot_dimension_numbers<[1], [1], [0], [0], [0, 0, 1, 0], [], []>} : vector<16x64xf32>, vector<8x64xf32>, vector<16x8xf32> -> vector<16x8xf32>
    %cst_32 = arith.constant 1.250000e-01 : f32
    %90 = vector.broadcast %cst_32 : f32 to vector<16x8xf32>
    %91 = arith.mulf %89, %90 : vector<16x8xf32>
    %cst_33 = arith.constant dense<0xFF800000> : vector<16xf32>
    %92 = vector.multi_reduction <maximumf>, %91, %cst_33 [1] : vector<16x8xf32> to vector<16xf32>
    %93 = vector.shape_cast %92 : vector<16xf32> to vector<16x1xf32>
    %94 = vector.broadcast %93 : vector<16x1xf32> to vector<16x8xf32>
    %95 = arith.subf %91, %94 : vector<16x8xf32>
    %96 = math.exp %95 : vector<16x8xf32>
    %cst_34 = arith.constant dense<0.000000e+00> : vector<16xf32>
    %97 = vector.multi_reduction <add>, %96, %cst_34 [1] : vector<16x8xf32> to vector<16xf32>
    %98 = vector.shape_cast %97 : vector<16xf32> to vector<16x1xf32>
    %99 = tpu.reciprocal %98 {approx = true} : vector<16x1xf32> -> vector<16x1xf32>
    %100 = vector.broadcast %99 : vector<16x1xf32> to vector<16x8xf32>
    %101 = arith.mulf %96, %100 : vector<16x8xf32>
    %cst_35 = arith.constant dense<0.000000e+00> : vector<16x64xf32>
    %102 = tpu.matmul %101, %88, %cst_35 {dimension_numbers = #tpu.dot_dimension_numbers<[1], [0], [0], [1], [0, 0, 1, 1], [], []>} : vector<16x8xf32>, vector<8x64xf32>, vector<16x64xf32> -> vector<16x64xf32>
    %103 = tpu.concatenate %85, %102 in 0 : vector<16x64xf32>, vector<16x64xf32> -> vector<32x64xf32>
    %c192 = arith.constant 192 : index
    %c0_36 = arith.constant 0 : index
    %104 = vector.load %arg1[%c192, %c0_36] : memref<1120x192xf32, #tpu.memory_space<vmem>>, vector<64x64xf32>
    %cst_37 = arith.constant dense<0.000000e+00> : vector<32x64xf32>
    %105 = tpu.matmul %103, %104, %cst_37 {dimension_numbers = #tpu.dot_dimension_numbers<[1], [0], [0], [1], [0, 0, 1, 1], [], []>} : vector<32x64xf32>, vector<64x64xf32>, vector<32x64xf32> -> vector<32x64xf32>
    %c8 = arith.constant 8 : index
    %c0_38 = arith.constant 0 : index
    %106 = vector.load %arg2[%c8, %c0_38] : memref<39x192xf32, #tpu.memory_space<vmem>>, vector<1x64xf32>
    %107 = vector.broadcast %106 : vector<1x64xf32> to vector<32x64xf32>
    %108 = arith.addf %105, %107 : vector<32x64xf32>
    %109 = arith.addf %12, %108 : vector<32x64xf32>
    %c4 = arith.constant 4 : index
    %c0_39 = arith.constant 0 : index
    %110 = vector.load %arg2[%c4, %c0_39] : memref<39x192xf32, #tpu.memory_space<vmem>>, vector<1x64xf32>
    %c5 = arith.constant 5 : index
    %c0_40 = arith.constant 0 : index
    %111 = vector.load %arg2[%c5, %c0_40] : memref<39x192xf32, #tpu.memory_space<vmem>>, vector<1x64xf32>
    %cst_41 = arith.constant dense<0.000000e+00> : vector<32xf32>
    %112 = vector.multi_reduction <add>, %109, %cst_41 [1] : vector<32x64xf32> to vector<32xf32>
    %113 = vector.shape_cast %112 : vector<32xf32> to vector<32x1xf32>
    %cst_42 = arith.constant 6.400000e+01 : f32
    %114 = vector.broadcast %cst_42 : f32 to vector<32x1xf32>
    %115 = arith.divf %113, %114 : vector<32x1xf32>
    %116 = vector.broadcast %115 : vector<32x1xf32> to vector<32x64xf32>
    %117 = arith.subf %109, %116 : vector<32x64xf32>
    %118 = arith.mulf %117, %117 : vector<32x64xf32>
    %cst_43 = arith.constant dense<0.000000e+00> : vector<32xf32>
    %119 = vector.multi_reduction <add>, %118, %cst_43 [1] : vector<32x64xf32> to vector<32xf32>
    %120 = vector.shape_cast %119 : vector<32xf32> to vector<32x1xf32>
    %cst_44 = arith.constant 6.400000e+01 : f32
    %121 = vector.broadcast %cst_44 : f32 to vector<32x1xf32>
    %122 = arith.divf %120, %121 : vector<32x1xf32>
    %cst_45 = arith.constant 9.99999974E-6 : f32
    %123 = vector.broadcast %cst_45 : f32 to vector<32x1xf32>
    %124 = arith.addf %122, %123 : vector<32x1xf32>
    %125 = math.rsqrt %124 : vector<32x1xf32>
    %126 = vector.broadcast %125 : vector<32x1xf32> to vector<32x64xf32>
    %127 = arith.mulf %117, %126 : vector<32x64xf32>
    %128 = vector.broadcast %110 : vector<1x64xf32> to vector<32x64xf32>
    %129 = arith.mulf %127, %128 : vector<32x64xf32>
    %130 = vector.broadcast %111 : vector<1x64xf32> to vector<32x64xf32>
    %131 = arith.addf %129, %130 : vector<32x64xf32>
    %c256 = arith.constant 256 : index
    %c0_46 = arith.constant 0 : index
    %132 = vector.load %arg1[%c256, %c0_46] : memref<1120x192xf32, #tpu.memory_space<vmem>>, vector<64x64xf32>
    %cst_47 = arith.constant dense<0.000000e+00> : vector<32x64xf32>
    %133 = tpu.matmul %131, %132, %cst_47 {dimension_numbers = #tpu.dot_dimension_numbers<[1], [0], [0], [1], [0, 0, 1, 1], [], []>} : vector<32x64xf32>, vector<64x64xf32>, vector<32x64xf32> -> vector<32x64xf32>
    %c9 = arith.constant 9 : index
    %c0_48 = arith.constant 0 : index
    %134 = vector.load %arg2[%c9, %c0_48] : memref<39x192xf32, #tpu.memory_space<vmem>>, vector<1x64xf32>
    %135 = vector.broadcast %134 : vector<1x64xf32> to vector<32x64xf32>
    %136 = arith.addf %133, %135 : vector<32x64xf32>
    %cst_49 = arith.constant 5.000000e-01 : f32
    %137 = vector.broadcast %cst_49 : f32 to vector<32x64xf32>
    %138 = arith.mulf %137, %136 : vector<32x64xf32>
    %cst_50 = arith.constant 0.707106769 : f32
    %139 = vector.broadcast %cst_50 : f32 to vector<32x64xf32>
    %140 = arith.mulf %136, %139 : vector<32x64xf32>
    %141 = math.absf %140 : vector<32x64xf32>
    %cst_51 = arith.constant 0.327591091 : f32
    %142 = vector.broadcast %cst_51 : f32 to vector<32x64xf32>
    %143 = arith.mulf %142, %141 : vector<32x64xf32>
    %cst_52 = arith.constant 1.000000e+00 : f32
    %144 = vector.broadcast %cst_52 : f32 to vector<32x64xf32>
    %145 = arith.addf %144, %143 : vector<32x64xf32>
    %cst_53 = arith.constant 1.000000e+00 : f32
    %146 = vector.broadcast %cst_53 : f32 to vector<32x64xf32>
    %147 = arith.divf %146, %145 : vector<32x64xf32>
    %cst_54 = arith.constant 1.06140542 : f32
    %148 = vector.broadcast %cst_54 : f32 to vector<32x64xf32>
    %149 = arith.mulf %148, %147 : vector<32x64xf32>
    %cst_55 = arith.constant 1.45315206 : f32
    %150 = vector.broadcast %cst_55 : f32 to vector<32x64xf32>
    %151 = arith.subf %149, %150 : vector<32x64xf32>
    %152 = arith.mulf %151, %147 : vector<32x64xf32>
    %cst_56 = arith.constant 1.42141378 : f32
    %153 = vector.broadcast %cst_56 : f32 to vector<32x64xf32>
    %154 = arith.addf %152, %153 : vector<32x64xf32>
    %155 = arith.mulf %154, %147 : vector<32x64xf32>
    %cst_57 = arith.constant 0.284496725 : f32
    %156 = vector.broadcast %cst_57 : f32 to vector<32x64xf32>
    %157 = arith.subf %155, %156 : vector<32x64xf32>
    %158 = arith.mulf %157, %147 : vector<32x64xf32>
    %cst_58 = arith.constant 0.254829586 : f32
    %159 = vector.broadcast %cst_58 : f32 to vector<32x64xf32>
    %160 = arith.addf %158, %159 : vector<32x64xf32>
    %161 = arith.mulf %160, %147 : vector<32x64xf32>
    %cst_59 = arith.constant 0.000000e+00 : f32
    %162 = vector.broadcast %cst_59 : f32 to vector<32x64xf32>
    %163 = arith.subf %162, %141 : vector<32x64xf32>
    %164 = arith.mulf %163, %141 : vector<32x64xf32>
    %165 = math.exp %164 : vector<32x64xf32>
    %166 = arith.mulf %161, %165 : vector<32x64xf32>
    %cst_60 = arith.constant 1.000000e+00 : f32
    %167 = vector.broadcast %cst_60 : f32 to vector<32x64xf32>
    %168 = arith.subf %167, %166 : vector<32x64xf32>
    %cst_61 = arith.constant 0.000000e+00 : f32
    %169 = vector.broadcast %cst_61 : f32 to vector<32x64xf32>
    %170 = arith.cmpf oge, %140, %169 : vector<32x64xf32>
    %cst_62 = arith.constant 0.000000e+00 : f32
    %171 = vector.broadcast %cst_62 : f32 to vector<32x64xf32>
    %172 = arith.subf %171, %168 : vector<32x64xf32>
    %173 = arith.select %170, %168, %172 : vector<32x64xi1>, vector<32x64xf32>
    %cst_63 = arith.constant 1.000000e+00 : f32
    %174 = vector.broadcast %cst_63 : f32 to vector<32x64xf32>
    %175 = arith.addf %174, %173 : vector<32x64xf32>
    %176 = arith.mulf %138, %175 : vector<32x64xf32>
    %c320 = arith.constant 320 : index
    %c0_64 = arith.constant 0 : index
    %177 = vector.load %arg1[%c320, %c0_64] : memref<1120x192xf32, #tpu.memory_space<vmem>>, vector<64x64xf32>
    %cst_65 = arith.constant dense<0.000000e+00> : vector<32x64xf32>
    %178 = tpu.matmul %176, %177, %cst_65 {dimension_numbers = #tpu.dot_dimension_numbers<[1], [0], [0], [1], [0, 0, 1, 1], [], []>} : vector<32x64xf32>, vector<64x64xf32>, vector<32x64xf32> -> vector<32x64xf32>
    %c10 = arith.constant 10 : index
    %c0_66 = arith.constant 0 : index
    %179 = vector.load %arg2[%c10, %c0_66] : memref<39x192xf32, #tpu.memory_space<vmem>>, vector<1x64xf32>
    %180 = vector.broadcast %179 : vector<1x64xf32> to vector<32x64xf32>
    %181 = arith.addf %178, %180 : vector<32x64xf32>
    %182 = arith.addf %109, %181 : vector<32x64xf32>
    %c11 = arith.constant 11 : index
    %c0_67 = arith.constant 0 : index
    %183 = vector.load %arg2[%c11, %c0_67] : memref<39x192xf32, #tpu.memory_space<vmem>>, vector<1x64xf32>
    %c12 = arith.constant 12 : index
    %c0_68 = arith.constant 0 : index
    %184 = vector.load %arg2[%c12, %c0_68] : memref<39x192xf32, #tpu.memory_space<vmem>>, vector<1x64xf32>
    %cst_69 = arith.constant dense<0.000000e+00> : vector<32xf32>
    %185 = vector.multi_reduction <add>, %182, %cst_69 [1] : vector<32x64xf32> to vector<32xf32>
    %186 = vector.shape_cast %185 : vector<32xf32> to vector<32x1xf32>
    %cst_70 = arith.constant 6.400000e+01 : f32
    %187 = vector.broadcast %cst_70 : f32 to vector<32x1xf32>
    %188 = arith.divf %186, %187 : vector<32x1xf32>
    %189 = vector.broadcast %188 : vector<32x1xf32> to vector<32x64xf32>
    %190 = arith.subf %182, %189 : vector<32x64xf32>
    %191 = arith.mulf %190, %190 : vector<32x64xf32>
    %cst_71 = arith.constant dense<0.000000e+00> : vector<32xf32>
    %192 = vector.multi_reduction <add>, %191, %cst_71 [1] : vector<32x64xf32> to vector<32xf32>
    %193 = vector.shape_cast %192 : vector<32xf32> to vector<32x1xf32>
    %cst_72 = arith.constant 6.400000e+01 : f32
    %194 = vector.broadcast %cst_72 : f32 to vector<32x1xf32>
    %195 = arith.divf %193, %194 : vector<32x1xf32>
    %cst_73 = arith.constant 9.99999974E-6 : f32
    %196 = vector.broadcast %cst_73 : f32 to vector<32x1xf32>
    %197 = arith.addf %195, %196 : vector<32x1xf32>
    %198 = math.rsqrt %197 : vector<32x1xf32>
    %199 = vector.broadcast %198 : vector<32x1xf32> to vector<32x64xf32>
    %200 = arith.mulf %190, %199 : vector<32x64xf32>
    %201 = vector.broadcast %183 : vector<1x64xf32> to vector<32x64xf32>
    %202 = arith.mulf %200, %201 : vector<32x64xf32>
    %203 = vector.broadcast %184 : vector<1x64xf32> to vector<32x64xf32>
    %204 = arith.addf %202, %203 : vector<32x64xf32>
    %c384 = arith.constant 384 : index
    %c0_74 = arith.constant 0 : index
    %205 = vector.load %arg1[%c384, %c0_74] : memref<1120x192xf32, #tpu.memory_space<vmem>>, vector<64x192xf32>
    %cst_75 = arith.constant dense<0.000000e+00> : vector<32x192xf32>
    %206 = tpu.matmul %204, %205, %cst_75 {dimension_numbers = #tpu.dot_dimension_numbers<[1], [0], [0], [1], [0, 0, 1, 1], [], []>} : vector<32x64xf32>, vector<64x192xf32>, vector<32x192xf32> -> vector<32x192xf32>
    %c15 = arith.constant 15 : index
    %c0_76 = arith.constant 0 : index
    %207 = vector.load %arg2[%c15, %c0_76] : memref<39x192xf32, #tpu.memory_space<vmem>>, vector<1x192xf32>
    %208 = vector.broadcast %207 : vector<1x192xf32> to vector<32x192xf32>
    %209 = arith.addf %206, %208 : vector<32x192xf32>
    %210 = vector.extract_strided_slice %209 {offsets = [0, 0], sizes = [32, 64], strides = [1, 1]} : vector<32x192xf32> to vector<32x64xf32>
    %211 = vector.extract_strided_slice %209 {offsets = [0, 64], sizes = [32, 64], strides = [1, 1]} : vector<32x192xf32> to vector<32x64xf32>
    %212 = vector.extract_strided_slice %209 {offsets = [0, 128], sizes = [32, 64], strides = [1, 1]} : vector<32x192xf32> to vector<32x64xf32>
    %213 = vector.extract_strided_slice %210 {offsets = [0, 0], sizes = [16, 8], strides = [1, 1]} : vector<32x64xf32> to vector<16x8xf32>
    %214 = vector.extract_strided_slice %211 {offsets = [0, 0], sizes = [16, 8], strides = [1, 1]} : vector<32x64xf32> to vector<16x8xf32>
    %215 = vector.extract_strided_slice %212 {offsets = [0, 0], sizes = [16, 8], strides = [1, 1]} : vector<32x64xf32> to vector<16x8xf32>
    %cst_77 = arith.constant dense<0.000000e+00> : vector<16x16xf32>
    %216 = tpu.matmul %213, %214, %cst_77 {dimension_numbers = #tpu.dot_dimension_numbers<[1], [1], [0], [0], [0, 0, 1, 0], [], []>} : vector<16x8xf32>, vector<16x8xf32>, vector<16x16xf32> -> vector<16x16xf32>
    %cst_78 = arith.constant 0.353553385 : f32
    %217 = vector.broadcast %cst_78 : f32 to vector<16x16xf32>
    %218 = arith.mulf %216, %217 : vector<16x16xf32>
    %cst_79 = arith.constant dense<0xFF800000> : vector<16xf32>
    %219 = vector.multi_reduction <maximumf>, %218, %cst_79 [1] : vector<16x16xf32> to vector<16xf32>
    %220 = vector.shape_cast %219 : vector<16xf32> to vector<16x1xf32>
    %221 = vector.broadcast %220 : vector<16x1xf32> to vector<16x16xf32>
    %222 = arith.subf %218, %221 : vector<16x16xf32>
    %223 = math.exp %222 : vector<16x16xf32>
    %cst_80 = arith.constant dense<0.000000e+00> : vector<16xf32>
    %224 = vector.multi_reduction <add>, %223, %cst_80 [1] : vector<16x16xf32> to vector<16xf32>
    %225 = vector.shape_cast %224 : vector<16xf32> to vector<16x1xf32>
    %226 = tpu.reciprocal %225 {approx = true} : vector<16x1xf32> -> vector<16x1xf32>
    %227 = vector.broadcast %226 : vector<16x1xf32> to vector<16x16xf32>
    %228 = arith.mulf %223, %227 : vector<16x16xf32>
    %cst_81 = arith.constant dense<0.000000e+00> : vector<16x8xf32>
    %229 = tpu.matmul %228, %215, %cst_81 {dimension_numbers = #tpu.dot_dimension_numbers<[1], [0], [0], [1], [0, 0, 1, 1], [], []>} : vector<16x16xf32>, vector<16x8xf32>, vector<16x8xf32> -> vector<16x8xf32>
    %230 = vector.extract_strided_slice %210 {offsets = [0, 8], sizes = [16, 8], strides = [1, 1]} : vector<32x64xf32> to vector<16x8xf32>
    %231 = vector.extract_strided_slice %211 {offsets = [0, 8], sizes = [16, 8], strides = [1, 1]} : vector<32x64xf32> to vector<16x8xf32>
    %232 = vector.extract_strided_slice %212 {offsets = [0, 8], sizes = [16, 8], strides = [1, 1]} : vector<32x64xf32> to vector<16x8xf32>
    %cst_82 = arith.constant dense<0.000000e+00> : vector<16x16xf32>
    %233 = tpu.matmul %230, %231, %cst_82 {dimension_numbers = #tpu.dot_dimension_numbers<[1], [1], [0], [0], [0, 0, 1, 0], [], []>} : vector<16x8xf32>, vector<16x8xf32>, vector<16x16xf32> -> vector<16x16xf32>
    %cst_83 = arith.constant 0.353553385 : f32
    %234 = vector.broadcast %cst_83 : f32 to vector<16x16xf32>
    %235 = arith.mulf %233, %234 : vector<16x16xf32>
    %cst_84 = arith.constant dense<0xFF800000> : vector<16xf32>
    %236 = vector.multi_reduction <maximumf>, %235, %cst_84 [1] : vector<16x16xf32> to vector<16xf32>
    %237 = vector.shape_cast %236 : vector<16xf32> to vector<16x1xf32>
    %238 = vector.broadcast %237 : vector<16x1xf32> to vector<16x16xf32>
    %239 = arith.subf %235, %238 : vector<16x16xf32>
    %240 = math.exp %239 : vector<16x16xf32>
    %cst_85 = arith.constant dense<0.000000e+00> : vector<16xf32>
    %241 = vector.multi_reduction <add>, %240, %cst_85 [1] : vector<16x16xf32> to vector<16xf32>
    %242 = vector.shape_cast %241 : vector<16xf32> to vector<16x1xf32>
    %243 = tpu.reciprocal %242 {approx = true} : vector<16x1xf32> -> vector<16x1xf32>
    %244 = vector.broadcast %243 : vector<16x1xf32> to vector<16x16xf32>
    %245 = arith.mulf %240, %244 : vector<16x16xf32>
    %cst_86 = arith.constant dense<0.000000e+00> : vector<16x8xf32>
    %246 = tpu.matmul %245, %232, %cst_86 {dimension_numbers = #tpu.dot_dimension_numbers<[1], [0], [0], [1], [0, 0, 1, 1], [], []>} : vector<16x16xf32>, vector<16x8xf32>, vector<16x8xf32> -> vector<16x8xf32>
    %247 = vector.extract_strided_slice %210 {offsets = [0, 16], sizes = [16, 8], strides = [1, 1]} : vector<32x64xf32> to vector<16x8xf32>
    %248 = vector.extract_strided_slice %211 {offsets = [0, 16], sizes = [16, 8], strides = [1, 1]} : vector<32x64xf32> to vector<16x8xf32>
    %249 = vector.extract_strided_slice %212 {offsets = [0, 16], sizes = [16, 8], strides = [1, 1]} : vector<32x64xf32> to vector<16x8xf32>
    %cst_87 = arith.constant dense<0.000000e+00> : vector<16x16xf32>
    %250 = tpu.matmul %247, %248, %cst_87 {dimension_numbers = #tpu.dot_dimension_numbers<[1], [1], [0], [0], [0, 0, 1, 0], [], []>} : vector<16x8xf32>, vector<16x8xf32>, vector<16x16xf32> -> vector<16x16xf32>
    %cst_88 = arith.constant 0.353553385 : f32
    %251 = vector.broadcast %cst_88 : f32 to vector<16x16xf32>
    %252 = arith.mulf %250, %251 : vector<16x16xf32>
    %cst_89 = arith.constant dense<0xFF800000> : vector<16xf32>
    %253 = vector.multi_reduction <maximumf>, %252, %cst_89 [1] : vector<16x16xf32> to vector<16xf32>
    %254 = vector.shape_cast %253 : vector<16xf32> to vector<16x1xf32>
    %255 = vector.broadcast %254 : vector<16x1xf32> to vector<16x16xf32>
    %256 = arith.subf %252, %255 : vector<16x16xf32>
    %257 = math.exp %256 : vector<16x16xf32>
    %cst_90 = arith.constant dense<0.000000e+00> : vector<16xf32>
    %258 = vector.multi_reduction <add>, %257, %cst_90 [1] : vector<16x16xf32> to vector<16xf32>
    %259 = vector.shape_cast %258 : vector<16xf32> to vector<16x1xf32>
    %260 = tpu.reciprocal %259 {approx = true} : vector<16x1xf32> -> vector<16x1xf32>
    %261 = vector.broadcast %260 : vector<16x1xf32> to vector<16x16xf32>
    %262 = arith.mulf %257, %261 : vector<16x16xf32>
    %cst_91 = arith.constant dense<0.000000e+00> : vector<16x8xf32>
    %263 = tpu.matmul %262, %249, %cst_91 {dimension_numbers = #tpu.dot_dimension_numbers<[1], [0], [0], [1], [0, 0, 1, 1], [], []>} : vector<16x16xf32>, vector<16x8xf32>, vector<16x8xf32> -> vector<16x8xf32>
    %264 = vector.extract_strided_slice %210 {offsets = [0, 24], sizes = [16, 8], strides = [1, 1]} : vector<32x64xf32> to vector<16x8xf32>
    %265 = vector.extract_strided_slice %211 {offsets = [0, 24], sizes = [16, 8], strides = [1, 1]} : vector<32x64xf32> to vector<16x8xf32>
    %266 = vector.extract_strided_slice %212 {offsets = [0, 24], sizes = [16, 8], strides = [1, 1]} : vector<32x64xf32> to vector<16x8xf32>
    %cst_92 = arith.constant dense<0.000000e+00> : vector<16x16xf32>
    %267 = tpu.matmul %264, %265, %cst_92 {dimension_numbers = #tpu.dot_dimension_numbers<[1], [1], [0], [0], [0, 0, 1, 0], [], []>} : vector<16x8xf32>, vector<16x8xf32>, vector<16x16xf32> -> vector<16x16xf32>
    %cst_93 = arith.constant 0.353553385 : f32
    %268 = vector.broadcast %cst_93 : f32 to vector<16x16xf32>
    %269 = arith.mulf %267, %268 : vector<16x16xf32>
    %cst_94 = arith.constant dense<0xFF800000> : vector<16xf32>
    %270 = vector.multi_reduction <maximumf>, %269, %cst_94 [1] : vector<16x16xf32> to vector<16xf32>
    %271 = vector.shape_cast %270 : vector<16xf32> to vector<16x1xf32>
    %272 = vector.broadcast %271 : vector<16x1xf32> to vector<16x16xf32>
    %273 = arith.subf %269, %272 : vector<16x16xf32>
    %274 = math.exp %273 : vector<16x16xf32>
    %cst_95 = arith.constant dense<0.000000e+00> : vector<16xf32>
    %275 = vector.multi_reduction <add>, %274, %cst_95 [1] : vector<16x16xf32> to vector<16xf32>
    %276 = vector.shape_cast %275 : vector<16xf32> to vector<16x1xf32>
    %277 = tpu.reciprocal %276 {approx = true} : vector<16x1xf32> -> vector<16x1xf32>
    %278 = vector.broadcast %277 : vector<16x1xf32> to vector<16x16xf32>
    %279 = arith.mulf %274, %278 : vector<16x16xf32>
    %cst_96 = arith.constant dense<0.000000e+00> : vector<16x8xf32>
    %280 = tpu.matmul %279, %266, %cst_96 {dimension_numbers = #tpu.dot_dimension_numbers<[1], [0], [0], [1], [0, 0, 1, 1], [], []>} : vector<16x16xf32>, vector<16x8xf32>, vector<16x8xf32> -> vector<16x8xf32>
    %281 = vector.extract_strided_slice %210 {offsets = [0, 32], sizes = [16, 8], strides = [1, 1]} : vector<32x64xf32> to vector<16x8xf32>
    %282 = vector.extract_strided_slice %211 {offsets = [0, 32], sizes = [16, 8], strides = [1, 1]} : vector<32x64xf32> to vector<16x8xf32>
    %283 = vector.extract_strided_slice %212 {offsets = [0, 32], sizes = [16, 8], strides = [1, 1]} : vector<32x64xf32> to vector<16x8xf32>
    %cst_97 = arith.constant dense<0.000000e+00> : vector<16x16xf32>
    %284 = tpu.matmul %281, %282, %cst_97 {dimension_numbers = #tpu.dot_dimension_numbers<[1], [1], [0], [0], [0, 0, 1, 0], [], []>} : vector<16x8xf32>, vector<16x8xf32>, vector<16x16xf32> -> vector<16x16xf32>
    %cst_98 = arith.constant 0.353553385 : f32
    %285 = vector.broadcast %cst_98 : f32 to vector<16x16xf32>
    %286 = arith.mulf %284, %285 : vector<16x16xf32>
    %cst_99 = arith.constant dense<0xFF800000> : vector<16xf32>
    %287 = vector.multi_reduction <maximumf>, %286, %cst_99 [1] : vector<16x16xf32> to vector<16xf32>
    %288 = vector.shape_cast %287 : vector<16xf32> to vector<16x1xf32>
    %289 = vector.broadcast %288 : vector<16x1xf32> to vector<16x16xf32>
    %290 = arith.subf %286, %289 : vector<16x16xf32>
    %291 = math.exp %290 : vector<16x16xf32>
    %cst_100 = arith.constant dense<0.000000e+00> : vector<16xf32>
    %292 = vector.multi_reduction <add>, %291, %cst_100 [1] : vector<16x16xf32> to vector<16xf32>
    %293 = vector.shape_cast %292 : vector<16xf32> to vector<16x1xf32>
    %294 = tpu.reciprocal %293 {approx = true} : vector<16x1xf32> -> vector<16x1xf32>
    %295 = vector.broadcast %294 : vector<16x1xf32> to vector<16x16xf32>
    %296 = arith.mulf %291, %295 : vector<16x16xf32>
    %cst_101 = arith.constant dense<0.000000e+00> : vector<16x8xf32>
    %297 = tpu.matmul %296, %283, %cst_101 {dimension_numbers = #tpu.dot_dimension_numbers<[1], [0], [0], [1], [0, 0, 1, 1], [], []>} : vector<16x16xf32>, vector<16x8xf32>, vector<16x8xf32> -> vector<16x8xf32>
    %298 = vector.extract_strided_slice %210 {offsets = [0, 40], sizes = [16, 8], strides = [1, 1]} : vector<32x64xf32> to vector<16x8xf32>
    %299 = vector.extract_strided_slice %211 {offsets = [0, 40], sizes = [16, 8], strides = [1, 1]} : vector<32x64xf32> to vector<16x8xf32>
    %300 = vector.extract_strided_slice %212 {offsets = [0, 40], sizes = [16, 8], strides = [1, 1]} : vector<32x64xf32> to vector<16x8xf32>
    %cst_102 = arith.constant dense<0.000000e+00> : vector<16x16xf32>
    %301 = tpu.matmul %298, %299, %cst_102 {dimension_numbers = #tpu.dot_dimension_numbers<[1], [1], [0], [0], [0, 0, 1, 0], [], []>} : vector<16x8xf32>, vector<16x8xf32>, vector<16x16xf32> -> vector<16x16xf32>
    %cst_103 = arith.constant 0.353553385 : f32
    %302 = vector.broadcast %cst_103 : f32 to vector<16x16xf32>
    %303 = arith.mulf %301, %302 : vector<16x16xf32>
    %cst_104 = arith.constant dense<0xFF800000> : vector<16xf32>
    %304 = vector.multi_reduction <maximumf>, %303, %cst_104 [1] : vector<16x16xf32> to vector<16xf32>
    %305 = vector.shape_cast %304 : vector<16xf32> to vector<16x1xf32>
    %306 = vector.broadcast %305 : vector<16x1xf32> to vector<16x16xf32>
    %307 = arith.subf %303, %306 : vector<16x16xf32>
    %308 = math.exp %307 : vector<16x16xf32>
    %cst_105 = arith.constant dense<0.000000e+00> : vector<16xf32>
    %309 = vector.multi_reduction <add>, %308, %cst_105 [1] : vector<16x16xf32> to vector<16xf32>
    %310 = vector.shape_cast %309 : vector<16xf32> to vector<16x1xf32>
    %311 = tpu.reciprocal %310 {approx = true} : vector<16x1xf32> -> vector<16x1xf32>
    %312 = vector.broadcast %311 : vector<16x1xf32> to vector<16x16xf32>
    %313 = arith.mulf %308, %312 : vector<16x16xf32>
    %cst_106 = arith.constant dense<0.000000e+00> : vector<16x8xf32>
    %314 = tpu.matmul %313, %300, %cst_106 {dimension_numbers = #tpu.dot_dimension_numbers<[1], [0], [0], [1], [0, 0, 1, 1], [], []>} : vector<16x16xf32>, vector<16x8xf32>, vector<16x8xf32> -> vector<16x8xf32>
    %315 = vector.extract_strided_slice %210 {offsets = [0, 48], sizes = [16, 8], strides = [1, 1]} : vector<32x64xf32> to vector<16x8xf32>
    %316 = vector.extract_strided_slice %211 {offsets = [0, 48], sizes = [16, 8], strides = [1, 1]} : vector<32x64xf32> to vector<16x8xf32>
    %317 = vector.extract_strided_slice %212 {offsets = [0, 48], sizes = [16, 8], strides = [1, 1]} : vector<32x64xf32> to vector<16x8xf32>
    %cst_107 = arith.constant dense<0.000000e+00> : vector<16x16xf32>
    %318 = tpu.matmul %315, %316, %cst_107 {dimension_numbers = #tpu.dot_dimension_numbers<[1], [1], [0], [0], [0, 0, 1, 0], [], []>} : vector<16x8xf32>, vector<16x8xf32>, vector<16x16xf32> -> vector<16x16xf32>
    %cst_108 = arith.constant 0.353553385 : f32
    %319 = vector.broadcast %cst_108 : f32 to vector<16x16xf32>
    %320 = arith.mulf %318, %319 : vector<16x16xf32>
    %cst_109 = arith.constant dense<0xFF800000> : vector<16xf32>
    %321 = vector.multi_reduction <maximumf>, %320, %cst_109 [1] : vector<16x16xf32> to vector<16xf32>
    %322 = vector.shape_cast %321 : vector<16xf32> to vector<16x1xf32>
    %323 = vector.broadcast %322 : vector<16x1xf32> to vector<16x16xf32>
    %324 = arith.subf %320, %323 : vector<16x16xf32>
    %325 = math.exp %324 : vector<16x16xf32>
    %cst_110 = arith.constant dense<0.000000e+00> : vector<16xf32>
    %326 = vector.multi_reduction <add>, %325, %cst_110 [1] : vector<16x16xf32> to vector<16xf32>
    %327 = vector.shape_cast %326 : vector<16xf32> to vector<16x1xf32>
    %328 = tpu.reciprocal %327 {approx = true} : vector<16x1xf32> -> vector<16x1xf32>
    %329 = vector.broadcast %328 : vector<16x1xf32> to vector<16x16xf32>
    %330 = arith.mulf %325, %329 : vector<16x16xf32>
    %cst_111 = arith.constant dense<0.000000e+00> : vector<16x8xf32>
    %331 = tpu.matmul %330, %317, %cst_111 {dimension_numbers = #tpu.dot_dimension_numbers<[1], [0], [0], [1], [0, 0, 1, 1], [], []>} : vector<16x16xf32>, vector<16x8xf32>, vector<16x8xf32> -> vector<16x8xf32>
    %332 = vector.extract_strided_slice %210 {offsets = [0, 56], sizes = [16, 8], strides = [1, 1]} : vector<32x64xf32> to vector<16x8xf32>
    %333 = vector.extract_strided_slice %211 {offsets = [0, 56], sizes = [16, 8], strides = [1, 1]} : vector<32x64xf32> to vector<16x8xf32>
    %334 = vector.extract_strided_slice %212 {offsets = [0, 56], sizes = [16, 8], strides = [1, 1]} : vector<32x64xf32> to vector<16x8xf32>
    %cst_112 = arith.constant dense<0.000000e+00> : vector<16x16xf32>
    %335 = tpu.matmul %332, %333, %cst_112 {dimension_numbers = #tpu.dot_dimension_numbers<[1], [1], [0], [0], [0, 0, 1, 0], [], []>} : vector<16x8xf32>, vector<16x8xf32>, vector<16x16xf32> -> vector<16x16xf32>
    %cst_113 = arith.constant 0.353553385 : f32
    %336 = vector.broadcast %cst_113 : f32 to vector<16x16xf32>
    %337 = arith.mulf %335, %336 : vector<16x16xf32>
    %cst_114 = arith.constant dense<0xFF800000> : vector<16xf32>
    %338 = vector.multi_reduction <maximumf>, %337, %cst_114 [1] : vector<16x16xf32> to vector<16xf32>
    %339 = vector.shape_cast %338 : vector<16xf32> to vector<16x1xf32>
    %340 = vector.broadcast %339 : vector<16x1xf32> to vector<16x16xf32>
    %341 = arith.subf %337, %340 : vector<16x16xf32>
    %342 = math.exp %341 : vector<16x16xf32>
    %cst_115 = arith.constant dense<0.000000e+00> : vector<16xf32>
    %343 = vector.multi_reduction <add>, %342, %cst_115 [1] : vector<16x16xf32> to vector<16xf32>
    %344 = vector.shape_cast %343 : vector<16xf32> to vector<16x1xf32>
    %345 = tpu.reciprocal %344 {approx = true} : vector<16x1xf32> -> vector<16x1xf32>
    %346 = vector.broadcast %345 : vector<16x1xf32> to vector<16x16xf32>
    %347 = arith.mulf %342, %346 : vector<16x16xf32>
    %cst_116 = arith.constant dense<0.000000e+00> : vector<16x8xf32>
    %348 = tpu.matmul %347, %334, %cst_116 {dimension_numbers = #tpu.dot_dimension_numbers<[1], [0], [0], [1], [0, 0, 1, 1], [], []>} : vector<16x16xf32>, vector<16x8xf32>, vector<16x8xf32> -> vector<16x8xf32>
    %349 = tpu.concatenate %229, %246, %263, %280, %297, %314, %331, %348 in 1 : vector<16x8xf32>, vector<16x8xf32>, vector<16x8xf32>, vector<16x8xf32>, vector<16x8xf32>, vector<16x8xf32>, vector<16x8xf32>, vector<16x8xf32> -> vector<16x64xf32>
    %350 = vector.extract_strided_slice %210 {offsets = [16, 0], sizes = [16, 8], strides = [1, 1]} : vector<32x64xf32> to vector<16x8xf32>
    %351 = vector.extract_strided_slice %211 {offsets = [16, 0], sizes = [16, 8], strides = [1, 1]} : vector<32x64xf32> to vector<16x8xf32>
    %352 = vector.extract_strided_slice %212 {offsets = [16, 0], sizes = [16, 8], strides = [1, 1]} : vector<32x64xf32> to vector<16x8xf32>
    %cst_117 = arith.constant dense<0.000000e+00> : vector<16x16xf32>
    %353 = tpu.matmul %350, %351, %cst_117 {dimension_numbers = #tpu.dot_dimension_numbers<[1], [1], [0], [0], [0, 0, 1, 0], [], []>} : vector<16x8xf32>, vector<16x8xf32>, vector<16x16xf32> -> vector<16x16xf32>
    %cst_118 = arith.constant 0.353553385 : f32
    %354 = vector.broadcast %cst_118 : f32 to vector<16x16xf32>
    %355 = arith.mulf %353, %354 : vector<16x16xf32>
    %cst_119 = arith.constant dense<0xFF800000> : vector<16xf32>
    %356 = vector.multi_reduction <maximumf>, %355, %cst_119 [1] : vector<16x16xf32> to vector<16xf32>
    %357 = vector.shape_cast %356 : vector<16xf32> to vector<16x1xf32>
    %358 = vector.broadcast %357 : vector<16x1xf32> to vector<16x16xf32>
    %359 = arith.subf %355, %358 : vector<16x16xf32>
    %360 = math.exp %359 : vector<16x16xf32>
    %cst_120 = arith.constant dense<0.000000e+00> : vector<16xf32>
    %361 = vector.multi_reduction <add>, %360, %cst_120 [1] : vector<16x16xf32> to vector<16xf32>
    %362 = vector.shape_cast %361 : vector<16xf32> to vector<16x1xf32>
    %363 = tpu.reciprocal %362 {approx = true} : vector<16x1xf32> -> vector<16x1xf32>
    %364 = vector.broadcast %363 : vector<16x1xf32> to vector<16x16xf32>
    %365 = arith.mulf %360, %364 : vector<16x16xf32>
    %cst_121 = arith.constant dense<0.000000e+00> : vector<16x8xf32>
    %366 = tpu.matmul %365, %352, %cst_121 {dimension_numbers = #tpu.dot_dimension_numbers<[1], [0], [0], [1], [0, 0, 1, 1], [], []>} : vector<16x16xf32>, vector<16x8xf32>, vector<16x8xf32> -> vector<16x8xf32>
    %367 = vector.extract_strided_slice %210 {offsets = [16, 8], sizes = [16, 8], strides = [1, 1]} : vector<32x64xf32> to vector<16x8xf32>
    %368 = vector.extract_strided_slice %211 {offsets = [16, 8], sizes = [16, 8], strides = [1, 1]} : vector<32x64xf32> to vector<16x8xf32>
    %369 = vector.extract_strided_slice %212 {offsets = [16, 8], sizes = [16, 8], strides = [1, 1]} : vector<32x64xf32> to vector<16x8xf32>
    %cst_122 = arith.constant dense<0.000000e+00> : vector<16x16xf32>
    %370 = tpu.matmul %367, %368, %cst_122 {dimension_numbers = #tpu.dot_dimension_numbers<[1], [1], [0], [0], [0, 0, 1, 0], [], []>} : vector<16x8xf32>, vector<16x8xf32>, vector<16x16xf32> -> vector<16x16xf32>
    %cst_123 = arith.constant 0.353553385 : f32
    %371 = vector.broadcast %cst_123 : f32 to vector<16x16xf32>
    %372 = arith.mulf %370, %371 : vector<16x16xf32>
    %cst_124 = arith.constant dense<0xFF800000> : vector<16xf32>
    %373 = vector.multi_reduction <maximumf>, %372, %cst_124 [1] : vector<16x16xf32> to vector<16xf32>
    %374 = vector.shape_cast %373 : vector<16xf32> to vector<16x1xf32>
    %375 = vector.broadcast %374 : vector<16x1xf32> to vector<16x16xf32>
    %376 = arith.subf %372, %375 : vector<16x16xf32>
    %377 = math.exp %376 : vector<16x16xf32>
    %cst_125 = arith.constant dense<0.000000e+00> : vector<16xf32>
    %378 = vector.multi_reduction <add>, %377, %cst_125 [1] : vector<16x16xf32> to vector<16xf32>
    %379 = vector.shape_cast %378 : vector<16xf32> to vector<16x1xf32>
    %380 = tpu.reciprocal %379 {approx = true} : vector<16x1xf32> -> vector<16x1xf32>
    %381 = vector.broadcast %380 : vector<16x1xf32> to vector<16x16xf32>
    %382 = arith.mulf %377, %381 : vector<16x16xf32>
    %cst_126 = arith.constant dense<0.000000e+00> : vector<16x8xf32>
    %383 = tpu.matmul %382, %369, %cst_126 {dimension_numbers = #tpu.dot_dimension_numbers<[1], [0], [0], [1], [0, 0, 1, 1], [], []>} : vector<16x16xf32>, vector<16x8xf32>, vector<16x8xf32> -> vector<16x8xf32>
    %384 = vector.extract_strided_slice %210 {offsets = [16, 16], sizes = [16, 8], strides = [1, 1]} : vector<32x64xf32> to vector<16x8xf32>
    %385 = vector.extract_strided_slice %211 {offsets = [16, 16], sizes = [16, 8], strides = [1, 1]} : vector<32x64xf32> to vector<16x8xf32>
    %386 = vector.extract_strided_slice %212 {offsets = [16, 16], sizes = [16, 8], strides = [1, 1]} : vector<32x64xf32> to vector<16x8xf32>
    %cst_127 = arith.constant dense<0.000000e+00> : vector<16x16xf32>
    %387 = tpu.matmul %384, %385, %cst_127 {dimension_numbers = #tpu.dot_dimension_numbers<[1], [1], [0], [0], [0, 0, 1, 0], [], []>} : vector<16x8xf32>, vector<16x8xf32>, vector<16x16xf32> -> vector<16x16xf32>
    %cst_128 = arith.constant 0.353553385 : f32
    %388 = vector.broadcast %cst_128 : f32 to vector<16x16xf32>
    %389 = arith.mulf %387, %388 : vector<16x16xf32>
    %cst_129 = arith.constant dense<0xFF800000> : vector<16xf32>
    %390 = vector.multi_reduction <maximumf>, %389, %cst_129 [1] : vector<16x16xf32> to vector<16xf32>
    %391 = vector.shape_cast %390 : vector<16xf32> to vector<16x1xf32>
    %392 = vector.broadcast %391 : vector<16x1xf32> to vector<16x16xf32>
    %393 = arith.subf %389, %392 : vector<16x16xf32>
    %394 = math.exp %393 : vector<16x16xf32>
    %cst_130 = arith.constant dense<0.000000e+00> : vector<16xf32>
    %395 = vector.multi_reduction <add>, %394, %cst_130 [1] : vector<16x16xf32> to vector<16xf32>
    %396 = vector.shape_cast %395 : vector<16xf32> to vector<16x1xf32>
    %397 = tpu.reciprocal %396 {approx = true} : vector<16x1xf32> -> vector<16x1xf32>
    %398 = vector.broadcast %397 : vector<16x1xf32> to vector<16x16xf32>
    %399 = arith.mulf %394, %398 : vector<16x16xf32>
    %cst_131 = arith.constant dense<0.000000e+00> : vector<16x8xf32>
    %400 = tpu.matmul %399, %386, %cst_131 {dimension_numbers = #tpu.dot_dimension_numbers<[1], [0], [0], [1], [0, 0, 1, 1], [], []>} : vector<16x16xf32>, vector<16x8xf32>, vector<16x8xf32> -> vector<16x8xf32>
    %401 = vector.extract_strided_slice %210 {offsets = [16, 24], sizes = [16, 8], strides = [1, 1]} : vector<32x64xf32> to vector<16x8xf32>
    %402 = vector.extract_strided_slice %211 {offsets = [16, 24], sizes = [16, 8], strides = [1, 1]} : vector<32x64xf32> to vector<16x8xf32>
    %403 = vector.extract_strided_slice %212 {offsets = [16, 24], sizes = [16, 8], strides = [1, 1]} : vector<32x64xf32> to vector<16x8xf32>
    %cst_132 = arith.constant dense<0.000000e+00> : vector<16x16xf32>
    %404 = tpu.matmul %401, %402, %cst_132 {dimension_numbers = #tpu.dot_dimension_numbers<[1], [1], [0], [0], [0, 0, 1, 0], [], []>} : vector<16x8xf32>, vector<16x8xf32>, vector<16x16xf32> -> vector<16x16xf32>
    %cst_133 = arith.constant 0.353553385 : f32
    %405 = vector.broadcast %cst_133 : f32 to vector<16x16xf32>
    %406 = arith.mulf %404, %405 : vector<16x16xf32>
    %cst_134 = arith.constant dense<0xFF800000> : vector<16xf32>
    %407 = vector.multi_reduction <maximumf>, %406, %cst_134 [1] : vector<16x16xf32> to vector<16xf32>
    %408 = vector.shape_cast %407 : vector<16xf32> to vector<16x1xf32>
    %409 = vector.broadcast %408 : vector<16x1xf32> to vector<16x16xf32>
    %410 = arith.subf %406, %409 : vector<16x16xf32>
    %411 = math.exp %410 : vector<16x16xf32>
    %cst_135 = arith.constant dense<0.000000e+00> : vector<16xf32>
    %412 = vector.multi_reduction <add>, %411, %cst_135 [1] : vector<16x16xf32> to vector<16xf32>
    %413 = vector.shape_cast %412 : vector<16xf32> to vector<16x1xf32>
    %414 = tpu.reciprocal %413 {approx = true} : vector<16x1xf32> -> vector<16x1xf32>
    %415 = vector.broadcast %414 : vector<16x1xf32> to vector<16x16xf32>
    %416 = arith.mulf %411, %415 : vector<16x16xf32>
    %cst_136 = arith.constant dense<0.000000e+00> : vector<16x8xf32>
    %417 = tpu.matmul %416, %403, %cst_136 {dimension_numbers = #tpu.dot_dimension_numbers<[1], [0], [0], [1], [0, 0, 1, 1], [], []>} : vector<16x16xf32>, vector<16x8xf32>, vector<16x8xf32> -> vector<16x8xf32>
    %418 = vector.extract_strided_slice %210 {offsets = [16, 32], sizes = [16, 8], strides = [1, 1]} : vector<32x64xf32> to vector<16x8xf32>
    %419 = vector.extract_strided_slice %211 {offsets = [16, 32], sizes = [16, 8], strides = [1, 1]} : vector<32x64xf32> to vector<16x8xf32>
    %420 = vector.extract_strided_slice %212 {offsets = [16, 32], sizes = [16, 8], strides = [1, 1]} : vector<32x64xf32> to vector<16x8xf32>
    %cst_137 = arith.constant dense<0.000000e+00> : vector<16x16xf32>
    %421 = tpu.matmul %418, %419, %cst_137 {dimension_numbers = #tpu.dot_dimension_numbers<[1], [1], [0], [0], [0, 0, 1, 0], [], []>} : vector<16x8xf32>, vector<16x8xf32>, vector<16x16xf32> -> vector<16x16xf32>
    %cst_138 = arith.constant 0.353553385 : f32
    %422 = vector.broadcast %cst_138 : f32 to vector<16x16xf32>
    %423 = arith.mulf %421, %422 : vector<16x16xf32>
    %cst_139 = arith.constant dense<0xFF800000> : vector<16xf32>
    %424 = vector.multi_reduction <maximumf>, %423, %cst_139 [1] : vector<16x16xf32> to vector<16xf32>
    %425 = vector.shape_cast %424 : vector<16xf32> to vector<16x1xf32>
    %426 = vector.broadcast %425 : vector<16x1xf32> to vector<16x16xf32>
    %427 = arith.subf %423, %426 : vector<16x16xf32>
    %428 = math.exp %427 : vector<16x16xf32>
    %cst_140 = arith.constant dense<0.000000e+00> : vector<16xf32>
    %429 = vector.multi_reduction <add>, %428, %cst_140 [1] : vector<16x16xf32> to vector<16xf32>
    %430 = vector.shape_cast %429 : vector<16xf32> to vector<16x1xf32>
    %431 = tpu.reciprocal %430 {approx = true} : vector<16x1xf32> -> vector<16x1xf32>
    %432 = vector.broadcast %431 : vector<16x1xf32> to vector<16x16xf32>
    %433 = arith.mulf %428, %432 : vector<16x16xf32>
    %cst_141 = arith.constant dense<0.000000e+00> : vector<16x8xf32>
    %434 = tpu.matmul %433, %420, %cst_141 {dimension_numbers = #tpu.dot_dimension_numbers<[1], [0], [0], [1], [0, 0, 1, 1], [], []>} : vector<16x16xf32>, vector<16x8xf32>, vector<16x8xf32> -> vector<16x8xf32>
    %435 = vector.extract_strided_slice %210 {offsets = [16, 40], sizes = [16, 8], strides = [1, 1]} : vector<32x64xf32> to vector<16x8xf32>
    %436 = vector.extract_strided_slice %211 {offsets = [16, 40], sizes = [16, 8], strides = [1, 1]} : vector<32x64xf32> to vector<16x8xf32>
    %437 = vector.extract_strided_slice %212 {offsets = [16, 40], sizes = [16, 8], strides = [1, 1]} : vector<32x64xf32> to vector<16x8xf32>
    %cst_142 = arith.constant dense<0.000000e+00> : vector<16x16xf32>
    %438 = tpu.matmul %435, %436, %cst_142 {dimension_numbers = #tpu.dot_dimension_numbers<[1], [1], [0], [0], [0, 0, 1, 0], [], []>} : vector<16x8xf32>, vector<16x8xf32>, vector<16x16xf32> -> vector<16x16xf32>
    %cst_143 = arith.constant 0.353553385 : f32
    %439 = vector.broadcast %cst_143 : f32 to vector<16x16xf32>
    %440 = arith.mulf %438, %439 : vector<16x16xf32>
    %cst_144 = arith.constant dense<0xFF800000> : vector<16xf32>
    %441 = vector.multi_reduction <maximumf>, %440, %cst_144 [1] : vector<16x16xf32> to vector<16xf32>
    %442 = vector.shape_cast %441 : vector<16xf32> to vector<16x1xf32>
    %443 = vector.broadcast %442 : vector<16x1xf32> to vector<16x16xf32>
    %444 = arith.subf %440, %443 : vector<16x16xf32>
    %445 = math.exp %444 : vector<16x16xf32>
    %cst_145 = arith.constant dense<0.000000e+00> : vector<16xf32>
    %446 = vector.multi_reduction <add>, %445, %cst_145 [1] : vector<16x16xf32> to vector<16xf32>
    %447 = vector.shape_cast %446 : vector<16xf32> to vector<16x1xf32>
    %448 = tpu.reciprocal %447 {approx = true} : vector<16x1xf32> -> vector<16x1xf32>
    %449 = vector.broadcast %448 : vector<16x1xf32> to vector<16x16xf32>
    %450 = arith.mulf %445, %449 : vector<16x16xf32>
    %cst_146 = arith.constant dense<0.000000e+00> : vector<16x8xf32>
    %451 = tpu.matmul %450, %437, %cst_146 {dimension_numbers = #tpu.dot_dimension_numbers<[1], [0], [0], [1], [0, 0, 1, 1], [], []>} : vector<16x16xf32>, vector<16x8xf32>, vector<16x8xf32> -> vector<16x8xf32>
    %452 = vector.extract_strided_slice %210 {offsets = [16, 48], sizes = [16, 8], strides = [1, 1]} : vector<32x64xf32> to vector<16x8xf32>
    %453 = vector.extract_strided_slice %211 {offsets = [16, 48], sizes = [16, 8], strides = [1, 1]} : vector<32x64xf32> to vector<16x8xf32>
    %454 = vector.extract_strided_slice %212 {offsets = [16, 48], sizes = [16, 8], strides = [1, 1]} : vector<32x64xf32> to vector<16x8xf32>
    %cst_147 = arith.constant dense<0.000000e+00> : vector<16x16xf32>
    %455 = tpu.matmul %452, %453, %cst_147 {dimension_numbers = #tpu.dot_dimension_numbers<[1], [1], [0], [0], [0, 0, 1, 0], [], []>} : vector<16x8xf32>, vector<16x8xf32>, vector<16x16xf32> -> vector<16x16xf32>
    %cst_148 = arith.constant 0.353553385 : f32
    %456 = vector.broadcast %cst_148 : f32 to vector<16x16xf32>
    %457 = arith.mulf %455, %456 : vector<16x16xf32>
    %cst_149 = arith.constant dense<0xFF800000> : vector<16xf32>
    %458 = vector.multi_reduction <maximumf>, %457, %cst_149 [1] : vector<16x16xf32> to vector<16xf32>
    %459 = vector.shape_cast %458 : vector<16xf32> to vector<16x1xf32>
    %460 = vector.broadcast %459 : vector<16x1xf32> to vector<16x16xf32>
    %461 = arith.subf %457, %460 : vector<16x16xf32>
    %462 = math.exp %461 : vector<16x16xf32>
    %cst_150 = arith.constant dense<0.000000e+00> : vector<16xf32>
    %463 = vector.multi_reduction <add>, %462, %cst_150 [1] : vector<16x16xf32> to vector<16xf32>
    %464 = vector.shape_cast %463 : vector<16xf32> to vector<16x1xf32>
    %465 = tpu.reciprocal %464 {approx = true} : vector<16x1xf32> -> vector<16x1xf32>
    %466 = vector.broadcast %465 : vector<16x1xf32> to vector<16x16xf32>
    %467 = arith.mulf %462, %466 : vector<16x16xf32>
    %cst_151 = arith.constant dense<0.000000e+00> : vector<16x8xf32>
    %468 = tpu.matmul %467, %454, %cst_151 {dimension_numbers = #tpu.dot_dimension_numbers<[1], [0], [0], [1], [0, 0, 1, 1], [], []>} : vector<16x16xf32>, vector<16x8xf32>, vector<16x8xf32> -> vector<16x8xf32>
    %469 = vector.extract_strided_slice %210 {offsets = [16, 56], sizes = [16, 8], strides = [1, 1]} : vector<32x64xf32> to vector<16x8xf32>
    %470 = vector.extract_strided_slice %211 {offsets = [16, 56], sizes = [16, 8], strides = [1, 1]} : vector<32x64xf32> to vector<16x8xf32>
    %471 = vector.extract_strided_slice %212 {offsets = [16, 56], sizes = [16, 8], strides = [1, 1]} : vector<32x64xf32> to vector<16x8xf32>
    %cst_152 = arith.constant dense<0.000000e+00> : vector<16x16xf32>
    %472 = tpu.matmul %469, %470, %cst_152 {dimension_numbers = #tpu.dot_dimension_numbers<[1], [1], [0], [0], [0, 0, 1, 0], [], []>} : vector<16x8xf32>, vector<16x8xf32>, vector<16x16xf32> -> vector<16x16xf32>
    %cst_153 = arith.constant 0.353553385 : f32
    %473 = vector.broadcast %cst_153 : f32 to vector<16x16xf32>
    %474 = arith.mulf %472, %473 : vector<16x16xf32>
    %cst_154 = arith.constant dense<0xFF800000> : vector<16xf32>
    %475 = vector.multi_reduction <maximumf>, %474, %cst_154 [1] : vector<16x16xf32> to vector<16xf32>
    %476 = vector.shape_cast %475 : vector<16xf32> to vector<16x1xf32>
    %477 = vector.broadcast %476 : vector<16x1xf32> to vector<16x16xf32>
    %478 = arith.subf %474, %477 : vector<16x16xf32>
    %479 = math.exp %478 : vector<16x16xf32>
    %cst_155 = arith.constant dense<0.000000e+00> : vector<16xf32>
    %480 = vector.multi_reduction <add>, %479, %cst_155 [1] : vector<16x16xf32> to vector<16xf32>
    %481 = vector.shape_cast %480 : vector<16xf32> to vector<16x1xf32>
    %482 = tpu.reciprocal %481 {approx = true} : vector<16x1xf32> -> vector<16x1xf32>
    %483 = vector.broadcast %482 : vector<16x1xf32> to vector<16x16xf32>
    %484 = arith.mulf %479, %483 : vector<16x16xf32>
    %cst_156 = arith.constant dense<0.000000e+00> : vector<16x8xf32>
    %485 = tpu.matmul %484, %471, %cst_156 {dimension_numbers = #tpu.dot_dimension_numbers<[1], [0], [0], [1], [0, 0, 1, 1], [], []>} : vector<16x16xf32>, vector<16x8xf32>, vector<16x8xf32> -> vector<16x8xf32>
    %486 = tpu.concatenate %366, %383, %400, %417, %434, %451, %468, %485 in 1 : vector<16x8xf32>, vector<16x8xf32>, vector<16x8xf32>, vector<16x8xf32>, vector<16x8xf32>, vector<16x8xf32>, vector<16x8xf32>, vector<16x8xf32> -> vector<16x64xf32>
    %487 = tpu.concatenate %349, %486 in 0 : vector<16x64xf32>, vector<16x64xf32> -> vector<32x64xf32>
    %c448 = arith.constant 448 : index
    %c0_157 = arith.constant 0 : index
    %488 = vector.load %arg1[%c448, %c0_157] : memref<1120x192xf32, #tpu.memory_space<vmem>>, vector<64x64xf32>
    %cst_158 = arith.constant dense<0.000000e+00> : vector<32x64xf32>
    %489 = tpu.matmul %487, %488, %cst_158 {dimension_numbers = #tpu.dot_dimension_numbers<[1], [0], [0], [1], [0, 0, 1, 1], [], []>} : vector<32x64xf32>, vector<64x64xf32>, vector<32x64xf32> -> vector<32x64xf32>
    %c16 = arith.constant 16 : index
    %c0_159 = arith.constant 0 : index
    %490 = vector.load %arg2[%c16, %c0_159] : memref<39x192xf32, #tpu.memory_space<vmem>>, vector<1x64xf32>
    %491 = vector.broadcast %490 : vector<1x64xf32> to vector<32x64xf32>
    %492 = arith.addf %489, %491 : vector<32x64xf32>
    %493 = arith.addf %182, %492 : vector<32x64xf32>
    %c13 = arith.constant 13 : index
    %c0_160 = arith.constant 0 : index
    %494 = vector.load %arg2[%c13, %c0_160] : memref<39x192xf32, #tpu.memory_space<vmem>>, vector<1x64xf32>
    %c14 = arith.constant 14 : index
    %c0_161 = arith.constant 0 : index
    %495 = vector.load %arg2[%c14, %c0_161] : memref<39x192xf32, #tpu.memory_space<vmem>>, vector<1x64xf32>
    %cst_162 = arith.constant dense<0.000000e+00> : vector<32xf32>
    %496 = vector.multi_reduction <add>, %493, %cst_162 [1] : vector<32x64xf32> to vector<32xf32>
    %497 = vector.shape_cast %496 : vector<32xf32> to vector<32x1xf32>
    %cst_163 = arith.constant 6.400000e+01 : f32
    %498 = vector.broadcast %cst_163 : f32 to vector<32x1xf32>
    %499 = arith.divf %497, %498 : vector<32x1xf32>
    %500 = vector.broadcast %499 : vector<32x1xf32> to vector<32x64xf32>
    %501 = arith.subf %493, %500 : vector<32x64xf32>
    %502 = arith.mulf %501, %501 : vector<32x64xf32>
    %cst_164 = arith.constant dense<0.000000e+00> : vector<32xf32>
    %503 = vector.multi_reduction <add>, %502, %cst_164 [1] : vector<32x64xf32> to vector<32xf32>
    %504 = vector.shape_cast %503 : vector<32xf32> to vector<32x1xf32>
    %cst_165 = arith.constant 6.400000e+01 : f32
    %505 = vector.broadcast %cst_165 : f32 to vector<32x1xf32>
    %506 = arith.divf %504, %505 : vector<32x1xf32>
    %cst_166 = arith.constant 9.99999974E-6 : f32
    %507 = vector.broadcast %cst_166 : f32 to vector<32x1xf32>
    %508 = arith.addf %506, %507 : vector<32x1xf32>
    %509 = math.rsqrt %508 : vector<32x1xf32>
    %510 = vector.broadcast %509 : vector<32x1xf32> to vector<32x64xf32>
    %511 = arith.mulf %501, %510 : vector<32x64xf32>
    %512 = vector.broadcast %494 : vector<1x64xf32> to vector<32x64xf32>
    %513 = arith.mulf %511, %512 : vector<32x64xf32>
    %514 = vector.broadcast %495 : vector<1x64xf32> to vector<32x64xf32>
    %515 = arith.addf %513, %514 : vector<32x64xf32>
    %c512 = arith.constant 512 : index
    %c0_167 = arith.constant 0 : index
    %516 = vector.load %arg1[%c512, %c0_167] : memref<1120x192xf32, #tpu.memory_space<vmem>>, vector<64x64xf32>
    %cst_168 = arith.constant dense<0.000000e+00> : vector<32x64xf32>
    %517 = tpu.matmul %515, %516, %cst_168 {dimension_numbers = #tpu.dot_dimension_numbers<[1], [0], [0], [1], [0, 0, 1, 1], [], []>} : vector<32x64xf32>, vector<64x64xf32>, vector<32x64xf32> -> vector<32x64xf32>
    %c17 = arith.constant 17 : index
    %c0_169 = arith.constant 0 : index
    %518 = vector.load %arg2[%c17, %c0_169] : memref<39x192xf32, #tpu.memory_space<vmem>>, vector<1x64xf32>
    %519 = vector.broadcast %518 : vector<1x64xf32> to vector<32x64xf32>
    %520 = arith.addf %517, %519 : vector<32x64xf32>
    %cst_170 = arith.constant 5.000000e-01 : f32
    %521 = vector.broadcast %cst_170 : f32 to vector<32x64xf32>
    %522 = arith.mulf %521, %520 : vector<32x64xf32>
    %cst_171 = arith.constant 0.707106769 : f32
    %523 = vector.broadcast %cst_171 : f32 to vector<32x64xf32>
    %524 = arith.mulf %520, %523 : vector<32x64xf32>
    %525 = math.absf %524 : vector<32x64xf32>
    %cst_172 = arith.constant 0.327591091 : f32
    %526 = vector.broadcast %cst_172 : f32 to vector<32x64xf32>
    %527 = arith.mulf %526, %525 : vector<32x64xf32>
    %cst_173 = arith.constant 1.000000e+00 : f32
    %528 = vector.broadcast %cst_173 : f32 to vector<32x64xf32>
    %529 = arith.addf %528, %527 : vector<32x64xf32>
    %cst_174 = arith.constant 1.000000e+00 : f32
    %530 = vector.broadcast %cst_174 : f32 to vector<32x64xf32>
    %531 = arith.divf %530, %529 : vector<32x64xf32>
    %cst_175 = arith.constant 1.06140542 : f32
    %532 = vector.broadcast %cst_175 : f32 to vector<32x64xf32>
    %533 = arith.mulf %532, %531 : vector<32x64xf32>
    %cst_176 = arith.constant 1.45315206 : f32
    %534 = vector.broadcast %cst_176 : f32 to vector<32x64xf32>
    %535 = arith.subf %533, %534 : vector<32x64xf32>
    %536 = arith.mulf %535, %531 : vector<32x64xf32>
    %cst_177 = arith.constant 1.42141378 : f32
    %537 = vector.broadcast %cst_177 : f32 to vector<32x64xf32>
    %538 = arith.addf %536, %537 : vector<32x64xf32>
    %539 = arith.mulf %538, %531 : vector<32x64xf32>
    %cst_178 = arith.constant 0.284496725 : f32
    %540 = vector.broadcast %cst_178 : f32 to vector<32x64xf32>
    %541 = arith.subf %539, %540 : vector<32x64xf32>
    %542 = arith.mulf %541, %531 : vector<32x64xf32>
    %cst_179 = arith.constant 0.254829586 : f32
    %543 = vector.broadcast %cst_179 : f32 to vector<32x64xf32>
    %544 = arith.addf %542, %543 : vector<32x64xf32>
    %545 = arith.mulf %544, %531 : vector<32x64xf32>
    %cst_180 = arith.constant 0.000000e+00 : f32
    %546 = vector.broadcast %cst_180 : f32 to vector<32x64xf32>
    %547 = arith.subf %546, %525 : vector<32x64xf32>
    %548 = arith.mulf %547, %525 : vector<32x64xf32>
    %549 = math.exp %548 : vector<32x64xf32>
    %550 = arith.mulf %545, %549 : vector<32x64xf32>
    %cst_181 = arith.constant 1.000000e+00 : f32
    %551 = vector.broadcast %cst_181 : f32 to vector<32x64xf32>
    %552 = arith.subf %551, %550 : vector<32x64xf32>
    %cst_182 = arith.constant 0.000000e+00 : f32
    %553 = vector.broadcast %cst_182 : f32 to vector<32x64xf32>
    %554 = arith.cmpf oge, %524, %553 : vector<32x64xf32>
    %cst_183 = arith.constant 0.000000e+00 : f32
    %555 = vector.broadcast %cst_183 : f32 to vector<32x64xf32>
    %556 = arith.subf %555, %552 : vector<32x64xf32>
    %557 = arith.select %554, %552, %556 : vector<32x64xi1>, vector<32x64xf32>
    %cst_184 = arith.constant 1.000000e+00 : f32
    %558 = vector.broadcast %cst_184 : f32 to vector<32x64xf32>
    %559 = arith.addf %558, %557 : vector<32x64xf32>
    %560 = arith.mulf %522, %559 : vector<32x64xf32>
    %c576 = arith.constant 576 : index
    %c0_185 = arith.constant 0 : index
    %561 = vector.load %arg1[%c576, %c0_185] : memref<1120x192xf32, #tpu.memory_space<vmem>>, vector<64x64xf32>
    %cst_186 = arith.constant dense<0.000000e+00> : vector<32x64xf32>
    %562 = tpu.matmul %560, %561, %cst_186 {dimension_numbers = #tpu.dot_dimension_numbers<[1], [0], [0], [1], [0, 0, 1, 1], [], []>} : vector<32x64xf32>, vector<64x64xf32>, vector<32x64xf32> -> vector<32x64xf32>
    %c18 = arith.constant 18 : index
    %c0_187 = arith.constant 0 : index
    %563 = vector.load %arg2[%c18, %c0_187] : memref<39x192xf32, #tpu.memory_space<vmem>>, vector<1x64xf32>
    %564 = vector.broadcast %563 : vector<1x64xf32> to vector<32x64xf32>
    %565 = arith.addf %562, %564 : vector<32x64xf32>
    %566 = arith.addf %493, %565 : vector<32x64xf32>
    %c19 = arith.constant 19 : index
    %c0_188 = arith.constant 0 : index
    %567 = vector.load %arg2[%c19, %c0_188] : memref<39x192xf32, #tpu.memory_space<vmem>>, vector<1x64xf32>
    %c20 = arith.constant 20 : index
    %c0_189 = arith.constant 0 : index
    %568 = vector.load %arg2[%c20, %c0_189] : memref<39x192xf32, #tpu.memory_space<vmem>>, vector<1x64xf32>
    %cst_190 = arith.constant dense<0.000000e+00> : vector<32xf32>
    %569 = vector.multi_reduction <add>, %566, %cst_190 [1] : vector<32x64xf32> to vector<32xf32>
    %570 = vector.shape_cast %569 : vector<32xf32> to vector<32x1xf32>
    %cst_191 = arith.constant 6.400000e+01 : f32
    %571 = vector.broadcast %cst_191 : f32 to vector<32x1xf32>
    %572 = arith.divf %570, %571 : vector<32x1xf32>
    %573 = vector.broadcast %572 : vector<32x1xf32> to vector<32x64xf32>
    %574 = arith.subf %566, %573 : vector<32x64xf32>
    %575 = arith.mulf %574, %574 : vector<32x64xf32>
    %cst_192 = arith.constant dense<0.000000e+00> : vector<32xf32>
    %576 = vector.multi_reduction <add>, %575, %cst_192 [1] : vector<32x64xf32> to vector<32xf32>
    %577 = vector.shape_cast %576 : vector<32xf32> to vector<32x1xf32>
    %cst_193 = arith.constant 6.400000e+01 : f32
    %578 = vector.broadcast %cst_193 : f32 to vector<32x1xf32>
    %579 = arith.divf %577, %578 : vector<32x1xf32>
    %cst_194 = arith.constant 9.99999974E-6 : f32
    %580 = vector.broadcast %cst_194 : f32 to vector<32x1xf32>
    %581 = arith.addf %579, %580 : vector<32x1xf32>
    %582 = math.rsqrt %581 : vector<32x1xf32>
    %583 = vector.broadcast %582 : vector<32x1xf32> to vector<32x64xf32>
    %584 = arith.mulf %574, %583 : vector<32x64xf32>
    %585 = vector.broadcast %567 : vector<1x64xf32> to vector<32x64xf32>
    %586 = arith.mulf %584, %585 : vector<32x64xf32>
    %587 = vector.broadcast %568 : vector<1x64xf32> to vector<32x64xf32>
    %588 = arith.addf %586, %587 : vector<32x64xf32>
    %c640 = arith.constant 640 : index
    %c0_195 = arith.constant 0 : index
    %589 = vector.load %arg1[%c640, %c0_195] : memref<1120x192xf32, #tpu.memory_space<vmem>>, vector<64x192xf32>
    %cst_196 = arith.constant dense<0.000000e+00> : vector<32x192xf32>
    %590 = tpu.matmul %588, %589, %cst_196 {dimension_numbers = #tpu.dot_dimension_numbers<[1], [0], [0], [1], [0, 0, 1, 1], [], []>} : vector<32x64xf32>, vector<64x192xf32>, vector<32x192xf32> -> vector<32x192xf32>
    %c23 = arith.constant 23 : index
    %c0_197 = arith.constant 0 : index
    %591 = vector.load %arg2[%c23, %c0_197] : memref<39x192xf32, #tpu.memory_space<vmem>>, vector<1x192xf32>
    %592 = vector.broadcast %591 : vector<1x192xf32> to vector<32x192xf32>
    %593 = arith.addf %590, %592 : vector<32x192xf32>
    %594 = vector.extract_strided_slice %593 {offsets = [0, 0], sizes = [32, 64], strides = [1, 1]} : vector<32x192xf32> to vector<32x64xf32>
    %595 = vector.extract_strided_slice %593 {offsets = [0, 64], sizes = [32, 64], strides = [1, 1]} : vector<32x192xf32> to vector<32x64xf32>
    %596 = vector.extract_strided_slice %593 {offsets = [0, 128], sizes = [32, 64], strides = [1, 1]} : vector<32x192xf32> to vector<32x64xf32>
    %597 = vector.extract_strided_slice %594 {offsets = [0, 0], sizes = [16, 8], strides = [1, 1]} : vector<32x64xf32> to vector<16x8xf32>
    %598 = vector.extract_strided_slice %595 {offsets = [0, 0], sizes = [16, 8], strides = [1, 1]} : vector<32x64xf32> to vector<16x8xf32>
    %599 = vector.extract_strided_slice %596 {offsets = [0, 0], sizes = [16, 8], strides = [1, 1]} : vector<32x64xf32> to vector<16x8xf32>
    %cst_198 = arith.constant dense<0.000000e+00> : vector<16x16xf32>
    %600 = tpu.matmul %597, %598, %cst_198 {dimension_numbers = #tpu.dot_dimension_numbers<[1], [1], [0], [0], [0, 0, 1, 0], [], []>} : vector<16x8xf32>, vector<16x8xf32>, vector<16x16xf32> -> vector<16x16xf32>
    %cst_199 = arith.constant 0.353553385 : f32
    %601 = vector.broadcast %cst_199 : f32 to vector<16x16xf32>
    %602 = arith.mulf %600, %601 : vector<16x16xf32>
    %cst_200 = arith.constant dense<0xFF800000> : vector<16xf32>
    %603 = vector.multi_reduction <maximumf>, %602, %cst_200 [1] : vector<16x16xf32> to vector<16xf32>
    %604 = vector.shape_cast %603 : vector<16xf32> to vector<16x1xf32>
    %605 = vector.broadcast %604 : vector<16x1xf32> to vector<16x16xf32>
    %606 = arith.subf %602, %605 : vector<16x16xf32>
    %607 = math.exp %606 : vector<16x16xf32>
    %cst_201 = arith.constant dense<0.000000e+00> : vector<16xf32>
    %608 = vector.multi_reduction <add>, %607, %cst_201 [1] : vector<16x16xf32> to vector<16xf32>
    %609 = vector.shape_cast %608 : vector<16xf32> to vector<16x1xf32>
    %610 = tpu.reciprocal %609 {approx = true} : vector<16x1xf32> -> vector<16x1xf32>
    %611 = vector.broadcast %610 : vector<16x1xf32> to vector<16x16xf32>
    %612 = arith.mulf %607, %611 : vector<16x16xf32>
    %cst_202 = arith.constant dense<0.000000e+00> : vector<16x8xf32>
    %613 = tpu.matmul %612, %599, %cst_202 {dimension_numbers = #tpu.dot_dimension_numbers<[1], [0], [0], [1], [0, 0, 1, 1], [], []>} : vector<16x16xf32>, vector<16x8xf32>, vector<16x8xf32> -> vector<16x8xf32>
    %614 = vector.extract_strided_slice %594 {offsets = [0, 8], sizes = [16, 8], strides = [1, 1]} : vector<32x64xf32> to vector<16x8xf32>
    %615 = vector.extract_strided_slice %595 {offsets = [0, 8], sizes = [16, 8], strides = [1, 1]} : vector<32x64xf32> to vector<16x8xf32>
    %616 = vector.extract_strided_slice %596 {offsets = [0, 8], sizes = [16, 8], strides = [1, 1]} : vector<32x64xf32> to vector<16x8xf32>
    %cst_203 = arith.constant dense<0.000000e+00> : vector<16x16xf32>
    %617 = tpu.matmul %614, %615, %cst_203 {dimension_numbers = #tpu.dot_dimension_numbers<[1], [1], [0], [0], [0, 0, 1, 0], [], []>} : vector<16x8xf32>, vector<16x8xf32>, vector<16x16xf32> -> vector<16x16xf32>
    %cst_204 = arith.constant 0.353553385 : f32
    %618 = vector.broadcast %cst_204 : f32 to vector<16x16xf32>
    %619 = arith.mulf %617, %618 : vector<16x16xf32>
    %cst_205 = arith.constant dense<0xFF800000> : vector<16xf32>
    %620 = vector.multi_reduction <maximumf>, %619, %cst_205 [1] : vector<16x16xf32> to vector<16xf32>
    %621 = vector.shape_cast %620 : vector<16xf32> to vector<16x1xf32>
    %622 = vector.broadcast %621 : vector<16x1xf32> to vector<16x16xf32>
    %623 = arith.subf %619, %622 : vector<16x16xf32>
    %624 = math.exp %623 : vector<16x16xf32>
    %cst_206 = arith.constant dense<0.000000e+00> : vector<16xf32>
    %625 = vector.multi_reduction <add>, %624, %cst_206 [1] : vector<16x16xf32> to vector<16xf32>
    %626 = vector.shape_cast %625 : vector<16xf32> to vector<16x1xf32>
    %627 = tpu.reciprocal %626 {approx = true} : vector<16x1xf32> -> vector<16x1xf32>
    %628 = vector.broadcast %627 : vector<16x1xf32> to vector<16x16xf32>
    %629 = arith.mulf %624, %628 : vector<16x16xf32>
    %cst_207 = arith.constant dense<0.000000e+00> : vector<16x8xf32>
    %630 = tpu.matmul %629, %616, %cst_207 {dimension_numbers = #tpu.dot_dimension_numbers<[1], [0], [0], [1], [0, 0, 1, 1], [], []>} : vector<16x16xf32>, vector<16x8xf32>, vector<16x8xf32> -> vector<16x8xf32>
    %631 = vector.extract_strided_slice %594 {offsets = [0, 16], sizes = [16, 8], strides = [1, 1]} : vector<32x64xf32> to vector<16x8xf32>
    %632 = vector.extract_strided_slice %595 {offsets = [0, 16], sizes = [16, 8], strides = [1, 1]} : vector<32x64xf32> to vector<16x8xf32>
    %633 = vector.extract_strided_slice %596 {offsets = [0, 16], sizes = [16, 8], strides = [1, 1]} : vector<32x64xf32> to vector<16x8xf32>
    %cst_208 = arith.constant dense<0.000000e+00> : vector<16x16xf32>
    %634 = tpu.matmul %631, %632, %cst_208 {dimension_numbers = #tpu.dot_dimension_numbers<[1], [1], [0], [0], [0, 0, 1, 0], [], []>} : vector<16x8xf32>, vector<16x8xf32>, vector<16x16xf32> -> vector<16x16xf32>
    %cst_209 = arith.constant 0.353553385 : f32
    %635 = vector.broadcast %cst_209 : f32 to vector<16x16xf32>
    %636 = arith.mulf %634, %635 : vector<16x16xf32>
    %cst_210 = arith.constant dense<0xFF800000> : vector<16xf32>
    %637 = vector.multi_reduction <maximumf>, %636, %cst_210 [1] : vector<16x16xf32> to vector<16xf32>
    %638 = vector.shape_cast %637 : vector<16xf32> to vector<16x1xf32>
    %639 = vector.broadcast %638 : vector<16x1xf32> to vector<16x16xf32>
    %640 = arith.subf %636, %639 : vector<16x16xf32>
    %641 = math.exp %640 : vector<16x16xf32>
    %cst_211 = arith.constant dense<0.000000e+00> : vector<16xf32>
    %642 = vector.multi_reduction <add>, %641, %cst_211 [1] : vector<16x16xf32> to vector<16xf32>
    %643 = vector.shape_cast %642 : vector<16xf32> to vector<16x1xf32>
    %644 = tpu.reciprocal %643 {approx = true} : vector<16x1xf32> -> vector<16x1xf32>
    %645 = vector.broadcast %644 : vector<16x1xf32> to vector<16x16xf32>
    %646 = arith.mulf %641, %645 : vector<16x16xf32>
    %cst_212 = arith.constant dense<0.000000e+00> : vector<16x8xf32>
    %647 = tpu.matmul %646, %633, %cst_212 {dimension_numbers = #tpu.dot_dimension_numbers<[1], [0], [0], [1], [0, 0, 1, 1], [], []>} : vector<16x16xf32>, vector<16x8xf32>, vector<16x8xf32> -> vector<16x8xf32>
    %648 = vector.extract_strided_slice %594 {offsets = [0, 24], sizes = [16, 8], strides = [1, 1]} : vector<32x64xf32> to vector<16x8xf32>
    %649 = vector.extract_strided_slice %595 {offsets = [0, 24], sizes = [16, 8], strides = [1, 1]} : vector<32x64xf32> to vector<16x8xf32>
    %650 = vector.extract_strided_slice %596 {offsets = [0, 24], sizes = [16, 8], strides = [1, 1]} : vector<32x64xf32> to vector<16x8xf32>
    %cst_213 = arith.constant dense<0.000000e+00> : vector<16x16xf32>
    %651 = tpu.matmul %648, %649, %cst_213 {dimension_numbers = #tpu.dot_dimension_numbers<[1], [1], [0], [0], [0, 0, 1, 0], [], []>} : vector<16x8xf32>, vector<16x8xf32>, vector<16x16xf32> -> vector<16x16xf32>
    %cst_214 = arith.constant 0.353553385 : f32
    %652 = vector.broadcast %cst_214 : f32 to vector<16x16xf32>
    %653 = arith.mulf %651, %652 : vector<16x16xf32>
    %cst_215 = arith.constant dense<0xFF800000> : vector<16xf32>
    %654 = vector.multi_reduction <maximumf>, %653, %cst_215 [1] : vector<16x16xf32> to vector<16xf32>
    %655 = vector.shape_cast %654 : vector<16xf32> to vector<16x1xf32>
    %656 = vector.broadcast %655 : vector<16x1xf32> to vector<16x16xf32>
    %657 = arith.subf %653, %656 : vector<16x16xf32>
    %658 = math.exp %657 : vector<16x16xf32>
    %cst_216 = arith.constant dense<0.000000e+00> : vector<16xf32>
    %659 = vector.multi_reduction <add>, %658, %cst_216 [1] : vector<16x16xf32> to vector<16xf32>
    %660 = vector.shape_cast %659 : vector<16xf32> to vector<16x1xf32>
    %661 = tpu.reciprocal %660 {approx = true} : vector<16x1xf32> -> vector<16x1xf32>
    %662 = vector.broadcast %661 : vector<16x1xf32> to vector<16x16xf32>
    %663 = arith.mulf %658, %662 : vector<16x16xf32>
    %cst_217 = arith.constant dense<0.000000e+00> : vector<16x8xf32>
    %664 = tpu.matmul %663, %650, %cst_217 {dimension_numbers = #tpu.dot_dimension_numbers<[1], [0], [0], [1], [0, 0, 1, 1], [], []>} : vector<16x16xf32>, vector<16x8xf32>, vector<16x8xf32> -> vector<16x8xf32>
    %665 = vector.extract_strided_slice %594 {offsets = [0, 32], sizes = [16, 8], strides = [1, 1]} : vector<32x64xf32> to vector<16x8xf32>
    %666 = vector.extract_strided_slice %595 {offsets = [0, 32], sizes = [16, 8], strides = [1, 1]} : vector<32x64xf32> to vector<16x8xf32>
    %667 = vector.extract_strided_slice %596 {offsets = [0, 32], sizes = [16, 8], strides = [1, 1]} : vector<32x64xf32> to vector<16x8xf32>
    %cst_218 = arith.constant dense<0.000000e+00> : vector<16x16xf32>
    %668 = tpu.matmul %665, %666, %cst_218 {dimension_numbers = #tpu.dot_dimension_numbers<[1], [1], [0], [0], [0, 0, 1, 0], [], []>} : vector<16x8xf32>, vector<16x8xf32>, vector<16x16xf32> -> vector<16x16xf32>
    %cst_219 = arith.constant 0.353553385 : f32
    %669 = vector.broadcast %cst_219 : f32 to vector<16x16xf32>
    %670 = arith.mulf %668, %669 : vector<16x16xf32>
    %cst_220 = arith.constant dense<0xFF800000> : vector<16xf32>
    %671 = vector.multi_reduction <maximumf>, %670, %cst_220 [1] : vector<16x16xf32> to vector<16xf32>
    %672 = vector.shape_cast %671 : vector<16xf32> to vector<16x1xf32>
    %673 = vector.broadcast %672 : vector<16x1xf32> to vector<16x16xf32>
    %674 = arith.subf %670, %673 : vector<16x16xf32>
    %675 = math.exp %674 : vector<16x16xf32>
    %cst_221 = arith.constant dense<0.000000e+00> : vector<16xf32>
    %676 = vector.multi_reduction <add>, %675, %cst_221 [1] : vector<16x16xf32> to vector<16xf32>
    %677 = vector.shape_cast %676 : vector<16xf32> to vector<16x1xf32>
    %678 = tpu.reciprocal %677 {approx = true} : vector<16x1xf32> -> vector<16x1xf32>
    %679 = vector.broadcast %678 : vector<16x1xf32> to vector<16x16xf32>
    %680 = arith.mulf %675, %679 : vector<16x16xf32>
    %cst_222 = arith.constant dense<0.000000e+00> : vector<16x8xf32>
    %681 = tpu.matmul %680, %667, %cst_222 {dimension_numbers = #tpu.dot_dimension_numbers<[1], [0], [0], [1], [0, 0, 1, 1], [], []>} : vector<16x16xf32>, vector<16x8xf32>, vector<16x8xf32> -> vector<16x8xf32>
    %682 = vector.extract_strided_slice %594 {offsets = [0, 40], sizes = [16, 8], strides = [1, 1]} : vector<32x64xf32> to vector<16x8xf32>
    %683 = vector.extract_strided_slice %595 {offsets = [0, 40], sizes = [16, 8], strides = [1, 1]} : vector<32x64xf32> to vector<16x8xf32>
    %684 = vector.extract_strided_slice %596 {offsets = [0, 40], sizes = [16, 8], strides = [1, 1]} : vector<32x64xf32> to vector<16x8xf32>
    %cst_223 = arith.constant dense<0.000000e+00> : vector<16x16xf32>
    %685 = tpu.matmul %682, %683, %cst_223 {dimension_numbers = #tpu.dot_dimension_numbers<[1], [1], [0], [0], [0, 0, 1, 0], [], []>} : vector<16x8xf32>, vector<16x8xf32>, vector<16x16xf32> -> vector<16x16xf32>
    %cst_224 = arith.constant 0.353553385 : f32
    %686 = vector.broadcast %cst_224 : f32 to vector<16x16xf32>
    %687 = arith.mulf %685, %686 : vector<16x16xf32>
    %cst_225 = arith.constant dense<0xFF800000> : vector<16xf32>
    %688 = vector.multi_reduction <maximumf>, %687, %cst_225 [1] : vector<16x16xf32> to vector<16xf32>
    %689 = vector.shape_cast %688 : vector<16xf32> to vector<16x1xf32>
    %690 = vector.broadcast %689 : vector<16x1xf32> to vector<16x16xf32>
    %691 = arith.subf %687, %690 : vector<16x16xf32>
    %692 = math.exp %691 : vector<16x16xf32>
    %cst_226 = arith.constant dense<0.000000e+00> : vector<16xf32>
    %693 = vector.multi_reduction <add>, %692, %cst_226 [1] : vector<16x16xf32> to vector<16xf32>
    %694 = vector.shape_cast %693 : vector<16xf32> to vector<16x1xf32>
    %695 = tpu.reciprocal %694 {approx = true} : vector<16x1xf32> -> vector<16x1xf32>
    %696 = vector.broadcast %695 : vector<16x1xf32> to vector<16x16xf32>
    %697 = arith.mulf %692, %696 : vector<16x16xf32>
    %cst_227 = arith.constant dense<0.000000e+00> : vector<16x8xf32>
    %698 = tpu.matmul %697, %684, %cst_227 {dimension_numbers = #tpu.dot_dimension_numbers<[1], [0], [0], [1], [0, 0, 1, 1], [], []>} : vector<16x16xf32>, vector<16x8xf32>, vector<16x8xf32> -> vector<16x8xf32>
    %699 = vector.extract_strided_slice %594 {offsets = [0, 48], sizes = [16, 8], strides = [1, 1]} : vector<32x64xf32> to vector<16x8xf32>
    %700 = vector.extract_strided_slice %595 {offsets = [0, 48], sizes = [16, 8], strides = [1, 1]} : vector<32x64xf32> to vector<16x8xf32>
    %701 = vector.extract_strided_slice %596 {offsets = [0, 48], sizes = [16, 8], strides = [1, 1]} : vector<32x64xf32> to vector<16x8xf32>
    %cst_228 = arith.constant dense<0.000000e+00> : vector<16x16xf32>
    %702 = tpu.matmul %699, %700, %cst_228 {dimension_numbers = #tpu.dot_dimension_numbers<[1], [1], [0], [0], [0, 0, 1, 0], [], []>} : vector<16x8xf32>, vector<16x8xf32>, vector<16x16xf32> -> vector<16x16xf32>
    %cst_229 = arith.constant 0.353553385 : f32
    %703 = vector.broadcast %cst_229 : f32 to vector<16x16xf32>
    %704 = arith.mulf %702, %703 : vector<16x16xf32>
    %cst_230 = arith.constant dense<0xFF800000> : vector<16xf32>
    %705 = vector.multi_reduction <maximumf>, %704, %cst_230 [1] : vector<16x16xf32> to vector<16xf32>
    %706 = vector.shape_cast %705 : vector<16xf32> to vector<16x1xf32>
    %707 = vector.broadcast %706 : vector<16x1xf32> to vector<16x16xf32>
    %708 = arith.subf %704, %707 : vector<16x16xf32>
    %709 = math.exp %708 : vector<16x16xf32>
    %cst_231 = arith.constant dense<0.000000e+00> : vector<16xf32>
    %710 = vector.multi_reduction <add>, %709, %cst_231 [1] : vector<16x16xf32> to vector<16xf32>
    %711 = vector.shape_cast %710 : vector<16xf32> to vector<16x1xf32>
    %712 = tpu.reciprocal %711 {approx = true} : vector<16x1xf32> -> vector<16x1xf32>
    %713 = vector.broadcast %712 : vector<16x1xf32> to vector<16x16xf32>
    %714 = arith.mulf %709, %713 : vector<16x16xf32>
    %cst_232 = arith.constant dense<0.000000e+00> : vector<16x8xf32>
    %715 = tpu.matmul %714, %701, %cst_232 {dimension_numbers = #tpu.dot_dimension_numbers<[1], [0], [0], [1], [0, 0, 1, 1], [], []>} : vector<16x16xf32>, vector<16x8xf32>, vector<16x8xf32> -> vector<16x8xf32>
    %716 = vector.extract_strided_slice %594 {offsets = [0, 56], sizes = [16, 8], strides = [1, 1]} : vector<32x64xf32> to vector<16x8xf32>
    %717 = vector.extract_strided_slice %595 {offsets = [0, 56], sizes = [16, 8], strides = [1, 1]} : vector<32x64xf32> to vector<16x8xf32>
    %718 = vector.extract_strided_slice %596 {offsets = [0, 56], sizes = [16, 8], strides = [1, 1]} : vector<32x64xf32> to vector<16x8xf32>
    %cst_233 = arith.constant dense<0.000000e+00> : vector<16x16xf32>
    %719 = tpu.matmul %716, %717, %cst_233 {dimension_numbers = #tpu.dot_dimension_numbers<[1], [1], [0], [0], [0, 0, 1, 0], [], []>} : vector<16x8xf32>, vector<16x8xf32>, vector<16x16xf32> -> vector<16x16xf32>
    %cst_234 = arith.constant 0.353553385 : f32
    %720 = vector.broadcast %cst_234 : f32 to vector<16x16xf32>
    %721 = arith.mulf %719, %720 : vector<16x16xf32>
    %cst_235 = arith.constant dense<0xFF800000> : vector<16xf32>
    %722 = vector.multi_reduction <maximumf>, %721, %cst_235 [1] : vector<16x16xf32> to vector<16xf32>
    %723 = vector.shape_cast %722 : vector<16xf32> to vector<16x1xf32>
    %724 = vector.broadcast %723 : vector<16x1xf32> to vector<16x16xf32>
    %725 = arith.subf %721, %724 : vector<16x16xf32>
    %726 = math.exp %725 : vector<16x16xf32>
    %cst_236 = arith.constant dense<0.000000e+00> : vector<16xf32>
    %727 = vector.multi_reduction <add>, %726, %cst_236 [1] : vector<16x16xf32> to vector<16xf32>
    %728 = vector.shape_cast %727 : vector<16xf32> to vector<16x1xf32>
    %729 = tpu.reciprocal %728 {approx = true} : vector<16x1xf32> -> vector<16x1xf32>
    %730 = vector.broadcast %729 : vector<16x1xf32> to vector<16x16xf32>
    %731 = arith.mulf %726, %730 : vector<16x16xf32>
    %cst_237 = arith.constant dense<0.000000e+00> : vector<16x8xf32>
    %732 = tpu.matmul %731, %718, %cst_237 {dimension_numbers = #tpu.dot_dimension_numbers<[1], [0], [0], [1], [0, 0, 1, 1], [], []>} : vector<16x16xf32>, vector<16x8xf32>, vector<16x8xf32> -> vector<16x8xf32>
    %733 = tpu.concatenate %613, %630, %647, %664, %681, %698, %715, %732 in 1 : vector<16x8xf32>, vector<16x8xf32>, vector<16x8xf32>, vector<16x8xf32>, vector<16x8xf32>, vector<16x8xf32>, vector<16x8xf32>, vector<16x8xf32> -> vector<16x64xf32>
    %734 = vector.extract_strided_slice %594 {offsets = [16, 0], sizes = [16, 8], strides = [1, 1]} : vector<32x64xf32> to vector<16x8xf32>
    %735 = vector.extract_strided_slice %595 {offsets = [16, 0], sizes = [16, 8], strides = [1, 1]} : vector<32x64xf32> to vector<16x8xf32>
    %736 = vector.extract_strided_slice %596 {offsets = [16, 0], sizes = [16, 8], strides = [1, 1]} : vector<32x64xf32> to vector<16x8xf32>
    %cst_238 = arith.constant dense<0.000000e+00> : vector<16x16xf32>
    %737 = tpu.matmul %734, %735, %cst_238 {dimension_numbers = #tpu.dot_dimension_numbers<[1], [1], [0], [0], [0, 0, 1, 0], [], []>} : vector<16x8xf32>, vector<16x8xf32>, vector<16x16xf32> -> vector<16x16xf32>
    %cst_239 = arith.constant 0.353553385 : f32
    %738 = vector.broadcast %cst_239 : f32 to vector<16x16xf32>
    %739 = arith.mulf %737, %738 : vector<16x16xf32>
    %cst_240 = arith.constant dense<0xFF800000> : vector<16xf32>
    %740 = vector.multi_reduction <maximumf>, %739, %cst_240 [1] : vector<16x16xf32> to vector<16xf32>
    %741 = vector.shape_cast %740 : vector<16xf32> to vector<16x1xf32>
    %742 = vector.broadcast %741 : vector<16x1xf32> to vector<16x16xf32>
    %743 = arith.subf %739, %742 : vector<16x16xf32>
    %744 = math.exp %743 : vector<16x16xf32>
    %cst_241 = arith.constant dense<0.000000e+00> : vector<16xf32>
    %745 = vector.multi_reduction <add>, %744, %cst_241 [1] : vector<16x16xf32> to vector<16xf32>
    %746 = vector.shape_cast %745 : vector<16xf32> to vector<16x1xf32>
    %747 = tpu.reciprocal %746 {approx = true} : vector<16x1xf32> -> vector<16x1xf32>
    %748 = vector.broadcast %747 : vector<16x1xf32> to vector<16x16xf32>
    %749 = arith.mulf %744, %748 : vector<16x16xf32>
    %cst_242 = arith.constant dense<0.000000e+00> : vector<16x8xf32>
    %750 = tpu.matmul %749, %736, %cst_242 {dimension_numbers = #tpu.dot_dimension_numbers<[1], [0], [0], [1], [0, 0, 1, 1], [], []>} : vector<16x16xf32>, vector<16x8xf32>, vector<16x8xf32> -> vector<16x8xf32>
    %751 = vector.extract_strided_slice %594 {offsets = [16, 8], sizes = [16, 8], strides = [1, 1]} : vector<32x64xf32> to vector<16x8xf32>
    %752 = vector.extract_strided_slice %595 {offsets = [16, 8], sizes = [16, 8], strides = [1, 1]} : vector<32x64xf32> to vector<16x8xf32>
    %753 = vector.extract_strided_slice %596 {offsets = [16, 8], sizes = [16, 8], strides = [1, 1]} : vector<32x64xf32> to vector<16x8xf32>
    %cst_243 = arith.constant dense<0.000000e+00> : vector<16x16xf32>
    %754 = tpu.matmul %751, %752, %cst_243 {dimension_numbers = #tpu.dot_dimension_numbers<[1], [1], [0], [0], [0, 0, 1, 0], [], []>} : vector<16x8xf32>, vector<16x8xf32>, vector<16x16xf32> -> vector<16x16xf32>
    %cst_244 = arith.constant 0.353553385 : f32
    %755 = vector.broadcast %cst_244 : f32 to vector<16x16xf32>
    %756 = arith.mulf %754, %755 : vector<16x16xf32>
    %cst_245 = arith.constant dense<0xFF800000> : vector<16xf32>
    %757 = vector.multi_reduction <maximumf>, %756, %cst_245 [1] : vector<16x16xf32> to vector<16xf32>
    %758 = vector.shape_cast %757 : vector<16xf32> to vector<16x1xf32>
    %759 = vector.broadcast %758 : vector<16x1xf32> to vector<16x16xf32>
    %760 = arith.subf %756, %759 : vector<16x16xf32>
    %761 = math.exp %760 : vector<16x16xf32>
    %cst_246 = arith.constant dense<0.000000e+00> : vector<16xf32>
    %762 = vector.multi_reduction <add>, %761, %cst_246 [1] : vector<16x16xf32> to vector<16xf32>
    %763 = vector.shape_cast %762 : vector<16xf32> to vector<16x1xf32>
    %764 = tpu.reciprocal %763 {approx = true} : vector<16x1xf32> -> vector<16x1xf32>
    %765 = vector.broadcast %764 : vector<16x1xf32> to vector<16x16xf32>
    %766 = arith.mulf %761, %765 : vector<16x16xf32>
    %cst_247 = arith.constant dense<0.000000e+00> : vector<16x8xf32>
    %767 = tpu.matmul %766, %753, %cst_247 {dimension_numbers = #tpu.dot_dimension_numbers<[1], [0], [0], [1], [0, 0, 1, 1], [], []>} : vector<16x16xf32>, vector<16x8xf32>, vector<16x8xf32> -> vector<16x8xf32>
    %768 = vector.extract_strided_slice %594 {offsets = [16, 16], sizes = [16, 8], strides = [1, 1]} : vector<32x64xf32> to vector<16x8xf32>
    %769 = vector.extract_strided_slice %595 {offsets = [16, 16], sizes = [16, 8], strides = [1, 1]} : vector<32x64xf32> to vector<16x8xf32>
    %770 = vector.extract_strided_slice %596 {offsets = [16, 16], sizes = [16, 8], strides = [1, 1]} : vector<32x64xf32> to vector<16x8xf32>
    %cst_248 = arith.constant dense<0.000000e+00> : vector<16x16xf32>
    %771 = tpu.matmul %768, %769, %cst_248 {dimension_numbers = #tpu.dot_dimension_numbers<[1], [1], [0], [0], [0, 0, 1, 0], [], []>} : vector<16x8xf32>, vector<16x8xf32>, vector<16x16xf32> -> vector<16x16xf32>
    %cst_249 = arith.constant 0.353553385 : f32
    %772 = vector.broadcast %cst_249 : f32 to vector<16x16xf32>
    %773 = arith.mulf %771, %772 : vector<16x16xf32>
    %cst_250 = arith.constant dense<0xFF800000> : vector<16xf32>
    %774 = vector.multi_reduction <maximumf>, %773, %cst_250 [1] : vector<16x16xf32> to vector<16xf32>
    %775 = vector.shape_cast %774 : vector<16xf32> to vector<16x1xf32>
    %776 = vector.broadcast %775 : vector<16x1xf32> to vector<16x16xf32>
    %777 = arith.subf %773, %776 : vector<16x16xf32>
    %778 = math.exp %777 : vector<16x16xf32>
    %cst_251 = arith.constant dense<0.000000e+00> : vector<16xf32>
    %779 = vector.multi_reduction <add>, %778, %cst_251 [1] : vector<16x16xf32> to vector<16xf32>
    %780 = vector.shape_cast %779 : vector<16xf32> to vector<16x1xf32>
    %781 = tpu.reciprocal %780 {approx = true} : vector<16x1xf32> -> vector<16x1xf32>
    %782 = vector.broadcast %781 : vector<16x1xf32> to vector<16x16xf32>
    %783 = arith.mulf %778, %782 : vector<16x16xf32>
    %cst_252 = arith.constant dense<0.000000e+00> : vector<16x8xf32>
    %784 = tpu.matmul %783, %770, %cst_252 {dimension_numbers = #tpu.dot_dimension_numbers<[1], [0], [0], [1], [0, 0, 1, 1], [], []>} : vector<16x16xf32>, vector<16x8xf32>, vector<16x8xf32> -> vector<16x8xf32>
    %785 = vector.extract_strided_slice %594 {offsets = [16, 24], sizes = [16, 8], strides = [1, 1]} : vector<32x64xf32> to vector<16x8xf32>
    %786 = vector.extract_strided_slice %595 {offsets = [16, 24], sizes = [16, 8], strides = [1, 1]} : vector<32x64xf32> to vector<16x8xf32>
    %787 = vector.extract_strided_slice %596 {offsets = [16, 24], sizes = [16, 8], strides = [1, 1]} : vector<32x64xf32> to vector<16x8xf32>
    %cst_253 = arith.constant dense<0.000000e+00> : vector<16x16xf32>
    %788 = tpu.matmul %785, %786, %cst_253 {dimension_numbers = #tpu.dot_dimension_numbers<[1], [1], [0], [0], [0, 0, 1, 0], [], []>} : vector<16x8xf32>, vector<16x8xf32>, vector<16x16xf32> -> vector<16x16xf32>
    %cst_254 = arith.constant 0.353553385 : f32
    %789 = vector.broadcast %cst_254 : f32 to vector<16x16xf32>
    %790 = arith.mulf %788, %789 : vector<16x16xf32>
    %cst_255 = arith.constant dense<0xFF800000> : vector<16xf32>
    %791 = vector.multi_reduction <maximumf>, %790, %cst_255 [1] : vector<16x16xf32> to vector<16xf32>
    %792 = vector.shape_cast %791 : vector<16xf32> to vector<16x1xf32>
    %793 = vector.broadcast %792 : vector<16x1xf32> to vector<16x16xf32>
    %794 = arith.subf %790, %793 : vector<16x16xf32>
    %795 = math.exp %794 : vector<16x16xf32>
    %cst_256 = arith.constant dense<0.000000e+00> : vector<16xf32>
    %796 = vector.multi_reduction <add>, %795, %cst_256 [1] : vector<16x16xf32> to vector<16xf32>
    %797 = vector.shape_cast %796 : vector<16xf32> to vector<16x1xf32>
    %798 = tpu.reciprocal %797 {approx = true} : vector<16x1xf32> -> vector<16x1xf32>
    %799 = vector.broadcast %798 : vector<16x1xf32> to vector<16x16xf32>
    %800 = arith.mulf %795, %799 : vector<16x16xf32>
    %cst_257 = arith.constant dense<0.000000e+00> : vector<16x8xf32>
    %801 = tpu.matmul %800, %787, %cst_257 {dimension_numbers = #tpu.dot_dimension_numbers<[1], [0], [0], [1], [0, 0, 1, 1], [], []>} : vector<16x16xf32>, vector<16x8xf32>, vector<16x8xf32> -> vector<16x8xf32>
    %802 = vector.extract_strided_slice %594 {offsets = [16, 32], sizes = [16, 8], strides = [1, 1]} : vector<32x64xf32> to vector<16x8xf32>
    %803 = vector.extract_strided_slice %595 {offsets = [16, 32], sizes = [16, 8], strides = [1, 1]} : vector<32x64xf32> to vector<16x8xf32>
    %804 = vector.extract_strided_slice %596 {offsets = [16, 32], sizes = [16, 8], strides = [1, 1]} : vector<32x64xf32> to vector<16x8xf32>
    %cst_258 = arith.constant dense<0.000000e+00> : vector<16x16xf32>
    %805 = tpu.matmul %802, %803, %cst_258 {dimension_numbers = #tpu.dot_dimension_numbers<[1], [1], [0], [0], [0, 0, 1, 0], [], []>} : vector<16x8xf32>, vector<16x8xf32>, vector<16x16xf32> -> vector<16x16xf32>
    %cst_259 = arith.constant 0.353553385 : f32
    %806 = vector.broadcast %cst_259 : f32 to vector<16x16xf32>
    %807 = arith.mulf %805, %806 : vector<16x16xf32>
    %cst_260 = arith.constant dense<0xFF800000> : vector<16xf32>
    %808 = vector.multi_reduction <maximumf>, %807, %cst_260 [1] : vector<16x16xf32> to vector<16xf32>
    %809 = vector.shape_cast %808 : vector<16xf32> to vector<16x1xf32>
    %810 = vector.broadcast %809 : vector<16x1xf32> to vector<16x16xf32>
    %811 = arith.subf %807, %810 : vector<16x16xf32>
    %812 = math.exp %811 : vector<16x16xf32>
    %cst_261 = arith.constant dense<0.000000e+00> : vector<16xf32>
    %813 = vector.multi_reduction <add>, %812, %cst_261 [1] : vector<16x16xf32> to vector<16xf32>
    %814 = vector.shape_cast %813 : vector<16xf32> to vector<16x1xf32>
    %815 = tpu.reciprocal %814 {approx = true} : vector<16x1xf32> -> vector<16x1xf32>
    %816 = vector.broadcast %815 : vector<16x1xf32> to vector<16x16xf32>
    %817 = arith.mulf %812, %816 : vector<16x16xf32>
    %cst_262 = arith.constant dense<0.000000e+00> : vector<16x8xf32>
    %818 = tpu.matmul %817, %804, %cst_262 {dimension_numbers = #tpu.dot_dimension_numbers<[1], [0], [0], [1], [0, 0, 1, 1], [], []>} : vector<16x16xf32>, vector<16x8xf32>, vector<16x8xf32> -> vector<16x8xf32>
    %819 = vector.extract_strided_slice %594 {offsets = [16, 40], sizes = [16, 8], strides = [1, 1]} : vector<32x64xf32> to vector<16x8xf32>
    %820 = vector.extract_strided_slice %595 {offsets = [16, 40], sizes = [16, 8], strides = [1, 1]} : vector<32x64xf32> to vector<16x8xf32>
    %821 = vector.extract_strided_slice %596 {offsets = [16, 40], sizes = [16, 8], strides = [1, 1]} : vector<32x64xf32> to vector<16x8xf32>
    %cst_263 = arith.constant dense<0.000000e+00> : vector<16x16xf32>
    %822 = tpu.matmul %819, %820, %cst_263 {dimension_numbers = #tpu.dot_dimension_numbers<[1], [1], [0], [0], [0, 0, 1, 0], [], []>} : vector<16x8xf32>, vector<16x8xf32>, vector<16x16xf32> -> vector<16x16xf32>
    %cst_264 = arith.constant 0.353553385 : f32
    %823 = vector.broadcast %cst_264 : f32 to vector<16x16xf32>
    %824 = arith.mulf %822, %823 : vector<16x16xf32>
    %cst_265 = arith.constant dense<0xFF800000> : vector<16xf32>
    %825 = vector.multi_reduction <maximumf>, %824, %cst_265 [1] : vector<16x16xf32> to vector<16xf32>
    %826 = vector.shape_cast %825 : vector<16xf32> to vector<16x1xf32>
    %827 = vector.broadcast %826 : vector<16x1xf32> to vector<16x16xf32>
    %828 = arith.subf %824, %827 : vector<16x16xf32>
    %829 = math.exp %828 : vector<16x16xf32>
    %cst_266 = arith.constant dense<0.000000e+00> : vector<16xf32>
    %830 = vector.multi_reduction <add>, %829, %cst_266 [1] : vector<16x16xf32> to vector<16xf32>
    %831 = vector.shape_cast %830 : vector<16xf32> to vector<16x1xf32>
    %832 = tpu.reciprocal %831 {approx = true} : vector<16x1xf32> -> vector<16x1xf32>
    %833 = vector.broadcast %832 : vector<16x1xf32> to vector<16x16xf32>
    %834 = arith.mulf %829, %833 : vector<16x16xf32>
    %cst_267 = arith.constant dense<0.000000e+00> : vector<16x8xf32>
    %835 = tpu.matmul %834, %821, %cst_267 {dimension_numbers = #tpu.dot_dimension_numbers<[1], [0], [0], [1], [0, 0, 1, 1], [], []>} : vector<16x16xf32>, vector<16x8xf32>, vector<16x8xf32> -> vector<16x8xf32>
    %836 = vector.extract_strided_slice %594 {offsets = [16, 48], sizes = [16, 8], strides = [1, 1]} : vector<32x64xf32> to vector<16x8xf32>
    %837 = vector.extract_strided_slice %595 {offsets = [16, 48], sizes = [16, 8], strides = [1, 1]} : vector<32x64xf32> to vector<16x8xf32>
    %838 = vector.extract_strided_slice %596 {offsets = [16, 48], sizes = [16, 8], strides = [1, 1]} : vector<32x64xf32> to vector<16x8xf32>
    %cst_268 = arith.constant dense<0.000000e+00> : vector<16x16xf32>
    %839 = tpu.matmul %836, %837, %cst_268 {dimension_numbers = #tpu.dot_dimension_numbers<[1], [1], [0], [0], [0, 0, 1, 0], [], []>} : vector<16x8xf32>, vector<16x8xf32>, vector<16x16xf32> -> vector<16x16xf32>
    %cst_269 = arith.constant 0.353553385 : f32
    %840 = vector.broadcast %cst_269 : f32 to vector<16x16xf32>
    %841 = arith.mulf %839, %840 : vector<16x16xf32>
    %cst_270 = arith.constant dense<0xFF800000> : vector<16xf32>
    %842 = vector.multi_reduction <maximumf>, %841, %cst_270 [1] : vector<16x16xf32> to vector<16xf32>
    %843 = vector.shape_cast %842 : vector<16xf32> to vector<16x1xf32>
    %844 = vector.broadcast %843 : vector<16x1xf32> to vector<16x16xf32>
    %845 = arith.subf %841, %844 : vector<16x16xf32>
    %846 = math.exp %845 : vector<16x16xf32>
    %cst_271 = arith.constant dense<0.000000e+00> : vector<16xf32>
    %847 = vector.multi_reduction <add>, %846, %cst_271 [1] : vector<16x16xf32> to vector<16xf32>
    %848 = vector.shape_cast %847 : vector<16xf32> to vector<16x1xf32>
    %849 = tpu.reciprocal %848 {approx = true} : vector<16x1xf32> -> vector<16x1xf32>
    %850 = vector.broadcast %849 : vector<16x1xf32> to vector<16x16xf32>
    %851 = arith.mulf %846, %850 : vector<16x16xf32>
    %cst_272 = arith.constant dense<0.000000e+00> : vector<16x8xf32>
    %852 = tpu.matmul %851, %838, %cst_272 {dimension_numbers = #tpu.dot_dimension_numbers<[1], [0], [0], [1], [0, 0, 1, 1], [], []>} : vector<16x16xf32>, vector<16x8xf32>, vector<16x8xf32> -> vector<16x8xf32>
    %853 = vector.extract_strided_slice %594 {offsets = [16, 56], sizes = [16, 8], strides = [1, 1]} : vector<32x64xf32> to vector<16x8xf32>
    %854 = vector.extract_strided_slice %595 {offsets = [16, 56], sizes = [16, 8], strides = [1, 1]} : vector<32x64xf32> to vector<16x8xf32>
    %855 = vector.extract_strided_slice %596 {offsets = [16, 56], sizes = [16, 8], strides = [1, 1]} : vector<32x64xf32> to vector<16x8xf32>
    %cst_273 = arith.constant dense<0.000000e+00> : vector<16x16xf32>
    %856 = tpu.matmul %853, %854, %cst_273 {dimension_numbers = #tpu.dot_dimension_numbers<[1], [1], [0], [0], [0, 0, 1, 0], [], []>} : vector<16x8xf32>, vector<16x8xf32>, vector<16x16xf32> -> vector<16x16xf32>
    %cst_274 = arith.constant 0.353553385 : f32
    %857 = vector.broadcast %cst_274 : f32 to vector<16x16xf32>
    %858 = arith.mulf %856, %857 : vector<16x16xf32>
    %cst_275 = arith.constant dense<0xFF800000> : vector<16xf32>
    %859 = vector.multi_reduction <maximumf>, %858, %cst_275 [1] : vector<16x16xf32> to vector<16xf32>
    %860 = vector.shape_cast %859 : vector<16xf32> to vector<16x1xf32>
    %861 = vector.broadcast %860 : vector<16x1xf32> to vector<16x16xf32>
    %862 = arith.subf %858, %861 : vector<16x16xf32>
    %863 = math.exp %862 : vector<16x16xf32>
    %cst_276 = arith.constant dense<0.000000e+00> : vector<16xf32>
    %864 = vector.multi_reduction <add>, %863, %cst_276 [1] : vector<16x16xf32> to vector<16xf32>
    %865 = vector.shape_cast %864 : vector<16xf32> to vector<16x1xf32>
    %866 = tpu.reciprocal %865 {approx = true} : vector<16x1xf32> -> vector<16x1xf32>
    %867 = vector.broadcast %866 : vector<16x1xf32> to vector<16x16xf32>
    %868 = arith.mulf %863, %867 : vector<16x16xf32>
    %cst_277 = arith.constant dense<0.000000e+00> : vector<16x8xf32>
    %869 = tpu.matmul %868, %855, %cst_277 {dimension_numbers = #tpu.dot_dimension_numbers<[1], [0], [0], [1], [0, 0, 1, 1], [], []>} : vector<16x16xf32>, vector<16x8xf32>, vector<16x8xf32> -> vector<16x8xf32>
    %870 = tpu.concatenate %750, %767, %784, %801, %818, %835, %852, %869 in 1 : vector<16x8xf32>, vector<16x8xf32>, vector<16x8xf32>, vector<16x8xf32>, vector<16x8xf32>, vector<16x8xf32>, vector<16x8xf32>, vector<16x8xf32> -> vector<16x64xf32>
    %871 = tpu.concatenate %733, %870 in 0 : vector<16x64xf32>, vector<16x64xf32> -> vector<32x64xf32>
    %c704 = arith.constant 704 : index
    %c0_278 = arith.constant 0 : index
    %872 = vector.load %arg1[%c704, %c0_278] : memref<1120x192xf32, #tpu.memory_space<vmem>>, vector<64x64xf32>
    %cst_279 = arith.constant dense<0.000000e+00> : vector<32x64xf32>
    %873 = tpu.matmul %871, %872, %cst_279 {dimension_numbers = #tpu.dot_dimension_numbers<[1], [0], [0], [1], [0, 0, 1, 1], [], []>} : vector<32x64xf32>, vector<64x64xf32>, vector<32x64xf32> -> vector<32x64xf32>
    %c24 = arith.constant 24 : index
    %c0_280 = arith.constant 0 : index
    %874 = vector.load %arg2[%c24, %c0_280] : memref<39x192xf32, #tpu.memory_space<vmem>>, vector<1x64xf32>
    %875 = vector.broadcast %874 : vector<1x64xf32> to vector<32x64xf32>
    %876 = arith.addf %873, %875 : vector<32x64xf32>
    %877 = arith.addf %566, %876 : vector<32x64xf32>
    %c21 = arith.constant 21 : index
    %c0_281 = arith.constant 0 : index
    %878 = vector.load %arg2[%c21, %c0_281] : memref<39x192xf32, #tpu.memory_space<vmem>>, vector<1x64xf32>
    %c22 = arith.constant 22 : index
    %c0_282 = arith.constant 0 : index
    %879 = vector.load %arg2[%c22, %c0_282] : memref<39x192xf32, #tpu.memory_space<vmem>>, vector<1x64xf32>
    %cst_283 = arith.constant dense<0.000000e+00> : vector<32xf32>
    %880 = vector.multi_reduction <add>, %877, %cst_283 [1] : vector<32x64xf32> to vector<32xf32>
    %881 = vector.shape_cast %880 : vector<32xf32> to vector<32x1xf32>
    %cst_284 = arith.constant 6.400000e+01 : f32
    %882 = vector.broadcast %cst_284 : f32 to vector<32x1xf32>
    %883 = arith.divf %881, %882 : vector<32x1xf32>
    %884 = vector.broadcast %883 : vector<32x1xf32> to vector<32x64xf32>
    %885 = arith.subf %877, %884 : vector<32x64xf32>
    %886 = arith.mulf %885, %885 : vector<32x64xf32>
    %cst_285 = arith.constant dense<0.000000e+00> : vector<32xf32>
    %887 = vector.multi_reduction <add>, %886, %cst_285 [1] : vector<32x64xf32> to vector<32xf32>
    %888 = vector.shape_cast %887 : vector<32xf32> to vector<32x1xf32>
    %cst_286 = arith.constant 6.400000e+01 : f32
    %889 = vector.broadcast %cst_286 : f32 to vector<32x1xf32>
    %890 = arith.divf %888, %889 : vector<32x1xf32>
    %cst_287 = arith.constant 9.99999974E-6 : f32
    %891 = vector.broadcast %cst_287 : f32 to vector<32x1xf32>
    %892 = arith.addf %890, %891 : vector<32x1xf32>
    %893 = math.rsqrt %892 : vector<32x1xf32>
    %894 = vector.broadcast %893 : vector<32x1xf32> to vector<32x64xf32>
    %895 = arith.mulf %885, %894 : vector<32x64xf32>
    %896 = vector.broadcast %878 : vector<1x64xf32> to vector<32x64xf32>
    %897 = arith.mulf %895, %896 : vector<32x64xf32>
    %898 = vector.broadcast %879 : vector<1x64xf32> to vector<32x64xf32>
    %899 = arith.addf %897, %898 : vector<32x64xf32>
    %c768 = arith.constant 768 : index
    %c0_288 = arith.constant 0 : index
    %900 = vector.load %arg1[%c768, %c0_288] : memref<1120x192xf32, #tpu.memory_space<vmem>>, vector<64x64xf32>
    %cst_289 = arith.constant dense<0.000000e+00> : vector<32x64xf32>
    %901 = tpu.matmul %899, %900, %cst_289 {dimension_numbers = #tpu.dot_dimension_numbers<[1], [0], [0], [1], [0, 0, 1, 1], [], []>} : vector<32x64xf32>, vector<64x64xf32>, vector<32x64xf32> -> vector<32x64xf32>
    %c25 = arith.constant 25 : index
    %c0_290 = arith.constant 0 : index
    %902 = vector.load %arg2[%c25, %c0_290] : memref<39x192xf32, #tpu.memory_space<vmem>>, vector<1x64xf32>
    %903 = vector.broadcast %902 : vector<1x64xf32> to vector<32x64xf32>
    %904 = arith.addf %901, %903 : vector<32x64xf32>
    %cst_291 = arith.constant 5.000000e-01 : f32
    %905 = vector.broadcast %cst_291 : f32 to vector<32x64xf32>
    %906 = arith.mulf %905, %904 : vector<32x64xf32>
    %cst_292 = arith.constant 0.707106769 : f32
    %907 = vector.broadcast %cst_292 : f32 to vector<32x64xf32>
    %908 = arith.mulf %904, %907 : vector<32x64xf32>
    %909 = math.absf %908 : vector<32x64xf32>
    %cst_293 = arith.constant 0.327591091 : f32
    %910 = vector.broadcast %cst_293 : f32 to vector<32x64xf32>
    %911 = arith.mulf %910, %909 : vector<32x64xf32>
    %cst_294 = arith.constant 1.000000e+00 : f32
    %912 = vector.broadcast %cst_294 : f32 to vector<32x64xf32>
    %913 = arith.addf %912, %911 : vector<32x64xf32>
    %cst_295 = arith.constant 1.000000e+00 : f32
    %914 = vector.broadcast %cst_295 : f32 to vector<32x64xf32>
    %915 = arith.divf %914, %913 : vector<32x64xf32>
    %cst_296 = arith.constant 1.06140542 : f32
    %916 = vector.broadcast %cst_296 : f32 to vector<32x64xf32>
    %917 = arith.mulf %916, %915 : vector<32x64xf32>
    %cst_297 = arith.constant 1.45315206 : f32
    %918 = vector.broadcast %cst_297 : f32 to vector<32x64xf32>
    %919 = arith.subf %917, %918 : vector<32x64xf32>
    %920 = arith.mulf %919, %915 : vector<32x64xf32>
    %cst_298 = arith.constant 1.42141378 : f32
    %921 = vector.broadcast %cst_298 : f32 to vector<32x64xf32>
    %922 = arith.addf %920, %921 : vector<32x64xf32>
    %923 = arith.mulf %922, %915 : vector<32x64xf32>
    %cst_299 = arith.constant 0.284496725 : f32
    %924 = vector.broadcast %cst_299 : f32 to vector<32x64xf32>
    %925 = arith.subf %923, %924 : vector<32x64xf32>
    %926 = arith.mulf %925, %915 : vector<32x64xf32>
    %cst_300 = arith.constant 0.254829586 : f32
    %927 = vector.broadcast %cst_300 : f32 to vector<32x64xf32>
    %928 = arith.addf %926, %927 : vector<32x64xf32>
    %929 = arith.mulf %928, %915 : vector<32x64xf32>
    %cst_301 = arith.constant 0.000000e+00 : f32
    %930 = vector.broadcast %cst_301 : f32 to vector<32x64xf32>
    %931 = arith.subf %930, %909 : vector<32x64xf32>
    %932 = arith.mulf %931, %909 : vector<32x64xf32>
    %933 = math.exp %932 : vector<32x64xf32>
    %934 = arith.mulf %929, %933 : vector<32x64xf32>
    %cst_302 = arith.constant 1.000000e+00 : f32
    %935 = vector.broadcast %cst_302 : f32 to vector<32x64xf32>
    %936 = arith.subf %935, %934 : vector<32x64xf32>
    %cst_303 = arith.constant 0.000000e+00 : f32
    %937 = vector.broadcast %cst_303 : f32 to vector<32x64xf32>
    %938 = arith.cmpf oge, %908, %937 : vector<32x64xf32>
    %cst_304 = arith.constant 0.000000e+00 : f32
    %939 = vector.broadcast %cst_304 : f32 to vector<32x64xf32>
    %940 = arith.subf %939, %936 : vector<32x64xf32>
    %941 = arith.select %938, %936, %940 : vector<32x64xi1>, vector<32x64xf32>
    %cst_305 = arith.constant 1.000000e+00 : f32
    %942 = vector.broadcast %cst_305 : f32 to vector<32x64xf32>
    %943 = arith.addf %942, %941 : vector<32x64xf32>
    %944 = arith.mulf %906, %943 : vector<32x64xf32>
    %c832 = arith.constant 832 : index
    %c0_306 = arith.constant 0 : index
    %945 = vector.load %arg1[%c832, %c0_306] : memref<1120x192xf32, #tpu.memory_space<vmem>>, vector<64x64xf32>
    %cst_307 = arith.constant dense<0.000000e+00> : vector<32x64xf32>
    %946 = tpu.matmul %944, %945, %cst_307 {dimension_numbers = #tpu.dot_dimension_numbers<[1], [0], [0], [1], [0, 0, 1, 1], [], []>} : vector<32x64xf32>, vector<64x64xf32>, vector<32x64xf32> -> vector<32x64xf32>
    %c26 = arith.constant 26 : index
    %c0_308 = arith.constant 0 : index
    %947 = vector.load %arg2[%c26, %c0_308] : memref<39x192xf32, #tpu.memory_space<vmem>>, vector<1x64xf32>
    %948 = vector.broadcast %947 : vector<1x64xf32> to vector<32x64xf32>
    %949 = arith.addf %946, %948 : vector<32x64xf32>
    %950 = arith.addf %877, %949 : vector<32x64xf32>
    %c27 = arith.constant 27 : index
    %c0_309 = arith.constant 0 : index
    %951 = vector.load %arg2[%c27, %c0_309] : memref<39x192xf32, #tpu.memory_space<vmem>>, vector<1x32xf32>
    %c28 = arith.constant 28 : index
    %c0_310 = arith.constant 0 : index
    %952 = vector.load %arg2[%c28, %c0_310] : memref<39x192xf32, #tpu.memory_space<vmem>>, vector<1x32xf32>
    %cst_311 = arith.constant dense<0.000000e+00> : vector<16xf32>
    %953 = vector.multi_reduction <add>, %9, %cst_311 [1] : vector<16x32xf32> to vector<16xf32>
    %954 = vector.shape_cast %953 : vector<16xf32> to vector<16x1xf32>
    %cst_312 = arith.constant 3.200000e+01 : f32
    %955 = vector.broadcast %cst_312 : f32 to vector<16x1xf32>
    %956 = arith.divf %954, %955 : vector<16x1xf32>
    %957 = vector.broadcast %956 : vector<16x1xf32> to vector<16x32xf32>
    %958 = arith.subf %9, %957 : vector<16x32xf32>
    %959 = arith.mulf %958, %958 : vector<16x32xf32>
    %cst_313 = arith.constant dense<0.000000e+00> : vector<16xf32>
    %960 = vector.multi_reduction <add>, %959, %cst_313 [1] : vector<16x32xf32> to vector<16xf32>
    %961 = vector.shape_cast %960 : vector<16xf32> to vector<16x1xf32>
    %cst_314 = arith.constant 3.200000e+01 : f32
    %962 = vector.broadcast %cst_314 : f32 to vector<16x1xf32>
    %963 = arith.divf %961, %962 : vector<16x1xf32>
    %cst_315 = arith.constant 9.99999974E-6 : f32
    %964 = vector.broadcast %cst_315 : f32 to vector<16x1xf32>
    %965 = arith.addf %963, %964 : vector<16x1xf32>
    %966 = math.rsqrt %965 : vector<16x1xf32>
    %967 = vector.broadcast %966 : vector<16x1xf32> to vector<16x32xf32>
    %968 = arith.mulf %958, %967 : vector<16x32xf32>
    %969 = vector.broadcast %951 : vector<1x32xf32> to vector<16x32xf32>
    %970 = arith.mulf %968, %969 : vector<16x32xf32>
    %971 = vector.broadcast %952 : vector<1x32xf32> to vector<16x32xf32>
    %972 = arith.addf %970, %971 : vector<16x32xf32>
    %c29 = arith.constant 29 : index
    %c0_316 = arith.constant 0 : index
    %973 = vector.load %arg2[%c29, %c0_316] : memref<39x192xf32, #tpu.memory_space<vmem>>, vector<1x64xf32>
    %c30 = arith.constant 30 : index
    %c0_317 = arith.constant 0 : index
    %974 = vector.load %arg2[%c30, %c0_317] : memref<39x192xf32, #tpu.memory_space<vmem>>, vector<1x64xf32>
    %cst_318 = arith.constant dense<0.000000e+00> : vector<32xf32>
    %975 = vector.multi_reduction <add>, %950, %cst_318 [1] : vector<32x64xf32> to vector<32xf32>
    %976 = vector.shape_cast %975 : vector<32xf32> to vector<32x1xf32>
    %cst_319 = arith.constant 6.400000e+01 : f32
    %977 = vector.broadcast %cst_319 : f32 to vector<32x1xf32>
    %978 = arith.divf %976, %977 : vector<32x1xf32>
    %979 = vector.broadcast %978 : vector<32x1xf32> to vector<32x64xf32>
    %980 = arith.subf %950, %979 : vector<32x64xf32>
    %981 = arith.mulf %980, %980 : vector<32x64xf32>
    %cst_320 = arith.constant dense<0.000000e+00> : vector<32xf32>
    %982 = vector.multi_reduction <add>, %981, %cst_320 [1] : vector<32x64xf32> to vector<32xf32>
    %983 = vector.shape_cast %982 : vector<32xf32> to vector<32x1xf32>
    %cst_321 = arith.constant 6.400000e+01 : f32
    %984 = vector.broadcast %cst_321 : f32 to vector<32x1xf32>
    %985 = arith.divf %983, %984 : vector<32x1xf32>
    %cst_322 = arith.constant 9.99999974E-6 : f32
    %986 = vector.broadcast %cst_322 : f32 to vector<32x1xf32>
    %987 = arith.addf %985, %986 : vector<32x1xf32>
    %988 = math.rsqrt %987 : vector<32x1xf32>
    %989 = vector.broadcast %988 : vector<32x1xf32> to vector<32x64xf32>
    %990 = arith.mulf %980, %989 : vector<32x64xf32>
    %991 = vector.broadcast %973 : vector<1x64xf32> to vector<32x64xf32>
    %992 = arith.mulf %990, %991 : vector<32x64xf32>
    %993 = vector.broadcast %974 : vector<1x64xf32> to vector<32x64xf32>
    %994 = arith.addf %992, %993 : vector<32x64xf32>
    %c896 = arith.constant 896 : index
    %c0_323 = arith.constant 0 : index
    %995 = vector.load %arg1[%c896, %c0_323] : memref<1120x192xf32, #tpu.memory_space<vmem>>, vector<32x32xf32>
    %cst_324 = arith.constant dense<0.000000e+00> : vector<16x32xf32>
    %996 = tpu.matmul %972, %995, %cst_324 {dimension_numbers = #tpu.dot_dimension_numbers<[1], [0], [0], [1], [0, 0, 1, 1], [], []>} : vector<16x32xf32>, vector<32x32xf32>, vector<16x32xf32> -> vector<16x32xf32>
    %c33 = arith.constant 33 : index
    %c0_325 = arith.constant 0 : index
    %997 = vector.load %arg2[%c33, %c0_325] : memref<39x192xf32, #tpu.memory_space<vmem>>, vector<1x32xf32>
    %998 = vector.broadcast %997 : vector<1x32xf32> to vector<16x32xf32>
    %999 = arith.addf %996, %998 : vector<16x32xf32>
    %c928 = arith.constant 928 : index
    %c0_326 = arith.constant 0 : index
    %1000 = vector.load %arg1[%c928, %c0_326] : memref<1120x192xf32, #tpu.memory_space<vmem>>, vector<64x64xf32>
    %cst_327 = arith.constant dense<0.000000e+00> : vector<32x64xf32>
    %1001 = tpu.matmul %994, %1000, %cst_327 {dimension_numbers = #tpu.dot_dimension_numbers<[1], [0], [0], [1], [0, 0, 1, 1], [], []>} : vector<32x64xf32>, vector<64x64xf32>, vector<32x64xf32> -> vector<32x64xf32>
    %c34 = arith.constant 34 : index
    %c0_328 = arith.constant 0 : index
    %1002 = vector.load %arg2[%c34, %c0_328] : memref<39x192xf32, #tpu.memory_space<vmem>>, vector<1x64xf32>
    %1003 = vector.broadcast %1002 : vector<1x64xf32> to vector<32x64xf32>
    %1004 = arith.addf %1001, %1003 : vector<32x64xf32>
    %1005 = vector.extract_strided_slice %1004 {offsets = [0, 0], sizes = [32, 32], strides = [1, 1]} : vector<32x64xf32> to vector<32x32xf32>
    %1006 = vector.extract_strided_slice %1004 {offsets = [0, 32], sizes = [32, 32], strides = [1, 1]} : vector<32x64xf32> to vector<32x32xf32>
    %1007 = vector.extract_strided_slice %999 {offsets = [0, 0], sizes = [8, 32], strides = [1, 1]} : vector<16x32xf32> to vector<8x32xf32>
    %1008 = vector.extract_strided_slice %1005 {offsets = [0, 0], sizes = [16, 32], strides = [1, 1]} : vector<32x32xf32> to vector<16x32xf32>
    %1009 = vector.extract_strided_slice %1006 {offsets = [0, 0], sizes = [16, 32], strides = [1, 1]} : vector<32x32xf32> to vector<16x32xf32>
    %cst_329 = arith.constant dense<0.000000e+00> : vector<8x16xf32>
    %1010 = tpu.matmul %1007, %1008, %cst_329 {dimension_numbers = #tpu.dot_dimension_numbers<[1], [1], [0], [0], [0, 0, 1, 0], [], []>} : vector<8x32xf32>, vector<16x32xf32>, vector<8x16xf32> -> vector<8x16xf32>
    %cst_330 = arith.constant 0.176776692 : f32
    %1011 = vector.broadcast %cst_330 : f32 to vector<8x16xf32>
    %1012 = arith.mulf %1010, %1011 : vector<8x16xf32>
    %cst_331 = arith.constant dense<0xFF800000> : vector<8xf32>
    %1013 = vector.multi_reduction <maximumf>, %1012, %cst_331 [1] : vector<8x16xf32> to vector<8xf32>
    %1014 = vector.shape_cast %1013 : vector<8xf32> to vector<8x1xf32>
    %1015 = vector.broadcast %1014 : vector<8x1xf32> to vector<8x16xf32>
    %1016 = arith.subf %1012, %1015 : vector<8x16xf32>
    %1017 = math.exp %1016 : vector<8x16xf32>
    %cst_332 = arith.constant dense<0.000000e+00> : vector<8xf32>
    %1018 = vector.multi_reduction <add>, %1017, %cst_332 [1] : vector<8x16xf32> to vector<8xf32>
    %1019 = vector.shape_cast %1018 : vector<8xf32> to vector<8x1xf32>
    %1020 = tpu.reciprocal %1019 {approx = true} : vector<8x1xf32> -> vector<8x1xf32>
    %1021 = vector.broadcast %1020 : vector<8x1xf32> to vector<8x16xf32>
    %1022 = arith.mulf %1017, %1021 : vector<8x16xf32>
    %cst_333 = arith.constant dense<0.000000e+00> : vector<8x32xf32>
    %1023 = tpu.matmul %1022, %1009, %cst_333 {dimension_numbers = #tpu.dot_dimension_numbers<[1], [0], [0], [1], [0, 0, 1, 1], [], []>} : vector<8x16xf32>, vector<16x32xf32>, vector<8x32xf32> -> vector<8x32xf32>
    %1024 = vector.extract_strided_slice %999 {offsets = [8, 0], sizes = [8, 32], strides = [1, 1]} : vector<16x32xf32> to vector<8x32xf32>
    %1025 = vector.extract_strided_slice %1005 {offsets = [16, 0], sizes = [16, 32], strides = [1, 1]} : vector<32x32xf32> to vector<16x32xf32>
    %1026 = vector.extract_strided_slice %1006 {offsets = [16, 0], sizes = [16, 32], strides = [1, 1]} : vector<32x32xf32> to vector<16x32xf32>
    %cst_334 = arith.constant dense<0.000000e+00> : vector<8x16xf32>
    %1027 = tpu.matmul %1024, %1025, %cst_334 {dimension_numbers = #tpu.dot_dimension_numbers<[1], [1], [0], [0], [0, 0, 1, 0], [], []>} : vector<8x32xf32>, vector<16x32xf32>, vector<8x16xf32> -> vector<8x16xf32>
    %cst_335 = arith.constant 0.176776692 : f32
    %1028 = vector.broadcast %cst_335 : f32 to vector<8x16xf32>
    %1029 = arith.mulf %1027, %1028 : vector<8x16xf32>
    %cst_336 = arith.constant dense<0xFF800000> : vector<8xf32>
    %1030 = vector.multi_reduction <maximumf>, %1029, %cst_336 [1] : vector<8x16xf32> to vector<8xf32>
    %1031 = vector.shape_cast %1030 : vector<8xf32> to vector<8x1xf32>
    %1032 = vector.broadcast %1031 : vector<8x1xf32> to vector<8x16xf32>
    %1033 = arith.subf %1029, %1032 : vector<8x16xf32>
    %1034 = math.exp %1033 : vector<8x16xf32>
    %cst_337 = arith.constant dense<0.000000e+00> : vector<8xf32>
    %1035 = vector.multi_reduction <add>, %1034, %cst_337 [1] : vector<8x16xf32> to vector<8xf32>
    %1036 = vector.shape_cast %1035 : vector<8xf32> to vector<8x1xf32>
    %1037 = tpu.reciprocal %1036 {approx = true} : vector<8x1xf32> -> vector<8x1xf32>
    %1038 = vector.broadcast %1037 : vector<8x1xf32> to vector<8x16xf32>
    %1039 = arith.mulf %1034, %1038 : vector<8x16xf32>
    %cst_338 = arith.constant dense<0.000000e+00> : vector<8x32xf32>
    %1040 = tpu.matmul %1039, %1026, %cst_338 {dimension_numbers = #tpu.dot_dimension_numbers<[1], [0], [0], [1], [0, 0, 1, 1], [], []>} : vector<8x16xf32>, vector<16x32xf32>, vector<8x32xf32> -> vector<8x32xf32>
    %1041 = tpu.concatenate %1023, %1040 in 0 : vector<8x32xf32>, vector<8x32xf32> -> vector<16x32xf32>
    %c992 = arith.constant 992 : index
    %c0_339 = arith.constant 0 : index
    %1042 = vector.load %arg1[%c992, %c0_339] : memref<1120x192xf32, #tpu.memory_space<vmem>>, vector<32x32xf32>
    %cst_340 = arith.constant dense<0.000000e+00> : vector<16x32xf32>
    %1043 = tpu.matmul %1041, %1042, %cst_340 {dimension_numbers = #tpu.dot_dimension_numbers<[1], [0], [0], [1], [0, 0, 1, 1], [], []>} : vector<16x32xf32>, vector<32x32xf32>, vector<16x32xf32> -> vector<16x32xf32>
    %c35 = arith.constant 35 : index
    %c0_341 = arith.constant 0 : index
    %1044 = vector.load %arg2[%c35, %c0_341] : memref<39x192xf32, #tpu.memory_space<vmem>>, vector<1x32xf32>
    %1045 = vector.broadcast %1044 : vector<1x32xf32> to vector<16x32xf32>
    %1046 = arith.addf %1043, %1045 : vector<16x32xf32>
    %c31 = arith.constant 31 : index
    %c0_342 = arith.constant 0 : index
    %1047 = vector.load %arg2[%c31, %c0_342] : memref<39x192xf32, #tpu.memory_space<vmem>>, vector<1x32xf32>
    %c32 = arith.constant 32 : index
    %c0_343 = arith.constant 0 : index
    %1048 = vector.load %arg2[%c32, %c0_343] : memref<39x192xf32, #tpu.memory_space<vmem>>, vector<1x32xf32>
    %cst_344 = arith.constant dense<0.000000e+00> : vector<16xf32>
    %1049 = vector.multi_reduction <add>, %1046, %cst_344 [1] : vector<16x32xf32> to vector<16xf32>
    %1050 = vector.shape_cast %1049 : vector<16xf32> to vector<16x1xf32>
    %cst_345 = arith.constant 3.200000e+01 : f32
    %1051 = vector.broadcast %cst_345 : f32 to vector<16x1xf32>
    %1052 = arith.divf %1050, %1051 : vector<16x1xf32>
    %1053 = vector.broadcast %1052 : vector<16x1xf32> to vector<16x32xf32>
    %1054 = arith.subf %1046, %1053 : vector<16x32xf32>
    %1055 = arith.mulf %1054, %1054 : vector<16x32xf32>
    %cst_346 = arith.constant dense<0.000000e+00> : vector<16xf32>
    %1056 = vector.multi_reduction <add>, %1055, %cst_346 [1] : vector<16x32xf32> to vector<16xf32>
    %1057 = vector.shape_cast %1056 : vector<16xf32> to vector<16x1xf32>
    %cst_347 = arith.constant 3.200000e+01 : f32
    %1058 = vector.broadcast %cst_347 : f32 to vector<16x1xf32>
    %1059 = arith.divf %1057, %1058 : vector<16x1xf32>
    %cst_348 = arith.constant 9.99999974E-6 : f32
    %1060 = vector.broadcast %cst_348 : f32 to vector<16x1xf32>
    %1061 = arith.addf %1059, %1060 : vector<16x1xf32>
    %1062 = math.rsqrt %1061 : vector<16x1xf32>
    %1063 = vector.broadcast %1062 : vector<16x1xf32> to vector<16x32xf32>
    %1064 = arith.mulf %1054, %1063 : vector<16x32xf32>
    %1065 = vector.broadcast %1047 : vector<1x32xf32> to vector<16x32xf32>
    %1066 = arith.mulf %1064, %1065 : vector<16x32xf32>
    %1067 = vector.broadcast %1048 : vector<1x32xf32> to vector<16x32xf32>
    %1068 = arith.addf %1066, %1067 : vector<16x32xf32>
    %c1024 = arith.constant 1024 : index
    %c0_349 = arith.constant 0 : index
    %1069 = vector.load %arg1[%c1024, %c0_349] : memref<1120x192xf32, #tpu.memory_space<vmem>>, vector<32x32xf32>
    %cst_350 = arith.constant dense<0.000000e+00> : vector<16x32xf32>
    %1070 = tpu.matmul %1068, %1069, %cst_350 {dimension_numbers = #tpu.dot_dimension_numbers<[1], [0], [0], [1], [0, 0, 1, 1], [], []>} : vector<16x32xf32>, vector<32x32xf32>, vector<16x32xf32> -> vector<16x32xf32>
    %c36 = arith.constant 36 : index
    %c0_351 = arith.constant 0 : index
    %1071 = vector.load %arg2[%c36, %c0_351] : memref<39x192xf32, #tpu.memory_space<vmem>>, vector<1x32xf32>
    %1072 = vector.broadcast %1071 : vector<1x32xf32> to vector<16x32xf32>
    %1073 = arith.addf %1070, %1072 : vector<16x32xf32>
    %cst_352 = arith.constant 5.000000e-01 : f32
    %1074 = vector.broadcast %cst_352 : f32 to vector<16x32xf32>
    %1075 = arith.mulf %1074, %1073 : vector<16x32xf32>
    %cst_353 = arith.constant 0.707106769 : f32
    %1076 = vector.broadcast %cst_353 : f32 to vector<16x32xf32>
    %1077 = arith.mulf %1073, %1076 : vector<16x32xf32>
    %1078 = math.absf %1077 : vector<16x32xf32>
    %cst_354 = arith.constant 0.327591091 : f32
    %1079 = vector.broadcast %cst_354 : f32 to vector<16x32xf32>
    %1080 = arith.mulf %1079, %1078 : vector<16x32xf32>
    %cst_355 = arith.constant 1.000000e+00 : f32
    %1081 = vector.broadcast %cst_355 : f32 to vector<16x32xf32>
    %1082 = arith.addf %1081, %1080 : vector<16x32xf32>
    %cst_356 = arith.constant 1.000000e+00 : f32
    %1083 = vector.broadcast %cst_356 : f32 to vector<16x32xf32>
    %1084 = arith.divf %1083, %1082 : vector<16x32xf32>
    %cst_357 = arith.constant 1.06140542 : f32
    %1085 = vector.broadcast %cst_357 : f32 to vector<16x32xf32>
    %1086 = arith.mulf %1085, %1084 : vector<16x32xf32>
    %cst_358 = arith.constant 1.45315206 : f32
    %1087 = vector.broadcast %cst_358 : f32 to vector<16x32xf32>
    %1088 = arith.subf %1086, %1087 : vector<16x32xf32>
    %1089 = arith.mulf %1088, %1084 : vector<16x32xf32>
    %cst_359 = arith.constant 1.42141378 : f32
    %1090 = vector.broadcast %cst_359 : f32 to vector<16x32xf32>
    %1091 = arith.addf %1089, %1090 : vector<16x32xf32>
    %1092 = arith.mulf %1091, %1084 : vector<16x32xf32>
    %cst_360 = arith.constant 0.284496725 : f32
    %1093 = vector.broadcast %cst_360 : f32 to vector<16x32xf32>
    %1094 = arith.subf %1092, %1093 : vector<16x32xf32>
    %1095 = arith.mulf %1094, %1084 : vector<16x32xf32>
    %cst_361 = arith.constant 0.254829586 : f32
    %1096 = vector.broadcast %cst_361 : f32 to vector<16x32xf32>
    %1097 = arith.addf %1095, %1096 : vector<16x32xf32>
    %1098 = arith.mulf %1097, %1084 : vector<16x32xf32>
    %cst_362 = arith.constant 0.000000e+00 : f32
    %1099 = vector.broadcast %cst_362 : f32 to vector<16x32xf32>
    %1100 = arith.subf %1099, %1078 : vector<16x32xf32>
    %1101 = arith.mulf %1100, %1078 : vector<16x32xf32>
    %1102 = math.exp %1101 : vector<16x32xf32>
    %1103 = arith.mulf %1098, %1102 : vector<16x32xf32>
    %cst_363 = arith.constant 1.000000e+00 : f32
    %1104 = vector.broadcast %cst_363 : f32 to vector<16x32xf32>
    %1105 = arith.subf %1104, %1103 : vector<16x32xf32>
    %cst_364 = arith.constant 0.000000e+00 : f32
    %1106 = vector.broadcast %cst_364 : f32 to vector<16x32xf32>
    %1107 = arith.cmpf oge, %1077, %1106 : vector<16x32xf32>
    %cst_365 = arith.constant 0.000000e+00 : f32
    %1108 = vector.broadcast %cst_365 : f32 to vector<16x32xf32>
    %1109 = arith.subf %1108, %1105 : vector<16x32xf32>
    %1110 = arith.select %1107, %1105, %1109 : vector<16x32xi1>, vector<16x32xf32>
    %cst_366 = arith.constant 1.000000e+00 : f32
    %1111 = vector.broadcast %cst_366 : f32 to vector<16x32xf32>
    %1112 = arith.addf %1111, %1110 : vector<16x32xf32>
    %1113 = arith.mulf %1075, %1112 : vector<16x32xf32>
    %c1056 = arith.constant 1056 : index
    %c0_367 = arith.constant 0 : index
    %1114 = vector.load %arg1[%c1056, %c0_367] : memref<1120x192xf32, #tpu.memory_space<vmem>>, vector<32x32xf32>
    %cst_368 = arith.constant dense<0.000000e+00> : vector<16x32xf32>
    %1115 = tpu.matmul %1113, %1114, %cst_368 {dimension_numbers = #tpu.dot_dimension_numbers<[1], [0], [0], [1], [0, 0, 1, 1], [], []>} : vector<16x32xf32>, vector<32x32xf32>, vector<16x32xf32> -> vector<16x32xf32>
    %c37 = arith.constant 37 : index
    %c0_369 = arith.constant 0 : index
    %1116 = vector.load %arg2[%c37, %c0_369] : memref<39x192xf32, #tpu.memory_space<vmem>>, vector<1x32xf32>
    %1117 = vector.broadcast %1116 : vector<1x32xf32> to vector<16x32xf32>
    %1118 = arith.addf %1115, %1117 : vector<16x32xf32>
    %1119 = arith.addf %1046, %1118 : vector<16x32xf32>
    %c1088 = arith.constant 1088 : index
    %c0_370 = arith.constant 0 : index
    %1120 = vector.load %arg1[%c1088, %c0_370] : memref<1120x192xf32, #tpu.memory_space<vmem>>, vector<32x64xf32>
    %cst_371 = arith.constant dense<0.000000e+00> : vector<16x64xf32>
    %1121 = tpu.matmul %1119, %1120, %cst_371 {dimension_numbers = #tpu.dot_dimension_numbers<[1], [0], [0], [1], [0, 0, 1, 1], [], []>} : vector<16x32xf32>, vector<32x64xf32>, vector<16x64xf32> -> vector<16x64xf32>
    %c38 = arith.constant 38 : index
    %c0_372 = arith.constant 0 : index
    %1122 = vector.load %arg2[%c38, %c0_372] : memref<39x192xf32, #tpu.memory_space<vmem>>, vector<1x64xf32>
    %1123 = vector.broadcast %1122 : vector<1x64xf32> to vector<16x64xf32>
    %1124 = arith.addf %1121, %1123 : vector<16x64xf32>
    %c0_373 = arith.constant 0 : index
    %c0_374 = arith.constant 0 : index
    %1125 = vector.load %arg3[%c0_373, %c0_374] : memref<16x64xf32, #tpu.memory_space<vmem>>, vector<16x64xf32>
    tpu.vector_store %arg3[%c0_373, %c0_374], %1124 {strides = array<i32>} : memref<16x64xf32, #tpu.memory_space<vmem>>, vector<16x64xf32>,
    return
  }
}

</mosaic_0001>

<bundles_post_ra>
// kernel: perceiver_lm_forward.1
= control target key start
LH: loop header
LB: loop body
LE: loop exit
PB: predicated region body
PF: predicated region fallthrough
CT: control target
= control target key end

     0   :  { %8 = vsyncpa [#allocation3], 0  ;;  %s9469_s0 = inlined_call_operand.vmem [shape: s32[16,1], index: 0, kind: input, shape index: {}]   ;;  %s9470_s1 = inlined_call_operand.hbm [shape: f32[1120,192], index: 1, kind: input, shape index: {}]   ;;  %s9471_s2 = inlined_call_operand.vmem [shape: f32[39,192], index: 2, kind: input, shape index: {}]   ;;  %s9472_s3 = inlined_call_operand.hbm [shape: f32[16,64], index: 3, kind: output, shape index: {}]  }
   0x1   :  { %9 = vsyncpa [#allocation4], 0  ;;  %s16_s14 = sshll.u32 %s9470_s1, 4  ;;  %s7073_s15 = smov [#allocation2]   ;;  %s17_s14 = int_to_ptr.hbm [resolvable:$true] %s16_s14 }
   0x2   :  { %s18_s16 = sshll.u32 %s7073_s15, 4  ;;  %s7074_s17 = smov 256   ;;  %s19_s16 = int_to_ptr.vmem [resolvable:$true] %s18_s16 }
   0x3   :  { %s7075_s18 = smov 16  }
   0x4   :  { %24 = dma.hbm_to_vmem [thread:$0]  %s17_s14, 35840, %s19_s16, [#allocation3], %s7074_s17, %s7074_s17, %s7075_s18  }
   0x5   :  { %7069 = dma.done.wait [#allocation3], 35840  }
   0x6   :  { %7070 = vsyncadd [#allocation3], 4294931456  ;;  %v7076_v0 = vmov 0   ;;  %v31_v1 = vld [vmem:[%s9469_s0] sm:$0xff]  ;;  %v54_v2 = vld [vmem:[#allocation2 + $0x70] sm:$0xff]  ;;  %v33_v11 = vlaneseq  ;;  %vm56_vm0 = vcmask 523264  }
   0x7   :  { %6466 = vset.pattern.permute.xlu0 %v7076_v0  ;;  %6467 = vset.pattern.permute.xlu1 %v7076_v0  ;;  %v53_v3 = vld [vmem:[#allocation2 + $0x60] sm:$0xff]  ;;  %v52_v4 = vld [vmem:[#allocation2 + $0x50] sm:$0xff]  ;;  %v32_v10 = vld [vmem:[%s9469_s0 + $0x8] sm:$0xff]  ;;  %v7077_v14 = vmov 0.0   ;;  %vm147_vm3 = vcmask 261120   ;;  %v7078_v26 = vmov 32.0  }
   0x8   :  { %36 = vperm.xlu0 %6466, %v31_v1   ;;  %71 = vmatpush.msra.mxu0 %v54_v2  ;;  %v51_v5 = vld [vmem:[#allocation2 + $0x40] sm:$0xff]  ;;  %v50_v6 = vld [vmem:[#allocation2 + $0x30] sm:$0xff]  ;;  %v34_v12 = vand.u32 127, %v33_v11  ;;  %6618 = vrcp.f32 %v7078_v26  ;;  %v7079_v27 = vmov 64.0   ;;  %s7080_s6 = smov 64   ;;  %s7081_s22 = smov 56  }
   0x9   :  { %v49_v7 = vld [vmem:[#allocation2 + $0x20] sm:$0xff]  ;;  %v48_v8 = vld [vmem:[#allocation2 + $0x10] sm:$0xff]  ;;  %39 = vperm.xlu1 %6467, %v32_v10   ;;  %6620 = vrcp.f32 %v7079_v27  ;;  %s7082_s23 = smov 8   ;;  %s7083_s24 = smov 48  }
   0xa   :  { %72 = vmatpush.msra.mxu0 %v53_v3  ;;  %v47_v9 = vld [vmem:[#allocation2] sm:$0xff]  ;;  %v7129_v18 = vld [vmem:[#allocation2 + $0xb0] sm:$0xff]  ;;  %s7084_s25 = smov 80   ;;  %s7085_s26 = smov 24  }
   0xb   :  { %v7127_v16 = vld [vmem:[#allocation2 + $0xa0] sm:$0xff]  ;;  %v93_v20 = vsel %vm56_vm0, %v7129_v18, 0.0  ;;  %v210_v58 = vld [vmem:[#allocation2 + $0x130] sm:$0xff]  ;;  %s7086_s27 = smov 72   ;;  %s7087_s28 = smov 112  }
   0xc   :  { %73 = vmatpush.msra.mxu0 %v52_v4  ;;  %v90_v19 = vsel %vm56_vm0, %v7127_v16, 0.0  ;;  %94 = vadd.xlane.f32.xlu2 %v93_v20  ;;  %v55_v22 = vld [vmem:[#allocation2 + $0x80] sm:$0xff]  ;;  %v250_v59 = vld [vmem:[#allocation2 + $0x170] sm:$0xff]  ;;  %s7088_s29 = smov 40   ;;  %s7089_s30 = smov 120  }
   0xd   :  { %226 = vmatpush.msra.mxu1 %v210_v58  ;;  %270 = vmatpush.msra.mxu2 %v250_v59  ;;  %v209_v60 = vld [vmem:[#allocation2 + $0x120] sm:$0xff]  ;;  %v208_v62 = vld [vmem:[#allocation2 + $0x110] sm:$0xff]  ;;  %s7090_s4 = smov 88   ;;  %s7091_s5 = smov 32  }
   0xe   :  { %74 = vmatpush.msra.mxu0 %v51_v5  ;;  %v6619_v28 = vpop.eup %6618  ;;  %v249_v61 = vld [vmem:[#allocation2 + $0x160] sm:$0xff]  ;;  %v248_v63 = vld [vmem:[#allocation2 + $0x150] sm:$0xff]  ;;  %s7092_s7 = smov 104   ;;  %s7093_s8 = smov 96  }
   0xf   :  { %v6621_v29 = vpop.eup %6620  ;;  %v155_v30 = vmul.f32 32.0, %v6619_v28  ;;  %vm159_vm4 = vweird.f32 %v6619_v28  ;;  %227 = vmatpush.msra.mxu1 %v209_v60  ;;  %271 = vmatpush.msra.mxu2 %v249_v61  ;;  %v207_v0 = vld [vmem:[#allocation2 + $0x100] sm:$0xff]  ;;  %v206_v2 = vld [vmem:[#allocation2 + $0xf0] sm:$0xff] }
  0x10   :  { %75 = vmatpush.msra.mxu0 %v50_v6  ;;  %v97_v31 = vmul.f32 64.0, %v6621_v29  ;;  %vm101_vm5 = vweird.f32 %v6621_v29  ;;  %v247_v1 = vld [vmem:[#allocation2 + $0x140] sm:$0xff]  ;;  %v204_v6 = vld [vmem:[#allocation2 + $0xd0] sm:$0xff] }
  0x11   :  { %v156_v32 = vsub.f32 1.0, %v155_v30  ;;  %228 = vmatpush.msra.mxu1 %v208_v62  ;;  %272 = vmatpush.msra.mxu2 %v248_v63  ;;  %v205_v3 = vld [vmem:[#allocation2 + $0xe0] sm:$0xff] }
  0x12   :  { %76 = vmatpush.msra.mxu0 %v49_v7  ;;  %v98_v33 = vsub.f32 1.0, %v97_v31  ;;  %v7168_v26 = vld [vmem:[%s9471_s2 + $0x2] ss:$0 sm:$0xff]  ;;  %v7174_v31 = vld [vmem:[%s9471_s2 + $0x3] ss:$0 sm:$0xff] }
  0x13   :  { %v157_v34 = vmul.f32 %v6619_v28, %v156_v32  ;;  %229 = vmatpush.msra.mxu1 %v207_v0  ;;  %273 = vmatpush.msra.mxu2 %v247_v1  ;;  %v251_v63 = vld [vmem:[%s9471_s2 + $0x7] ss:$0 sm:$0xff]  ;;  %v211_v1 = vld [vmem:[%s9471_s2 + $0x6] ss:$0 sm:$0xff] }
  0x14   :  { %77 = vmatpush.msra.mxu0 %v48_v8  ;;  %v99_v35 = vmul.f32 %v6621_v29, %v98_v33  ;;  %v203_v8 = vld [vmem:[#allocation2 + $0xc0] sm:$0xff] }
  0x15   :  { %v158_v36 = vadd.f32 %v6619_v28, %v157_v34  ;;  %230 = vmatpush.msra.mxu1 %v206_v2 }
  0x16   :  { %78 = vmatpush.msra.mxu0 %v47_v9  ;;  %v100_v37 = vadd.f32 %v6621_v29, %v99_v35 }
  0x17   :  { %v7137_v38 = vsel %vm159_vm4, %v6619_v28, %v158_v36  ;;  %231 = vmatpush.msra.mxu1 %v205_v3  ;;  %vm315_vm4 = vcmask 64512  }
  0x18   :  { %v7139_v39 = vsel %vm101_vm5, %v6621_v29, %v100_v37 }
  0x19   :  { %232 = vmatpush.msra.mxu1 %v204_v6 }
  0x1b   :  { %233 = vmatpush.msra.mxu1 %v203_v8 }
  0x33   :  { %91 = vadd.xlane.f32.xlu1 %v90_v19 }
  0x7a   :  { %v37_v13 = vpop.permute.xlu0 %36 }
  0x7b   :  { %vm41_vm1 = vcmp.eq.s32.totalorder %v34_v12, %v37_v13  ;;  %v40_v17 = vpop.permute.xlu1 %39 }
  0x7c   :  { %v6119_v15 = vsel %vm41_vm1, 1.0, %v7077_v14  ;;  %vm42_vm2 = vcmp.eq.s32.totalorder %v34_v12, %v40_v17 }
  0x7d   :  { %6121 = vmatmul.msk.f32.vlgmr.msra.gmra.mxu0 %vm56_vm0, %v6119_v15  ;;  %v6120_v21 = vsel %vm42_vm2, 1.0, %v7077_v14 }
  0x7f   :  { %v95_v47 = vpop.xlane.xlu2 %94 }
  0x80   :  { %v104_v49 = vmul.f32 %v7139_v39, %v95_v47 }
  0x82   :  { %v7155_v51 = vsub.f32 %v7129_v18, %v104_v49 }
  0x84   :  { %v108_v53 = vmul.f32 %v7155_v51, %v7155_v51 }
  0x85   :  { %6122 = vmatmul.msk.f32.gmra.mxu0 %vm56_vm0, %v6120_v21 }
  0x86   :  { %v112_v54 = vsel %vm56_vm0, %v108_v53, 0.0 }
  0xa6   :  { %v92_v40 = vpop.xlane.xlu1 %91 }
  0xa7   :  { %v103_v43 = vmul.f32 %v7139_v39, %v92_v40 }
  0xa9   :  { %v7146_v45 = vsub.f32 %v7127_v16, %v103_v43 }
  0xab   :  { %v107_v50 = vmul.f32 %v7146_v45, %v7146_v45 }
  0xad   :  { %v109_v52 = vsel %vm56_vm0, %v107_v50, 0.0  ;;  %v89_v50 = vld [vmem:[%s9471_s2 + $0x1] ss:$0 sm:$0xff] }
  0xfa   :  { %v80_v23 = vpop.f32.mrf.mxu0 }
  0xfb   :  { %v81_v24 = vadd.f32 %v80_v23, %v55_v22 }
  0xfd   :  { %v148_v25 = vsel %vm147_vm3, %v81_v24, 0.0 }
  0xfe   :  { %149 = vadd.xlane.f32.xlu0 %v148_v25 }
 0x102   :  { %v83_v55 = vpop.f32.mrf.mxu0 }
 0x103   :  { %v84_v56 = vadd.f32 %v83_v55, %v55_v22 }
 0x105   :  { %v151_v57 = vsel %vm147_vm3, %v84_v56, 0.0 }
 0x171   :  { %v150_v41 = vpop.xlane.xlu0 %149 }
 0x172   :  { %v161_v42 = vmul.f32 %v7137_v38, %v150_v41 }
 0x174   :  { %v7143_v44 = vsub.f32 %v81_v24, %v161_v42 }
 0x176   :  { %v165_v46 = vmul.f32 %v7143_v44, %v7143_v44 }
 0x178   :  { %v167_v48 = vsel %vm147_vm3, %v165_v46, 0.0 }
 0x179   :  { %168 = vadd.xlane.f32.xlu2 %v167_v48 }
 0x181   :  { %110 = vadd.xlane.f32.xlu2 %v109_v52 }
 0x189   :  { %113 = vadd.xlane.f32.xlu2 %v112_v54 }
 0x191   :  { %152 = vadd.xlane.f32.xlu2 %v151_v57 }
 0x1ec   :  { %v169_v4 = vpop.xlane.xlu2 %168 }
 0x1ed   :  { %v173_v5 = vmul.f32 %v169_v4, %v7137_v38 }
 0x1ef   :  { %v175_v7 = vadd.f32 1e-05, %v173_v5 }
 0x1f1   :  { %6622 = vrsqrt.f32 %v175_v7  ;;  %vm183_vm7 = vweird.f32 %v175_v7 }
 0x1f4   :  { %v111_v9 = vpop.xlane.xlu2 %110 }
 0x1f5   :  { %v115_v10 = vmul.f32 %v111_v9, %v7139_v39 }
 0x1f7   :  { %v6623_v11 = vpop.eup %6622  ;;  %v117_v12 = vadd.f32 1e-05, %v115_v10 }
 0x1f8   :  { %v178_v13 = vmul.f32 %v6623_v11, %v175_v7  ;;  %vm184_vm6 = vweird.f32 %v6623_v11 }
 0x1f9   :  { %6624 = vrsqrt.f32 %v117_v12  ;;  %vm185_vm8 = vmor %vm183_vm7, %vm184_vm6  ;;  %vm125_vm10 = vweird.f32 %v117_v12 }
 0x1fa   :  { %v179_v14 = vmul.f32 %v6623_v11, %v178_v13 }
 0x1fc   :  { %v180_v15 = vmul.f32 0.5, %v179_v14  ;;  %v114_v17 = vpop.xlane.xlu2 %113 }
 0x1fd   :  { %v116_v19 = vmul.f32 %v114_v17, %v7139_v39 }
 0x1fe   :  { %v181_v20 = vsub.f32 1.5, %v180_v15 }
 0x1ff   :  { %v6625_v21 = vpop.eup %6624  ;;  %v118_v22 = vadd.f32 1e-05, %v116_v19 }
 0x200   :  { %v182_v23 = vmul.f32 %v6623_v11, %v181_v20  ;;  %v120_v24 = vmul.f32 %v6625_v21, %v117_v12  ;;  %vm126_vm9 = vweird.f32 %v6625_v21 }
 0x201   :  { %6626 = vrsqrt.f32 %v118_v22  ;;  %vm127_vm11 = vmor %vm125_vm10, %vm126_vm9  ;;  %vm135_vm13 = vweird.f32 %v118_v22 }
 0x202   :  { %v121_v25 = vmul.f32 %v6625_v21, %v120_v24  ;;  %v186_v27 = vsel %vm185_vm8, %v6623_v11, %v182_v23 }
 0x203   :  { %v197_v28 = vmul.f32 %v186_v27, %v7143_v44  ;;  %v88_v44 = vld [vmem:[%s9471_s2] ss:$0 sm:$0xff] }
 0x204   :  { %v122_v29 = vmul.f32 0.5, %v121_v25  ;;  %v153_v30 = vpop.xlane.xlu2 %152 }
 0x205   :  { %v162_v32 = vmul.f32 %v7137_v38, %v153_v30  ;;  %v199_v33 = vmul.f32 %v197_v28, %v7168_v26 }
 0x206   :  { %v123_v34 = vsub.f32 1.5, %v122_v29 }
 0x207   :  { %v6627_v35 = vpop.eup %6626  ;;  %v164_v36 = vsub.f32 %v84_v56, %v162_v32  ;;  %v201_v37 = vadd.f32 %v199_v33, %v7174_v31 }
 0x208   :  { %v124_v40 = vmul.f32 %v6625_v21, %v123_v34  ;;  %v130_v41 = vmul.f32 %v6627_v35, %v118_v22  ;;  %vm136_vm12 = vweird.f32 %v6627_v35 }
 0x209   :  { %6127 = vmatmul.msk.f32.vlgmr.msra.gmra.mxu2 %vm147_vm3, %v201_v37  ;;  %v166_v42 = vmul.f32 %v164_v36, %v164_v36  ;;  %vm137_vm14 = vmor %vm135_vm13, %vm136_vm12 }
 0x20a   :  { %v131_v43 = vmul.f32 %v6627_v35, %v130_v41  ;;  %v128_v46 = vsel %vm127_vm11, %v6625_v21, %v124_v40 }
 0x20b   :  { %v170_v47 = vsel %vm147_vm3, %v166_v42, 0.0  ;;  %v139_v48 = vmul.f32 %v128_v46, %v7146_v45 }
 0x20c   :  { %v132_v49 = vmul.f32 0.5, %v131_v43  ;;  %171 = vadd.xlane.f32.xlu2 %v170_v47 }
 0x20d   :  { %v141_v52 = vmul.f32 %v139_v48, %v88_v44 }
 0x20e   :  { %v133_v53 = vsub.f32 1.5, %v132_v49 }
 0x20f   :  { %v143_v54 = vadd.f32 %v141_v52, %v89_v50 }
 0x210   :  { %v134_v55 = vmul.f32 %v6627_v35, %v133_v53 }
 0x211   :  { %6123 = vmatmul.msk.f32.vlgmr.msra.gmra.mxu1 %vm56_vm0, %v143_v54 }
 0x212   :  { %v138_v56 = vsel %vm137_vm14, %v6627_v35, %v134_v55 }
 0x213   :  { %v140_v57 = vmul.f32 %v138_v56, %v7155_v51 }
 0x215   :  { %v142_v58 = vmul.f32 %v140_v57, %v88_v44 }
 0x217   :  { %v144_v45 = vadd.f32 %v142_v58, %v89_v50 }
 0x219   :  { %6124 = vmatmul.msk.f32.gmra.mxu1 %vm56_vm0, %v144_v45 }
 0x221   :  { %6125 = vmatmul.msk.f32.gmra.mxu1 %vm56_vm0, %v143_v54 }
 0x229   :  { %6126 = vmatmul.msk.f32.gmra.mxu1 %vm56_vm0, %v144_v45  ;;  %v465_v45 = vld [vmem:[#allocation2 + $0x1f0] sm:$0xff] }
 0x27f   :  { %v172_v59 = vpop.xlane.xlu2 %171 }
 0x280   :  { %v174_v60 = vmul.f32 %v172_v59, %v7137_v38  ;;  %v464_v59 = vld [vmem:[#allocation2 + $0x1e0] sm:$0xff] }
 0x282   :  { %v176_v61 = vadd.f32 1e-05, %v174_v60 }
 0x284   :  { %6628 = vrsqrt.f32 %v176_v61  ;;  %vm193_vm1 = vweird.f32 %v176_v61 }
 0x28a   :  { %v6629_v62 = vpop.eup %6628 }
 0x28b   :  { %v188_v0 = vmul.f32 %v6629_v62, %v176_v61  ;;  %vm194_vm15 = vweird.f32 %v6629_v62  ;;  %v463_v61 = vld [vmem:[#allocation2 + $0x1d0] sm:$0xff] }
 0x28c   :  { %v275_v51 = vpop.f32.mrf.mxu2  ;;  %vm195_vm2 = vmor %vm193_vm1, %vm194_vm15 }
 0x28d   :  { %v189_v2 = vmul.f32 %v6629_v62, %v188_v0  ;;  %v276_v3 = vadd.f32 %v275_v51, %v251_v63 }
 0x28e   :  { %v235_v4 = vpop.f32.mrf.mxu1 }
 0x28f   :  { %v190_v5 = vmul.f32 0.5, %v189_v2  ;;  %v236_v6 = vadd.f32 %v235_v4, %v211_v1  ;;  %6129 = vmatpush.xpose.msk.msra.mxu3 %vm56_vm0, %v276_v3  ;;  %v461_v2 = vld [vmem:[#allocation2 + $0x1b0] sm:$0xff] }
 0x290   :  { %v459_v4 = vld [vmem:[#allocation2 + $0x190] sm:$0xff] }
 0x291   :  { %v191_v7 = vsub.f32 1.5, %v190_v5 }
 0x292   :  { %6130 = vmatmul.msk.f32.vlgmr.msra.gmra.mxu3 %vm56_vm0, %v236_v6 }
 0x293   :  { %v192_v8 = vmul.f32 %v6629_v62, %v191_v7  ;;  %v458_v7 = vld [vmem:[#allocation2 + $0x180] sm:$0xff] }
 0x295   :  { %v196_v9 = vsel %vm195_vm2, %v6629_v62, %v192_v8 }
 0x296   :  { %v238_v10 = vpop.f32.mrf.mxu1  ;;  %v198_v11 = vmul.f32 %v196_v9, %v164_v36 }
 0x297   :  { %v239_v12 = vadd.f32 %v238_v10, %v211_v1 }
 0x298   :  { %v200_v13 = vmul.f32 %v198_v11, %v7168_v26 }
 0x29a   :  { %6131 = vmatmul.msk.f32.gmra.mxu3 %vm56_vm0, %v239_v12  ;;  %v202_v14 = vadd.f32 %v200_v13, %v7174_v31 }
 0x29c   :  { %6128 = vmatmul.msk.f32.gmra.mxu2 %vm147_vm3, %v202_v14 }
 0x29e   :  { %v241_v21 = vpop.f32.mrf.mxu1 }
 0x29f   :  { %v242_v26 = vadd.f32 %v241_v21, %v211_v1 }
 0x2a6   :  { %v244_v27 = vpop.f32.mrf.mxu1 }
 0x2a7   :  { %v245_v28 = vadd.f32 %v244_v27, %v211_v1 }
 0x315   :  { %v307_v15 = vpop.f32.mrf.mxu3 }
 0x316   :  { %v313_v17 = vmul.f32 0.125, %v307_v15 }
 0x318   :  { %v316_v19 = vsel %vm315_vm4, %v313_v17, -inf }
 0x319   :  { %317 = vmax.xlane.f32.xlu2 %v316_v19  ;;  %v466_v19 = vld [vmem:[%s9471_s2 + $0x10] ss:$0 sm:$0xff] }
 0x31d   :  { %v310_v20 = vpop.f32.mrf.mxu3 }
 0x31e   :  { %v314_v22 = vmul.f32 0.125, %v310_v20 }
 0x31f   :  { %v278_v23 = vpop.f32.mrf.mxu2 }
 0x320   :  { %v7207_v24 = vadd.f32 %v278_v23, %v251_v63  ;;  %v319_v25 = vsel %vm315_vm4, %v314_v22, -inf  ;;  %v462_v63 = vld [vmem:[#allocation2 + $0x1c0] sm:$0xff] }
 0x321   :  { %320 = vmax.xlane.f32.xlu0 %v319_v25 }
 0x322   :  { %6134 = vmatpush.xpose.msk.msrb.mxu2 %vm56_vm0, %v7207_v24 }
 0x325   :  { %6135 = vmatmul.msk.f32.vlgmr.msrb.gmra.mxu2 %vm56_vm0, %v242_v26 }
 0x32d   :  { %6136 = vmatmul.msk.f32.gmra.mxu2 %vm56_vm0, %v245_v28 }
 0x335   :  { %338 = vrot.lane.b32.xlu0 %v276_v3, %s7080_s6  ;;  %v460_v3 = vld [vmem:[#allocation2 + $0x1a0] sm:$0xff] }
 0x38c   :  { %v318_v29 = vpop.xlane.xlu2 %317 }
 0x38d   :  { %v322_v30 = vsub.f32 %v313_v17, %v318_v29 }
 0x38f   :  { %v324_v31 = vmul.f32 1.442695, %v322_v30 }
 0x391   :  { %6630 = vpow2.f32 %v324_v31 }
 0x394   :  { %v321_v32 = vpop.xlane.xlu0 %320 }
 0x395   :  { %v323_v33 = vsub.f32 %v314_v22, %v321_v32 }
 0x397   :  { %v6631_v34 = vpop.eup %6630  ;;  %v326_v35 = vmul.f32 1.442695, %v323_v33 }
 0x398   :  { %v328_v36 = vsel %vm315_vm4, %v6631_v34, 0.0 }
 0x399   :  { %6632 = vpow2.f32 %v326_v35  ;;  %329 = vadd.xlane.f32.xlu1 %v328_v36 }
 0x39f   :  { %v6633_v37 = vpop.eup %6632 }
 0x3a0   :  { %v331_v40 = vsel %vm315_vm4, %v6633_v37, 0.0 }
 0x3a1   :  { %332 = vadd.xlane.f32.xlu2 %v331_v40 }
 0x3a7   :  { %v339_v41 = vpop.permute.xlu0 %338 }
 0x3a8   :  { %362 = vmatpush.msrb.mxu3 %v339_v41  ;;  %v396_v42 = vpop.f32.mrf.mxu2 }
 0x3a9   :  { %v402_v43 = vmul.f32 0.125, %v396_v42 }
 0x3aa   :  { %487 = vmatpush.msra.mxu3 %v465_v45 }
 0x3ab   :  { %v404_v44 = vsel %vm315_vm4, %v402_v43, -inf }
 0x3ac   :  { %405 = vmax.xlane.f32.xlu1 %v404_v44  ;;  %488 = vmatpush.msra.mxu3 %v464_v59 }
 0x3ae   :  { %489 = vmatpush.msra.mxu3 %v463_v61 }
 0x3b0   :  { %v399_v46 = vpop.f32.mrf.mxu2  ;;  %490 = vmatpush.msra.mxu3 %v462_v63 }
 0x3b1   :  { %v403_v47 = vmul.f32 0.125, %v399_v46 }
 0x3b2   :  { %491 = vmatpush.msra.mxu3 %v461_v2 }
 0x3b3   :  { %v407_v48 = vsel %vm315_vm4, %v403_v47, -inf }
 0x3b4   :  { %408 = vmax.xlane.f32.xlu2 %v407_v48  ;;  %492 = vmatpush.msra.mxu3 %v460_v3 }
 0x3b6   :  { %493 = vmatpush.msra.mxu3 %v459_v4 }
 0x3b8   :  { %494 = vmatpush.msra.mxu3 %v458_v7 }
 0x40c   :  { %v330_v49 = vpop.xlane.xlu1 %329 }
 0x40d   :  { %6634 = vrcp.f32 %v330_v49 }
 0x413   :  { %v6635_v50 = vpop.eup %6634 }
 0x414   :  { %v333_v52 = vpop.xlane.xlu2 %332  ;;  %v336_v53 = vmul.f32 %v6635_v50, %v6631_v34 }
 0x415   :  { %6636 = vrcp.f32 %v333_v52  ;;  %v617_v52 = vld [vmem:[#allocation2 + $0x270] sm:$0xff] }
 0x416   :  { %6132 = vmatmul.msk.f32.vlgmr.msrb.gmra.mxu3 %vm315_vm4, %v336_v53  ;;  %639 = vmatpush.msra.mxu2 %v617_v52  ;;  %v616_v53 = vld [vmem:[#allocation2 + $0x260] sm:$0xff] }
 0x418   :  { %640 = vmatpush.msra.mxu2 %v616_v53 }
 0x41b   :  { %v6637_v54 = vpop.eup %6636 }
 0x41c   :  { %v337_v55 = vmul.f32 %v6637_v54, %v6633_v37  ;;  %v615_v54 = vld [vmem:[#allocation2 + $0x250] sm:$0xff] }
 0x41d   :  { %641 = vmatpush.msra.mxu2 %v615_v54 }
 0x41e   :  { %6133 = vmatmul.msk.f32.gmra.mxu3 %vm315_vm4, %v337_v55  ;;  %v613_v55 = vld [vmem:[#allocation2 + $0x230] sm:$0xff] }
 0x41f   :  { %v406_v56 = vpop.xlane.xlu1 %405 }
 0x420   :  { %v410_v57 = vsub.f32 %v402_v43, %v406_v56  ;;  %v612_v56 = vld [vmem:[#allocation2 + $0x220] sm:$0xff] }
 0x422   :  { %v412_v58 = vmul.f32 1.442695, %v410_v57  ;;  %v611_v57 = vld [vmem:[#allocation2 + $0x210] sm:$0xff] }
 0x424   :  { %6638 = vpow2.f32 %v412_v58 }
 0x427   :  { %v409_v60 = vpop.xlane.xlu2 %408 }
 0x428   :  { %v411_v62 = vsub.f32 %v403_v47, %v409_v60 }
 0x42a   :  { %v6639_v0 = vpop.eup %6638  ;;  %v414_v51 = vmul.f32 1.442695, %v411_v62 }
 0x42b   :  { %v416_v1 = vsel %vm315_vm4, %v6639_v0, 0.0 }
 0x42c   :  { %6640 = vpow2.f32 %v414_v51  ;;  %417 = vadd.xlane.f32.xlu1 %v416_v1 }
 0x432   :  { %v6641_v5 = vpop.eup %6640 }
 0x433   :  { %v419_v6 = vsel %vm315_vm4, %v6641_v5, 0.0 }
 0x434   :  { %420 = vadd.xlane.f32.xlu2 %v419_v6  ;;  %v7269_v6 = vld [vmem:[%s9471_s2 + $0x4] ss:$0 sm:$0xff] }
 0x445   :  { %426 = vrot.lane.b32.xlu1 %v7207_v24, %s7080_s6 }
 0x499   :  { %v364_v8 = vpop.f32.mrf.mxu3 }
 0x49a   :  { %6139 = vmatmul.msk.f32.vlgmr.msra.gmra.mxu3 %vm56_vm0, %v364_v8 }
 0x49f   :  { %v418_v10 = vpop.xlane.xlu1 %417 }
 0x4a0   :  { %6642 = vrcp.f32 %v418_v10 }
 0x4a1   :  { %v367_v9 = vpop.f32.mrf.mxu3 }
 0x4a2   :  { %6140 = vmatmul.msk.f32.gmra.mxu3 %vm56_vm0, %v367_v9 }
 0x4a6   :  { %v6643_v12 = vpop.eup %6642 }
 0x4a7   :  { %v421_v11 = vpop.xlane.xlu2 %420  ;;  %v424_v14 = vmul.f32 %v6643_v12, %v6639_v0 }
 0x4a8   :  { %6644 = vrcp.f32 %v421_v11  ;;  %v7274_v11 = vld [vmem:[%s9471_s2 + $0x5] ss:$0 sm:$0xff] }
 0x4ae   :  { %v6645_v15 = vpop.eup %6644 }
 0x4af   :  { %v425_v17 = vmul.f32 %v6645_v15, %v6641_v5 }
 0x4b7   :  { %v427_v13 = vpop.permute.xlu1 %426 }
 0x4b8   :  { %450 = vmatpush.msrb.mxu0 %v427_v13 }
 0x4b9   :  { %6137 = vmatmul.msk.f32.vlgmr.msrb.gmra.mxu0 %vm315_vm4, %v424_v14 }
 0x4c1   :  { %6138 = vmatmul.msk.f32.gmra.mxu0 %vm315_vm4, %v425_v17 }
 0x51d   :  { %v496_v20 = vpop.f32.mrf.mxu3 }
 0x51e   :  { %v497_v21 = vadd.f32 %v496_v20, %v466_v19 }
 0x520   :  { %v7233_v22 = vadd.f32 %v497_v21, %v7127_v16 }
 0x522   :  { %v514_v23 = vsel %vm56_vm0, %v7233_v22, 0.0 }
 0x523   :  { %515 = vadd.xlane.f32.xlu0 %v514_v23 }
 0x525   :  { %v499_v24 = vpop.f32.mrf.mxu3 }
 0x526   :  { %v500_v25 = vadd.f32 %v499_v24, %v466_v19 }
 0x528   :  { %v7238_v26 = vadd.f32 %v500_v25, %v7129_v18 }
 0x52a   :  { %v517_v27 = vsel %vm56_vm0, %v7238_v26, 0.0 }
 0x52b   :  { %518 = vadd.xlane.f32.xlu2 %v517_v27 }
 0x536   :  { %v452_v28 = vpop.f32.mrf.mxu0 }
 0x537   :  { %6141 = vmatmul.msk.f32.gmra.mxu3 %vm56_vm0, %v452_v28 }
 0x53e   :  { %v455_v29 = vpop.f32.mrf.mxu0 }
 0x53f   :  { %6142 = vmatmul.msk.f32.gmra.mxu3 %vm56_vm0, %v455_v29 }
 0x596   :  { %v516_v30 = vpop.xlane.xlu0 %515 }
 0x597   :  { %v526_v31 = vmul.f32 %v516_v30, %v7139_v39 }
 0x599   :  { %v530_v32 = vsub.f32 %v7233_v22, %v526_v31 }
 0x59b   :  { %v534_v33 = vmul.f32 %v530_v32, %v530_v32 }
 0x59d   :  { %v538_v34 = vsel %vm56_vm0, %v534_v33, 0.0 }
 0x59e   :  { %539 = vadd.xlane.f32.xlu2 %v538_v34  ;;  %v519_v35 = vpop.xlane.xlu2 %518 }
 0x59f   :  { %v527_v36 = vmul.f32 %v519_v35, %v7139_v39 }
 0x5a1   :  { %v7249_v37 = vsub.f32 %v7238_v26, %v527_v36  ;;  %v7297_v36 = vld [vmem:[%s9471_s2 + $0x11] ss:$0 sm:$0xff] }
 0x5a3   :  { %v535_v40 = vmul.f32 %v7249_v37, %v7249_v37 }
 0x5a5   :  { %v541_v41 = vsel %vm56_vm0, %v535_v40, 0.0 }
 0x5a6   :  { %542 = vadd.xlane.f32.xlu2 %v541_v41 }
 0x5ba   :  { %v502_v42 = vpop.f32.mrf.mxu3 }
 0x5bb   :  { %v503_v43 = vadd.f32 %v502_v42, %v466_v19 }
 0x5bd   :  { %v7255_v44 = vadd.f32 %v503_v43, %v7127_v16  ;;  %v614_v16 = vld [vmem:[#allocation2 + $0x240] sm:$0xff] }
 0x5be   :  { %642 = vmatpush.msra.mxu2 %v614_v16 }
 0x5bf   :  { %v520_v46 = vsel %vm56_vm0, %v7255_v44, 0.0 }
 0x5c0   :  { %521 = vadd.xlane.f32.xlu1 %v520_v46  ;;  %643 = vmatpush.msra.mxu2 %v613_v55 }
 0x5c2   :  { %v505_v47 = vpop.f32.mrf.mxu3  ;;  %644 = vmatpush.msra.mxu2 %v612_v56 }
 0x5c3   :  { %v506_v48 = vadd.f32 %v505_v47, %v466_v19 }
 0x5c4   :  { %645 = vmatpush.msra.mxu2 %v611_v57  ;;  %v827_v57 = vld [vmem:[#allocation2 + $0x2f0] sm:$0xff] }
 0x5c5   :  { %v7260_v49 = vadd.f32 %v506_v48, %v7129_v18  ;;  %v610_v18 = vld [vmem:[#allocation2 + $0x200] sm:$0xff]  ;;  %849 = vmatpush.msra.mxu0 %v827_v57 }
 0x5c6   :  { %646 = vmatpush.msra.mxu2 %v610_v18 }
 0x5c7   :  { %v523_v50 = vsel %vm56_vm0, %v7260_v49, 0.0 }
 0x5c8   :  { %524 = vadd.xlane.f32.xlu2 %v523_v50 }
 0x611   :  { %v540_v58 = vpop.xlane.xlu2 %539 }
 0x612   :  { %v550_v45 = vmul.f32 %v540_v58, %v7139_v39 }
 0x614   :  { %v554_v59 = vadd.f32 1e-05, %v550_v45  ;;  %v826_v45 = vld [vmem:[#allocation2 + $0x2e0] sm:$0xff] }
 0x615   :  { %850 = vmatpush.msra.mxu0 %v826_v45 }
 0x616   :  { %6646 = vrsqrt.f32 %v554_v59  ;;  %vm564_vm6 = vweird.f32 %v554_v59 }
 0x619   :  { %v543_v60 = vpop.xlane.xlu2 %542 }
 0x61a   :  { %v551_v61 = vmul.f32 %v543_v60, %v7139_v39 }
 0x61c   :  { %v6647_v62 = vpop.eup %6646  ;;  %v555_v63 = vadd.f32 1e-05, %v551_v61  ;;  %v825_v61 = vld [vmem:[#allocation2 + $0x2d0] sm:$0xff] }
 0x61d   :  { %v559_v0 = vmul.f32 %v6647_v62, %v554_v59  ;;  %vm565_vm5 = vweird.f32 %v6647_v62  ;;  %851 = vmatpush.msra.mxu0 %v825_v61 }
 0x61e   :  { %6648 = vrsqrt.f32 %v555_v63  ;;  %vm566_vm7 = vmor %vm564_vm6, %vm565_vm5  ;;  %vm574_vm9 = vweird.f32 %v555_v63 }
 0x61f   :  { %v560_v51 = vmul.f32 %v6647_v62, %v559_v0 }
 0x621   :  { %v561_v1 = vmul.f32 0.5, %v560_v51 }
 0x623   :  { %v562_v2 = vsub.f32 1.5, %v561_v1 }
 0x624   :  { %v6649_v3 = vpop.eup %6648 }
 0x625   :  { %v563_v4 = vmul.f32 %v6647_v62, %v562_v2  ;;  %v569_v5 = vmul.f32 %v6649_v3, %v555_v63  ;;  %vm575_vm8 = vweird.f32 %v6649_v3  ;;  %v824_v2 = vld [vmem:[#allocation2 + $0x2c0] sm:$0xff] }
 0x626   :  { %vm576_vm10 = vmor %vm574_vm9, %vm575_vm8  ;;  %852 = vmatpush.msra.mxu0 %v824_v2 }
 0x627   :  { %v567_v7 = vsel %vm566_vm7, %v6647_v62, %v563_v4  ;;  %v570_v8 = vmul.f32 %v6649_v3, %v569_v5 }
 0x628   :  { %v598_v9 = vmul.f32 %v567_v7, %v530_v32 }
 0x629   :  { %v571_v10 = vmul.f32 0.5, %v570_v8  ;;  %v823_v8 = vld [vmem:[#allocation2 + $0x2b0] sm:$0xff] }
 0x62a   :  { %v602_v12 = vmul.f32 %v598_v9, %v7269_v6  ;;  %853 = vmatpush.msra.mxu0 %v823_v8 }
 0x62b   :  { %v572_v13 = vsub.f32 1.5, %v571_v10 }
 0x62c   :  { %v606_v14 = vadd.f32 %v602_v12, %v7274_v11 }
 0x62d   :  { %v573_v15 = vmul.f32 %v6649_v3, %v572_v13 }
 0x62e   :  { %6143 = vmatmul.msk.f32.vlgmr.msra.gmra.mxu2 %vm56_vm0, %v606_v14  ;;  %v822_v14 = vld [vmem:[#allocation2 + $0x2a0] sm:$0xff] }
 0x62f   :  { %v577_v17 = vsel %vm576_vm10, %v6649_v3, %v573_v15  ;;  %854 = vmatpush.msra.mxu0 %v822_v14 }
 0x630   :  { %v599_v19 = vmul.f32 %v577_v17, %v7249_v37 }
 0x632   :  { %v603_v20 = vmul.f32 %v599_v19, %v7269_v6 }
 0x633   :  { %v522_v21 = vpop.xlane.xlu1 %521 }
 0x634   :  { %v528_v23 = vmul.f32 %v522_v21, %v7139_v39  ;;  %v607_v24 = vadd.f32 %v603_v20, %v7274_v11  ;;  %v821_v21 = vld [vmem:[#allocation2 + $0x290] sm:$0xff] }
 0x635   :  { %855 = vmatpush.msra.mxu0 %v821_v21 }
 0x636   :  { %v532_v25 = vsub.f32 %v7255_v44, %v528_v23  ;;  %6144 = vmatmul.msk.f32.gmra.mxu2 %vm56_vm0, %v607_v24  ;;  %v820_v23 = vld [vmem:[#allocation2 + $0x280] sm:$0xff] }
 0x637   :  { %856 = vmatpush.msra.mxu0 %v820_v23 }
 0x638   :  { %v536_v27 = vmul.f32 %v532_v25, %v532_v25 }
 0x63a   :  { %v544_v28 = vsel %vm56_vm0, %v536_v27, 0.0 }
 0x63b   :  { %545 = vadd.xlane.f32.xlu2 %v544_v28  ;;  %v525_v29 = vpop.xlane.xlu2 %524 }
 0x63c   :  { %v529_v30 = vmul.f32 %v525_v29, %v7139_v39 }
 0x63e   :  { %v7288_v31 = vsub.f32 %v7260_v49, %v529_v30 }
 0x640   :  { %v537_v32 = vmul.f32 %v7288_v31, %v7288_v31 }
 0x642   :  { %v547_v33 = vsel %vm56_vm0, %v537_v32, 0.0 }
 0x643   :  { %548 = vadd.xlane.f32.xlu0 %v547_v33 }
 0x6ae   :  { %v546_v34 = vpop.xlane.xlu2 %545 }
 0x6af   :  { %v552_v35 = vmul.f32 %v546_v34, %v7139_v39 }
 0x6b1   :  { %v556_v37 = vadd.f32 1e-05, %v552_v35  ;;  %v648_v40 = vpop.f32.mrf.mxu2 }
 0x6b2   :  { %v7300_v41 = vadd.f32 %v648_v40, %v7297_v36 }
 0x6b3   :  { %6650 = vrsqrt.f32 %v556_v37  ;;  %vm584_vm12 = vweird.f32 %v556_v37 }
 0x6b4   :  { %v7303_v42 = vmul.f32 0.70710677, %v7300_v41 }
 0x6b6   :  { %v7306_v43 = vand.u32 2147483647, %v7303_v42  ;;  %v549_v46 = vpop.xlane.xlu0 %548 }
 0x6b7   :  { %v553_v47 = vmul.f32 %v549_v46, %v7139_v39 }
 0x6b8   :  { %v672_v48 = vmul.f32 0.3275911, %v7306_v43  ;;  %v776_v33 = vsub.f32 0.0, %v7306_v43 }
 0x6b9   :  { %v6651_v50 = vpop.eup %6650  ;;  %v557_v52 = vadd.f32 1e-05, %v553_v47  ;;  %v651_v53 = vpop.f32.mrf.mxu2 }
 0x6ba   :  { %v579_v54 = vmul.f32 %v6651_v50, %v556_v37  ;;  %v676_v16 = vadd.f32 1.0, %v672_v48  ;;  %v7311_v55 = vadd.f32 %v651_v53, %v7297_v36  ;;  %vm585_vm11 = vweird.f32 %v6651_v50 }
 0x6bb   :  { %6652 = vrsqrt.f32 %v557_v52  ;;  %vm586_vm13 = vmor %vm584_vm12, %vm585_vm11  ;;  %vm594_vm5 = vweird.f32 %v557_v52  ;;  %vm800_vm12 = vcmp.ge.f32.partialorder %v7303_v42, 0.0 }
 0x6bc   :  { %v580_v56 = vmul.f32 %v6651_v50, %v579_v54  ;;  %6654 = vrcp.f32 %v676_v16  ;;  %v7314_v18 = vmul.f32 0.70710677, %v7311_v55  ;;  %v691_v10 = vand.u32 2147483648, %v676_v16 }
 0x6bd   :  { %v689_v17 = vand.u32 2147483647, %v676_v16  ;;  %vm685_vm1 = vweird.f32 %v676_v16 }
 0x6be   :  { %v581_v58 = vmul.f32 0.5, %v580_v56  ;;  %v7317_v59 = vand.u32 2147483647, %v7314_v18  ;;  %v692_v27 = vor.u32 1.1754944e-38, %v691_v10 }
 0x6bf   :  { %vm690_vm6 = vcmp.eq.f32.partialorder %v689_v17, 8.507059e+37 }
 0x6c0   :  { %v582_v60 = vsub.f32 1.5, %v581_v58  ;;  %v673_v63 = vmul.f32 0.3275911, %v7317_v59 }
 0x6c1   :  { %v6653_v62 = vpop.eup %6652 }
 0x6c2   :  { %v6655_v0 = vpop.eup %6654  ;;  %v583_v51 = vmul.f32 %v6651_v50, %v582_v60  ;;  %v589_v1 = vmul.f32 %v6653_v62, %v557_v52  ;;  %v677_v4 = vadd.f32 1.0, %v673_v63  ;;  %vm595_vm15 = vweird.f32 %v6653_v62 }
 0x6c3   :  { %v681_v3 = vmul.f32 %v6655_v0, %v676_v16  ;;  %vm686_vm14 = vweird.f32 %v6655_v0  ;;  %vm596_vm7 = vmor %vm594_vm5, %vm595_vm15  ;;  %v780_v52 = vmul.f32 %v776_v33, %v7306_v43 }
 0x6c4   :  { %v590_v5 = vmul.f32 %v6653_v62, %v589_v1  ;;  %v587_v7 = vsel %vm586_vm13, %v6651_v50, %v583_v51  ;;  %6656 = vrcp.f32 %v677_v4  ;;  %vm687_vm2 = vmor %vm685_vm1, %vm686_vm14  ;;  %v706_v48 = vand.u32 2147483648, %v677_v4 }
 0x6c5   :  { %v682_v9 = vsub.f32 1.0, %v681_v3  ;;  %v600_v13 = vmul.f32 %v587_v7, %v532_v25  ;;  %v704_v54 = vand.u32 2147483647, %v677_v4  ;;  %vm700_vm9 = vweird.f32 %v677_v4 }
 0x6c6   :  { %v591_v12 = vmul.f32 0.5, %v590_v5  ;;  %v707_v45 = vor.u32 1.1754944e-38, %v706_v48  ;;  %v784_v60 = vmul.f32 1.442695, %v780_v52  ;;  %vm801_vm13 = vcmp.ge.f32.partialorder %v7314_v18, 0.0 }
 0x6c7   :  { %v683_v15 = vmul.f32 %v6655_v0, %v682_v9  ;;  %v604_v20 = vmul.f32 %v600_v13, %v7269_v6  ;;  %vm705_vm11 = vcmp.eq.f32.partialorder %v704_v54, 8.507059e+37 }
 0x6c8   :  { %v592_v19 = vsub.f32 1.5, %v591_v12  ;;  %6658 = vpow2.f32 %v784_v60 }
 0x6c9   :  { %v684_v24 = vadd.f32 %v6655_v0, %v683_v15  ;;  %v608_v25 = vadd.f32 %v604_v20, %v7274_v11 }
 0x6ca   :  { %v593_v28 = vmul.f32 %v6653_v62, %v592_v19  ;;  %v6657_v29 = vpop.eup %6656  ;;  %v660_v19 = vmul.f32 0.5, %v7300_v41 }
 0x6cb   :  { %v688_v30 = vsel %vm687_vm2, %v6655_v0, %v684_v24  ;;  %v696_v34 = vmul.f32 %v6657_v29, %v677_v4  ;;  %6145 = vmatmul.msk.f32.gmra.mxu2 %vm56_vm0, %v608_v25  ;;  %vm701_vm8 = vweird.f32 %v6657_v29 }
 0x6cc   :  { %v693_v32 = vsel %vm690_vm6, %v692_v27, %v688_v30  ;;  %v597_v35 = vsel %vm596_vm7, %v6653_v62, %v593_v28  ;;  %vm702_vm10 = vmor %vm700_vm9, %vm701_vm8 }
 0x6cd   :  { %v740_v37 = vmul.f32 1.0614054, %v693_v32  ;;  %v601_v40 = vmul.f32 %v597_v35, %v7288_v31  ;;  %v697_v46 = vsub.f32 1.0, %v696_v34 }
 0x6ce   :  { %v6659_v7 = vpop.eup %6658 }
 0x6cf   :  { %v6147_v47 = vadd.f32 -1.4531521, %v740_v37  ;;  %v605_v50 = vmul.f32 %v601_v40, %v7269_v6  ;;  %v698_v53 = vmul.f32 %v6657_v29, %v697_v46  ;;  %v777_v6 = vsub.f32 0.0, %v7317_v59 }
 0x6d1   :  { %v748_v16 = vmul.f32 %v6147_v47, %v693_v32  ;;  %v609_v56 = vadd.f32 %v605_v50, %v7274_v11  ;;  %v699_v57 = vadd.f32 %v6657_v29, %v698_v53  ;;  %v781_v11 = vmul.f32 %v777_v6, %v7317_v59 }
 0x6d3   :  { %v752_v58 = vadd.f32 1.4214138, %v748_v16  ;;  %6146 = vmatmul.msk.f32.gmra.mxu2 %vm56_vm0, %v609_v56  ;;  %v703_v31 = vsel %vm702_vm10, %v6657_v29, %v699_v57  ;;  %v786_v5 = vmul.f32 1.442695, %v781_v11  ;;  %v661_v29 = vmul.f32 0.5, %v7311_v55 }
 0x6d4   :  { %v708_v43 = vsel %vm705_vm11, %v707_v45, %v703_v31  ;;  %v7355_v56 = vld [vmem:[%s9471_s2 + $0x12] ss:$0 sm:$0xff] }
 0x6d5   :  { %v756_v61 = vmul.f32 %v752_v58, %v693_v32  ;;  %v741_v62 = vmul.f32 1.0614054, %v708_v43  ;;  %6660 = vpow2.f32 %v786_v5 }
 0x6d7   :  { %v6151_v63 = vadd.f32 -0.28449672, %v756_v61  ;;  %v6148_v0 = vadd.f32 -1.4531521, %v741_v62 }
 0x6d9   :  { %v764_v51 = vmul.f32 %v6151_v63, %v693_v32  ;;  %v749_v1 = vmul.f32 %v6148_v0, %v708_v43 }
 0x6db   :  { %v768_v2 = vadd.f32 0.2548296, %v764_v51  ;;  %v753_v3 = vadd.f32 1.4214138, %v749_v1  ;;  %v6661_v21 = vpop.eup %6660 }
 0x6dd   :  { %v772_v4 = vmul.f32 %v768_v2, %v693_v32  ;;  %v757_v8 = vmul.f32 %v753_v3, %v708_v43 }
 0x6df   :  { %v792_v9 = vmul.f32 %v6659_v7, %v772_v4  ;;  %v6152_v10 = vadd.f32 -0.28449672, %v757_v8 }
 0x6e1   :  { %v796_v12 = vsub.f32 1.0, %v792_v9  ;;  %v765_v13 = vmul.f32 %v6152_v10, %v708_v43 }
 0x6e3   :  { %v804_v14 = vsub.f32 0.0, %v796_v12  ;;  %v769_v15 = vadd.f32 0.2548296, %v765_v13 }
 0x6e5   :  { %v808_v17 = vsel %vm800_vm12, %v796_v12, %v804_v14  ;;  %v773_v20 = vmul.f32 %v769_v15, %v708_v43 }
 0x6e6   :  { %v812_v59 = vadd.f32 1.0, %v808_v17 }
 0x6e7   :  { %v793_v24 = vmul.f32 %v6661_v21, %v773_v20 }
 0x6e8   :  { %v816_v23 = vmul.f32 %v812_v59, %v660_v19 }
 0x6e9   :  { %v797_v27 = vsub.f32 1.0, %v793_v24 }
 0x6ea   :  { %6155 = vmatmul.msk.f32.vlgmr.msra.gmra.mxu0 %vm56_vm0, %v816_v23 }
 0x6eb   :  { %v805_v28 = vsub.f32 0.0, %v797_v27 }
 0x6ed   :  { %v809_v25 = vsel %vm801_vm13, %v797_v27, %v805_v28 }
 0x6ee   :  { %v813_v30 = vadd.f32 1.0, %v809_v25 }
 0x6f0   :  { %v817_v42 = vmul.f32 %v813_v30, %v661_v29 }
 0x6f2   :  { %6156 = vmatmul.msk.f32.gmra.mxu0 %vm56_vm0, %v817_v42 }
 0x74e   :  { %v654_v32 = vpop.f32.mrf.mxu2 }
 0x74f   :  { %v7339_v41 = vadd.f32 %v654_v32, %v7297_v36 }
 0x751   :  { %v7342_v33 = vmul.f32 0.70710677, %v7339_v41 }
 0x753   :  { %v670_v34 = vand.u32 2147483647, %v7342_v33  ;;  %vm802_vm9 = vcmp.ge.f32.partialorder %v7342_v33, 0.0 }
 0x755   :  { %v674_v35 = vmul.f32 0.3275911, %v670_v34  ;;  %v778_v6 = vsub.f32 0.0, %v670_v34 }
 0x756   :  { %v657_v37 = vpop.f32.mrf.mxu2 }
 0x757   :  { %v678_v40 = vadd.f32 1.0, %v674_v35  ;;  %v7346_v18 = vadd.f32 %v657_v37, %v7297_v36  ;;  %v782_v3 = vmul.f32 %v778_v6, %v670_v34 }
 0x759   :  { %6662 = vrcp.f32 %v678_v40  ;;  %v7349_v55 = vmul.f32 0.70710677, %v7346_v18  ;;  %v721_v54 = vand.u32 2147483648, %v678_v40  ;;  %v719_v36 = vand.u32 2147483647, %v678_v40 }
 0x75a   :  { %vm715_vm15 = vweird.f32 %v678_v40  ;;  %v788_v13 = vmul.f32 1.442695, %v782_v3 }
 0x75b   :  { %v671_v46 = vand.u32 2147483647, %v7349_v55  ;;  %v722_v45 = vor.u32 1.1754944e-38, %v721_v54  ;;  %vm720_vm2 = vcmp.eq.f32.partialorder %v719_v36, 8.507059e+37  ;;  %vm803_vm10 = vcmp.ge.f32.partialorder %v7349_v55, 0.0 }
 0x75d   :  { %v675_v47 = vmul.f32 0.3275911, %v671_v46  ;;  %v779_v15 = vsub.f32 0.0, %v671_v46 }
 0x75f   :  { %v6663_v48 = vpop.eup %6662  ;;  %v679_v52 = vadd.f32 1.0, %v675_v47  ;;  %v783_v27 = vmul.f32 %v779_v15, %v671_v46  ;;  %v662_v46 = vmul.f32 0.5, %v7339_v41  ;;  %v978_v15 = vld [vmem:[#allocation2 + $0x330] sm:$0xff] }
 0x760   :  { %v711_v50 = vmul.f32 %v6663_v48, %v678_v40  ;;  %vm716_vm14 = vweird.f32 %v6663_v48 }
 0x761   :  { %6664 = vrcp.f32 %v679_v52  ;;  %vm717_vm1 = vmor %vm715_vm15, %vm716_vm14  ;;  %v736_v1 = vand.u32 2147483648, %v679_v52  ;;  %v734_v5 = vand.u32 2147483647, %v679_v52  ;;  %vm730_vm6 = vweird.f32 %v679_v52 }
 0x762   :  { %v712_v53 = vsub.f32 1.0, %v711_v50  ;;  %6666 = vpow2.f32 %v788_v13  ;;  %v790_v42 = vmul.f32 1.442695, %v783_v27  ;;  %v983_v13 = vld [vmem:[#allocation2 + $0x358] sm:$0xff]  ;;  %v973_v27 = vld [vmem:[#allocation2 + $0x308] sm:$0xff] }
 0x763   :  { %v737_v10 = vor.u32 1.1754944e-38, %v736_v1  ;;  %vm735_vm8 = vcmp.eq.f32.partialorder %v734_v5, 8.507059e+37 }
 0x764   :  { %v713_v16 = vmul.f32 %v6663_v48, %v712_v53  ;;  %6668 = vpow2.f32 %v790_v42 }
 0x766   :  { %v714_v58 = vadd.f32 %v6663_v48, %v713_v16 }
 0x767   :  { %v858_v57 = vpop.f32.mrf.mxu0  ;;  %v6665_v31 = vpop.eup %6664 }
 0x768   :  { %v859_v60 = vadd.f32 %v858_v57, %v7355_v56  ;;  %v718_v61 = vsel %vm717_vm1, %v6663_v48, %v714_v58  ;;  %v726_v43 = vmul.f32 %v6665_v31, %v679_v52  ;;  %vm731_vm5 = vweird.f32 %v6665_v31  ;;  %v6667_v34 = vpop.eup %6666 }
 0x769   :  { %v723_v63 = vsel %vm720_vm2, %v722_v45, %v718_v61  ;;  %vm732_vm7 = vmor %vm730_vm6, %vm731_vm5 }
 0x76a   :  { %v7359_v62 = vadd.f32 %v859_v60, %v7233_v22  ;;  %v742_v0 = vmul.f32 1.0614054, %v723_v63  ;;  %v727_v51 = vsub.f32 1.0, %v726_v43  ;;  %v6669_v16 = vpop.eup %6668 }
 0x76c   :  { %v876_v11 = vsel %vm56_vm0, %v7359_v62, 0.0  ;;  %v6149_v2 = vadd.f32 -1.4531521, %v742_v0  ;;  %v728_v4 = vmul.f32 %v6665_v31, %v727_v51 }
 0x76d   :  { %877 = vadd.xlane.f32.xlu2 %v876_v11 }
 0x76e   :  { %v750_v7 = vmul.f32 %v6149_v2, %v723_v63  ;;  %v729_v9 = vadd.f32 %v6665_v31, %v728_v4 }
 0x76f   :  { %v861_v8 = vpop.f32.mrf.mxu0 }
 0x770   :  { %v862_v22 = vadd.f32 %v861_v8, %v7355_v56  ;;  %v754_v12 = vadd.f32 1.4214138, %v750_v7  ;;  %v733_v14 = vsel %vm732_vm7, %v6665_v31, %v729_v9  ;;  %v663_v31 = vmul.f32 0.5, %v7346_v18  ;;  %v986_v8 = vld [vmem:[#allocation2 + $0x370] sm:$0xff]  ;;  %v987_v9 = vld [vmem:[#allocation2 + $0x378] sm:$0xff] }
 0x771   :  { %v738_v59 = vsel %vm735_vm8, %v737_v10, %v733_v14  ;;  %1015 = vmatpush.msrb.mxu1 %v986_v8  ;;  %1044 = vmatpush.msrb.mxu3 %v987_v9  ;;  %v984_v10 = vld [vmem:[#allocation2 + $0x360] sm:$0xff]  ;;  %v981_v14 = vld [vmem:[#allocation2 + $0x348] sm:$0xff] }
 0x772   :  { %v7365_v17 = vadd.f32 %v862_v22, %v7238_v26  ;;  %v758_v19 = vmul.f32 %v754_v12, %v723_v63  ;;  %v743_v20 = vmul.f32 1.0614054, %v738_v59  ;;  %v985_v22 = vld [vmem:[#allocation2 + $0x368] sm:$0xff]  ;;  %6435 = vmatpush.msrb.mxu2 %v986_v8  ;;  %v982_v12 = vld [vmem:[#allocation2 + $0x350] sm:$0xff] }
 0x773   :  { %1016 = vmatpush.msrb.mxu1 %v984_v10  ;;  %1045 = vmatpush.msrb.mxu3 %v985_v22 }
 0x774   :  { %v879_v21 = vsel %vm56_vm0, %v7365_v17, 0.0  ;;  %v6153_v23 = vadd.f32 -0.28449672, %v758_v19  ;;  %v6150_v24 = vadd.f32 -1.4531521, %v743_v20  ;;  %6436 = vmatpush.msrb.mxu2 %v984_v10  ;;  %v979_v19 = vld [vmem:[#allocation2 + $0x338] sm:$0xff] }
 0x775   :  { %880 = vadd.xlane.f32.xlu0 %v879_v21  ;;  %1017 = vmatpush.msrb.mxu1 %v982_v12  ;;  %v977_v20 = vld [vmem:[#allocation2 + $0x328] sm:$0xff]  ;;  %v974_v21 = vld [vmem:[#allocation2 + $0x310] sm:$0xff] }
 0x776   :  { %v766_v28 = vmul.f32 %v6153_v23, %v723_v63  ;;  %v751_v25 = vmul.f32 %v6150_v24, %v738_v59  ;;  %1046 = vmatpush.msrb.mxu3 %v983_v13  ;;  %6437 = vmatpush.msrb.mxu2 %v982_v12  ;;  %v975_v23 = vld [vmem:[#allocation2 + $0x318] sm:$0xff]  ;;  %v972_v24 = vld [vmem:[#allocation2 + $0x300] sm:$0xff] }
 0x778   :  { %v770_v29 = vadd.f32 0.2548296, %v766_v28  ;;  %v755_v30 = vadd.f32 1.4214138, %v751_v25  ;;  %1047 = vmatpush.msrb.mxu3 %v981_v14 }
 0x77a   :  { %v774_v32 = vmul.f32 %v770_v29, %v723_v63  ;;  %v759_v26 = vmul.f32 %v755_v30, %v738_v59  ;;  %1048 = vmatpush.msrb.mxu3 %v979_v19 }
 0x77c   :  { %v794_v35 = vmul.f32 %v6667_v34, %v774_v32  ;;  %v6154_v37 = vadd.f32 -0.28449672, %v759_v26  ;;  %1049 = vmatpush.msrb.mxu3 %v977_v20 }
 0x77e   :  { %v798_v40 = vsub.f32 1.0, %v794_v35  ;;  %v767_v47 = vmul.f32 %v6154_v37, %v738_v59  ;;  %1050 = vmatpush.msrb.mxu3 %v975_v23 }
 0x780   :  { %v806_v48 = vsub.f32 0.0, %v798_v40  ;;  %v771_v50 = vadd.f32 0.2548296, %v767_v47  ;;  %1051 = vmatpush.msrb.mxu3 %v973_v27 }
 0x782   :  { %v810_v52 = vsel %vm802_vm9, %v798_v40, %v806_v48  ;;  %v775_v54 = vmul.f32 %v771_v50, %v738_v59  ;;  %v976_v59 = vld [vmem:[#allocation2 + $0x320] sm:$0xff] }
 0x783   :  { %v814_v53 = vadd.f32 1.0, %v810_v52 }
 0x784   :  { %v795_v57 = vmul.f32 %v6669_v16, %v775_v54  ;;  %v7408_v16 = vld [vmem:[%s9471_s2 + $0x14] ss:$0 sm:$0xff] }
 0x785   :  { %v818_v36 = vmul.f32 %v814_v53, %v662_v46  ;;  %v7402_v46 = vld [vmem:[%s9471_s2 + $0x13] ss:$0 sm:$0xff] }
 0x786   :  { %v799_v58 = vsub.f32 1.0, %v795_v57 }
 0x787   :  { %6157 = vmatmul.msk.f32.gmra.mxu0 %vm56_vm0, %v818_v36 }
 0x788   :  { %v807_v45 = vsub.f32 0.0, %v799_v58 }
 0x78a   :  { %v811_v60 = vsel %vm803_vm10, %v799_v58, %v807_v45  ;;  %vm1104_vm10 = vcmask 130048  }
 0x78b   :  { %v815_v61 = vadd.f32 1.0, %v811_v60 }
 0x78d   :  { %v819_v33 = vmul.f32 %v815_v61, %v663_v31 }
 0x78f   :  { %6158 = vmatmul.msk.f32.gmra.mxu0 %vm56_vm0, %v819_v33 }
 0x7e0   :  { %v878_v6 = vpop.xlane.xlu2 %877 }
 0x7e1   :  { %v888_v41 = vmul.f32 %v878_v6, %v7139_v39 }
 0x7e3   :  { %v7377_v43 = vsub.f32 %v7359_v62, %v888_v41 }
 0x7e5   :  { %v896_v63 = vmul.f32 %v7377_v43, %v7377_v43 }
 0x7e7   :  { %v900_v0 = vsel %vm56_vm0, %v896_v63, 0.0 }
 0x7e8   :  { %901 = vadd.xlane.f32.xlu2 %v900_v0  ;;  %v881_v55 = vpop.xlane.xlu0 %880 }
 0x7e9   :  { %v889_v51 = vmul.f32 %v881_v55, %v7139_v39 }
 0x7eb   :  { %v7384_v18 = vsub.f32 %v7365_v17, %v889_v51 }
 0x7ed   :  { %v897_v11 = vmul.f32 %v7384_v18, %v7384_v18 }
 0x7ef   :  { %v903_v1 = vsel %vm56_vm0, %v897_v11, 0.0 }
 0x7f0   :  { %904 = vadd.xlane.f32.xlu0 %v903_v1  ;;  %v6159_v1 = vld [vmem:[%s9471_s2 + $0x17] ss:$8 sm:$0x3] }
 0x7f1   :  { %v7444_v8 = vperm.slane %v6159_v1, 1 }
 0x804   :  { %v7389_v2 = vpop.f32.mrf.mxu0 }
 0x805   :  { %v865_v55 = vadd.f32 %v7389_v2, %v7355_v56 }
 0x80c   :  { %v867_v3 = vpop.f32.mrf.mxu0 }
 0x80d   :  { %v868_v4 = vadd.f32 %v867_v3, %v7355_v56  ;;  %v7432_v3 = vperm.slane %v6159_v1, 0 }
 0x80f   :  { %v7393_v5 = vadd.f32 %v868_v4, %v7260_v49  ;;  %v980_v49 = vld [vmem:[#allocation2 + $0x340] sm:$0xff] }
 0x810   :  { %1018 = vmatpush.msrb.mxu1 %v980_v49  ;;  %6438 = vmatpush.msrb.mxu2 %v980_v49 }
 0x811   :  { %v885_v7 = vsel %vm56_vm0, %v7393_v5, 0.0 }
 0x812   :  { %886 = vadd.xlane.f32.xlu2 %v885_v7  ;;  %1019 = vmatpush.msrb.mxu1 %v978_v15 }
 0x813   :  { %6439 = vmatpush.msrb.mxu2 %v978_v15 }
 0x814   :  { %1020 = vmatpush.msrb.mxu1 %v976_v59 }
 0x815   :  { %6440 = vmatpush.msrb.mxu2 %v976_v59 }
 0x816   :  { %1021 = vmatpush.msrb.mxu1 %v974_v21 }
 0x817   :  { %6441 = vmatpush.msrb.mxu2 %v974_v21 }
 0x818   :  { %1022 = vmatpush.msrb.mxu1 %v972_v24 }
 0x819   :  { %6442 = vmatpush.msrb.mxu2 %v972_v24 }
 0x85b   :  { %v902_v28 = vpop.xlane.xlu2 %901 }
 0x85c   :  { %v912_v25 = vmul.f32 %v902_v28, %v7139_v39 }
 0x85e   :  { %v916_v29 = vadd.f32 1e-05, %v912_v25 }
 0x860   :  { %6670 = vrsqrt.f32 %v916_v29  ;;  %vm926_vm12 = vweird.f32 %v916_v29 }
 0x863   :  { %v905_v30 = vpop.xlane.xlu0 %904 }
 0x864   :  { %v913_v42 = vmul.f32 %v905_v30, %v7139_v39 }
 0x866   :  { %v6671_v32 = vpop.eup %6670  ;;  %v917_v26 = vadd.f32 1e-05, %v913_v42 }
 0x867   :  { %v921_v34 = vmul.f32 %v6671_v32, %v916_v29  ;;  %vm927_vm11 = vweird.f32 %v6671_v32 }
 0x868   :  { %6672 = vrsqrt.f32 %v917_v26  ;;  %vm928_vm13 = vmor %vm926_vm12, %vm927_vm11  ;;  %vm936_vm15 = vweird.f32 %v917_v26  ;;  %vm1904_vm11 = vcmask 195584   ;;  %vm1909_vm12 = vcmask 326656  }
 0x869   :  { %v922_v35 = vmul.f32 %v6671_v32, %v921_v34 }
 0x86b   :  { %v923_v37 = vmul.f32 0.5, %v922_v35 }
 0x86d   :  { %v924_v40 = vsub.f32 1.5, %v923_v37 }
 0x86e   :  { %v6673_v47 = vpop.eup %6672 }
 0x86f   :  { %v925_v48 = vmul.f32 %v6671_v32, %v924_v40  ;;  %v931_v50 = vmul.f32 %v6673_v47, %v917_v26  ;;  %vm937_vm14 = vweird.f32 %v6673_v47 }
 0x870   :  { %vm938_vm1 = vmor %vm936_vm15, %vm937_vm14  ;;  %vm1915_vm14 = vcmask 457728  }
 0x871   :  { %v929_v52 = vsel %vm928_vm13, %v6671_v32, %v925_v48  ;;  %v932_v54 = vmul.f32 %v6673_v47, %v931_v50  ;;  %vm1912_vm13 = vcmask 392192  }
 0x872   :  { %v960_v53 = vmul.f32 %v929_v52, %v7377_v43 }
 0x873   :  { %v933_v36 = vmul.f32 0.5, %v932_v54 }
 0x874   :  { %v964_v57 = vmul.f32 %v960_v53, %v7402_v46 }
 0x875   :  { %v934_v58 = vsub.f32 1.5, %v933_v36 }
 0x876   :  { %v968_v45 = vadd.f32 %v964_v57, %v7408_v16 }
 0x877   :  { %v935_v60 = vmul.f32 %v6673_v47, %v934_v58 }
 0x878   :  { %6160 = vmatmul.msk.f32.vlgmr.msrb.gmra.mxu1 %vm56_vm0, %v968_v45  ;;  %6164 = vmatmul.msk.f32.vlgmr.msrb.gmra.mxu3 %vm56_vm0, %v968_v45 }
 0x879   :  { %v939_v31 = vsel %vm938_vm1, %v6673_v47, %v935_v60 }
 0x87a   :  { %v961_v61 = vmul.f32 %v939_v31, %v7384_v18  ;;  %v7425_v18 = vadd.f32 %v865_v55, %v7255_v44 }
 0x87c   :  { %v965_v33 = vmul.f32 %v961_v61, %v7402_v46  ;;  %v882_v11 = vsel %vm56_vm0, %v7425_v18, 0.0 }
 0x87e   :  { %v969_v6 = vadd.f32 %v965_v33, %v7408_v16 }
 0x880   :  { %6161 = vmatmul.msk.f32.gmra.mxu1 %vm56_vm0, %v969_v6  ;;  %6165 = vmatmul.msk.f32.gmra.mxu3 %vm56_vm0, %v969_v6 }
 0x885   :  { %v887_v41 = vpop.xlane.xlu2 %886 }
 0x886   :  { %v891_v43 = vmul.f32 %v887_v41, %v7139_v39 }
 0x888   :  { %v895_v63 = vsub.f32 %v7393_v5, %v891_v43 }
 0x88a   :  { %v899_v0 = vmul.f32 %v895_v63, %v895_v63 }
 0x88c   :  { %v909_v51 = vsel %vm56_vm0, %v899_v0, 0.0 }
 0x88d   :  { %910 = vadd.xlane.f32.xlu1 %v909_v51 }
 0x895   :  { %883 = vadd.xlane.f32.xlu1 %v882_v11 }
 0x8f5   :  { %v1024_v4 = vpop.f32.mrf.mxu1 }
 0x8f6   :  { %v7435_v7 = vadd.f32 %v1024_v4, %v7432_v3 }
 0x8f8   :  { %1067 = vrot.lane.b32.xlu2 %v7435_v7, %s7080_s6 }
 0x8fb   :  { %v1053_v56 = vpop.f32.mrf.mxu3 }
 0x8fc   :  { %v1054_v12 = vadd.f32 %v1053_v56, %v7444_v8 }
 0x8fd   :  { %v1027_v44 = vpop.f32.mrf.mxu1 }
 0x8fe   :  { %v7440_v2 = vadd.f32 %v1027_v44, %v7432_v3 }
 0x900   :  { %1160 = vrot.lane.b32.xlu2 %v7435_v7, %s7081_s22  ;;  %1069 = vrot.lane.b32.xlu0 %v7440_v2, %s7080_s6  ;;  %v911_v9 = vpop.xlane.xlu1 %910 }
 0x901   :  { %v915_v10 = vmul.f32 %v911_v9, %v7139_v39 }
 0x903   :  { %v1056_v22 = vpop.f32.mrf.mxu3  ;;  %v919_v13 = vadd.f32 1e-05, %v915_v10 }
 0x904   :  { %v1057_v49 = vadd.f32 %v1056_v22, %v7444_v8 }
 0x905   :  { %6674 = vrsqrt.f32 %v919_v13  ;;  %vm956_vm5 = vweird.f32 %v919_v13 }
 0x906   :  { %1147 = vmatpush.msrb.mxu0 %v1057_v49  ;;  %v7451_v14 = vpack.i.bf16 %v1054_v12, %v1057_v49 }
 0x908   :  { %1750 = vrot.lane.b32.xlu2 %v7435_v7, %s7082_s23  ;;  %1148 = vmatpush.msrb.mxu0 %v1054_v12  ;;  %v884_v15 = vpop.xlane.xlu1 %883 }
 0x909   :  { %1260 = vrot.lane.b32.xlu0 %v7435_v7, %s7083_s24  ;;  %v890_v19 = vmul.f32 %v884_v15, %v7139_v39 }
 0x90b   :  { %v6675_v59 = vpop.eup %6674  ;;  %v7459_v20 = vsub.f32 %v7425_v18, %v890_v19 }
 0x90c   :  { %v951_v21 = vmul.f32 %v6675_v59, %v919_v13  ;;  %vm957_vm2 = vweird.f32 %v6675_v59 }
 0x90d   :  { %v898_v23 = vmul.f32 %v7459_v20, %v7459_v20  ;;  %vm958_vm6 = vmor %vm956_vm5, %vm957_vm2 }
 0x90e   :  { %v952_v24 = vmul.f32 %v6675_v59, %v951_v21 }
 0x90f   :  { %v906_v27 = vsel %vm56_vm0, %v898_v23, 0.0 }
 0x910   :  { %1648 = vrot.lane.b32.xlu2 %v7435_v7, %s7084_s25  ;;  %v953_v28 = vmul.f32 0.5, %v952_v24  ;;  %907 = vadd.xlane.f32.xlu1 %v906_v27 }
 0x911   :  { %1554 = vrot.lane.b32.xlu0 %v7435_v7, %s7085_s26 }
 0x912   :  { %v954_v25 = vsub.f32 1.5, %v953_v28 }
 0x914   :  { %v955_v29 = vmul.f32 %v6675_v59, %v954_v25 }
 0x916   :  { %v959_v30 = vsel %vm958_vm6, %v6675_v59, %v955_v29 }
 0x917   :  { %v963_v42 = vmul.f32 %v959_v30, %v895_v63 }
 0x918   :  { %1162 = vrot.lane.b32.xlu2 %v7440_v2, %s7081_s22 }
 0x919   :  { %1746 = vrot.lane.b32.xlu0 %v7435_v7, %s7086_s27  ;;  %v967_v32 = vmul.f32 %v963_v42, %v7402_v46 }
 0x91b   :  { %v7474_v34 = vadd.f32 %v967_v32, %v7408_v16 }
 0x91d   :  { %6163 = vmatmul.msk.f32.vlgmr.msrb.gmra.mxu2 %vm56_vm0, %v7474_v34 }
 0x920   :  { %1262 = vrot.lane.b32.xlu2 %v7440_v2, %s7083_s24 }
 0x921   :  { %1652 = vrot.lane.b32.xlu0 %v7435_v7, %s7075_s18 }
 0x928   :  { %1258 = vrot.lane.b32.xlu2 %v7440_v2, %s7087_s28 }
 0x929   :  { %1360 = vrot.lane.b32.xlu0 %v7440_v2, %s7088_s29  ;;  %1156 = vrot.lane.b32.xlu1 %v7435_v7, %s7089_s30 }
 0x930   :  { %1552 = vrot.lane.b32.xlu2 %v7440_v2, %s7090_s4 }
 0x931   :  { %1556 = vrot.lane.b32.xlu0 %v7440_v2, %s7085_s26  ;;  %1358 = vrot.lane.b32.xlu1 %v7435_v7, %s7088_s29 }
 0x938   :  { %1654 = vrot.lane.b32.xlu2 %v7440_v2, %s7075_s18 }
 0x939   :  { %1458 = vrot.lane.b32.xlu0 %v7440_v2, %s7091_s5  ;;  %1354 = vrot.lane.b32.xlu1 %v7435_v7, %s7092_s7 }
 0x941   :  { %1752 = vrot.lane.b32.xlu0 %v7440_v2, %s7082_s23  ;;  %1256 = vrot.lane.b32.xlu1 %v7435_v7, %s7087_s28 }
 0x949   :  { %1550 = vrot.lane.b32.xlu1 %v7435_v7, %s7090_s4 }
 0x951   :  { %1456 = vrot.lane.b32.xlu1 %v7435_v7, %s7091_s5 }
 0x952   :  { %v1068_v26 = vpop.permute.xlu2 %1067 }
 0x959   :  { %1452 = vrot.lane.b32.xlu1 %v7435_v7, %s7093_s8 }
 0x95a   :  { %v1161_v35 = vpop.permute.xlu2 %1160 }
 0x961   :  { %1158 = vrot.lane.b32.xlu1 %v7440_v2, %s7089_s30 }
 0x962   :  { %v1751_v37 = vpop.permute.xlu2 %1750 }
 0x969   :  { %1356 = vrot.lane.b32.xlu1 %v7440_v2, %s7092_s7 }
 0x96a   :  { %v7512_v40 = vpop.permute.xlu2 %1648 }
 0x971   :  { %1454 = vrot.lane.b32.xlu1 %v7440_v2, %s7093_s8 }
 0x972   :  { %v1163_v47 = vpop.permute.xlu2 %1162  ;;  %v1070_v48 = vpop.permute.xlu0 %1069 }
 0x973   :  { %6174 = vmatpush.xpose.msk.msra.mxu1 %vm315_vm4, %v1163_v47  ;;  %6168 = vmatpush.xpose.msk.msra.mxu2 %vm315_vm4, %v1070_v48 }
 0x977   :  { %6175 = vmatpush.xpose.msk.msra.mxu1 %vm315_vm4, %v1161_v35  ;;  %6169 = vmatpush.xpose.msk.msra.mxu2 %vm315_vm4, %v1068_v26 }
 0x979   :  { %1748 = vrot.lane.b32.xlu1 %v7440_v2, %s7086_s27 }
 0x97a   :  { %v1263_v50 = vpop.permute.xlu2 %1262  ;;  %6170 = vmatmul.msk.f32.vlgmr.msra.gmra.mxu2 %vm315_vm4, %v7435_v7 }
 0x97b   :  { %v1261_v52 = vpop.permute.xlu0 %1260  ;;  %6180 = vmatpush.xpose.msk.msra.mxu0 %vm315_vm4, %v1263_v50 }
 0x97f   :  { %6181 = vmatpush.xpose.msk.msra.mxu0 %vm315_vm4, %v1261_v52 }
 0x982   :  { %6171 = vmatmul.msk.f32.gmra.mxu2 %vm315_vm4, %v7440_v2  ;;  %v7558_v13 = vpop.permute.xlu2 %1258 }
 0x983   :  { %v1555_v53 = vpop.permute.xlu0 %1554  ;;  %v908_v54 = vpop.xlane.xlu1 %907 }
 0x984   :  { %v914_v36 = vmul.f32 %v908_v54, %v7139_v39 }
 0x986   :  { %v918_v57 = vadd.f32 1e-05, %v914_v36 }
 0x988   :  { %6676 = vrsqrt.f32 %v918_v57  ;;  %vm946_vm8 = vweird.f32 %v918_v57 }
 0x98a   :  { %v1553_v49 = vpop.permute.xlu2 %1552 }
 0x98b   :  { %v1747_v58 = vpop.permute.xlu0 %1746 }
 0x98e   :  { %v6677_v45 = vpop.eup %6676 }
 0x98f   :  { %v941_v60 = vmul.f32 %v6677_v45, %v918_v57  ;;  %vm947_vm7 = vweird.f32 %v6677_v45 }
 0x990   :  { %vm948_vm9 = vmor %vm946_vm8, %vm947_vm7 }
 0x991   :  { %v942_v31 = vmul.f32 %v6677_v45, %v941_v60 }
 0x993   :  { %v7531_v61 = vpop.permute.xlu0 %1652  ;;  %v943_v33 = vmul.f32 0.5, %v942_v31 }
 0x995   :  { %v944_v6 = vsub.f32 1.5, %v943_v33 }
 0x997   :  { %v945_v41 = vmul.f32 %v6677_v45, %v944_v6 }
 0x999   :  { %v949_v63 = vsel %vm948_vm9, %v6677_v45, %v945_v41 }
 0x99a   :  { %v962_v0 = vmul.f32 %v949_v63, %v7459_v20 }
 0x99b   :  { %v1361_v43 = vpop.permute.xlu0 %1360  ;;  %v1157_v55 = vpop.permute.xlu1 %1156 }
 0x99c   :  { %6186 = vmatpush.xpose.msk.msra.mxu3 %vm315_vm4, %v1361_v43  ;;  %v966_v51 = vmul.f32 %v962_v0, %v7402_v46 }
 0x99e   :  { %v970_v11 = vadd.f32 %v966_v51, %v7408_v16 }
 0x9a0   :  { %6162 = vmatmul.msk.f32.gmra.mxu1 %vm56_vm0, %v970_v11  ;;  %6166 = vmatmul.msk.f32.gmra.mxu3 %vm56_vm0, %v970_v11  ;;  %v1033_v19 = vpop.f32.mrf.mxu2 }
 0x9a3   :  { %v1557_v1 = vpop.permute.xlu0 %1556  ;;  %v1359_v4 = vpop.permute.xlu1 %1358 }
 0x9a4   :  { %6187 = vmatpush.xpose.msk.msra.mxu3 %vm315_vm4, %v1359_v4 }
 0x9a8   :  { %6198 = vmatpush.xpose.msk.msrb.mxu3 %vm315_vm4, %v1557_v1  ;;  %6176 = vmatmul.msk.f32.vlgmr.msra.gmra.mxu1 %vm315_vm4, %v1157_v55 }
 0x9a9   :  { %6167 = vmatmul.msk.f32.gmra.mxu3 %vm56_vm0, %v7474_v34 }
 0x9ab   :  { %v7545_v46 = vpop.permute.xlu0 %1458  ;;  %v1355_v16 = vpop.permute.xlu1 %1354 }
 0x9ac   :  { %6199 = vmatpush.xpose.msk.msrb.mxu3 %vm315_vm4, %v1555_v53 }
 0x9b1   :  { %6188 = vmatmul.msk.f32.vlgmr.msra.gmra.mxu3 %vm315_vm4, %v1355_v16 }
 0x9b3   :  { %v1753_v7 = vpop.permute.xlu0 %1752  ;;  %v7549_v56 = vpop.permute.xlu1 %1256 }
 0x9b4   :  { %6210 = vmatpush.xpose.msk.msra.mxu3 %vm315_vm4, %v1753_v7 }
 0x9b8   :  { %6211 = vmatpush.xpose.msk.msra.mxu3 %vm315_vm4, %v1751_v37 }
 0x9bb   :  { %v1551_v44 = vpop.permute.xlu1 %1550 }
 0x9c3   :  { %v7552_v9 = vpop.permute.xlu1 %1456 }
 0x9cb   :  { %v7554_v10 = vpop.permute.xlu1 %1452 }
 0x9d3   :  { %v1159_v22 = vpop.permute.xlu1 %1158 }
 0x9d4   :  { %6177 = vmatmul.msk.f32.gmra.mxu1 %vm315_vm4, %v1159_v22  ;;  %v7644_v22 = vpop.permute.xlu2 %1654 }
 0x9db   :  { %v1357_v12 = vpop.permute.xlu1 %1356 }
 0x9dc   :  { %6189 = vmatmul.msk.f32.gmra.mxu3 %vm315_vm4, %v1357_v12 }
 0x9e3   :  { %v7562_v15 = vpop.permute.xlu1 %1454 }
 0x9e4   :  { %6200 = vmatmul.msk.f32.vlgmr.msrb.gmra.mxu3 %vm315_vm4, %v1551_v44 }
 0x9eb   :  { %v1749_v59 = vpop.permute.xlu1 %1748 }
 0x9ec   :  { %6201 = vmatmul.msk.f32.gmra.mxu3 %vm315_vm4, %v1553_v49 }
 0x9f4   :  { %6212 = vmatmul.msk.f32.vlgmr.msra.gmra.mxu3 %vm315_vm4, %v1747_v58 }
 0x9fc   :  { %6213 = vmatmul.msk.f32.gmra.mxu3 %vm315_vm4, %v1749_v59 }
 0x9fd   :  { %v1096_v20 = vpop.f32.mrf.mxu2 }
 0x9fe   :  { %v1102_v21 = vmul.f32 0.35355338, %v1096_v20 }
 0xa00   :  { %v1105_v23 = vsel %vm1104_vm10, %v1102_v21, -inf }
 0xa01   :  { %1106 = vmax.xlane.f32.xlu1 %v1105_v23 }
 0xa05   :  { %v1099_v24 = vpop.f32.mrf.mxu2 }
 0xa06   :  { %v7567_v27 = vmul.f32 0.35355338, %v1099_v24 }
 0xa08   :  { %v1108_v28 = vsel %vm1104_vm10, %v7567_v27, -inf }
 0xa09   :  { %1109 = vmax.xlane.f32.xlu0 %v1108_v28 }
 0xa1d   :  { %1650 = vrot.lane.b32.xlu0 %v7440_v2, %s7084_s25  ;;  %v1030_v25 = vpop.f32.mrf.mxu1  ;;  %v7584_v2 = vadd.f32 %v1033_v19, %v7432_v3 }
 0xa1e   :  { %v7594_v52 = vadd.f32 %v1030_v25, %v7432_v3 }
 0xa23   :  { %v7574_v32 = vpop.f32.mrf.mxu3 }
 0xa25   :  { %v1189_v29 = vpop.f32.mrf.mxu1 }
 0xa26   :  { %v1195_v30 = vmul.f32 0.35355338, %v1189_v29 }
 0xa28   :  { %v1197_v42 = vsel %vm1104_vm10, %v1195_v30, -inf }
 0xa29   :  { %1198 = vmax.xlane.f32.xlu1 %v1197_v42 }
 0xa2c   :  { %v7576_v34 = vpop.f32.mrf.mxu3 }
 0xa34   :  { %v1387_v26 = vpop.f32.mrf.mxu3 }
 0xa35   :  { %v1393_v35 = vmul.f32 0.35355338, %v1387_v26 }
 0xa37   :  { %v1395_v37 = vsel %vm1104_vm10, %v1393_v35, -inf }
 0xa42   :  { %6484 = vrot.lane.b32.xlu1 %v7451_v14, %s7090_s4 }
 0xa47   :  { %1396 = vmax.xlane.f32.xlu0 %v1395_v37 }
 0xa4a   :  { %6489 = vrot.lane.b32.xlu1 %v7451_v14, %s7093_s8 }
 0xa51   :  { %v1192_v47 = vpop.f32.mrf.mxu1 }
 0xa52   :  { %v1196_v48 = vmul.f32 0.35355338, %v1192_v47  ;;  %2014 = vrot.lane.b32.xlu1 %v7584_v2, %s7081_s22 }
 0xa54   :  { %v1200_v50 = vsel %vm1104_vm10, %v1196_v48, -inf }
 0xa55   :  { %1201 = vmax.xlane.f32.xlu2 %v1200_v50 }
 0xa5a   :  { %2010 = vrot.lane.b32.xlu1 %v7584_v2, %s7089_s30 }
 0xa5b   :  { %6469 = vrot.lane.b32.xlu0 %v7451_v14, %s7089_s30 }
 0xa5f   :  { %v1390_v3 = vpop.f32.mrf.mxu3 }
 0xa60   :  { %v7653_v20 = vmul.f32 0.35355338, %v1390_v3 }
 0xa62   :  { %2206 = vrot.lane.b32.xlu1 %v7594_v52, %s7092_s7  ;;  %v1398_v29 = vsel %vm1104_vm10, %v7653_v20, -inf }
 0xa63   :  { %6474 = vrot.lane.b32.xlu0 %v7451_v14, %s7092_s7 }
 0xa67   :  { %v1583_v54 = vpop.f32.mrf.mxu3 }
 0xa68   :  { %v7616_v58 = vmul.f32 0.35355338, %v1583_v54 }
 0xa6a   :  { %2112 = vrot.lane.b32.xlu1 %v7594_v52, %s7083_s24 }
 0xa6b   :  { %6494 = vrot.lane.b32.xlu0 %v7451_v14, %s7086_s27 }
 0xa6d   :  { %6479 = vrot.lane.b32.xlu2 %v7451_v14, %s7087_s28 }
 0xa6f   :  { %v1586_v45 = vpop.f32.mrf.mxu3 }
 0xa70   :  { %v7622_v60 = vmul.f32 0.35355338, %v1586_v45 }
 0xa72   :  { %v1594_v6 = vsel %vm1104_vm10, %v7622_v60, -inf }
 0xa73   :  { %2212 = vrot.lane.b32.xlu0 %v7584_v2, %s7088_s29 }
 0xa74   :  { %v1107_v53 = vpop.xlane.xlu1 %1106 }
 0xa75   :  { %6499 = vrot.lane.b32.xlu2 %v7451_v14, %s7084_s25  ;;  %v1111_v36 = vsub.f32 %v1102_v21, %v1107_v53  ;;  %v1591_v14 = vsel %vm1104_vm10, %v7616_v58, -inf }
 0xa77   :  { %v1113_v57 = vmul.f32 1.442695, %v1111_v36  ;;  %v1779_v24 = vpop.f32.mrf.mxu3 }
 0xa78   :  { %v7659_v26 = vmul.f32 0.35355338, %v1779_v24 }
 0xa79   :  { %6678 = vpow2.f32 %v1113_v57 }
 0xa7a   :  { %v1787_v36 = vsel %vm1104_vm10, %v7659_v26, -inf }
 0xa7c   :  { %v1110_v51 = vpop.xlane.xlu0 %1109 }
 0xa7d   :  { %2012 = vrot.lane.b32.xlu2 %v7594_v52, %s7081_s22  ;;  %v1112_v47 = vsub.f32 %v7567_v27, %v1110_v51 }
 0xa7f   :  { %v7624_v31 = vpop.eup %6678  ;;  %v1782_v57 = vpop.f32.mrf.mxu3  ;;  %v1115_v27 = vmul.f32 1.442695, %v1112_v47 }
 0xa80   :  { %v1117_v33 = vsel %vm1104_vm10, %v7624_v31, 0.0 }
 0xa85   :  { %2008 = vrot.lane.b32.xlu2 %v7594_v52, %s7089_s30 }
 0xa8d   :  { %1922 = vrot.lane.b32.xlu2 %v7584_v2, %s7080_s6 }
 0xa8f   :  { %v7638_v11 = vpop.permute.xlu0 %1650 }
 0xa94   :  { %1592 = vmax.xlane.f32.xlu1 %v1591_v14 }
 0xa95   :  { %1920 = vrot.lane.b32.xlu2 %v7594_v52, %s7080_s6 }
 0xa9c   :  { %1118 = vadd.xlane.f32.xlu1 %v1117_v33  ;;  %v1199_v41 = vpop.xlane.xlu1 %1198 }
 0xa9d   :  { %1595 = vmax.xlane.f32.xlu0 %v1594_v6  ;;  %v1203_v43 = vsub.f32 %v1195_v30, %v1199_v41  ;;  %2210 = vrot.lane.b32.xlu2 %v7594_v52, %s7088_s29  ;;  %v7672_v6 = vmul.f32 0.35355338, %v1782_v57 }
 0xa9f   :  { %v1205_v63 = vmul.f32 1.442695, %v1203_v43  ;;  %v1790_v43 = vsel %vm1104_vm10, %v7672_v6, -inf }
 0xaa1   :  { %6680 = vpow2.f32 %v1205_v63 }
 0xaa5   :  { %2114 = vrot.lane.b32.xlu2 %v7584_v2, %s7083_s24 }
 0xaa7   :  { %v7634_v0 = vpop.eup %6680 }
 0xaa8   :  { %v1209_v55 = vsel %vm1104_vm10, %v7634_v0, 0.0 }
 0xaa9   :  { %1210 = vadd.xlane.f32.xlu0 %v1209_v55 }
 0xab4   :  { %v7640_v1 = vpop.permute.xlu1 %6484 }
 0xab5   :  { %v6486_v47 = vunpack.i.l.bf16 %v7640_v1 }
 0xaba   :  { %v1397_v4 = vpop.xlane.xlu0 %1396 }
 0xabb   :  { %v1401_v16 = vsub.f32 %v1393_v35, %v1397_v4 }
 0xabc   :  { %v6490_v44 = vpop.permute.xlu1 %6489 }
 0xabd   :  { %v1403_v7 = vmul.f32 1.442695, %v1401_v16  ;;  %2408 = vrot.lane.b32.xlu0 %v7584_v2, %s7085_s26  ;;  %v6491_v53 = vunpack.i.l.bf16 %v6490_v44  ;;  %v6492_v14 = vunpack.i.h.bf16 %v6490_v44 }
 0xabf   :  { %6682 = vpow2.f32 %v1403_v7 }
 0xac4   :  { %v2015_v49 = vpop.permute.xlu1 %2014 }
 0xac5   :  { %v7646_v12 = vpop.eup %6682  ;;  %6222 = vmatpush.xpose.msk.msrb.mxu3 %vm315_vm4, %v2015_v49  ;;  %2402 = vrot.lane.b32.xlu0 %v7594_v52, %s7090_s4 }
 0xac6   :  { %v1407_v19 = vsel %vm1104_vm10, %v7646_v12, 0.0 }
 0xac7   :  { %1408 = vadd.xlane.f32.xlu1 %v1407_v19 }
 0xac8   :  { %v1202_v59 = vpop.xlane.xlu2 %1201 }
 0xac9   :  { %v1204_v21 = vsub.f32 %v1196_v48, %v1202_v59 }
 0xacb   :  { %v1207_v23 = vmul.f32 1.442695, %v1204_v21 }
 0xacc   :  { %v2011_v7 = vpop.permute.xlu1 %2010 }
 0xacd   :  { %v6470_v28 = vpop.permute.xlu0 %6469  ;;  %6684 = vpow2.f32 %v1207_v23  ;;  %2308 = vrot.lane.b32.xlu0 %v7594_v52, %s7091_s5 }
 0xace   :  { %v6471_v25 = vunpack.i.l.bf16 %v6470_v28  ;;  %1399 = vmax.xlane.f32.xlu2 %v1398_v29  ;;  %v6472_v30 = vunpack.i.h.bf16 %v6470_v28  ;;  %6686 = vpow2.f32 %v1115_v27 }
 0xad0   :  { %1247 = vmatpush.msrb.mxu2 %v6471_v25  ;;  %v6480_v42 = vpop.permute.xlu2 %6479 }
 0xad1   :  { %v6481_v35 = vunpack.i.l.bf16 %v6480_v42  ;;  %v6482_v48 = vunpack.i.h.bf16 %v6480_v42 }
 0xad2   :  { %1248 = vmatpush.msrb.mxu2 %v6472_v30 }
 0xad3   :  { %v7661_v37 = vpop.eup %6684  ;;  %1345 = vmatpush.msrb.mxu1 %v6481_v35 }
 0xad4   :  { %v1212_v3 = vsel %vm1104_vm10, %v7661_v37, 0.0  ;;  %v7681_v55 = vpop.eup %6686  ;;  %v2207_v49 = vpop.permute.xlu1 %2206 }
 0xad5   :  { %v6475_v50 = vpop.permute.xlu0 %6474  ;;  %2304 = vrot.lane.b32.xlu0 %v7594_v52, %s7093_s8  ;;  %1213 = vadd.xlane.f32.xlu1 %v1212_v3  ;;  %v1120_v4 = vsel %vm1104_vm10, %v7681_v55, 0.0 }
 0xad6   :  { %v6476_v54 = vunpack.i.l.bf16 %v6475_v50  ;;  %1346 = vmatpush.msrb.mxu1 %v6482_v48  ;;  %1788 = vmax.xlane.f32.xlu2 %v1787_v36  ;;  %v6477_v45 = vunpack.i.h.bf16 %v6475_v50 }
 0xad8   :  { %1541 = vmatpush.msra.mxu1 %v6491_v53  ;;  %1443 = vmatpush.msra.mxu2 %v6476_v54  ;;  %v7670_v33 = vpop.permute.xlu2 %6499 }
 0xada   :  { %1542 = vmatpush.msra.mxu1 %v6492_v14  ;;  %1444 = vmatpush.msra.mxu2 %v6477_v45 }
 0xadc   :  { %v7702_v59 = vpop.permute.xlu1 %2112 }
 0xadd   :  { %v7674_v41 = vpop.permute.xlu0 %6494  ;;  %2306 = vrot.lane.b32.xlu0 %v7584_v2, %s7093_s8 }
 0xade   :  { %1791 = vmax.xlane.f32.xlu2 %v1790_v43 }
 0xae0   :  { %v2013_v63 = vpop.permute.xlu2 %2012 }
 0xae1   :  { %6223 = vmatpush.xpose.msk.msrb.mxu3 %vm315_vm4, %v2013_v63 }
 0xae5   :  { %v2213_v51 = vpop.permute.xlu0 %2212  ;;  %2600 = vrot.lane.b32.xlu0 %v7584_v2, %s7086_s27 }
 0xae6   :  { %6234 = vmatpush.xpose.msk.msra.mxu3 %vm315_vm4, %v2213_v51  ;;  %1121 = vadd.xlane.f32.xlu2 %v1120_v4 }
 0xae8   :  { %v2009_v16 = vpop.permute.xlu2 %2008 }
 0xae9   :  { %6224 = vmatmul.msk.f32.vlgmr.msrb.gmra.mxu3 %vm315_vm4, %v2009_v16 }
 0xaee   :  { %2108 = vrot.lane.b32.xlu1 %v7594_v52, %s7087_s28 }
 0xaf0   :  { %v7691_v44 = vpop.permute.xlu2 %1922 }
 0xaf1   :  { %6225 = vmatmul.msk.f32.gmra.mxu3 %vm315_vm4, %v2011_v7 }
 0xaf6   :  { %2110 = vrot.lane.b32.xlu1 %v7584_v2, %s7087_s28 }
 0xaf8   :  { %v7696_v19 = vpop.permute.xlu2 %1920 }
 0xafe   :  { %2208 = vrot.lane.b32.xlu2 %v7584_v2, %s7092_s7  ;;  %2404 = vrot.lane.b32.xlu1 %v7584_v2, %s7090_s4 }
 0xb00   :  { %v2211_v21 = vpop.permute.xlu2 %2210 }
 0xb01   :  { %6235 = vmatpush.xpose.msk.msra.mxu3 %vm315_vm4, %v2211_v21 }
 0xb04   :  { %6236 = vmatmul.msk.f32.vlgmr.msra.gmra.mxu3 %vm315_vm4, %v2207_v49 }
 0xb06   :  { %2406 = vrot.lane.b32.xlu2 %v7594_v52, %s7085_s26  ;;  %2602 = vrot.lane.b32.xlu1 %v7594_v52, %s7082_s23 }
 0xb07   :  { %v1593_v23 = vpop.xlane.xlu1 %1592 }
 0xb08   :  { %v1597_v3 = vsub.f32 %v7616_v58, %v1593_v23 }
 0xb0e   :  { %2310 = vrot.lane.b32.xlu2 %v7584_v2, %s7091_s5  ;;  %2506 = vrot.lane.b32.xlu1 %v7584_v2, %s7075_s18 }
 0xb0f   :  { %v1119_v24 = vpop.xlane.xlu1 %1118 }
 0xb10   :  { %6688 = vrcp.f32 %v1119_v24  ;;  %v1596_v28 = vpop.xlane.xlu0 %1595 }
 0xb11   :  { %v1598_v54 = vsub.f32 %v7622_v60, %v1596_v28  ;;  %v6497_v28 = vunpack.i.h.bf16 %v7674_v41 }
 0xb13   :  { %v1601_v57 = vmul.f32 1.442695, %v1598_v54 }
 0xb16   :  { %v6689_v25 = vpop.eup %6688  ;;  %2604 = vrot.lane.b32.xlu2 %v7584_v2, %s7082_s23  ;;  %2500 = vrot.lane.b32.xlu1 %v7594_v52, %s7084_s25 }
 0xb17   :  { %v1125_v29 = vmul.f32 %v6689_v25, %v7624_v31  ;;  %v7735_v31 = vpop.permute.xlu2 %2114 }
 0xb19   :  { %6172 = vmatmul.msk.f32.vlgmr.msrb.gmra.mxu0 %vm1104_vm10, %v1125_v29 }
 0xb1a   :  { %6192 = vmatpush.xpose.msk.msrb.mxu0 %vm315_vm4, %v7545_v46  ;;  %v6487_v46 = vunpack.i.h.bf16 %v7640_v1  ;;  %v1599_v1 = vmul.f32 1.442695, %v1597_v3 }
 0xb1c   :  { %v1211_v30 = vpop.xlane.xlu0 %1210 }
 0xb1d   :  { %6690 = vrcp.f32 %v1211_v30 }
 0xb1e   :  { %6193 = vmatpush.xpose.msk.msrb.mxu0 %vm315_vm4, %v7552_v9  ;;  %2598 = vrot.lane.b32.xlu2 %v7594_v52, %s7086_s27 }
 0xb23   :  { %v6691_v42 = vpop.eup %6690 }
 0xb24   :  { %v1217_v35 = vmul.f32 %v6691_v42, %v7634_v0 }
 0xb26   :  { %2504 = vrot.lane.b32.xlu2 %v7594_v52, %s7075_s18  ;;  %6178 = vmatmul.msk.f32.vlgmr.msrb.gmra.mxu2 %vm1104_vm10, %v1217_v35 }
 0xb27   :  { %1639 = vmatpush.msrb.mxu2 %v6486_v47 }
 0xb29   :  { %1640 = vmatpush.msrb.mxu2 %v6487_v46 }
 0xb2e   :  { %2502 = vrot.lane.b32.xlu2 %v7584_v2, %s7084_s25 }
 0xb2f   :  { %v2409_v9 = vpop.permute.xlu0 %2408 }
 0xb30   :  { %6246 = vmatpush.xpose.msk.msrb.mxu3 %vm315_vm4, %v2409_v9 }
 0xb37   :  { %v2403_v35 = vpop.permute.xlu0 %2402 }
 0xb3a   :  { %v1409_v0 = vpop.xlane.xlu1 %1408 }
 0xb41   :  { %v1400_v48 = vpop.xlane.xlu2 %1399 }
 0xb42   :  { %v1402_v50 = vsub.f32 %v7653_v20, %v1400_v48 }
 0xb44   :  { %v1405_v53 = vmul.f32 1.442695, %v1402_v50 }
 0xb46   :  { %6692 = vpow2.f32 %v1405_v53 }
 0xb48   :  { %v1214_v36 = vpop.xlane.xlu1 %1213 }
 0xb49   :  { %6694 = vrcp.f32 %v1214_v36  ;;  %v1789_v14 = vpop.xlane.xlu2 %1788 }
 0xb4a   :  { %6696 = vpow2.f32 %v1599_v1  ;;  %v1793_v27 = vsub.f32 %v7659_v26, %v1789_v14 }
 0xb4b   :  { %6698 = vpow2.f32 %v1601_v57 }
 0xb4c   :  { %v7740_v45 = vpop.eup %6692  ;;  %6700 = vrcp.f32 %v1409_v0  ;;  %v1795_v43 = vmul.f32 1.442695, %v1793_v27  ;;  %v2309_v0 = vpop.permute.xlu0 %2308 }
 0xb4d   :  { %v1410_v20 = vsel %vm1104_vm10, %v7740_v45, 0.0 }
 0xb4e   :  { %1411 = vadd.xlane.f32.xlu1 %v1410_v20  ;;  %6702 = vpow2.f32 %v1795_v43 }
 0xb4f   :  { %v6695_v58 = vpop.eup %6694 }
 0xb50   :  { %v1218_v60 = vmul.f32 %v6695_v58, %v7661_v37  ;;  %v7746_v51 = vpop.eup %6696 }
 0xb51   :  { %v1792_v63 = vpop.xlane.xlu2 %1791  ;;  %v7750_v16 = vpop.eup %6698  ;;  %v1603_v49 = vsel %vm1104_vm10, %v7746_v51, 0.0 }
 0xb52   :  { %v1794_v4 = vsub.f32 %v7672_v6, %v1792_v63  ;;  %6179 = vmatmul.msk.f32.gmra.mxu2 %vm1104_vm10, %v1218_v60  ;;  %v6701_v7 = vpop.eup %6700  ;;  %v1606_v37 = vsel %vm1104_vm10, %v7750_v16, 0.0  ;;  %v6496_v6 = vunpack.i.l.bf16 %v7674_v41 }
 0xb53   :  { %v1415_v21 = vmul.f32 %v6701_v7, %v7646_v12 }
 0xb54   :  { %v1797_v26 = vmul.f32 1.442695, %v1794_v4  ;;  %v7758_v24 = vpop.eup %6702  ;;  %v2305_v50 = vpop.permute.xlu0 %2304 }
 0xb55   :  { %v1799_v29 = vsel %vm1104_vm10, %v7758_v24, 0.0 }
 0xb56   :  { %6704 = vpow2.f32 %v1797_v26  ;;  %1604 = vadd.xlane.f32.xlu1 %v1603_v49 }
 0xb57   :  { %1607 = vadd.xlane.f32.xlu2 %v1606_v37 }
 0xb59   :  { %v1122_v23 = vpop.xlane.xlu2 %1121 }
 0xb5a   :  { %6706 = vrcp.f32 %v1122_v23  ;;  %6190 = vmatmul.msk.f32.vlgmr.msra.gmra.mxu2 %vm1104_vm10, %v1415_v21 }
 0xb5b   :  { %1835 = vmatpush.msra.mxu2 %v6496_v6 }
 0xb5c   :  { %v7762_v25 = vpop.eup %6704 }
 0xb5d   :  { %1836 = vmatpush.msra.mxu2 %v6497_v28  ;;  %v1802_v12 = vsel %vm1104_vm10, %v7762_v25, 0.0 }
 0xb5e   :  { %1800 = vadd.xlane.f32.xlu1 %v1799_v29 }
 0xb5f   :  { %1803 = vadd.xlane.f32.xlu2 %v1802_v12 }
 0xb60   :  { %v6707_v30 = vpop.eup %6706  ;;  %v2109_v42 = vpop.permute.xlu1 %2108 }
 0xb61   :  { %v2209_v47 = vpop.permute.xlu2 %2208  ;;  %v1126_v46 = vmul.f32 %v6707_v30, %v7681_v55 }
 0xb62   :  { %6237 = vmatmul.msk.f32.gmra.mxu3 %vm315_vm4, %v2209_v47 }
 0xb63   :  { %6173 = vmatmul.msk.f32.gmra.mxu0 %vm1104_vm10, %v1126_v46 }
 0xb68   :  { %v2111_v41 = vpop.permute.xlu1 %2110 }
 0xb69   :  { %v2407_v9 = vpop.permute.xlu2 %2406 }
 0xb6a   :  { %6247 = vmatpush.xpose.msk.msrb.mxu3 %vm315_vm4, %v2407_v9 }
 0xb6b   :  { %6182 = vmatmul.msk.f32.vlgmr.msra.gmra.mxu0 %vm315_vm4, %v7549_v56 }
 0xb6c   :  { %6204 = vmatpush.xpose.msk.msra.mxu0 %vm315_vm4, %v7644_v22 }
 0xb6d   :  { %6248 = vmatmul.msk.f32.vlgmr.msrb.gmra.mxu3 %vm315_vm4, %v2403_v35 }
 0xb70   :  { %6205 = vmatpush.xpose.msk.msra.mxu0 %vm315_vm4, %v7531_v61  ;;  %v2405_v48 = vpop.permute.xlu1 %2404  ;;  %v2307_v61 = vpop.permute.xlu0 %2306 }
 0xb71   :  { %v2311_v55 = vpop.permute.xlu2 %2310 }
 0xb73   :  { %6183 = vmatmul.msk.f32.gmra.mxu0 %vm315_vm4, %v7558_v13 }
 0xb75   :  { %6249 = vmatmul.msk.f32.gmra.mxu3 %vm315_vm4, %v2405_v48 }
 0xb78   :  { %v2603_v56 = vpop.permute.xlu1 %2602  ;;  %v2601_v22 = vpop.permute.xlu0 %2600 }
 0xb79   :  { %v2605_v3 = vpop.permute.xlu2 %2604 }
 0xb7a   :  { %6258 = vmatpush.xpose.msk.msra.mxu3 %vm315_vm4, %v2605_v3 }
 0xb7b   :  { %6194 = vmatmul.msk.f32.vlgmr.msrb.gmra.mxu0 %vm315_vm4, %v7554_v10 }
 0xb7c   :  { %6216 = vmatpush.xpose.msk.msrb.mxu0 %vm315_vm4, %v7691_v44 }
 0xb7e   :  { %6259 = vmatpush.xpose.msk.msra.mxu3 %vm315_vm4, %v2603_v56 }
 0xb80   :  { %6217 = vmatpush.xpose.msk.msrb.mxu0 %vm315_vm4, %v7696_v19  ;;  %v2507_v10 = vpop.permute.xlu1 %2506 }
 0xb81   :  { %v2599_v13 = vpop.permute.xlu2 %2598 }
 0xb82   :  { %6260 = vmatmul.msk.f32.vlgmr.msra.gmra.mxu3 %vm315_vm4, %v2599_v13 }
 0xb83   :  { %6195 = vmatmul.msk.f32.gmra.mxu0 %vm315_vm4, %v7562_v15 }
 0xb89   :  { %v2505_v15 = vpop.permute.xlu2 %2504 }
 0xb8a   :  { %6261 = vmatmul.msk.f32.gmra.mxu3 %vm315_vm4, %v2601_v22 }
 0xb8b   :  { %6206 = vmatmul.msk.f32.vlgmr.msra.gmra.mxu0 %vm315_vm4, %v7512_v40 }
 0xb8c   :  { %6228 = vmatpush.xpose.msk.msra.mxu0 %vm315_vm4, %v7735_v31 }
 0xb90   :  { %6229 = vmatpush.xpose.msk.msra.mxu0 %vm315_vm4, %v7702_v59 }
 0xb93   :  { %6207 = vmatmul.msk.f32.gmra.mxu0 %vm315_vm4, %v7638_v11 }
 0xb96   :  { %v7823_v14 = vpop.f32.mrf.mxu0 }
 0xb9b   :  { %6218 = vmatmul.msk.f32.vlgmr.msrb.gmra.mxu0 %vm315_vm4, %v7594_v52  ;;  %v2501_v52 = vpop.permute.xlu1 %2500 }
 0xb9c   :  { %6240 = vmatpush.xpose.msk.msrb.mxu0 %vm315_vm4, %v2311_v55 }
 0xba0   :  { %6241 = vmatpush.xpose.msk.msrb.mxu0 %vm315_vm4, %v2309_v0 }
 0xba3   :  { %6219 = vmatmul.msk.f32.gmra.mxu0 %vm315_vm4, %v7584_v2  ;;  %v2503_v2 = vpop.permute.xlu2 %2502 }
 0xba9   :  { %v1250_v40 = vpop.f32.mrf.mxu2 }
 0xbaa   :  { %1846 = vrot.lane.b32.xlu0 %v1250_v40, %s7082_s23 }
 0xbab   :  { %6230 = vmatmul.msk.f32.vlgmr.msra.gmra.mxu0 %vm315_vm4, %v2109_v42 }
 0xbac   :  { %6252 = vmatpush.xpose.msk.msra.mxu0 %vm315_vm4, %v2507_v10  ;;  %v2041_v10 = vpop.f32.mrf.mxu3 }
 0xbb0   :  { %6253 = vmatpush.xpose.msk.msra.mxu0 %vm315_vm4, %v2505_v15 }
 0xbb3   :  { %6231 = vmatmul.msk.f32.gmra.mxu0 %vm315_vm4, %v2111_v41 }
 0xbbb   :  { %6242 = vmatmul.msk.f32.vlgmr.msrb.gmra.mxu0 %vm315_vm4, %v2305_v50 }
 0xbc1   :  { %v1412_v11 = vpop.xlane.xlu1 %1411 }
 0xbc2   :  { %6708 = vrcp.f32 %v1412_v11 }
 0xbc3   :  { %6243 = vmatmul.msk.f32.gmra.mxu0 %vm315_vm4, %v2307_v61 }
 0xbc8   :  { %v6709_v44 = vpop.eup %6708 }
 0xbc9   :  { %v1605_v19 = vpop.xlane.xlu1 %1604  ;;  %v1416_v59 = vmul.f32 %v6709_v44, %v7740_v45 }
 0xbca   :  { %6710 = vrcp.f32 %v1605_v19  ;;  %v1608_v31 = vpop.xlane.xlu2 %1607 }
 0xbcb   :  { %6191 = vmatmul.msk.f32.gmra.mxu2 %vm1104_vm10, %v1416_v59  ;;  %6254 = vmatmul.msk.f32.vlgmr.msra.gmra.mxu0 %vm315_vm4, %v2501_v52  ;;  %6712 = vrcp.f32 %v1608_v31 }
 0xbd0   :  { %v6711_v53 = vpop.eup %6710 }
 0xbd1   :  { %v1611_v54 = vmul.f32 %v6711_v53, %v7746_v51  ;;  %v1801_v1 = vpop.xlane.xlu1 %1800  ;;  %v6713_v57 = vpop.eup %6712  ;;  %v7876_v53 = vmul.f32 0.35355338, %v2041_v10 }
 0xbd2   :  { %6714 = vrcp.f32 %v1801_v1  ;;  %v1612_v45 = vmul.f32 %v6713_v57, %v7750_v16  ;;  %v1804_v27 = vpop.xlane.xlu2 %1803 }
 0xbd3   :  { %6202 = vmatmul.msk.f32.vlgmr.msrb.gmra.mxu2 %vm1104_vm10, %v1611_v54  ;;  %6255 = vmatmul.msk.f32.gmra.mxu0 %vm315_vm4, %v2503_v2  ;;  %6716 = vrcp.f32 %v1804_v27  ;;  %v7866_v2 = vpop.f32.mrf.mxu3  ;;  %v2049_v57 = vsel %vm1104_vm10, %v7876_v53, -inf }
 0xbd5   :  { %v7821_v36 = vpop.f32.mrf.mxu2 }
 0xbd8   :  { %v6715_v58 = vpop.eup %6714 }
 0xbd9   :  { %v1807_v60 = vmul.f32 %v6715_v58, %v7758_v24  ;;  %v6717_v63 = vpop.eup %6716 }
 0xbda   :  { %v1808_v26 = vmul.f32 %v6717_v63, %v7762_v25 }
 0xbdb   :  { %6203 = vmatmul.msk.f32.gmra.mxu2 %vm1104_vm10, %v1612_v45  ;;  %v7872_v31 = vpop.f32.mrf.mxu3 }
 0xbdd   :  { %v1446_v20 = vpop.f32.mrf.mxu2 }
 0xbde   :  { %1862 = vrot.lane.b32.xlu2 %v1446_v20, %s7085_s26 }
 0xbe0   :  { %v7828_v43 = vpop.f32.mrf.mxu0 }
 0xbe3   :  { %6214 = vmatmul.msk.f32.vlgmr.msra.gmra.mxu2 %vm1104_vm10, %v1807_v60 }
 0xbe5   :  { %v2242_v54 = vpop.f32.mrf.mxu3 }
 0xbe6   :  { %v7892_v63 = vmul.f32 0.35355338, %v2242_v54 }
 0xbe8   :  { %v1289_v51 = vpop.f32.mrf.mxu0 }
 0xbe9   :  { %v1295_v4 = vmul.f32 0.35355338, %v1289_v51 }
 0xbeb   :  { %6215 = vmatmul.msk.f32.gmra.mxu2 %vm1104_vm10, %v1808_v26  ;;  %v1297_v16 = vsel %vm1104_vm10, %v1295_v4, -inf  ;;  %v2250_v26 = vsel %vm1104_vm10, %v7892_v63, -inf }
 0xbec   :  { %1298 = vmax.xlane.f32.xlu1 %v1297_v16 }
 0xbf0   :  { %v1292_v7 = vpop.f32.mrf.mxu0  ;;  %v7886_v20 = vpop.f32.mrf.mxu3 }
 0xbf1   :  { %v1296_v49 = vmul.f32 0.35355338, %v1292_v7 }
 0xbf3   :  { %v1300_v37 = vsel %vm1104_vm10, %v1296_v49, -inf }
 0xbf4   :  { %1301 = vmax.xlane.f32.xlu0 %v1300_v37 }
 0xbf8   :  { %v1485_v21 = vpop.f32.mrf.mxu0 }
 0xbf9   :  { %v7836_v23 = vmul.f32 0.35355338, %v1485_v21 }
 0xbfb   :  { %v1493_v24 = vsel %vm1104_vm10, %v7836_v23, -inf }
 0xc00   :  { %v1488_v6 = vpop.f32.mrf.mxu0 }
 0xc01   :  { %v7851_v48 = vmul.f32 0.35355338, %v1488_v6 }
 0xc03   :  { %v1496_v3 = vsel %vm1104_vm10, %v7851_v48, -inf }
 0xc07   :  { %1494 = vmax.xlane.f32.xlu2 %v1493_v24 }
 0xc08   :  { %v1681_v28 = vpop.f32.mrf.mxu0 }
 0xc09   :  { %v7857_v56 = vmul.f32 0.35355338, %v1681_v28 }
 0xc0b   :  { %v1689_v22 = vsel %vm1104_vm10, %v7857_v56, -inf }
 0xc10   :  { %v1684_v25 = vpop.f32.mrf.mxu0 }
 0xc11   :  { %v7840_v29 = vmul.f32 0.35355338, %v1684_v25 }
 0xc13   :  { %v1692_v12 = vsel %vm1104_vm10, %v7840_v29, -inf }
 0xc14   :  { %1693 = vmax.xlane.f32.xlu2 %v1692_v12 }
 0xc18   :  { %v1949_v52 = vpop.f32.mrf.mxu0 }
 0xc19   :  { %v7868_v44 = vmul.f32 0.35355338, %v1949_v52 }
 0xc1b   :  { %v1957_v59 = vsel %vm1104_vm10, %v7868_v44, -inf }
 0xc1c   :  { %v7853_v50 = vpop.permute.xlu0 %1846 }
 0xc20   :  { %v1952_v19 = vpop.f32.mrf.mxu0 }
 0xc21   :  { %v7884_v27 = vmul.f32 0.35355338, %v1952_v19 }
 0xc28   :  { %v7878_v1 = vpop.f32.mrf.mxu0 }
 0xc30   :  { %v7888_v58 = vpop.f32.mrf.mxu0 }
 0xc38   :  { %v7882_v45 = vpop.permute.xlu2 %1862  ;;  %v2337_v16 = vpop.f32.mrf.mxu0 }
 0xc4e   :  { %v1449_v30 = vpop.f32.mrf.mxu2 }
 0xc56   :  { %v1642_v42 = vpop.f32.mrf.mxu2 }
 0xc57   :  { %1878 = vrot.lane.b32.xlu1 %v1642_v42, %s7088_s29 }
 0xc5e   :  { %v1645_v35 = vpop.f32.mrf.mxu2 }
 0xc5f   :  { %v1299_v47 = vpop.xlane.xlu1 %1298 }
 0xc60   :  { %v1303_v46 = vsub.f32 %v1295_v4, %v1299_v47  ;;  %v7895_v4 = vpop.f32.mrf.mxu3 }
 0xc62   :  { %v1305_v41 = vmul.f32 1.442695, %v1303_v46 }
 0xc64   :  { %6718 = vpow2.f32 %v1305_v41 }
 0xc66   :  { %v1838_v9 = vpop.f32.mrf.mxu2 }
 0xc67   :  { %1894 = vrot.lane.b32.xlu0 %v1838_v9, %s7081_s22  ;;  %v1302_v61 = vpop.xlane.xlu0 %1301  ;;  %v6501_v9 = vunpack.i.l.bf16 %v7670_v33 }
 0xc68   :  { %v1304_v13 = vsub.f32 %v1296_v49, %v1302_v61  ;;  %v7899_v49 = vmul.f32 0.35355338, %v2337_v16  ;;  %v2631_v37 = vpop.f32.mrf.mxu3 }
 0xc69   :  { %v7905_v24 = vmul.f32 0.35355338, %v2631_v37 }
 0xc6a   :  { %v7846_v0 = vpop.eup %6718  ;;  %v1307_v40 = vmul.f32 1.442695, %v1304_v13  ;;  %v2345_v21 = vsel %vm1104_vm10, %v7899_v49, -inf }
 0xc6b   :  { %v1309_v55 = vsel %vm1104_vm10, %v7846_v0, 0.0  ;;  %v2639_v28 = vsel %vm1104_vm10, %v7905_v24, -inf }
 0xc6c   :  { %1310 = vadd.xlane.f32.xlu2 %v1309_v55  ;;  %6720 = vpow2.f32 %v1307_v40  ;;  %v6502_v55 = vunpack.i.h.bf16 %v7670_v33 }
 0xc6e   :  { %v1841_v47 = vpop.f32.mrf.mxu2 }
 0xc6f   :  { %1864 = vrot.lane.b32.xlu0 %v1449_v30, %s7085_s26 }
 0xc70   :  { %v2634_v25 = vpop.f32.mrf.mxu3 }
 0xc71   :  { %v7911_v12 = vmul.f32 0.35355338, %v2634_v25 }
 0xc72   :  { %v7862_v15 = vpop.eup %6720 }
 0xc73   :  { %v1312_v11 = vsel %vm1104_vm10, %v7862_v15, 0.0  ;;  %v2642_v30 = vsel %vm1104_vm10, %v7911_v12, -inf }
 0xc7a   :  { %v1495_v60 = vpop.xlane.xlu2 %1494 }
 0xc7b   :  { %v1499_v51 = vsub.f32 %v7836_v23, %v1495_v60 }
 0xc7d   :  { %v1501_v7 = vmul.f32 1.442695, %v1499_v51 }
 0xc7f   :  { %6722 = vpow2.f32 %v1501_v7  ;;  %v7950_v7 = vmul.f32 0.35355338, %v7872_v31  ;;  %v7964_v31 = vmul.f32 0.35355338, %v7888_v58 }
 0xc81   :  { %1497 = vmax.xlane.f32.xlu1 %v1496_v3 }
 0xc84   :  { %1880 = vrot.lane.b32.xlu2 %v1645_v35, %s7088_s29 }
 0xc85   :  { %v7903_v6 = vpop.eup %6722 }
 0xc86   :  { %v1505_v23 = vsel %vm1104_vm10, %v7903_v6, 0.0 }
 0xc87   :  { %v1694_v42 = vpop.xlane.xlu2 %1693 }
 0xc89   :  { %1690 = vmax.xlane.f32.xlu1 %v1689_v22 }
 0xc99   :  { %1313 = vadd.xlane.f32.xlu0 %v1312_v11  ;;  %v1696_v11 = vsub.f32 %v7840_v29, %v1694_v42 }
 0xca1   :  { %1958 = vmax.xlane.f32.xlu0 %v1957_v59  ;;  %v1699_v59 = vmul.f32 1.442695, %v1696_v11  ;;  %v1063_v11 = vadd.f32 %v7576_v34, %v7444_v8 }
 0xca2   :  { %1848 = vrot.lane.b32.xlu1 %v7821_v36, %s7082_s23  ;;  %v1960_v36 = vsel %vm1104_vm10, %v7884_v27, -inf }
 0xcad   :  { %2050 = vmax.xlane.f32.xlu2 %v2049_v57 }
 0xcb5   :  { %1961 = vmax.xlane.f32.xlu2 %v1960_v36 }
 0xcbd   :  { %2251 = vmax.xlane.f32.xlu2 %v2250_v26  ;;  %v7947_v26 = vmul.f32 0.35355338, %v7878_v1  ;;  %v7961_v1 = vmul.f32 0.35355338, %v7886_v20  ;;  %v7974_v20 = vmul.f32 0.35355338, %v7895_v4 }
 0xcbf   :  { %v2149_v37 = vsel %vm1104_vm10, %v7947_v26, -inf }
 0xcc5   :  { %2346 = vmax.xlane.f32.xlu2 %v2345_v21 }
 0xcc9   :  { %v7920_v3 = vpop.permute.xlu1 %1878 }
 0xccc   :  { %1506 = vadd.xlane.f32.xlu1 %v1505_v23  ;;  %v2247_v23 = vsel %vm1104_vm10, %v7950_v7, -inf }
 0xccd   :  { %2640 = vmax.xlane.f32.xlu2 %v2639_v28  ;;  %v2340_v28 = vpop.f32.mrf.mxu0 }
 0xcd5   :  { %2643 = vmax.xlane.f32.xlu2 %v2642_v30  ;;  %v2152_v30 = vsel %vm1104_vm10, %v7964_v31, -inf }
 0xcd9   :  { %v7923_v40 = vpop.permute.xlu0 %1894 }
 0xcdf   :  { %v1311_v35 = vpop.xlane.xlu2 %1310 }
 0xce0   :  { %6724 = vrcp.f32 %v1311_v35  ;;  %v7971_v35 = vmul.f32 0.35355338, %v2340_v28 }
 0xce1   :  { %v7931_v54 = vpop.permute.xlu0 %1864 }
 0xce5   :  { %1896 = vrot.lane.b32.xlu1 %v1841_v47, %s7081_s22 }
 0xce6   :  { %v6725_v46 = vpop.eup %6724 }
 0xce7   :  { %v1317_v41 = vmul.f32 %v6725_v46, %v7846_v0  ;;  %v7956_v21 = vpop.permute.xlu2 %1880  ;;  %v2348_v46 = vsel %vm1104_vm10, %v7971_v35, -inf }
 0xce9   :  { %6184 = vmatmul.msk.f32.vlgmr.msrb.gmra.mxu1 %vm1104_vm10, %v1317_v41 }
 0xcea   :  { %1737 = vmatpush.msrb.mxu1 %v6501_v9  ;;  %v2446_v9 = vsel %vm1104_vm10, %v7974_v20, -inf }
 0xcec   :  { %1738 = vmatpush.msrb.mxu1 %v6502_v55 }
 0xcf4   :  { %v1498_v61 = vpop.xlane.xlu1 %1497 }
 0xcf5   :  { %v1500_v13 = vsub.f32 %v7851_v48, %v1498_v61 }
 0xcf7   :  { %v1503_v22 = vmul.f32 1.442695, %v1500_v13 }
 0xcf9   :  { %6726 = vpow2.f32 %v1503_v22 }
 0xcfc   :  { %v1691_v10 = vpop.xlane.xlu1 %1690 }
 0xcfd   :  { %v1695_v0 = vsub.f32 %v7857_v56, %v1691_v10  ;;  %v7938_v56 = vmul.f32 0.35355338, %v7866_v2 }
 0xcff   :  { %v7926_v52 = vpop.eup %6726  ;;  %v1697_v19 = vmul.f32 1.442695, %v1695_v0  ;;  %v2052_v60 = vsel %vm1104_vm10, %v7938_v56, -inf }
 0xd00   :  { %v1508_v33 = vsel %vm1104_vm10, %v7926_v52, 0.0 }
 0xd01   :  { %6728 = vpow2.f32 %v1697_v19  ;;  %1509 = vadd.xlane.f32.xlu0 %v1508_v33  ;;  %v1060_v19 = vadd.f32 %v7574_v32, %v7444_v8  ;;  %v2533_v8 = vpop.f32.mrf.mxu0 }
 0xd02   :  { %6730 = vpow2.f32 %v1699_v59 }
 0xd07   :  { %v7933_v48 = vpop.eup %6728 }
 0xd08   :  { %v1701_v57 = vsel %vm1104_vm10, %v7933_v48, 0.0  ;;  %v7940_v36 = vpop.eup %6730 }
 0xd09   :  { %1702 = vadd.xlane.f32.xlu0 %v1701_v57  ;;  %v1704_v51 = vsel %vm1104_vm10, %v7940_v36, 0.0 }
 0xd0c   :  { %v1314_v29 = vpop.xlane.xlu0 %1313 }
 0xd0d   :  { %6732 = vrcp.f32 %v1314_v29 }
 0xd0f   :  { %2053 = vmax.xlane.f32.xlu1 %v2052_v60 }
 0xd11   :  { %1705 = vadd.xlane.f32.xlu0 %v1704_v51 }
 0xd13   :  { %v6733_v16 = vpop.eup %6732 }
 0xd14   :  { %v1318_v2 = vmul.f32 %v6733_v16, %v7862_v15  ;;  %v2443_v15 = vsel %vm1104_vm10, %v7961_v1, -inf  ;;  %v1959_v58 = vpop.xlane.xlu0 %1958  ;;  %v7985_v13 = vpop.permute.xlu1 %1848  ;;  %v7999_v16 = vmul.f32 0.35355338, %v2533_v8 }
 0xd15   :  { %v1963_v41 = vsub.f32 %v7868_v44, %v1959_v58 }
 0xd16   :  { %6185 = vmatmul.msk.f32.gmra.mxu1 %vm1104_vm10, %v1318_v2 }
 0xd17   :  { %2150 = vmax.xlane.f32.xlu1 %v2149_v37 }
 0xd19   :  { %2248 = vmax.xlane.f32.xlu0 %v2247_v23 }
 0xd1f   :  { %2444 = vmax.xlane.f32.xlu1 %v2443_v15 }
 0xd20   :  { %v2051_v25 = vpop.xlane.xlu2 %2050 }
 0xd21   :  { %v2055_v42 = vsub.f32 %v7876_v53, %v2051_v25  ;;  %2153 = vmax.xlane.f32.xlu0 %v2152_v30  ;;  %v1965_v53 = vmul.f32 1.442695, %v1963_v41 }
 0xd23   :  { %v2057_v47 = vmul.f32 1.442695, %v2055_v42 }
 0xd25   :  { %6734 = vpow2.f32 %v2057_v47 }
 0xd26   :  { %6736 = vpow2.f32 %v1965_v53 }
 0xd27   :  { %2349 = vmax.xlane.f32.xlu1 %v2348_v46 }
 0xd28   :  { %v1962_v58 = vpop.xlane.xlu2 %1961 }
 0xd29   :  { %2447 = vmax.xlane.f32.xlu0 %v2446_v9  ;;  %v1964_v41 = vsub.f32 %v7884_v27, %v1962_v58  ;;  %v2536_v27 = vpop.f32.mrf.mxu0 }
 0xd2b   :  { %v7981_v55 = vpop.eup %6734  ;;  %v1967_v53 = vmul.f32 1.442695, %v1964_v41  ;;  %v2771_v41 = vld [vmem:[#allocation2 + $0x3d0] sm:$0xff] }
 0xd2c   :  { %v2061_v4 = vsel %vm1104_vm10, %v7981_v55, 0.0  ;;  %v6737_v61 = vpop.eup %6736 }
 0xd2d   :  { %v1969_v22 = vsel %vm1104_vm10, %v6737_v61, 0.0 }
 0xd31   :  { %2062 = vadd.xlane.f32.xlu0 %v2061_v4 }
 0xd39   :  { %1970 = vadd.xlane.f32.xlu0 %v1969_v22 }
 0xd3f   :  { %v1507_v44 = vpop.xlane.xlu1 %1506 }
 0xd40   :  { %6738 = vrcp.f32 %v1507_v44 }
 0xd46   :  { %v6739_v10 = vpop.eup %6738 }
 0xd47   :  { %v1513_v0 = vmul.f32 %v6739_v10, %v7903_v6 }
 0xd49   :  { %6196 = vmatmul.msk.f32.vlgmr.msra.gmra.mxu1 %vm1104_vm10, %v1513_v0 }
 0xd4a   :  { %1999 = vmatpush.msra.mxu1 %v1063_v11 }
 0xd4c   :  { %2000 = vmatpush.msra.mxu1 %v1060_v19 }
 0xd57   :  { %v8010_v28 = vpop.permute.xlu1 %1896 }
 0xd66   :  { %v1348_v33 = vpop.f32.mrf.mxu1 }
 0xd67   :  { %1854 = vrot.lane.b32.xlu1 %v1348_v33, %s7075_s18 }
 0xd74   :  { %v1510_v59 = vpop.xlane.xlu0 %1509 }
 0xd75   :  { %6740 = vrcp.f32 %v1510_v59  ;;  %v2252_v59 = vpop.xlane.xlu2 %2251 }
 0xd7b   :  { %v6741_v57 = vpop.eup %6740 }
 0xd7c   :  { %v1703_v29 = vpop.xlane.xlu0 %1702  ;;  %v1514_v60 = vmul.f32 %v6741_v57, %v7926_v52  ;;  %v2541_v52 = vsel %vm1104_vm10, %v7999_v16, -inf  ;;  %v8031_v57 = vpack.i.bf16 %v1060_v19, %v1063_v11 }
 0xd7d   :  { %6742 = vrcp.f32 %v1703_v29 }
 0xd7e   :  { %6197 = vmatmul.msk.f32.gmra.mxu1 %vm1104_vm10, %v1514_v60 }
 0xd82   :  { %v2054_v30 = vpop.xlane.xlu1 %2053 }
 0xd83   :  { %v6743_v34 = vpop.eup %6742 }
 0xd84   :  { %v1709_v6 = vmul.f32 %v6743_v34, %v7933_v48  ;;  %v1706_v51 = vpop.xlane.xlu0 %1705  ;;  %v2347_v34 = vpop.xlane.xlu2 %2346 }
 0xd85   :  { %6744 = vrcp.f32 %v1706_v51 }
 0xd86   :  { %6208 = vmatmul.msk.f32.vlgmr.msrb.gmra.mxu1 %vm1104_vm10, %v1709_v6 }
 0xd8a   :  { %v2151_v51 = vpop.xlane.xlu1 %2150 }
 0xd8b   :  { %v6745_v32 = vpop.eup %6744  ;;  %v2155_v8 = vsub.f32 %v7947_v26, %v2151_v51  ;;  %v2773_v26 = vld [vmem:[#allocation2 + $0x3f0] sm:$0xff] }
 0xd8c   :  { %v2249_v2 = vpop.xlane.xlu0 %2248  ;;  %v1710_v37 = vmul.f32 %v6745_v32, %v7940_v36  ;;  %v2056_v36 = vsub.f32 %v7938_v56, %v2054_v30  ;;  %v8037_v6 = vpop.xlane.xlu2 %2640  ;;  %v2254_v32 = vsub.f32 %v7892_v63, %v2252_v59  ;;  %2795 = vmatpush.msrb.mxu0 %v2773_v26 }
 0xd8e   :  { %6209 = vmatmul.msk.f32.gmra.mxu1 %vm1104_vm10, %v1710_v37  ;;  %v2059_v47 = vmul.f32 1.442695, %v2056_v36  ;;  %v2157_v37 = vmul.f32 1.442695, %v2155_v8  ;;  %v2257_v11 = vmul.f32 1.442695, %v2254_v32 }
 0xd91   :  { %2542 = vmax.xlane.f32.xlu1 %v2541_v52  ;;  %v2351_v52 = vsub.f32 %v7899_v49, %v2347_v34 }
 0xd92   :  { %v2445_v34 = vpop.xlane.xlu1 %2444 }
 0xd93   :  { %v1351_v23 = vpop.f32.mrf.mxu1  ;;  %v2353_v30 = vmul.f32 1.442695, %v2351_v52 }
 0xd94   :  { %v8005_v15 = vpop.xlane.xlu0 %2153  ;;  %1856 = vrot.lane.b32.xlu2 %v1351_v23, %s7075_s18  ;;  %v8041_v19 = vpop.xlane.xlu2 %2643  ;;  %v2253_v23 = vsub.f32 %v7950_v7, %v2249_v2  ;;  %v2772_v7 = vld [vmem:[#allocation2 + $0x3e0] sm:$0xff] }
 0xd95   :  { %2796 = vmatpush.msrb.mxu0 %v2772_v7 }
 0xd96   :  { %v2255_v36 = vmul.f32 1.442695, %v2253_v23  ;;  %v2449_v23 = vsub.f32 %v7961_v1, %v2445_v34 }
 0xd97   :  { %2797 = vmatpush.msrb.mxu0 %v2771_v41 }
 0xd9a   :  { %v2350_v51 = vpop.xlane.xlu1 %2349 }
 0xd9b   :  { %v2352_v1 = vsub.f32 %v7971_v35, %v2350_v51 }
 0xd9c   :  { %v8008_v48 = vpop.xlane.xlu0 %2447 }
 0xd9d   :  { %v2355_v7 = vmul.f32 1.442695, %v2352_v1 }
 0xda4   :  { %v8012_v25 = vpop.xlane.xlu0 %2062 }
 0xdac   :  { %v1971_v42 = vpop.xlane.xlu0 %1970 }
 0xdad   :  { %6746 = vrcp.f32 %v1971_v42 }
 0xdae   :  { %6748 = vpow2.f32 %v2059_v47 }
 0xdaf   :  { %6750 = vpow2.f32 %v1967_v53  ;;  %v2770_v53 = vld [vmem:[#allocation2 + $0x3c0] sm:$0xff] }
 0xdb0   :  { %6752 = vpow2.f32 %v2157_v37  ;;  %2798 = vmatpush.msrb.mxu0 %v2770_v53 }
 0xdb1   :  { %6754 = vpow2.f32 %v2257_v11 }
 0xdb2   :  { %6756 = vpow2.f32 %v2353_v30 }
 0xdb3   :  { %v6747_v46 = vpop.eup %6746  ;;  %6758 = vpow2.f32 %v2255_v36 }
 0xdb4   :  { %v1977_v9 = vmul.f32 %v6747_v46, %v6737_v61  ;;  %v8017_v4 = vpop.eup %6748  ;;  %v8026_v61 = vmul.f32 0.35355338, %v2536_v27 }
 0xdb5   :  { %v2064_v22 = vsel %vm1104_vm10, %v8017_v4, 0.0  ;;  %v8021_v56 = vpop.eup %6750 }
 0xdb6   :  { %6220 = vmatmul.msk.f32.vlgmr.msra.gmra.mxu1 %vm1104_vm10, %v1977_v9  ;;  %v1972_v44 = vsel %vm1104_vm10, %v8021_v56, 0.0  ;;  %v2544_v0 = vsel %vm1104_vm10, %v8026_v61, -inf  ;;  %v8047_v47 = vpop.eup %6752 }
 0xdb7   :  { %v8049_v58 = vpop.eup %6754  ;;  %v2161_v63 = vsel %vm1104_vm10, %v8047_v47, 0.0 }
 0xdb8   :  { %v2262_v49 = vsel %vm1104_vm10, %v8049_v58, 0.0  ;;  %v8057_v46 = vpop.eup %6756 }
 0xdb9   :  { %v8059_v9 = vpop.eup %6758 }
 0xdbd   :  { %2065 = vadd.xlane.f32.xlu2 %v2064_v22  ;;  %v2357_v22 = vsel %vm1104_vm10, %v8057_v46, 0.0 }
 0xdc5   :  { %1973 = vadd.xlane.f32.xlu2 %v1972_v44  ;;  %v2259_v44 = vsel %vm1104_vm10, %v8059_v9, 0.0 }
 0xdc6   :  { %v1544_v10 = vpop.f32.mrf.mxu1 }
 0xdc7   :  { %1870 = vrot.lane.b32.xlu0 %v1544_v10, %s7091_s5  ;;  %v2769_v10 = vld [vmem:[#allocation2 + $0x3b0] sm:$0xff] }
 0xdc8   :  { %2799 = vmatpush.msrb.mxu0 %v2769_v10 }
 0xdd9   :  { %v1855_v8 = vpop.permute.xlu1 %1854 }
 0xdee   :  { %v8045_v42 = vpop.permute.xlu2 %1856 }
 0xdf1   :  { %2545 = vmax.xlane.f32.xlu0 %v2544_v0  ;;  %v2768_v0 = vld [vmem:[#allocation2 + $0x3a0] sm:$0xff] }
 0xdf2   :  { %2800 = vmatpush.msrb.mxu0 %v2768_v0 }
 0xdfb   :  { %v1547_v33 = vpop.f32.mrf.mxu1 }
 0xdfc   :  { %1872 = vrot.lane.b32.xlu1 %v1547_v33, %s7091_s5  ;;  %v2767_v33 = vld [vmem:[#allocation2 + $0x390] sm:$0xff] }
 0xdfd   :  { %2801 = vmatpush.msrb.mxu0 %v2767_v33 }
 0xe03   :  { %v1740_v29 = vpop.f32.mrf.mxu1 }
 0xe04   :  { %6504 = vrot.lane.b32.xlu1 %v8031_v57, %s7089_s30  ;;  %1886 = vrot.lane.b32.xlu2 %v1740_v29, %s7083_s24  ;;  %v2543_v26 = vpop.xlane.xlu1 %2542 }
 0xe0b   :  { %v1743_v60 = vpop.f32.mrf.mxu1 }
 0xe0c   :  { %1888 = vrot.lane.b32.xlu0 %v1743_v60, %s7083_s24  ;;  %v2766_v60 = vld [vmem:[#allocation2 + $0x380] sm:$0xff] }
 0xe0d   :  { %2802 = vmatpush.msrb.mxu0 %v2766_v60 }
 0xe2d   :  { %2162 = vadd.xlane.f32.xlu2 %v2161_v63 }
 0xe2e   :  { %2263 = vadd.xlane.f32.xlu1 %v2262_v49 }
 0xe30   :  { %v8055_v2 = vpop.xlane.xlu2 %2065 }
 0xe36   :  { %2358 = vadd.xlane.f32.xlu1 %v2357_v22  ;;  %2260 = vadd.xlane.f32.xlu0 %v2259_v44  ;;  %v2547_v22 = vsub.f32 %v7999_v16, %v2543_v26 }
 0xe38   :  { %v1974_v27 = vpop.xlane.xlu2 %1973  ;;  %v2549_v10 = vmul.f32 1.442695, %v2547_v22 }
 0xe39   :  { %6760 = vrcp.f32 %v1974_v27  ;;  %v1871_v37 = vpop.permute.xlu0 %1870 }
 0xe3f   :  { %v6761_v59 = vpop.eup %6760 }
 0xe40   :  { %v1978_v29 = vmul.f32 %v6761_v59, %v8021_v56  ;;  %v1900_v56 = vsel %vm315_vm4, %v7823_v14, %v7853_v50  ;;  %v2451_v50 = vmul.f32 1.442695, %v2449_v23 }
 0xe41   :  { %v1902_v32 = vsel %vm1104_vm10, %v1900_v56, %v1855_v8 }
 0xe42   :  { %6221 = vmatmul.msk.f32.gmra.mxu1 %vm1104_vm10, %v1978_v29  ;;  %v1905_v11 = vsel %vm1904_vm11, %v1902_v32, %v7882_v45  ;;  %v2156_v45 = vsub.f32 %v7964_v31, %v8005_v15  ;;  %6762 = vpow2.f32 %v2451_v50 }
 0xe43   :  { %v1907_v52 = vsel %vm147_vm3, %v1905_v11, %v1871_v37 }
 0xe44   :  { %v1910_v30 = vsel %vm1909_vm12, %v1907_v52, %v7920_v3  ;;  %v2159_v49 = vmul.f32 1.442695, %v2156_v45  ;;  %v2645_v3 = vsub.f32 %v7905_v24, %v8037_v6 }
 0xe45   :  { %6514 = vrot.lane.b32.xlu2 %v8031_v57, %s7087_s28 }
 0xe46   :  { %6764 = vpow2.f32 %v2159_v49  ;;  %v2647_v53 = vmul.f32 1.442695, %v2645_v3 }
 0xe47   :  { %6766 = vpow2.f32 %v2355_v7 }
 0xe48   :  { %v8092_v41 = vpop.eup %6762  ;;  %6768 = vpow2.f32 %v2647_v53 }
 0xe49   :  { %v2455_v35 = vsel %vm1104_vm10, %v8092_v41, 0.0  ;;  %6770 = vrcp.f32 %v8012_v25 }
 0xe4a   :  { %6509 = vrot.lane.b32.xlu0 %v8031_v57, %s7092_s7 }
 0xe4c   :  { %v8100_v6 = vpop.eup %6764 }
 0xe4d   :  { %v2164_v16 = vsel %vm1104_vm10, %v8100_v6, 0.0 }
 0xe4f   :  { %6519 = vrot.lane.b32.xlu1 %v8031_v57, %s7090_s4 }
 0xe5e   :  { %v1887_v36 = vpop.permute.xlu2 %1886 }
 0xe5f   :  { %v1913_v14 = vsel %vm1912_vm13, %v1910_v30, %v1887_v36 }
 0xe60   :  { %v1916_v63 = vsel %vm1915_vm14, %v1913_v14, %v7923_v40  ;;  %v2450_v40 = vsub.f32 %v7974_v20, %v8008_v48  ;;  %v8103_v20 = vpop.eup %6766 }
 0xe61   :  { %6264 = vmatmul.msk.f32.vlgmr.msrb.gmra.mxu0 %vm56_vm0, %v1916_v63  ;;  %v8107_v27 = vpop.eup %6768  ;;  %v2360_v0 = vsel %vm1104_vm10, %v8103_v20, 0.0 }
 0xe62   :  { %v2453_v15 = vmul.f32 1.442695, %v2450_v40  ;;  %v6771_v25 = vpop.eup %6770  ;;  %v2651_v34 = vsel %vm1104_vm10, %v8107_v27, 0.0 }
 0xe64   :  { %v2546_v31 = vpop.xlane.xlu0 %2545  ;;  %6772 = vpow2.f32 %v2453_v15 }
 0xe65   :  { %v2548_v24 = vsub.f32 %v8026_v61, %v2546_v31  ;;  %6774 = vpow2.f32 %v2549_v10  ;;  %v1901_v61 = vsel %vm315_vm4, %v7828_v43, %v7985_v13  ;;  %v2069_v43 = vmul.f32 %v6771_v25, %v7981_v55 }
 0xe66   :  { %v1903_v59 = vsel %vm1104_vm10, %v1901_v61, %v8045_v42 }
 0xe67   :  { %v2551_v48 = vmul.f32 1.442695, %v2548_v24  ;;  %v1906_v13 = vsel %vm1904_vm11, %v1903_v59, %v7931_v54 }
 0xe69   :  { %6776 = vpow2.f32 %v2551_v48 }
 0xe6a   :  { %v8116_v60 = vpop.eup %6772  ;;  %6778 = vrcp.f32 %v8055_v2 }
 0xe6b   :  { %v8121_v8 = vpop.eup %6774  ;;  %v2458_v56 = vsel %vm1104_vm10, %v8116_v60, 0.0 }
 0xe6c   :  { %v2553_v32 = vsel %vm1104_vm10, %v8121_v8, 0.0 }
 0xe6e   :  { %v1873_v44 = vpop.permute.xlu1 %1872  ;;  %2456 = vadd.xlane.f32.xlu2 %v2455_v35 }
 0xe6f   :  { %v1908_v42 = vsel %vm147_vm3, %v1906_v13, %v1873_v44  ;;  %v8130_v2 = vpop.eup %6776  ;;  %v8165_v44 = vld [vmem:[%s9471_s2 + $0x20] ss:$0 sm:$0xff] }
 0xe70   :  { %v1911_v55 = vsel %vm1909_vm12, %v1908_v42, %v7956_v21  ;;  %v6779_v54 = vpop.eup %6778  ;;  %v2556_v52 = vsel %vm1104_vm10, %v8130_v2, 0.0 }
 0xe71   :  { %v2070_v30 = vmul.f32 %v6779_v54, %v8017_v4 }
 0xe74   :  { %2165 = vadd.xlane.f32.xlu0 %v2164_v16 }
 0xe76   :  { %v6505_v33 = vpop.permute.xlu1 %6504  ;;  %2361 = vadd.xlane.f32.xlu2 %v2360_v0 }
 0xe77   :  { %v6506_v29 = vunpack.i.l.bf16 %v6505_v33  ;;  %v6507_v51 = vunpack.i.h.bf16 %v6505_v33 }
 0xe79   :  { %2652 = vadd.xlane.f32.xlu1 %v2651_v34  ;;  %2099 = vmatpush.msrb.mxu2 %v6506_v29 }
 0xe7b   :  { %2100 = vmatpush.msrb.mxu2 %v6507_v51 }
 0xe7c   :  { %6226 = vmatmul.msk.f32.vlgmr.msrb.gmra.mxu2 %vm1104_vm10, %v2069_v43  ;;  %2459 = vadd.xlane.f32.xlu0 %v2458_v56 }
 0xe7e   :  { %2554 = vadd.xlane.f32.xlu2 %v2553_v32  ;;  %v1889_v37 = vpop.permute.xlu0 %1888 }
 0xe7f   :  { %v1914_v11 = vsel %vm1912_vm13, %v1911_v55, %v1889_v37 }
 0xe80   :  { %v1917_v23 = vsel %vm1915_vm14, %v1914_v11, %v8010_v28  ;;  %v2646_v28 = vsub.f32 %v7911_v12, %v8041_v19 }
 0xe81   :  { %2557 = vadd.xlane.f32.xlu1 %v2556_v52  ;;  %6265 = vmatmul.msk.f32.gmra.mxu0 %vm56_vm0, %v1917_v23 }
 0xe82   :  { %v2649_v63 = vmul.f32 1.442695, %v2646_v28 }
 0xe84   :  { %6227 = vmatmul.msk.f32.gmra.mxu2 %vm1104_vm10, %v2070_v30 }
 0xe90   :  { %6524 = vrot.lane.b32.xlu0 %v8031_v57, %s7093_s8 }
 0xe96   :  { %6529 = vrot.lane.b32.xlu2 %v8031_v57, %s7086_s27 }
 0xe9e   :  { %6534 = vrot.lane.b32.xlu2 %v8031_v57, %s7084_s25 }
 0xea0   :  { %v2163_v21 = vpop.xlane.xlu2 %2162 }
 0xea1   :  { %6780 = vrcp.f32 %v2163_v21  ;;  %v2264_v1 = vpop.xlane.xlu1 %2263 }
 0xea2   :  { %6782 = vpow2.f32 %v2649_v63 }
 0xea7   :  { %v6781_v14 = vpop.eup %6780 }
 0xea8   :  { %v6515_v36 = vpop.permute.xlu2 %6514  ;;  %v2169_v45 = vmul.f32 %v6781_v14, %v8047_v47  ;;  %v8154_v57 = vpop.eup %6782 }
 0xea9   :  { %v6516_v50 = vunpack.i.l.bf16 %v6515_v36  ;;  %v6517_v4 = vunpack.i.h.bf16 %v6515_v36  ;;  %v2261_v49 = vpop.xlane.xlu0 %2260  ;;  %v2359_v26 = vpop.xlane.xlu1 %2358  ;;  %v2654_v12 = vsel %vm1104_vm10, %v8154_v57, 0.0 }
 0xeaa   :  { %6784 = vrcp.f32 %v2261_v49 }
 0xeab   :  { %2197 = vmatpush.msrb.mxu1 %v6516_v50  ;;  %6786 = vrcp.f32 %v2264_v1 }
 0xead   :  { %2198 = vmatpush.msrb.mxu1 %v6517_v4 }
 0xeae   :  { %6232 = vmatmul.msk.f32.vlgmr.msrb.gmra.mxu1 %vm1104_vm10, %v2169_v45 }
 0xeb0   :  { %v6785_v3 = vpop.eup %6784 }
 0xeb1   :  { %v2267_v47 = vmul.f32 %v6785_v3, %v8059_v9  ;;  %v6787_v35 = vpop.eup %6786 }
 0xeb2   :  { %v2268_v15 = vmul.f32 %v6787_v35, %v8049_v58 }
 0xeba   :  { %2655 = vadd.xlane.f32.xlu0 %v2654_v12 }
 0xebc   :  { %v6510_v19 = vpop.permute.xlu0 %6509 }
 0xebd   :  { %v6511_v7 = vunpack.i.l.bf16 %v6510_v19  ;;  %v6512_v40 = vunpack.i.h.bf16 %v6510_v19  ;;  %v8204_v19 = vpop.f32.mrf.mxu1 }
 0xebf   :  { %2295 = vmatpush.msra.mxu2 %v6511_v7 }
 0xec1   :  { %v6520_v53 = vpop.permute.xlu1 %6519  ;;  %2296 = vmatpush.msra.mxu2 %v6512_v40 }
 0xec2   :  { %v6521_v22 = vunpack.i.l.bf16 %v6520_v53  ;;  %6238 = vmatmul.msk.f32.vlgmr.msra.gmra.mxu2 %vm1104_vm10, %v2267_v47  ;;  %v6522_v31 = vunpack.i.h.bf16 %v6520_v53 }
 0xec4   :  { %2491 = vmatpush.msrb.mxu2 %v6521_v22 }
 0xec5   :  { %v8206_v7 = vpop.f32.mrf.mxu1 }
 0xec6   :  { %2492 = vmatpush.msrb.mxu2 %v6522_v31 }
 0xeca   :  { %6239 = vmatmul.msk.f32.gmra.mxu2 %vm1104_vm10, %v2268_v15 }
 0xede   :  { %v2804_v24 = vpop.f32.mrf.mxu0 }
 0xedf   :  { %v2805_v9 = vadd.f32 %v2804_v24, %v8165_v44 }
 0xee1   :  { %v8169_v10 = vadd.f32 %v2805_v9, %v7359_v62  ;;  %v2457_v48 = vpop.xlane.xlu2 %2456 }
 0xee2   :  { %6788 = vrcp.f32 %v2457_v48 }
 0xee3   :  { %v2822_v16 = vsel %vm56_vm0, %v8169_v10, 0.0 }
 0xee4   :  { %2823 = vadd.xlane.f32.xlu2 %v2822_v16 }
 0xee7   :  { %v2166_v58 = vpop.xlane.xlu0 %2165 }
 0xee8   :  { %v6789_v0 = vpop.eup %6788  ;;  %6790 = vrcp.f32 %v2166_v58 }
 0xee9   :  { %v2463_v61 = vmul.f32 %v6789_v0, %v8092_v41  ;;  %v2362_v33 = vpop.xlane.xlu2 %2361 }
 0xeeb   :  { %6250 = vmatmul.msk.f32.vlgmr.msrb.gmra.mxu2 %vm1104_vm10, %v2463_v61 }
 0xeec   :  { %v2653_v34 = vpop.xlane.xlu1 %2652 }
 0xeee   :  { %v6791_v25 = vpop.eup %6790 }
 0xeef   :  { %v2460_v59 = vpop.xlane.xlu0 %2459  ;;  %v2170_v29 = vmul.f32 %v6791_v25, %v8100_v6 }
 0xef0   :  { %6792 = vrcp.f32 %v2460_v59 }
 0xef1   :  { %v2555_v62 = vpop.xlane.xlu2 %2554  ;;  %6233 = vmatmul.msk.f32.gmra.mxu1 %vm1104_vm10, %v2170_v29  ;;  %6794 = vrcp.f32 %v2653_v34  ;;  %v2925_v29 = vld [vmem:[#allocation2 + $0x470] sm:$0xff] }
 0xef2   :  { %6796 = vrcp.f32 %v2359_v26  ;;  %v2923_v34 = vld [vmem:[#allocation2 + $0x450] sm:$0xff] }
 0xef3   :  { %6798 = vrcp.f32 %v2362_v33 }
 0xef4   :  { %6800 = vrcp.f32 %v2555_v62  ;;  %v2558_v14 = vpop.xlane.xlu1 %2557  ;;  %v2924_v62 = vld [vmem:[#allocation2 + $0x460] sm:$0xff] }
 0xef5   :  { %6802 = vrcp.f32 %v2558_v14 }
 0xef6   :  { %v6793_v51 = vpop.eup %6792 }
 0xef7   :  { %v2464_v43 = vmul.f32 %v6793_v51, %v8116_v60  ;;  %v6795_v42 = vpop.eup %6794  ;;  %v2922_v51 = vld [vmem:[#allocation2 + $0x440] sm:$0xff] }
 0xef8   :  { %v2659_v6 = vmul.f32 %v6795_v42, %v8107_v27  ;;  %v6797_v54 = vpop.eup %6796  ;;  %v2918_v42 = vld [vmem:[#allocation2 + $0x400] sm:$0xff] }
 0xef9   :  { %v6530_v13 = vpop.permute.xlu2 %6529  ;;  %6251 = vmatmul.msk.f32.gmra.mxu2 %vm1104_vm10, %v2464_v43  ;;  %v2365_v27 = vmul.f32 %v6797_v54, %v8057_v46  ;;  %v6799_v28 = vpop.eup %6798  ;;  %v2921_v43 = vld [vmem:[#allocation2 + $0x430] sm:$0xff] }
 0xefa   :  { %v6531_v41 = vunpack.i.l.bf16 %v6530_v13  ;;  %v6532_v56 = vunpack.i.h.bf16 %v6530_v13  ;;  %v2366_v36 = vmul.f32 %v6799_v28, %v8103_v20  ;;  %v6801_v50 = vpop.eup %6800  ;;  %v2920_v13 = vld [vmem:[#allocation2 + $0x420] sm:$0xff] }
 0xefb   :  { %v2561_v4 = vmul.f32 %v6801_v50, %v8121_v8  ;;  %v6803_v46 = vpop.eup %6802 }
 0xefc   :  { %2687 = vmatpush.msra.mxu2 %v6531_v41  ;;  %v2562_v63 = vmul.f32 %v6803_v46, %v8130_v2  ;;  %v2919_v41 = vld [vmem:[#allocation2 + $0x410] sm:$0xff] }
 0xefe   :  { %2688 = vmatpush.msra.mxu2 %v6532_v56  ;;  %v2807_v32 = vpop.f32.mrf.mxu0 }
 0xeff   :  { %v2808_v55 = vadd.f32 %v2807_v32, %v8165_v44  ;;  %v2102_v3 = vpop.f32.mrf.mxu2 }
 0xf01   :  { %v8182_v37 = vadd.f32 %v2808_v55, %v7365_v17  ;;  %6262 = vmatmul.msk.f32.vlgmr.msra.gmra.mxu2 %vm1104_vm10, %v2659_v6  ;;  %v6535_v23 = vpop.permute.xlu2 %6534 }
 0xf02   :  { %v6525_v60 = vpop.permute.xlu0 %6524  ;;  %v6536_v21 = vunpack.i.l.bf16 %v6535_v23  ;;  %v6537_v17 = vunpack.i.h.bf16 %v6535_v23 }
 0xf03   :  { %v6526_v11 = vunpack.i.l.bf16 %v6525_v60  ;;  %v2825_v52 = vsel %vm56_vm0, %v8182_v37, 0.0  ;;  %v6527_v30 = vunpack.i.h.bf16 %v6525_v60 }
 0xf04   :  { %2826 = vadd.xlane.f32.xlu1 %v2825_v52 }
 0xf05   :  { %2393 = vmatpush.msra.mxu1 %v6526_v11 }
 0xf07   :  { %2394 = vmatpush.msra.mxu1 %v6527_v30  ;;  %v8233_v30 = vld [vmem:[%s9471_s2 + $0x15] ss:$0 sm:$0xff] }
 0xf08   :  { %6244 = vmatmul.msk.f32.vlgmr.msra.gmra.mxu1 %vm1104_vm10, %v2365_v27 }
 0xf09   :  { %2589 = vmatpush.msrb.mxu1 %v6536_v21 }
 0xf0b   :  { %2590 = vmatpush.msrb.mxu1 %v6537_v17  ;;  %v8239_v17 = vld [vmem:[%s9471_s2 + $0x16] ss:$0 sm:$0xff] }
 0xf0d   :  { %2947 = vmatpush.msra.mxu1 %v2925_v29 }
 0xf0f   :  { %2948 = vmatpush.msra.mxu1 %v2924_v62 }
 0xf10   :  { %6245 = vmatmul.msk.f32.gmra.mxu1 %vm1104_vm10, %v2366_v36 }
 0xf11   :  { %2949 = vmatpush.msra.mxu1 %v2923_v34 }
 0xf13   :  { %2950 = vmatpush.msra.mxu1 %v2922_v51 }
 0xf15   :  { %2951 = vmatpush.msra.mxu1 %v2921_v43 }
 0xf17   :  { %2952 = vmatpush.msra.mxu1 %v2920_v13 }
 0xf18   :  { %6256 = vmatmul.msk.f32.vlgmr.msrb.gmra.mxu1 %vm1104_vm10, %v2561_v4 }
 0xf19   :  { %2953 = vmatpush.msra.mxu1 %v2919_v41 }
 0xf1b   :  { %2954 = vmatpush.msra.mxu1 %v2918_v42 }
 0xf20   :  { %6257 = vmatmul.msk.f32.gmra.mxu1 %vm1104_vm10, %v2562_v63 }
 0xf2b   :  { %v2200_v40 = vpop.f32.mrf.mxu1 }
 0xf2d   :  { %v2656_v45 = vpop.xlane.xlu0 %2655 }
 0xf2e   :  { %6804 = vrcp.f32 %v2656_v45 }
 0xf34   :  { %v6805_v1 = vpop.eup %6804 }
 0xf35   :  { %v2660_v49 = vmul.f32 %v6805_v1, %v8154_v57  ;;  %v2105_v57 = vpop.f32.mrf.mxu2 }
 0xf37   :  { %6263 = vmatmul.msk.f32.gmra.mxu2 %vm1104_vm10, %v2660_v49 }
 0xf45   :  { %v2298_v22 = vpop.f32.mrf.mxu2 }
 0xf4d   :  { %v2301_v48 = vpop.f32.mrf.mxu2 }
 0xf57   :  { %v2824_v20 = vpop.xlane.xlu2 %2823 }
 0xf58   :  { %v2834_v26 = vmul.f32 %v2824_v20, %v7139_v39 }
 0xf5a   :  { %v8199_v12 = vsub.f32 %v8169_v10, %v2834_v26 }
 0xf5c   :  { %v2842_v8 = vmul.f32 %v8199_v12, %v8199_v12 }
 0xf5e   :  { %v2846_v2 = vsel %vm56_vm0, %v2842_v8, 0.0 }
 0xf5f   :  { %2847 = vadd.xlane.f32.xlu0 %v2846_v2 }
 0xf6e   :  { %v2203_v15 = vpop.f32.mrf.mxu1  ;;  %v2494_v58 = vpop.f32.mrf.mxu2 }
 0xf73   :  { %2698 = vrot.lane.b32.xlu0 %v2102_v3, %s7082_s23 }
 0xf77   :  { %v2827_v47 = vpop.xlane.xlu1 %2826 }
 0xf78   :  { %v2835_v53 = vmul.f32 %v2827_v47, %v7139_v39 }
 0xf7a   :  { %v8211_v31 = vsub.f32 %v8182_v37, %v2835_v53 }
 0xf7b   :  { %2714 = vrot.lane.b32.xlu0 %v2298_v22, %s7085_s26 }
 0xf7c   :  { %v2843_v35 = vmul.f32 %v8211_v31, %v8211_v31  ;;  %v2497_v61 = vpop.f32.mrf.mxu2 }
 0xf7e   :  { %v2849_v24 = vsel %vm56_vm0, %v2843_v35, 0.0 }
 0xf7f   :  { %2850 = vadd.xlane.f32.xlu1 %v2849_v24 }
 0xf84   :  { %v2690_v33 = vpop.f32.mrf.mxu2 }
 0xf85   :  { %v2396_v9 = vpop.f32.mrf.mxu1 }
 0xf86   :  { %2722 = vrot.lane.b32.xlu2 %v2396_v9, %s7091_s5 }
 0xf8d   :  { %v2399_v16 = vpop.f32.mrf.mxu1 }
 0xf8e   :  { %2724 = vrot.lane.b32.xlu2 %v2399_v16, %s7091_s5 }
 0xf95   :  { %v2592_v0 = vpop.f32.mrf.mxu1 }
 0xf96   :  { %2738 = vrot.lane.b32.xlu0 %v2592_v0, %s7083_s24 }
 0xf98   :  { %2706 = vrot.lane.b32.xlu1 %v2200_v40, %s7075_s18 }
 0xf9d   :  { %v2595_v25 = vpop.f32.mrf.mxu1 }
 0xf9e   :  { %2700 = vrot.lane.b32.xlu0 %v2105_v57, %s7082_s23 }
 0xfa0   :  { %2730 = vrot.lane.b32.xlu1 %v2494_v58, %s7088_s29 }
 0xfa6   :  { %2716 = vrot.lane.b32.xlu0 %v2301_v48, %s7085_s26 }
 0xfa8   :  { %2746 = vrot.lane.b32.xlu1 %v2690_v33, %s7081_s22 }
 0xfae   :  { %2740 = vrot.lane.b32.xlu0 %v2595_v25, %s7083_s24 }
 0xfb0   :  { %2708 = vrot.lane.b32.xlu1 %v2203_v15, %s7075_s18 }
 0xfb8   :  { %2732 = vrot.lane.b32.xlu1 %v2497_v61, %s7088_s29 }
 0xfba   :  { %v2693_v59 = vpop.f32.mrf.mxu2 }
 0xfbb   :  { %2748 = vrot.lane.b32.xlu2 %v2693_v59, %s7081_s22 }
 0xfd2   :  { %v2848_v56 = vpop.xlane.xlu0 %2847 }
 0xfd3   :  { %v2858_v32 = vmul.f32 %v2848_v56, %v7139_v39 }
 0xfd5   :  { %v2862_v6 = vadd.f32 1e-05, %v2858_v32 }
 0xfd7   :  { %6806 = vrsqrt.f32 %v2862_v6  ;;  %vm2872_vm1 = vweird.f32 %v2862_v6 }
 0xfdd   :  { %v6807_v55 = vpop.eup %6806 }
 0xfde   :  { %v2867_v60 = vmul.f32 %v6807_v55, %v2862_v6  ;;  %vm2873_vm15 = vweird.f32 %v6807_v55 }
 0xfdf   :  { %vm2874_vm2 = vmor %vm2872_vm1, %vm2873_vm15 }
 0xfe0   :  { %v2868_v54 = vmul.f32 %v6807_v55, %v2867_v60  ;;  %v2723_v24 = vpop.permute.xlu2 %2722 }
 0xfe2   :  { %v2869_v11 = vmul.f32 0.5, %v2868_v54 }
 0xfe4   :  { %v2870_v52 = vsub.f32 1.5, %v2869_v11  ;;  %v3135_v11 = vld [vmem:[#allocation2 + $0x4f0] sm:$0xff] }
 0xfe5   :  { %v2699_v46 = vpop.permute.xlu0 %2698  ;;  %3157 = vmatpush.msrb.mxu3 %v3135_v11 }
 0xfe6   :  { %v2871_v23 = vmul.f32 %v6807_v55, %v2870_v52  ;;  %v2752_v53 = vsel %vm315_vm4, %v8204_v19, %v2699_v46  ;;  %v3134_v52 = vld [vmem:[#allocation2 + $0x4e0] sm:$0xff] }
 0xfe7   :  { %3158 = vmatpush.msrb.mxu3 %v3134_v52 }
 0xfe8   :  { %v2875_v27 = vsel %vm2874_vm2, %v6807_v55, %v2871_v23  ;;  %v2725_v25 = vpop.permute.xlu2 %2724  ;;  %v3133_v23 = vld [vmem:[#allocation2 + $0x4d0] sm:$0xff] }
 0xfe9   :  { %v2906_v21 = vmul.f32 %v2875_v27, %v8199_v12  ;;  %3159 = vmatpush.msrb.mxu3 %v3133_v23  ;;  %v3132_v27 = vld [vmem:[#allocation2 + $0x4c0] sm:$0xff] }
 0xfeb   :  { %v2910_v28 = vmul.f32 %v2906_v21, %v8233_v30  ;;  %3160 = vmatpush.msrb.mxu3 %v3132_v27 }
 0xfed   :  { %v2914_v36 = vadd.f32 %v2910_v28, %v8239_v17  ;;  %v2715_v26 = vpop.permute.xlu0 %2714 }
 0xfef   :  { %6268 = vmatmul.msk.f32.vlgmr.msra.gmra.mxu1 %vm56_vm0, %v2914_v36  ;;  %v3131_v36 = vld [vmem:[#allocation2 + $0x4b0] sm:$0xff] }
 0xff0   :  { %3161 = vmatpush.msrb.mxu3 %v3131_v36 }
 0xff2   :  { %v2851_v14 = vpop.xlane.xlu1 %2850 }
 0xff3   :  { %v2859_v50 = vmul.f32 %v2851_v14, %v7139_v39 }
 0xff5   :  { %v2863_v4 = vadd.f32 1e-05, %v2859_v50  ;;  %v3130_v50 = vld [vmem:[#allocation2 + $0x4a0] sm:$0xff] }
 0xff6   :  { %3162 = vmatpush.msrb.mxu3 %v3130_v50 }
 0xff7   :  { %6808 = vrsqrt.f32 %v2863_v4  ;;  %vm2882_vm6 = vweird.f32 %v2863_v4 }
 0xffd   :  { %v6809_v63 = vpop.eup %6808 }
 0xffe   :  { %v2877_v45 = vmul.f32 %v6809_v63, %v2863_v4  ;;  %vm2883_vm5 = vweird.f32 %v6809_v63 }
 0xfff   :  { %vm2884_vm7 = vmor %vm2882_vm6, %vm2883_vm5 }
0x1000   :  { %v2878_v1 = vmul.f32 %v6809_v63, %v2877_v45  ;;  %v3129_v45 = vld [vmem:[#allocation2 + $0x490] sm:$0xff] }
0x1001   :  { %3163 = vmatpush.msrb.mxu3 %v3129_v45 }
0x1002   :  { %v2879_v49 = vmul.f32 0.5, %v2878_v1 }
0x1004   :  { %v2880_v20 = vsub.f32 1.5, %v2879_v49  ;;  %v3128_v49 = vld [vmem:[#allocation2 + $0x480] sm:$0xff] }
0x1005   :  { %3164 = vmatpush.msrb.mxu3 %v3128_v49 }
0x1006   :  { %v2881_v12 = vmul.f32 %v6809_v63, %v2880_v20 }
0x1008   :  { %v2885_v8 = vsel %vm2884_vm7, %v6809_v63, %v2881_v12  ;;  %v2739_v40 = vpop.permute.xlu0 %2738 }
0x1009   :  { %v2907_v2 = vmul.f32 %v2885_v8, %v8211_v31 }
0x100a   :  { %v2707_v3 = vpop.permute.xlu1 %2706 }
0x100b   :  { %v2911_v57 = vmul.f32 %v2907_v2, %v8233_v30  ;;  %v2754_v22 = vsel %vm1104_vm10, %v2752_v53, %v2707_v3 }
0x100c   :  { %v2756_v15 = vsel %vm1904_vm11, %v2754_v22, %v2715_v26 }
0x100d   :  { %v2915_v47 = vadd.f32 %v2911_v57, %v8239_v17  ;;  %v2758_v9 = vsel %vm147_vm3, %v2756_v15, %v2723_v24 }
0x100f   :  { %6269 = vmatmul.msk.f32.gmra.mxu1 %vm56_vm0, %v2915_v47 }
0x1010   :  { %v2701_v31 = vpop.permute.xlu0 %2700 }
0x1011   :  { %v2753_v33 = vsel %vm315_vm4, %v8206_v7, %v2701_v31  ;;  %v8270_v7 = vld [vmem:[%s9471_s2 + $0x21] ss:$0 sm:$0xff] }
0x1012   :  { %v2731_v35 = vpop.permute.xlu1 %2730 }
0x1013   :  { %v2760_v48 = vsel %vm1909_vm12, %v2758_v9, %v2731_v35 }
0x1014   :  { %v2762_v58 = vsel %vm1912_vm13, %v2760_v48, %v2739_v40 }
0x1015   :  { %v2749_v13 = vpop.permute.xlu2 %2748 }
0x1018   :  { %v2717_v19 = vpop.permute.xlu0 %2716 }
0x101a   :  { %v2747_v16 = vpop.permute.xlu1 %2746 }
0x101b   :  { %v2764_v0 = vsel %vm1915_vm14, %v2762_v58, %v2747_v16 }
0x101c   :  { %6266 = vmatmul.msk.f32.gmra.mxu0 %vm56_vm0, %v2764_v0 }
0x1020   :  { %v2741_v51 = vpop.permute.xlu0 %2740 }
0x1022   :  { %v2709_v61 = vpop.permute.xlu1 %2708 }
0x1023   :  { %v2755_v59 = vsel %vm1104_vm10, %v2753_v33, %v2709_v61 }
0x1024   :  { %v2757_v29 = vsel %vm1904_vm11, %v2755_v59, %v2717_v19 }
0x1025   :  { %v2759_v34 = vsel %vm147_vm3, %v2757_v29, %v2725_v25 }
0x102a   :  { %v2733_v62 = vpop.permute.xlu1 %2732 }
0x102b   :  { %v2761_v43 = vsel %vm1909_vm12, %v2759_v34, %v2733_v62 }
0x102c   :  { %v2763_v41 = vsel %vm1912_vm13, %v2761_v43, %v2741_v51 }
0x102d   :  { %v2765_v42 = vsel %vm1915_vm14, %v2763_v41, %v2749_v13 }
0x102e   :  { %6267 = vmatmul.msk.f32.gmra.mxu0 %vm56_vm0, %v2765_v42 }
0x106c   :  { %v2956_v56 = vpop.f32.mrf.mxu1 }
0x106d   :  { %v8273_v32 = vadd.f32 %v2956_v56, %v8270_v7 }
0x106f   :  { %v8276_v6 = vmul.f32 0.70710677, %v8273_v32  ;;  %v2968_v56 = vmul.f32 0.5, %v8273_v32 }
0x1071   :  { %v2976_v55 = vand.u32 2147483647, %v8276_v6  ;;  %vm3108_vm2 = vcmp.ge.f32.partialorder %v8276_v6, 0.0 }
0x1073   :  { %v2980_v60 = vmul.f32 0.3275911, %v2976_v55  ;;  %v3084_v8 = vsub.f32 0.0, %v2976_v55 }
0x1075   :  { %v2984_v54 = vadd.f32 1.0, %v2980_v60  ;;  %v3088_v57 = vmul.f32 %v3084_v8, %v2976_v55 }
0x1077   :  { %6810 = vrcp.f32 %v2984_v54  ;;  %v2999_v4 = vand.u32 2147483648, %v2984_v54  ;;  %v2997_v63 = vand.u32 2147483647, %v2984_v54  ;;  %vm2993_vm9 = vweird.f32 %v2984_v54 }
0x1078   :  { %v3092_v35 = vmul.f32 1.442695, %v3088_v57 }
0x1079   :  { %v3000_v20 = vor.u32 1.1754944e-38, %v2999_v4  ;;  %vm2998_vm1 = vcmp.eq.f32.partialorder %v2997_v63, 8.507059e+37 }
0x107a   :  { %6812 = vpow2.f32 %v3092_v35 }
0x107d   :  { %v6811_v21 = vpop.eup %6810 }
0x107e   :  { %v2989_v28 = vmul.f32 %v6811_v21, %v2984_v54  ;;  %vm2994_vm8 = vweird.f32 %v6811_v21 }
0x107f   :  { %vm2995_vm15 = vmor %vm2993_vm9, %vm2994_vm8 }
0x1080   :  { %v2990_v14 = vsub.f32 1.0, %v2989_v28  ;;  %v6813_v61 = vpop.eup %6812 }
0x1082   :  { %v2991_v46 = vmul.f32 %v6811_v21, %v2990_v14 }
0x1084   :  { %v2992_v1 = vadd.f32 %v6811_v21, %v2991_v46 }
0x1086   :  { %v2996_v26 = vsel %vm2995_vm15, %v6811_v21, %v2992_v1 }
0x1087   :  { %v3001_v12 = vsel %vm2998_vm1, %v3000_v20, %v2996_v26 }
0x1088   :  { %v3048_v2 = vmul.f32 1.0614054, %v3001_v12 }
0x108a   :  { %v6272_v3 = vadd.f32 -1.4531521, %v3048_v2 }
0x108c   :  { %v3056_v40 = vmul.f32 %v6272_v3, %v3001_v12  ;;  %v2959_v47 = vpop.f32.mrf.mxu1 }
0x108d   :  { %v8280_v53 = vadd.f32 %v2959_v47, %v8270_v7 }
0x108e   :  { %v3060_v22 = vadd.f32 1.4214138, %v3056_v40 }
0x108f   :  { %v8283_v15 = vmul.f32 0.70710677, %v8280_v53 }
0x1090   :  { %v3064_v24 = vmul.f32 %v3060_v22, %v3001_v12 }
0x1091   :  { %v2977_v9 = vand.u32 2147483647, %v8283_v15  ;;  %vm3109_vm9 = vcmp.ge.f32.partialorder %v8283_v15, 0.0 }
0x1092   :  { %v6276_v31 = vadd.f32 -0.28449672, %v3064_v24 }
0x1093   :  { %v2981_v48 = vmul.f32 0.3275911, %v2977_v9  ;;  %v3085_v21 = vsub.f32 0.0, %v2977_v9 }
0x1094   :  { %v3072_v16 = vmul.f32 %v6276_v31, %v3001_v12 }
0x1095   :  { %v2985_v58 = vadd.f32 1.0, %v2981_v48  ;;  %v3089_v14 = vmul.f32 %v3085_v21, %v2977_v9 }
0x1096   :  { %v3076_v0 = vadd.f32 0.2548296, %v3072_v16 }
0x1097   :  { %6814 = vrcp.f32 %v2985_v58  ;;  %v3014_v60 = vand.u32 2147483648, %v2985_v58  ;;  %v3012_v11 = vand.u32 2147483647, %v2985_v58  ;;  %vm3008_vm6 = vweird.f32 %v2985_v58 }
0x1098   :  { %v3080_v19 = vmul.f32 %v3076_v0, %v3001_v12  ;;  %v3094_v45 = vmul.f32 1.442695, %v3089_v14 }
0x1099   :  { %v2810_v33 = vpop.f32.mrf.mxu0  ;;  %v3015_v23 = vor.u32 1.1754944e-38, %v3014_v60  ;;  %vm3013_vm8 = vcmp.eq.f32.partialorder %v3012_v11, 8.507059e+37 }
0x109a   :  { %v3100_v25 = vmul.f32 %v6813_v61, %v3080_v19  ;;  %v2811_v59 = vadd.f32 %v2810_v33, %v8165_v44  ;;  %6816 = vpow2.f32 %v3094_v45 }
0x109c   :  { %v3104_v29 = vsub.f32 1.0, %v3100_v25  ;;  %v8288_v62 = vadd.f32 %v2811_v59, %v7425_v18 }
0x109d   :  { %v6815_v34 = vpop.eup %6814 }
0x109e   :  { %v3112_v51 = vsub.f32 0.0, %v3104_v29  ;;  %v3004_v43 = vmul.f32 %v6815_v34, %v2985_v58  ;;  %v2828_v13 = vsel %vm56_vm0, %v8288_v62, 0.0  ;;  %vm3009_vm5 = vweird.f32 %v6815_v34 }
0x109f   :  { %2829 = vadd.xlane.f32.xlu1 %v2828_v13  ;;  %vm3010_vm7 = vmor %vm3008_vm6, %vm3009_vm5 }
0x10a0   :  { %v3116_v41 = vsel %vm3108_vm2, %v3104_v29, %v3112_v51  ;;  %v3005_v42 = vsub.f32 1.0, %v3004_v43  ;;  %v6817_v2 = vpop.eup %6816 }
0x10a1   :  { %v3120_v55 = vadd.f32 1.0, %v3116_v41 }
0x10a2   :  { %v3006_v54 = vmul.f32 %v6815_v34, %v3005_v42 }
0x10a3   :  { %v3124_v18 = vmul.f32 %v3120_v55, %v2968_v56 }
0x10a4   :  { %v3007_v52 = vadd.f32 %v6815_v34, %v3006_v54 }
0x10a5   :  { %6280 = vmatmul.msk.f32.vlgmr.msrb.gmra.mxu3 %vm56_vm0, %v3124_v18 }
0x10a6   :  { %v3011_v27 = vsel %vm3010_vm7, %v6815_v34, %v3007_v52 }
0x10a7   :  { %v3016_v6 = vsel %vm3013_vm8, %v3015_v23, %v3011_v27 }
0x10a8   :  { %v3049_v28 = vmul.f32 1.0614054, %v3016_v6 }
0x10aa   :  { %v6273_v36 = vadd.f32 -1.4531521, %v3049_v28 }
0x10ab   :  { %v2813_v32 = vpop.f32.mrf.mxu0 }
0x10ac   :  { %v3057_v50 = vmul.f32 %v6273_v36, %v3016_v6  ;;  %v2814_v4 = vadd.f32 %v2813_v32, %v8165_v44 }
0x10ae   :  { %v3061_v46 = vadd.f32 1.4214138, %v3057_v50  ;;  %v8297_v63 = vadd.f32 %v2814_v4, %v7393_v5  ;;  %v2969_v5 = vmul.f32 0.5, %v8280_v53  ;;  %v8311_v53 = vld [vmem:[%s9471_s2 + $0x22] ss:$0 sm:$0xff] }
0x10b0   :  { %v3065_v1 = vmul.f32 %v3061_v46, %v3016_v6  ;;  %v2831_v49 = vsel %vm56_vm0, %v8297_v63, 0.0 }
0x10b1   :  { %2832 = vadd.xlane.f32.xlu0 %v2831_v49 }
0x10b2   :  { %v6277_v20 = vadd.f32 -0.28449672, %v3065_v1 }
0x10b4   :  { %v3073_v26 = vmul.f32 %v6277_v20, %v3016_v6 }
0x10b6   :  { %v3077_v12 = vadd.f32 0.2548296, %v3073_v26 }
0x10b8   :  { %v3081_v8 = vmul.f32 %v3077_v12, %v3016_v6 }
0x10ba   :  { %v3101_v3 = vmul.f32 %v6817_v2, %v3081_v8 }
0x10bc   :  { %v3105_v57 = vsub.f32 1.0, %v3101_v3 }
0x10be   :  { %v3113_v40 = vsub.f32 0.0, %v3105_v57 }
0x10c0   :  { %v3117_v44 = vsel %vm3109_vm9, %v3105_v57, %v3113_v40 }
0x10c1   :  { %v3121_v47 = vadd.f32 1.0, %v3117_v44 }
0x10c3   :  { %v3125_v22 = vmul.f32 %v3121_v47, %v2969_v5  ;;  %v3294_v47 = vld [vmem:[#allocation2 + $0x570] sm:$0xff] }
0x10c4   :  { %3323 = vmatpush.msrb.mxu2 %v3294_v47 }
0x10c5   :  { %6281 = vmatmul.msk.f32.gmra.mxu3 %vm56_vm0, %v3125_v22  ;;  %v3295_v22 = vld [vmem:[#allocation2 + $0x578] sm:$0xff] }
0x10c6   :  { %3352 = vmatpush.msra.mxu0 %v3295_v22 }
0x1112   :  { %v2830_v35 = vpop.xlane.xlu1 %2829 }
0x1113   :  { %v2836_v24 = vmul.f32 %v2830_v35, %v7139_v39  ;;  %v3290_v35 = vld [vmem:[#allocation2 + $0x550] sm:$0xff] }
0x1115   :  { %v2840_v9 = vsub.f32 %v8288_v62, %v2836_v24  ;;  %v3291_v24 = vld [vmem:[#allocation2 + $0x558] sm:$0xff] }
0x1117   :  { %v2844_v31 = vmul.f32 %v2840_v9, %v2840_v9 }
0x1119   :  { %v2852_v48 = vsel %vm56_vm0, %v2844_v31, 0.0  ;;  %v3289_v31 = vld [vmem:[#allocation2 + $0x548] sm:$0xff] }
0x111a   :  { %2853 = vadd.xlane.f32.xlu2 %v2852_v48  ;;  %v3286_v48 = vld [vmem:[#allocation2 + $0x530] sm:$0xff] }
0x1124   :  { %v2833_v16 = vpop.xlane.xlu0 %2832 }
0x1125   :  { %v2837_v58 = vmul.f32 %v2833_v16, %v7139_v39  ;;  %v3287_v16 = vld [vmem:[#allocation2 + $0x538] sm:$0xff] }
0x1127   :  { %v2841_v15 = vsub.f32 %v8297_v63, %v2837_v58  ;;  %v3284_v58 = vld [vmem:[#allocation2 + $0x520] sm:$0xff] }
0x1128   :  { %v3166_v0 = vpop.f32.mrf.mxu3 }
0x1129   :  { %v3167_v19 = vadd.f32 %v3166_v0, %v8311_v53  ;;  %v2845_v61 = vmul.f32 %v2841_v15, %v2841_v15  ;;  %v3282_v0 = vld [vmem:[#allocation2 + $0x510] sm:$0xff] }
0x112b   :  { %v8316_v33 = vadd.f32 %v3167_v19, %v8169_v10  ;;  %v2855_v25 = vsel %vm56_vm0, %v2845_v61, 0.0  ;;  %v3283_v19 = vld [vmem:[#allocation2 + $0x518] sm:$0xff]  ;;  %v3280_v61 = vld [vmem:[#allocation2 + $0x500] sm:$0xff] }
0x112c   :  { %2856 = vadd.xlane.f32.xlu1 %v2855_v25  ;;  %v3281_v25 = vld [vmem:[#allocation2 + $0x508] sm:$0xff] }
0x112d   :  { %v3184_v59 = vsel %vm56_vm0, %v8316_v33, 0.0 }
0x112e   :  { %3185 = vadd.xlane.f32.xlu2 %v3184_v59 }
0x1148   :  { %v3169_v29 = vpop.f32.mrf.mxu3 }
0x1149   :  { %v3170_v34 = vadd.f32 %v3169_v29, %v8311_v53 }
0x114b   :  { %v8323_v51 = vadd.f32 %v3170_v34, %v8182_v37 }
0x114d   :  { %v3187_v43 = vsel %vm56_vm0, %v8323_v51, 0.0 }
0x114e   :  { %3188 = vadd.xlane.f32.xlu0 %v3187_v43 }
0x118d   :  { %v2854_v13 = vpop.xlane.xlu2 %2853 }
0x118e   :  { %v2860_v10 = vmul.f32 %v2854_v13, %v7139_v39 }
0x1190   :  { %v2864_v41 = vadd.f32 1e-05, %v2860_v10 }
0x1192   :  { %6818 = vrsqrt.f32 %v2864_v41  ;;  %vm2892_vm1 = vweird.f32 %v2864_v41 }
0x1198   :  { %v6819_v42 = vpop.eup %6818 }
0x1199   :  { %v2887_v56 = vmul.f32 %v6819_v42, %v2864_v41  ;;  %vm2893_vm15 = vweird.f32 %v6819_v42 }
0x119a   :  { %vm2894_vm2 = vmor %vm2892_vm1, %vm2893_vm15 }
0x119b   :  { %v2888_v55 = vmul.f32 %v6819_v42, %v2887_v56 }
0x119d   :  { %v2889_v60 = vmul.f32 0.5, %v2888_v55 }
0x119f   :  { %v2890_v54 = vsub.f32 1.5, %v2889_v60  ;;  %v2857_v11 = vpop.xlane.xlu1 %2856 }
0x11a0   :  { %v2861_v18 = vmul.f32 %v2857_v11, %v7139_v39 }
0x11a1   :  { %v2891_v37 = vmul.f32 %v6819_v42, %v2890_v54  ;;  %v3186_v52 = vpop.xlane.xlu2 %3185 }
0x11a2   :  { %v2865_v23 = vadd.f32 1e-05, %v2861_v18  ;;  %v3196_v27 = vmul.f32 %v3186_v52, %v7139_v39  ;;  %v8360_v52 = vld [vmem:[%s9471_s2 + $0x23] ss:$0 sm:$0xff] }
0x11a3   :  { %v2895_v6 = vsel %vm2894_vm2, %v6819_v42, %v2891_v37 }
0x11a4   :  { %v2908_v21 = vmul.f32 %v2895_v6, %v2840_v9  ;;  %6820 = vrsqrt.f32 %v2865_v23  ;;  %v8331_v28 = vsub.f32 %v8316_v33, %v3196_v27  ;;  %vm2902_vm6 = vweird.f32 %v2865_v23  ;;  %v3288_v9 = vld [vmem:[#allocation2 + $0x540] sm:$0xff] }
0x11a5   :  { %v8366_v6 = vld [vmem:[%s9471_s2 + $0x24] ss:$0 sm:$0xff] }
0x11a6   :  { %v3204_v36 = vmul.f32 %v8331_v28, %v8331_v28  ;;  %v2912_v14 = vmul.f32 %v2908_v21, %v8233_v30 }
0x11a8   :  { %v3208_v32 = vsel %vm56_vm0, %v3204_v36, 0.0  ;;  %v2916_v50 = vadd.f32 %v2912_v14, %v8239_v17 }
0x11a9   :  { %3209 = vadd.xlane.f32.xlu1 %v3208_v32 }
0x11aa   :  { %v6821_v4 = vpop.eup %6820  ;;  %6270 = vmatmul.msk.f32.gmra.mxu1 %vm56_vm0, %v2916_v50 }
0x11ab   :  { %v2897_v46 = vmul.f32 %v6821_v4, %v2865_v23  ;;  %vm2903_vm5 = vweird.f32 %v6821_v4 }
0x11ac   :  { %vm2904_vm7 = vmor %vm2902_vm6, %vm2903_vm5 }
0x11ad   :  { %v2898_v45 = vmul.f32 %v6821_v4, %v2897_v46 }
0x11af   :  { %v2899_v1 = vmul.f32 0.5, %v2898_v45 }
0x11b1   :  { %v2900_v49 = vsub.f32 1.5, %v2899_v1 }
0x11b3   :  { %v2901_v20 = vmul.f32 %v6821_v4, %v2900_v49 }
0x11b5   :  { %v2905_v26 = vsel %vm2904_vm7, %v6821_v4, %v2901_v20 }
0x11b6   :  { %v2909_v12 = vmul.f32 %v2905_v26, %v2841_v15  ;;  %v3285_v15 = vld [vmem:[#allocation2 + $0x528] sm:$0xff] }
0x11b8   :  { %v2913_v8 = vmul.f32 %v2909_v12, %v8233_v30  ;;  %v3292_v30 = vld [vmem:[#allocation2 + $0x560] sm:$0xff] }
0x11b9   :  { %3324 = vmatpush.msrb.mxu2 %v3292_v30 }
0x11ba   :  { %v2917_v2 = vadd.f32 %v2913_v8, %v8239_v17  ;;  %v3293_v17 = vld [vmem:[#allocation2 + $0x568] sm:$0xff] }
0x11bb   :  { %3353 = vmatpush.msra.mxu0 %v3293_v17  ;;  %3325 = vmatpush.msrb.mxu2 %v3290_v35 }
0x11bc   :  { %6271 = vmatmul.msk.f32.gmra.mxu1 %vm56_vm0, %v2917_v2 }
0x11bd   :  { %3354 = vmatpush.msra.mxu0 %v3291_v24  ;;  %3326 = vmatpush.msrb.mxu2 %v3288_v9 }
0x11bf   :  { %3355 = vmatpush.msra.mxu0 %v3289_v31  ;;  %3327 = vmatpush.msrb.mxu2 %v3286_v48 }
0x11c1   :  { %v3189_v3 = vpop.xlane.xlu0 %3188  ;;  %3356 = vmatpush.msra.mxu0 %v3287_v16  ;;  %3328 = vmatpush.msrb.mxu2 %v3284_v58 }
0x11c2   :  { %v3197_v57 = vmul.f32 %v3189_v3, %v7139_v39 }
0x11c3   :  { %3357 = vmatpush.msra.mxu0 %v3285_v15  ;;  %3329 = vmatpush.msrb.mxu2 %v3282_v0 }
0x11c4   :  { %v8344_v40 = vsub.f32 %v8323_v51, %v3197_v57 }
0x11c5   :  { %3358 = vmatpush.msra.mxu0 %v3283_v19  ;;  %3330 = vmatpush.msrb.mxu2 %v3280_v61 }
0x11c6   :  { %v3205_v44 = vmul.f32 %v8344_v40, %v8344_v40 }
0x11c7   :  { %3359 = vmatpush.msra.mxu0 %v3281_v25 }
0x11c8   :  { %v3211_v5 = vsel %vm56_vm0, %v3205_v44, 0.0 }
0x11c9   :  { %3212 = vadd.xlane.f32.xlu2 %v3211_v5 }
0x121c   :  { %v3210_v59 = vpop.xlane.xlu1 %3209 }
0x121d   :  { %v3220_v29 = vmul.f32 %v3210_v59, %v7139_v39 }
0x121f   :  { %v3224_v34 = vadd.f32 1e-05, %v3220_v29 }
0x1221   :  { %6822 = vrsqrt.f32 %v3224_v34  ;;  %vm3234_vm9 = vweird.f32 %v3224_v34 }
0x1227   :  { %v6823_v43 = vpop.eup %6822  ;;  %v2962_v13 = vpop.f32.mrf.mxu1 }
0x1228   :  { %v3229_v10 = vmul.f32 %v6823_v43, %v3224_v34  ;;  %v8351_v41 = vadd.f32 %v2962_v13, %v8270_v7  ;;  %vm3235_vm8 = vweird.f32 %v6823_v43 }
0x1229   :  { %vm3236_vm15 = vmor %vm3234_vm9, %vm3235_vm8 }
0x122a   :  { %v3230_v42 = vmul.f32 %v6823_v43, %v3229_v10  ;;  %v8354_v56 = vmul.f32 0.70710677, %v8351_v41 }
0x122c   :  { %v3231_v55 = vmul.f32 0.5, %v3230_v42  ;;  %v2978_v60 = vand.u32 2147483647, %v8354_v56 }
0x122e   :  { %v3232_v54 = vsub.f32 1.5, %v3231_v55  ;;  %v2982_v11 = vmul.f32 0.3275911, %v2978_v60  ;;  %v3086_v5 = vsub.f32 0.0, %v2978_v60 }
0x1230   :  { %v3233_v18 = vmul.f32 %v6823_v43, %v3232_v54  ;;  %v2986_v37 = vadd.f32 1.0, %v2982_v11  ;;  %v3090_v17 = vmul.f32 %v3086_v5, %v2978_v60 }
0x1232   :  { %v3237_v23 = vsel %vm3236_vm15, %v6823_v43, %v3233_v18  ;;  %6824 = vrcp.f32 %v2986_v37  ;;  %v3029_v46 = vand.u32 2147483648, %v2986_v37  ;;  %v3027_v20 = vand.u32 2147483647, %v2986_v37 }
0x1233   :  { %v3268_v27 = vmul.f32 %v3237_v23, %v8331_v28  ;;  %vm3023_vm2 = vweird.f32 %v2986_v37  ;;  %v3096_v16 = vmul.f32 1.442695, %v3090_v17 }
0x1234   :  { %v3030_v3 = vor.u32 1.1754944e-38, %v3029_v46  ;;  %vm3028_vm6 = vcmp.eq.f32.partialorder %v3027_v20, 8.507059e+37 }
0x1235   :  { %v3272_v21 = vmul.f32 %v3268_v27, %v8360_v52 }
0x1237   :  { %v3276_v36 = vadd.f32 %v3272_v21, %v8366_v6 }
0x1238   :  { %v6825_v14 = vpop.eup %6824 }
0x1239   :  { %v3019_v32 = vmul.f32 %v6825_v14, %v2986_v37  ;;  %v2965_v50 = vpop.f32.mrf.mxu1  ;;  %6285 = vmatmul.msk.f32.vlgmr.msrb.gmra.mxu2 %vm56_vm0, %v3276_v36  ;;  %6289 = vmatmul.msk.f32.vlgmr.msra.gmra.mxu0 %vm56_vm0, %v3276_v36  ;;  %vm3024_vm1 = vweird.f32 %v6825_v14 }
0x123a   :  { %v8373_v4 = vadd.f32 %v2965_v50, %v8270_v7  ;;  %vm3025_vm5 = vmor %vm3023_vm2, %vm3024_vm1 }
0x123b   :  { %v3020_v28 = vsub.f32 1.0, %v3019_v32 }
0x123c   :  { %v8376_v45 = vmul.f32 0.70710677, %v8373_v4  ;;  %v3213_v1 = vpop.xlane.xlu2 %3212 }
0x123d   :  { %v3021_v49 = vmul.f32 %v6825_v14, %v3020_v28  ;;  %v3221_v26 = vmul.f32 %v3213_v1, %v7139_v39 }
0x123e   :  { %v2979_v12 = vand.u32 2147483647, %v8376_v45 }
0x123f   :  { %v3022_v8 = vadd.f32 %v6825_v14, %v3021_v49  ;;  %v3225_v2 = vadd.f32 1e-05, %v3221_v26 }
0x1240   :  { %v2983_v7 = vmul.f32 0.3275911, %v2979_v12  ;;  %v3087_v21 = vsub.f32 0.0, %v2979_v12 }
0x1241   :  { %v3026_v57 = vsel %vm3025_vm5, %v6825_v14, %v3022_v8  ;;  %6826 = vrsqrt.f32 %v3225_v2  ;;  %vm3244_vm9 = vweird.f32 %v3225_v2  ;;  %v2970_v8 = vmul.f32 0.5, %v8351_v41 }
0x1242   :  { %v3031_v44 = vsel %vm3028_vm6, %v3030_v3, %v3026_v57  ;;  %v2987_v47 = vadd.f32 1.0, %v2983_v7  ;;  %v3091_v1 = vmul.f32 %v3087_v21, %v2979_v12  ;;  %vm3110_vm6 = vcmp.ge.f32.partialorder %v8354_v56, 0.0 }
0x1243   :  { %v3050_v22 = vmul.f32 1.0614054, %v3031_v44  ;;  %v2971_v41 = vmul.f32 0.5, %v8373_v4 }
0x1244   :  { %6828 = vrcp.f32 %v2987_v47  ;;  %v3044_v59 = vand.u32 2147483648, %v2987_v47  ;;  %v3042_v13 = vand.u32 2147483647, %v2987_v47  ;;  %vm3038_vm15 = vweird.f32 %v2987_v47 }
0x1245   :  { %v6274_v30 = vadd.f32 -1.4531521, %v3050_v22  ;;  %6830 = vpow2.f32 %v3096_v16  ;;  %v3098_v3 = vmul.f32 1.442695, %v3091_v1 }
0x1246   :  { %v3045_v60 = vor.u32 1.1754944e-38, %v3044_v59  ;;  %vm3043_vm5 = vcmp.eq.f32.partialorder %v3042_v13, 8.507059e+37 }
0x1247   :  { %v6827_v35 = vpop.eup %6826  ;;  %v3058_v24 = vmul.f32 %v6274_v30, %v3031_v44  ;;  %6832 = vpow2.f32 %v3098_v3 }
0x1248   :  { %v3239_v9 = vmul.f32 %v6827_v35, %v3225_v2  ;;  %vm3245_vm7 = vweird.f32 %v6827_v35 }
0x1249   :  { %v3062_v31 = vadd.f32 1.4214138, %v3058_v24  ;;  %vm3246_vm1 = vmor %vm3244_vm9, %vm3245_vm7  ;;  %vm3111_vm7 = vcmp.ge.f32.partialorder %v8376_v45, 0.0 }
0x124a   :  { %v6829_v48 = vpop.eup %6828  ;;  %v3240_v58 = vmul.f32 %v6827_v35, %v3239_v9 }
0x124b   :  { %v3066_v15 = vmul.f32 %v3062_v31, %v3031_v44  ;;  %v3034_v0 = vmul.f32 %v6829_v48, %v2987_v47  ;;  %vm3039_vm8 = vweird.f32 %v6829_v48  ;;  %v6831_v23 = vpop.eup %6830  ;;  %v6284_v31 = vld [vmem:[%s9471_s2 + $0x27] ss:$8 sm:$0x3] }
0x124c   :  { %v3241_v19 = vmul.f32 0.5, %v3240_v58  ;;  %vm3040_vm2 = vmor %vm3038_vm15, %vm3039_vm8  ;;  %v8400_v4 = vperm.slane %v6284_v31, 1 }
0x124d   :  { %v6278_v61 = vadd.f32 -0.28449672, %v3066_v15  ;;  %v3035_v25 = vsub.f32 1.0, %v3034_v0  ;;  %v6833_v22 = vpop.eup %6832 }
0x124e   :  { %v3242_v29 = vsub.f32 1.5, %v3241_v19 }
0x124f   :  { %v3074_v34 = vmul.f32 %v6278_v61, %v3031_v44  ;;  %v3036_v43 = vmul.f32 %v6829_v48, %v3035_v25 }
0x1250   :  { %v3243_v10 = vmul.f32 %v6827_v35, %v3242_v29 }
0x1251   :  { %v3078_v42 = vadd.f32 0.2548296, %v3074_v34  ;;  %v3037_v55 = vadd.f32 %v6829_v48, %v3036_v43 }
0x1252   :  { %v3247_v54 = vsel %vm3246_vm1, %v6827_v35, %v3243_v10 }
0x1253   :  { %v3082_v11 = vmul.f32 %v3078_v42, %v3031_v44  ;;  %v3041_v18 = vsel %vm3040_vm2, %v6829_v48, %v3037_v55  ;;  %v3269_v37 = vmul.f32 %v3247_v54, %v8344_v40  ;;  %v8394_v48 = vperm.slane %v6284_v31, 0 }
0x1254   :  { %v3046_v27 = vsel %vm3043_vm5, %v3045_v60, %v3041_v18 }
0x1255   :  { %v3102_v36 = vmul.f32 %v6831_v23, %v3082_v11  ;;  %v3051_v14 = vmul.f32 1.0614054, %v3046_v27  ;;  %v3273_v32 = vmul.f32 %v3269_v37, %v8360_v52 }
0x1257   :  { %v3106_v50 = vsub.f32 1.0, %v3102_v36  ;;  %v6275_v28 = vadd.f32 -1.4531521, %v3051_v14  ;;  %v3277_v46 = vadd.f32 %v3273_v32, %v8366_v6 }
0x1259   :  { %v3114_v49 = vsub.f32 0.0, %v3106_v50  ;;  %v3059_v20 = vmul.f32 %v6275_v28, %v3046_v27  ;;  %6286 = vmatmul.msk.f32.gmra.mxu2 %vm56_vm0, %v3277_v46  ;;  %6290 = vmatmul.msk.f32.gmra.mxu0 %vm56_vm0, %v3277_v46 }
0x125b   :  { %v3118_v40 = vsel %vm3110_vm6, %v3106_v50, %v3114_v49  ;;  %v3063_v26 = vadd.f32 1.4214138, %v3059_v20 }
0x125c   :  { %v3122_v2 = vadd.f32 1.0, %v3118_v40 }
0x125d   :  { %v3067_v7 = vmul.f32 %v3063_v26, %v3046_v27 }
0x125e   :  { %v3126_v57 = vmul.f32 %v3122_v2, %v2970_v8 }
0x125f   :  { %v6279_v44 = vadd.f32 -0.28449672, %v3067_v7 }
0x1260   :  { %6282 = vmatmul.msk.f32.gmra.mxu3 %vm56_vm0, %v3126_v57 }
0x1261   :  { %v3075_v12 = vmul.f32 %v6279_v44, %v3046_v27 }
0x1263   :  { %v3079_v5 = vadd.f32 0.2548296, %v3075_v12 }
0x1265   :  { %v3083_v47 = vmul.f32 %v3079_v5, %v3046_v27 }
0x1267   :  { %v3103_v30 = vmul.f32 %v6833_v22, %v3083_v47 }
0x1269   :  { %v3107_v17 = vsub.f32 1.0, %v3103_v30 }
0x126b   :  { %v3115_v35 = vsub.f32 0.0, %v3107_v17 }
0x126d   :  { %v3119_v56 = vsel %vm3111_vm7, %v3107_v17, %v3115_v35 }
0x126e   :  { %v3123_v24 = vadd.f32 1.0, %v3119_v56 }
0x1270   :  { %v3127_v9 = vmul.f32 %v3123_v24, %v2971_v41 }
0x1272   :  { %6283 = vmatmul.msk.f32.gmra.mxu3 %vm56_vm0, %v3127_v9 }
0x12b6   :  { %v3361_v45 = vpop.f32.mrf.mxu0 }
0x12b7   :  { %v3362_v0 = vadd.f32 %v3361_v45, %v8400_v4 }
0x12bc   :  { %v3332_v16 = vpop.f32.mrf.mxu2 }
0x12bd   :  { %v3333_v58 = vadd.f32 %v3332_v16, %v8394_v48 }
0x12bf   :  { %3375 = vrot.lane.b32.xlu1 %v3333_v58, %s7080_s6 }
0x12c7   :  { %3463 = vrot.lane.b32.xlu1 %v3333_v58, %s7089_s30 }
0x12cf   :  { %3763 = vrot.lane.b32.xlu1 %v3333_v58, %s7091_s5 }
0x12d6   :  { %v3364_v15 = vpop.f32.mrf.mxu0 }
0x12d7   :  { %v3365_v19 = vadd.f32 %v3364_v15, %v8400_v4  ;;  %3861 = vrot.lane.b32.xlu1 %v3333_v58, %s7085_s26 }
0x12d9   :  { %3454 = vmatpush.msra.mxu3 %v3365_v19  ;;  %v8405_v61 = vpack.i.bf16 %v3362_v0, %v3365_v19 }
0x12db   :  { %3455 = vmatpush.msra.mxu3 %v3362_v0 }
0x12dc   :  { %v3335_v25 = vpop.f32.mrf.mxu2 }
0x12dd   :  { %v3336_v59 = vadd.f32 %v3335_v25, %v8394_v48 }
0x12df   :  { %3955 = vrot.lane.b32.xlu1 %v3333_v58, %s7084_s25  ;;  %3377 = vrot.lane.b32.xlu0 %v3336_v59, %s7080_s6 }
0x12e3   :  { %v3172_v29 = vpop.f32.mrf.mxu3 }
0x12e4   :  { %v3173_v34 = vadd.f32 %v3172_v29, %v8311_v53 }
0x12e6   :  { %v8412_v43 = vadd.f32 %v3173_v34, %v8288_v62 }
0x12e7   :  { %4053 = vrot.lane.b32.xlu1 %v3333_v58, %s7086_s27 }
0x12e8   :  { %v3190_v13 = vsel %vm56_vm0, %v8412_v43, 0.0 }
0x12e9   :  { %3191 = vadd.xlane.f32.xlu2 %v3190_v13 }
0x12ef   :  { %3765 = vrot.lane.b32.xlu1 %v3336_v59, %s7091_s5 }
0x12f5   :  { %v3175_v10 = vpop.f32.mrf.mxu3 }
0x12f6   :  { %v3176_v42 = vadd.f32 %v3175_v10, %v8311_v53 }
0x12f7   :  { %3863 = vrot.lane.b32.xlu1 %v3336_v59, %s7085_s26 }
0x12f8   :  { %v8421_v55 = vadd.f32 %v3176_v42, %v8297_v63 }
0x12fa   :  { %v3193_v62 = vsel %vm56_vm0, %v8421_v55, 0.0 }
0x12fb   :  { %3194 = vadd.xlane.f32.xlu2 %v3193_v62 }
0x12ff   :  { %3957 = vrot.lane.b32.xlu1 %v3336_v59, %s7084_s25 }
0x1331   :  { %v3376_v54 = vpop.permute.xlu1 %3375 }
0x1339   :  { %v3464_v8 = vpop.permute.xlu1 %3463 }
0x1341   :  { %v8464_v35 = vpop.permute.xlu1 %3763 }
0x1349   :  { %v3862_v45 = vpop.permute.xlu1 %3861 }
0x1351   :  { %v3378_v60 = vpop.permute.xlu0 %3377  ;;  %v8477_v34 = vpop.permute.xlu1 %3955 }
0x1352   :  { %6293 = vmatpush.xpose.msk.msrb.mxu1 %vm315_vm4, %v3378_v60 }
0x1356   :  { %6294 = vmatpush.xpose.msk.msrb.mxu1 %vm315_vm4, %v3376_v54 }
0x1359   :  { %6295 = vmatmul.msk.f32.vlgmr.msrb.gmra.mxu1 %vm315_vm4, %v3333_v58  ;;  %v4054_v62 = vpop.permute.xlu1 %4053 }
0x135c   :  { %v3192_v53 = vpop.xlane.xlu2 %3191 }
0x135d   :  { %v3198_v11 = vmul.f32 %v3192_v53, %v7139_v39 }
0x135f   :  { %v3202_v63 = vsub.f32 %v8412_v43, %v3198_v11 }
0x1361   :  { %6296 = vmatmul.msk.f32.gmra.mxu1 %vm315_vm4, %v3336_v59  ;;  %v3206_v18 = vmul.f32 %v3202_v63, %v3202_v63  ;;  %v8489_v54 = vpop.permute.xlu1 %3765 }
0x1363   :  { %v3214_v37 = vsel %vm56_vm0, %v3206_v18, 0.0 }
0x1364   :  { %3215 = vadd.xlane.f32.xlu0 %v3214_v37 }
0x136e   :  { %v3195_v23 = vpop.xlane.xlu2 %3194 }
0x136f   :  { %v3199_v27 = vmul.f32 %v3195_v23, %v7139_v39 }
0x1371   :  { %v8435_v21 = vsub.f32 %v8421_v55, %v3199_v27 }
0x1373   :  { %v3207_v36 = vmul.f32 %v8435_v21, %v8435_v21 }
0x1375   :  { %v3217_v14 = vsel %vm56_vm0, %v3207_v36, 0.0 }
0x1376   :  { %3218 = vadd.xlane.f32.xlu2 %v3217_v14 }
0x1378   :  { %3467 = vrot.lane.b32.xlu0 %v3333_v58, %s7081_s22 }
0x1380   :  { %3567 = vrot.lane.b32.xlu0 %v3333_v58, %s7083_s24 }
0x1388   :  { %3563 = vrot.lane.b32.xlu0 %v3333_v58, %s7087_s28 }
0x138e   :  { %3665 = vrot.lane.b32.xlu2 %v3333_v58, %s7088_s29 }
0x1390   :  { %3661 = vrot.lane.b32.xlu0 %v3333_v58, %s7092_s7 }
0x1396   :  { %3759 = vrot.lane.b32.xlu2 %v3333_v58, %s7093_s8 }
0x1398   :  { %3959 = vrot.lane.b32.xlu0 %v3333_v58, %s7075_s18 }
0x139e   :  { %3857 = vrot.lane.b32.xlu2 %v3333_v58, %s7090_s4 }
0x13a0   :  { %4057 = vrot.lane.b32.xlu0 %v3333_v58, %s7082_s23 }
0x13a6   :  { %3469 = vrot.lane.b32.xlu2 %v3336_v59, %s7081_s22 }
0x13a8   :  { %3565 = vrot.lane.b32.xlu0 %v3336_v59, %s7087_s28 }
0x13ae   :  { %3569 = vrot.lane.b32.xlu2 %v3336_v59, %s7083_s24 }
0x13b0   :  { %3663 = vrot.lane.b32.xlu0 %v3336_v59, %s7092_s7 }
0x13b6   :  { %3465 = vrot.lane.b32.xlu2 %v3336_v59, %s7089_s30 }
0x13b8   :  { %3961 = vrot.lane.b32.xlu0 %v3336_v59, %s7075_s18 }
0x13be   :  { %3667 = vrot.lane.b32.xlu2 %v3336_v59, %s7088_s29 }
0x13c0   :  { %4059 = vrot.lane.b32.xlu0 %v3336_v59, %s7082_s23 }
0x13c6   :  { %3761 = vrot.lane.b32.xlu2 %v3336_v59, %s7093_s8 }
0x13c8   :  { %4055 = vrot.lane.b32.xlu0 %v3336_v59, %s7086_s27 }
0x13ce   :  { %3859 = vrot.lane.b32.xlu2 %v3336_v59, %s7090_s4 }
0x13d7   :  { %v3216_v32 = vpop.xlane.xlu0 %3215 }
0x13d8   :  { %v3222_v50 = vmul.f32 %v3216_v32, %v7139_v39 }
0x13da   :  { %v3226_v28 = vadd.f32 1e-05, %v3222_v50 }
0x13dc   :  { %6834 = vrsqrt.f32 %v3226_v28  ;;  %vm3254_vm9 = vweird.f32 %v3226_v28 }
0x13e2   :  { %v6835_v46 = vpop.eup %6834 }
0x13e3   :  { %v3249_v1 = vmul.f32 %v6835_v46, %v3226_v28  ;;  %vm3255_vm8 = vweird.f32 %v6835_v46 }
0x13e4   :  { %vm3256_vm15 = vmor %vm3254_vm9, %vm3255_vm8 }
0x13e5   :  { %v3250_v49 = vmul.f32 %v6835_v46, %v3249_v1 }
0x13e7   :  { %v3251_v20 = vmul.f32 0.5, %v3250_v49 }
0x13e9   :  { %v3252_v40 = vsub.f32 1.5, %v3251_v20  ;;  %v3219_v26 = vpop.xlane.xlu2 %3218 }
0x13ea   :  { %v3223_v2 = vmul.f32 %v3219_v26, %v7139_v39  ;;  %v3468_v3 = vpop.permute.xlu0 %3467 }
0x13eb   :  { %v3253_v7 = vmul.f32 %v6835_v46, %v3252_v40 }
0x13ec   :  { %v3227_v57 = vadd.f32 1e-05, %v3223_v2 }
0x13ed   :  { %v3257_v44 = vsel %vm3256_vm15, %v6835_v46, %v3253_v7 }
0x13ee   :  { %v3270_v12 = vmul.f32 %v3257_v44, %v3202_v63  ;;  %6836 = vrsqrt.f32 %v3227_v57  ;;  %vm3264_vm2 = vweird.f32 %v3227_v57  ;;  %v3864_v63 = vpop.permute.xlu1 %3863 }
0x13f0   :  { %v3274_v5 = vmul.f32 %v3270_v12, %v8360_v52 }
0x13f1   :  { %v3666_v47 = vpop.permute.xlu2 %3665 }
0x13f2   :  { %v3568_v22 = vpop.permute.xlu0 %3567  ;;  %v3278_v30 = vadd.f32 %v3274_v5, %v8366_v6 }
0x13f4   :  { %v6837_v17 = vpop.eup %6836  ;;  %6287 = vmatmul.msk.f32.gmra.mxu2 %vm56_vm0, %v3278_v30  ;;  %6291 = vmatmul.msk.f32.gmra.mxu0 %vm56_vm0, %v3278_v30 }
0x13f5   :  { %v3259_v56 = vmul.f32 %v6837_v17, %v3227_v57  ;;  %vm3265_vm1 = vweird.f32 %v6837_v17 }
0x13f6   :  { %vm3266_vm5 = vmor %vm3264_vm2, %vm3265_vm1 }
0x13f7   :  { %v3260_v41 = vmul.f32 %v6837_v17, %v3259_v56 }
0x13f9   :  { %v3261_v24 = vmul.f32 0.5, %v3260_v41  ;;  %v8468_v9 = vpop.permute.xlu2 %3759 }
0x13fa   :  { %v8470_v31 = vpop.permute.xlu0 %3563 }
0x13fb   :  { %v3262_v16 = vsub.f32 1.5, %v3261_v24 }
0x13fd   :  { %v3263_v58 = vmul.f32 %v6837_v17, %v3262_v16 }
0x13ff   :  { %v3267_v15 = vsel %vm3266_vm5, %v6837_v17, %v3263_v58 }
0x1400   :  { %v3271_v0 = vmul.f32 %v3267_v15, %v8435_v21 }
0x1401   :  { %v3858_v19 = vpop.permute.xlu2 %3857 }
0x1402   :  { %v3662_v25 = vpop.permute.xlu0 %3661  ;;  %v3275_v59 = vmul.f32 %v3271_v0, %v8360_v52 }
0x1404   :  { %v3279_v29 = vadd.f32 %v3275_v59, %v8366_v6 }
0x1406   :  { %6288 = vmatmul.msk.f32.gmra.mxu2 %vm56_vm0, %v3279_v29  ;;  %6292 = vmatmul.msk.f32.gmra.mxu0 %vm56_vm0, %v3279_v29 }
0x1409   :  { %v3470_v13 = vpop.permute.xlu2 %3469 }
0x140a   :  { %v8479_v10 = vpop.permute.xlu0 %3959  ;;  %6299 = vmatpush.xpose.msk.msra.mxu2 %vm315_vm4, %v3470_v13 }
0x140e   :  { %6300 = vmatpush.xpose.msk.msra.mxu2 %vm315_vm4, %v3468_v3 }
0x1411   :  { %6301 = vmatmul.msk.f32.vlgmr.msra.gmra.mxu2 %vm315_vm4, %v3464_v8  ;;  %v3570_v42 = vpop.permute.xlu2 %3569 }
0x1412   :  { %v4058_v52 = vpop.permute.xlu0 %4057  ;;  %6305 = vmatpush.xpose.msk.msrb.mxu3 %vm315_vm4, %v3570_v42 }
0x1416   :  { %6306 = vmatpush.xpose.msk.msrb.mxu3 %vm315_vm4, %v3568_v22  ;;  %v8575_v22 = vpop.permute.xlu1 %3957 }
0x1419   :  { %v3466_v6 = vpop.permute.xlu2 %3465 }
0x141a   :  { %v8486_v60 = vpop.permute.xlu0 %3565  ;;  %6302 = vmatmul.msk.f32.gmra.mxu2 %vm315_vm4, %v3466_v6 }
0x1421   :  { %v3668_v53 = vpop.permute.xlu2 %3667 }
0x1422   :  { %v3664_v11 = vpop.permute.xlu0 %3663  ;;  %6311 = vmatpush.xpose.msk.msrb.mxu0 %vm315_vm4, %v3668_v53 }
0x1426   :  { %6312 = vmatpush.xpose.msk.msrb.mxu0 %vm315_vm4, %v3666_v47 }
0x1429   :  { %6313 = vmatmul.msk.f32.vlgmr.msrb.gmra.mxu0 %vm315_vm4, %v3662_v25  ;;  %v8500_v23 = vpop.permute.xlu2 %3761 }
0x142a   :  { %6323 = vmatpush.xpose.msk.msra.mxu0 %vm315_vm4, %v3864_v63  ;;  %v8495_v18 = vpop.permute.xlu0 %3961 }
0x142e   :  { %6324 = vmatpush.xpose.msk.msra.mxu0 %vm315_vm4, %v3862_v45 }
0x1431   :  { %6314 = vmatmul.msk.f32.gmra.mxu0 %vm315_vm4, %v3664_v11  ;;  %v3860_v27 = vpop.permute.xlu2 %3859 }
0x1432   :  { %v4060_v37 = vpop.permute.xlu0 %4059 }
0x1433   :  { %6335 = vmatpush.xpose.msk.msrb.mxu0 %vm315_vm4, %v4060_v37 }
0x1437   :  { %6336 = vmatpush.xpose.msk.msrb.mxu0 %vm315_vm4, %v4058_v52 }
0x1439   :  { %6325 = vmatmul.msk.f32.vlgmr.msra.gmra.mxu0 %vm315_vm4, %v3858_v19 }
0x143a   :  { %v4056_v21 = vpop.permute.xlu0 %4055 }
0x1441   :  { %6326 = vmatmul.msk.f32.gmra.mxu0 %vm315_vm4, %v3860_v27 }
0x1449   :  { %6337 = vmatmul.msk.f32.vlgmr.msrb.gmra.mxu0 %vm315_vm4, %v4054_v62 }
0x1451   :  { %6338 = vmatmul.msk.f32.gmra.mxu0 %vm315_vm4, %v4056_v21 }
0x1471   :  { %v8545_v40 = vpop.f32.mrf.mxu0 }
0x1477   :  { %v3338_v36 = vpop.f32.mrf.mxu2 }
0x1478   :  { %v8508_v14 = vadd.f32 %v3338_v36, %v8394_v48 }
0x147a   :  { %4311 = vrot.lane.b32.xlu1 %v8508_v14, %s7089_s30  ;;  %4315 = vrot.lane.b32.xlu0 %v8508_v14, %s7081_s22 }
0x147b   :  { %4223 = vrot.lane.b32.xlu2 %v8508_v14, %s7080_s6 }
0x1482   :  { %4411 = vrot.lane.b32.xlu0 %v8508_v14, %s7087_s28 }
0x1483   :  { %4415 = vrot.lane.b32.xlu2 %v8508_v14, %s7083_s24  ;;  %v8547_v26 = vpop.f32.mrf.mxu0 }
0x1489   :  { %v3341_v32 = vpop.f32.mrf.mxu2 }
0x148a   :  { %v8521_v50 = vadd.f32 %v3341_v32, %v8394_v48  ;;  %v3404_v48 = vpop.f32.mrf.mxu1 }
0x148b   :  { %v3410_v49 = vmul.f32 0.35355338, %v3404_v48 }
0x148c   :  { %4413 = vrot.lane.b32.xlu0 %v8521_v50, %s7087_s28  ;;  %4317 = vrot.lane.b32.xlu1 %v8521_v50, %s7081_s22 }
0x148d   :  { %4225 = vrot.lane.b32.xlu2 %v8521_v50, %s7080_s6  ;;  %v3412_v20 = vsel %vm1104_vm10, %v3410_v49, -inf }
0x1492   :  { %v3407_v28 = vpop.f32.mrf.mxu1 }
0x1493   :  { %v3411_v46 = vmul.f32 0.35355338, %v3407_v28 }
0x1494   :  { %4509 = vrot.lane.b32.xlu0 %v8508_v14, %s7092_s7  ;;  %v8553_v2 = vpop.f32.mrf.mxu2 }
0x1495   :  { %4417 = vrot.lane.b32.xlu2 %v8521_v50, %s7083_s24  ;;  %v3415_v1 = vsel %vm1104_vm10, %v3411_v46, -inf }
0x149c   :  { %4511 = vrot.lane.b32.xlu0 %v8521_v50, %s7092_s7 }
0x149d   :  { %v3499_v7 = vpop.f32.mrf.mxu2 }
0x149e   :  { %v8563_v57 = vmul.f32 0.35355338, %v3499_v7 }
0x14a0   :  { %v3507_v44 = vsel %vm1104_vm10, %v8563_v57, -inf }
0x14a4   :  { %4809 = vrot.lane.b32.xlu0 %v8521_v50, %s7075_s18 }
0x14a6   :  { %v8551_v8 = vpop.f32.mrf.mxu0 }
0x14ac   :  { %4807 = vrot.lane.b32.xlu0 %v8508_v14, %s7075_s18 }
0x14ae   :  { %v3697_v3 = vpop.f32.mrf.mxu0 }
0x14af   :  { %v8606_v0 = vmul.f32 0.35355338, %v3697_v3 }
0x14b1   :  { %v3705_v59 = vsel %vm1104_vm10, %v8606_v0, -inf }
0x14b4   :  { %4907 = vrot.lane.b32.xlu0 %v8521_v50, %s7082_s23 }
0x14b6   :  { %3416 = vmax.xlane.f32.xlu1 %v3415_v1  ;;  %v3890_v12 = vpop.f32.mrf.mxu0 }
0x14b7   :  { %v8571_v5 = vmul.f32 0.35355338, %v3890_v12 }
0x14b9   :  { %v3898_v47 = vsel %vm1104_vm10, %v8571_v5, -inf }
0x14bc   :  { %4901 = vrot.lane.b32.xlu0 %v8508_v14, %s7086_s27 }
0x14be   :  { %3413 = vmax.xlane.f32.xlu2 %v3412_v20  ;;  %v8600_v58 = vpop.f32.mrf.mxu0 }
0x14c6   :  { %v4086_v19 = vpop.f32.mrf.mxu0 }
0x14c7   :  { %v8612_v62 = vmul.f32 0.35355338, %v4086_v19 }
0x14c9   :  { %v4094_v11 = vsel %vm1104_vm10, %v8612_v62, -inf }
0x14ce   :  { %v4089_v63 = vpop.f32.mrf.mxu0 }
0x14cf   :  { %4313 = vrot.lane.b32.xlu1 %v8521_v50, %s7089_s30  ;;  %v8617_v36 = vmul.f32 0.35355338, %v4089_v63 }
0x14d1   :  { %v4097_v48 = vsel %vm1104_vm10, %v8617_v36, -inf }
0x14d5   :  { %v8594_v41 = vpop.permute.xlu2 %4223 }
0x14d6   :  { %4515 = vrot.lane.b32.xlu2 %v8521_v50, %s7088_s29 }
0x14d7   :  { %4613 = vrot.lane.b32.xlu1 %v8521_v50, %s7091_s5 }
0x14dd   :  { %v8596_v24 = vpop.permute.xlu2 %4415 }
0x14de   :  { %4513 = vrot.lane.b32.xlu2 %v8508_v14, %s7088_s29 }
0x14df   :  { %4611 = vrot.lane.b32.xlu1 %v8508_v14, %s7091_s5 }
0x14e6   :  { %4607 = vrot.lane.b32.xlu2 %v8508_v14, %s7093_s8  ;;  %3508 = vmax.xlane.f32.xlu0 %v3507_v44 }
0x14e7   :  { %4711 = vrot.lane.b32.xlu1 %v8521_v50, %s7085_s26  ;;  %v8598_v16 = vpop.permute.xlu2 %4225 }
0x14ec   :  { %v4312_v30 = vpop.permute.xlu1 %4311  ;;  %v4316_v56 = vpop.permute.xlu0 %4315 }
0x14ee   :  { %4609 = vrot.lane.b32.xlu2 %v8521_v50, %s7093_s8  ;;  %3899 = vmax.xlane.f32.xlu0 %v3898_v47 }
0x14ef   :  { %4709 = vrot.lane.b32.xlu1 %v8508_v14, %s7085_s26  ;;  %v8604_v15 = vpop.permute.xlu2 %4417 }
0x14f4   :  { %v8602_v45 = vpop.permute.xlu0 %4411 }
0x14f6   :  { %4705 = vrot.lane.b32.xlu2 %v8508_v14, %s7090_s4 }
0x14f7   :  { %4803 = vrot.lane.b32.xlu1 %v8508_v14, %s7084_s25 }
0x14fe   :  { %4707 = vrot.lane.b32.xlu2 %v8521_v50, %s7090_s4  ;;  %v4318_v17 = vpop.permute.xlu1 %4317  ;;  %v8608_v25 = vpop.permute.xlu0 %4413 }
0x14ff   :  { %4805 = vrot.lane.b32.xlu1 %v8521_v50, %s7084_s25  ;;  %6347 = vmatpush.xpose.msk.msra.mxu0 %vm315_vm4, %v4318_v17 }
0x1503   :  { %6348 = vmatpush.xpose.msk.msra.mxu0 %vm315_vm4, %v4316_v56 }
0x1506   :  { %6349 = vmatmul.msk.f32.vlgmr.msra.gmra.mxu0 %vm315_vm4, %v4312_v30  ;;  %v4510_v27 = vpop.permute.xlu0 %4509 }
0x1507   :  { %4903 = vrot.lane.b32.xlu1 %v8521_v50, %s7086_s27 }
0x1529   :  { %v3417_v29 = vpop.xlane.xlu1 %3416 }
0x152a   :  { %v3419_v52 = vsub.f32 %v3411_v46, %v3417_v29 }
0x152c   :  { %v3422_v53 = vmul.f32 1.442695, %v3419_v52 }
0x1531   :  { %v3414_v13 = vpop.xlane.xlu2 %3413  ;;  %3706 = vmax.xlane.f32.xlu1 %v3705_v59 }
0x1532   :  { %v3418_v42 = vsub.f32 %v3410_v49, %v3414_v13  ;;  %v4512_v49 = vpop.permute.xlu0 %4511  ;;  %v8647_v13 = vmul.f32 0.35355338, %v8553_v2  ;;  %v8661_v2 = vmul.f32 0.35355338, %v8600_v58 }
0x1534   :  { %v3420_v6 = vmul.f32 1.442695, %v3418_v42 }
0x1536   :  { %6838 = vpow2.f32 %v3420_v6  ;;  %v3504_v6 = vsel %vm1104_vm10, %v8647_v13, -inf }
0x1537   :  { %6840 = vpow2.f32 %v3422_v53 }
0x1539   :  { %v4516_v37 = vpop.permute.xlu2 %4515  ;;  %4095 = vmax.xlane.f32.xlu1 %v4094_v11  ;;  %v8656_v11 = vmul.f32 0.35355338, %v8551_v8 }
0x153a   :  { %6359 = vmatpush.xpose.msk.msrb.mxu0 %vm315_vm4, %v4516_v37  ;;  %v8628_v7 = vpop.permute.xlu0 %4809  ;;  %v3901_v37 = vsel %vm1104_vm10, %v8661_v2, -inf }
0x153b   :  { %v3702_v63 = vsel %vm1104_vm10, %v8656_v11, -inf }
0x153c   :  { %v6839_v21 = vpop.eup %6838 }
0x153d   :  { %v3424_v32 = vsel %vm1104_vm10, %v6839_v21, 0.0  ;;  %v6841_v1 = vpop.eup %6840 }
0x153e   :  { %3425 = vadd.xlane.f32.xlu2 %v3424_v32  ;;  %v3427_v20 = vsel %vm1104_vm10, %v6841_v1, 0.0 }
0x1541   :  { %v4514_v28 = vpop.permute.xlu2 %4513  ;;  %v4314_v46 = vpop.permute.xlu1 %4313  ;;  %4098 = vmax.xlane.f32.xlu1 %v4097_v48 }
0x1542   :  { %6360 = vmatpush.xpose.msk.msrb.mxu0 %vm315_vm4, %v4514_v28  ;;  %v8635_v47 = vpop.permute.xlu0 %4807 }
0x1543   :  { %6350 = vmatmul.msk.f32.gmra.mxu0 %vm315_vm4, %v4314_v46 }
0x1546   :  { %3428 = vadd.xlane.f32.xlu2 %v3427_v20 }
0x1549   :  { %v8625_v3 = vpop.permute.xlu1 %4613  ;;  %v8630_v44 = vpop.permute.xlu2 %4607 }
0x154a   :  { %v4908_v19 = vpop.permute.xlu0 %4907 }
0x154b   :  { %6361 = vmatmul.msk.f32.vlgmr.msrb.gmra.mxu0 %vm315_vm4, %v4510_v27 }
0x1551   :  { %v8632_v12 = vpop.permute.xlu1 %4611  ;;  %v8637_v30 = vpop.permute.xlu2 %4609 }
0x1553   :  { %6362 = vmatmul.msk.f32.gmra.mxu0 %vm315_vm4, %v4512_v49 }
0x1559   :  { %v4712_v17 = vpop.permute.xlu1 %4711  ;;  %v4706_v59 = vpop.permute.xlu2 %4705 }
0x155a   :  { %6371 = vmatpush.xpose.msk.msra.mxu0 %vm315_vm4, %v4712_v17 }
0x155e   :  { %4905 = vrot.lane.b32.xlu2 %v8508_v14, %s7082_s23 }
0x1561   :  { %v4710_v56 = vpop.permute.xlu1 %4709  ;;  %v4708_v29 = vpop.permute.xlu2 %4707 }
0x1562   :  { %6372 = vmatpush.xpose.msk.msra.mxu0 %vm315_vm4, %v4710_v56 }
0x1565   :  { %6373 = vmatmul.msk.f32.vlgmr.msra.gmra.mxu0 %vm315_vm4, %v4706_v59 }
0x1566   :  { %6383 = vmatpush.xpose.msk.msrb.mxu0 %vm315_vm4, %v4908_v19  ;;  %v4902_v19 = vpop.permute.xlu0 %4901 }
0x1569   :  { %v8671_v32 = vpop.permute.xlu1 %4803 }
0x156d   :  { %6374 = vmatmul.msk.f32.gmra.mxu0 %vm315_vm4, %v4708_v29 }
0x156e   :  { %v3509_v29 = vpop.xlane.xlu0 %3508 }
0x1571   :  { %v8682_v56 = vpop.permute.xlu1 %4805 }
0x1579   :  { %v4904_v59 = vpop.permute.xlu1 %4903 }
0x1583   :  { %v4344_v42 = vpop.f32.mrf.mxu0 }
0x1584   :  { %v8649_v52 = vmul.f32 0.35355338, %v4344_v42  ;;  %v3511_v42 = vsub.f32 %v8563_v57, %v3509_v29 }
0x1586   :  { %v4352_v53 = vsel %vm1104_vm10, %v8649_v52, -inf }
0x1587   :  { %3505 = vmax.xlane.f32.xlu2 %v3504_v6  ;;  %4353 = vmax.xlane.f32.xlu1 %v4352_v53 }
0x158f   :  { %3703 = vmax.xlane.f32.xlu2 %v3702_v63 }
0x1597   :  { %3902 = vmax.xlane.f32.xlu2 %v3901_v37 }
0x15a0   :  { %6544 = vrot.lane.b32.xlu1 %v8405_v61, %s7087_s28 }
0x15a4   :  { %v3707_v6 = vpop.xlane.xlu1 %3706 }
0x15a8   :  { %6549 = vrot.lane.b32.xlu1 %v8405_v61, %s7092_s7 }
0x15b0   :  { %6559 = vrot.lane.b32.xlu1 %v8405_v61, %s7090_s4 }
0x15b1   :  { %v3426_v8 = vpop.xlane.xlu2 %3425 }
0x15b2   :  { %6842 = vrcp.f32 %v3426_v8 }
0x15b8   :  { %v6843_v27 = vpop.eup %6842  ;;  %6564 = vrot.lane.b32.xlu1 %v8405_v61, %s7084_s25 }
0x15b9   :  { %v3432_v58 = vmul.f32 %v6843_v27, %v6839_v21  ;;  %v3429_v48 = vpop.xlane.xlu2 %3428 }
0x15ba   :  { %6844 = vrcp.f32 %v3429_v48 }
0x15bb   :  { %6297 = vmatmul.msk.f32.vlgmr.msra.gmra.mxu3 %vm1104_vm10, %v3432_v58 }
0x15bc   :  { %6317 = vmatpush.xpose.msk.msra.mxu3 %vm315_vm4, %v8489_v54 }
0x15c0   :  { %v6845_v28 = vpop.eup %6844  ;;  %6318 = vmatpush.xpose.msk.msra.mxu3 %vm315_vm4, %v8464_v35  ;;  %v4347_v46 = vpop.f32.mrf.mxu0 }
0x15c1   :  { %v8680_v49 = vmul.f32 0.35355338, %v4347_v46  ;;  %v4906_v20 = vpop.permute.xlu2 %4905  ;;  %v3433_v17 = vmul.f32 %v6845_v28, %v6841_v1 }
0x15c2   :  { %6384 = vmatpush.xpose.msk.msrb.mxu0 %vm315_vm4, %v4906_v20 }
0x15c3   :  { %6298 = vmatmul.msk.f32.gmra.mxu3 %vm1104_vm10, %v3433_v17  ;;  %v4355_v21 = vsel %vm1104_vm10, %v8680_v49, -inf }
0x15c4   :  { %4356 = vmax.xlane.f32.xlu2 %v4355_v21 }
0x15c5   :  { %6385 = vmatmul.msk.f32.vlgmr.msrb.gmra.mxu0 %vm315_vm4, %v4902_v19 }
0x15c8   :  { %v4542_v54 = vpop.f32.mrf.mxu0 }
0x15c9   :  { %v8689_v35 = vmul.f32 0.35355338, %v4542_v54 }
0x15cb   :  { %6307 = vmatmul.msk.f32.vlgmr.msrb.gmra.mxu3 %vm315_vm4, %v8470_v31  ;;  %v4550_v1 = vsel %vm1104_vm10, %v8689_v35, -inf  ;;  %v3514_v31 = vmul.f32 1.442695, %v3511_v42 }
0x15cc   :  { %6329 = vmatpush.xpose.msk.msrb.mxu3 %vm315_vm4, %v8495_v18  ;;  %4551 = vmax.xlane.f32.xlu2 %v4550_v1  ;;  %v3709_v18 = vsub.f32 %v8606_v0, %v3707_v6 }
0x15cd   :  { %6386 = vmatmul.msk.f32.gmra.mxu0 %vm315_vm4, %v4904_v59  ;;  %6846 = vpow2.f32 %v3514_v31 }
0x15ce   :  { %v3712_v63 = vmul.f32 1.442695, %v3709_v18 }
0x15d0   :  { %6330 = vmatpush.xpose.msk.msrb.mxu3 %vm315_vm4, %v8479_v10  ;;  %v8703_v53 = vpop.f32.mrf.mxu0  ;;  %v3900_v10 = vpop.xlane.xlu0 %3899  ;;  %6848 = vpow2.f32 %v3712_v63 }
0x15d1   :  { %v3904_v0 = vsub.f32 %v8571_v5, %v3900_v10 }
0x15d3   :  { %6308 = vmatmul.msk.f32.gmra.mxu3 %vm315_vm4, %v8486_v60  ;;  %v8710_v57 = vpop.eup %6846  ;;  %v3906_v8 = vmul.f32 1.442695, %v3904_v0 }
0x15d4   :  { %v3519_v60 = vsel %vm1104_vm10, %v8710_v57, 0.0 }
0x15d5   :  { %6850 = vpow2.f32 %v3906_v8 }
0x15db   :  { %6319 = vmatmul.msk.f32.vlgmr.msra.gmra.mxu3 %vm315_vm4, %v8468_v9 }
0x15dc   :  { %6341 = vmatpush.xpose.msk.msra.mxu3 %vm315_vm4, %v8598_v16 }
0x15e0   :  { %6342 = vmatpush.xpose.msk.msra.mxu3 %vm315_vm4, %v8594_v41  ;;  %v8723_v41 = vpop.eup %6848 }
0x15e1   :  { %v8733_v5 = vpop.eup %6850 }
0x15e2   :  { %3520 = vadd.xlane.f32.xlu1 %v3519_v60  ;;  %v4738_v37 = vpop.f32.mrf.mxu0  ;;  %v3910_v27 = vsel %vm1104_vm10, %v8733_v5, 0.0 }
0x15e3   :  { %6320 = vmatmul.msk.f32.gmra.mxu3 %vm315_vm4, %v8500_v23  ;;  %v8718_v9 = vmul.f32 0.35355338, %v4738_v37  ;;  %v3717_v23 = vsel %vm1104_vm10, %v8723_v41, 0.0 }
0x15e5   :  { %v4746_v16 = vsel %vm1104_vm10, %v8718_v9, -inf }
0x15e6   :  { %4747 = vmax.xlane.f32.xlu2 %v4746_v16 }
0x15ea   :  { %v4741_v54 = vpop.f32.mrf.mxu0 }
0x15eb   :  { %6331 = vmatmul.msk.f32.vlgmr.msrb.gmra.mxu3 %vm315_vm4, %v8477_v34  ;;  %v8739_v34 = vpop.xlane.xlu1 %4095 }
0x15ec   :  { %6353 = vmatpush.xpose.msk.msrb.mxu3 %vm315_vm4, %v8604_v15  ;;  %v4100_v0 = vsub.f32 %v8612_v62, %v8739_v34 }
0x15ee   :  { %3718 = vadd.xlane.f32.xlu2 %v3717_v23  ;;  %v4102_v23 = vmul.f32 1.442695, %v4100_v0 }
0x15f0   :  { %6354 = vmatpush.xpose.msk.msrb.mxu3 %vm315_vm4, %v8596_v24 }
0x15f3   :  { %6332 = vmatmul.msk.f32.gmra.mxu3 %vm315_vm4, %v8575_v22  ;;  %v8748_v22 = vpop.xlane.xlu1 %4098 }
0x15f6   :  { %3911 = vadd.xlane.f32.xlu2 %v3910_v27  ;;  %v8821_v27 = vmul.f32 0.35355338, %v8703_v53 }
0x15f8   :  { %v4553_v62 = vsel %vm1104_vm10, %v8821_v27, -inf }
0x15fa   :  { %v3506_v58 = vpop.xlane.xlu2 %3505 }
0x15fb   :  { %v3510_v15 = vsub.f32 %v8647_v13, %v3506_v58  ;;  %6343 = vmatmul.msk.f32.vlgmr.msra.gmra.mxu3 %vm315_vm4, %v8508_v14  ;;  %v8756_v14 = vpop.xlane.xlu1 %4353 }
0x15fc   :  { %6365 = vmatpush.xpose.msk.msra.mxu3 %vm315_vm4, %v8625_v3 }
0x15fd   :  { %v3512_v24 = vmul.f32 1.442695, %v3510_v15 }
0x15ff   :  { %6852 = vpow2.f32 %v3512_v24  ;;  %v4101_v24 = vsub.f32 %v8617_v36, %v8748_v22 }
0x1600   :  { %6366 = vmatpush.xpose.msk.msra.mxu3 %vm315_vm4, %v8632_v12 }
0x1601   :  { %v4104_v34 = vmul.f32 1.442695, %v4101_v24 }
0x1602   :  { %v3704_v48 = vpop.xlane.xlu2 %3703 }
0x1603   :  { %6344 = vmatmul.msk.f32.gmra.mxu3 %vm315_vm4, %v8521_v50 }
0x1605   :  { %v8752_v28 = vpop.eup %6852 }
0x1606   :  { %v3516_v13 = vsel %vm1104_vm10, %v8752_v28, 0.0 }
0x1607   :  { %3517 = vadd.xlane.f32.xlu0 %v3516_v13 }
0x160a   :  { %v3903_v3 = vpop.xlane.xlu2 %3902 }
0x160b   :  { %v3905_v46 = vsub.f32 %v8661_v2, %v3903_v3  ;;  %6355 = vmatmul.msk.f32.vlgmr.msrb.gmra.mxu3 %vm315_vm4, %v8602_v45 }
0x160c   :  { %6377 = vmatpush.xpose.msk.msrb.mxu3 %vm315_vm4, %v8628_v7 }
0x160d   :  { %v3908_v12 = vmul.f32 1.442695, %v3905_v46 }
0x160f   :  { %6854 = vpow2.f32 %v3908_v12 }
0x1610   :  { %6378 = vmatpush.xpose.msk.msrb.mxu3 %vm315_vm4, %v8635_v47 }
0x1612   :  { %v6545_v50 = vpop.permute.xlu1 %6544 }
0x1613   :  { %v6546_v20 = vunpack.i.l.bf16 %v6545_v50  ;;  %6356 = vmatmul.msk.f32.gmra.mxu3 %vm315_vm4, %v8608_v25  ;;  %v6547_v21 = vunpack.i.h.bf16 %v6545_v50  ;;  %v3708_v25 = vsub.f32 %v8656_v11, %v3704_v48 }
0x1615   :  { %v8767_v17 = vpop.eup %6854  ;;  %3652 = vmatpush.msrb.mxu2 %v6546_v20  ;;  %v3710_v7 = vmul.f32 1.442695, %v3708_v25 }
0x1616   :  { %v3913_v45 = vsel %vm1104_vm10, %v8767_v17, 0.0 }
0x1617   :  { %3914 = vadd.xlane.f32.xlu2 %v3913_v45  ;;  %3653 = vmatpush.msrb.mxu2 %v6547_v21  ;;  %6856 = vpow2.f32 %v3710_v7 }
0x1618   :  { %6858 = vpow2.f32 %v4102_v23 }
0x161b   :  { %6367 = vmatmul.msk.f32.vlgmr.msra.gmra.mxu3 %vm315_vm4, %v8630_v44  ;;  %6539 = vrot.lane.b32.xlu0 %v8405_v61, %s7089_s30 }
0x161d   :  { %v8786_v47 = vpop.eup %6856 }
0x161e   :  { %v8835_v12 = vpop.eup %6858 }
0x161f   :  { %v4106_v22 = vsel %vm1104_vm10, %v8835_v12, 0.0 }
0x1623   :  { %6368 = vmatmul.msk.f32.gmra.mxu3 %vm315_vm4, %v8637_v30  ;;  %v3714_v30 = vsel %vm1104_vm10, %v8786_v47, 0.0 }
0x162b   :  { %6379 = vmatmul.msk.f32.vlgmr.msrb.gmra.mxu3 %vm315_vm4, %v8671_v32 }
0x162f   :  { %6569 = vrot.lane.b32.xlu2 %v8405_v61, %s7086_s27 }
0x1633   :  { %6380 = vmatmul.msk.f32.gmra.mxu3 %vm315_vm4, %v8682_v56  ;;  %v8796_v56 = vmul.f32 0.35355338, %v4741_v54 }
0x1635   :  { %v4749_v59 = vsel %vm1104_vm10, %v8796_v56, -inf }
0x1637   :  { %v8833_v3 = vpop.xlane.xlu2 %4356 }
0x163e   :  { %v8784_v44 = vpop.f32.mrf.mxu3 }
0x1645   :  { %3715 = vadd.xlane.f32.xlu0 %v3714_v30 }
0x1646   :  { %v8790_v2 = vpop.f32.mrf.mxu3 }
0x164e   :  { %v3596_v32 = vpop.f32.mrf.mxu3 }
0x164f   :  { %v8792_v19 = vmul.f32 0.35355338, %v3596_v32 }
0x1651   :  { %v3604_v11 = vsel %vm1104_vm10, %v8792_v19, -inf }
0x1652   :  { %3605 = vmax.xlane.f32.xlu1 %v3604_v11  ;;  %v8847_v11 = vpop.xlane.xlu2 %4551 }
0x1656   :  { %v8798_v1 = vpop.f32.mrf.mxu3 }
0x1659   :  { %6554 = vrot.lane.b32.xlu0 %v8405_v61, %s7093_s8  ;;  %v6550_v61 = vpop.permute.xlu1 %6549 }
0x165a   :  { %4750 = vmax.xlane.f32.xlu1 %v4749_v59 }
0x165e   :  { %v3792_v29 = vpop.f32.mrf.mxu3 }
0x165f   :  { %v8804_v42 = vmul.f32 0.35355338, %v3792_v29 }
0x1661   :  { %v3800_v31 = vsel %vm1104_vm10, %v8804_v42, -inf  ;;  %v6560_v8 = vpop.permute.xlu1 %6559 }
0x1662   :  { %3801 = vmax.xlane.f32.xlu2 %v3800_v31  ;;  %v6551_v31 = vunpack.i.l.bf16 %v6550_v61  ;;  %v6561_v0 = vunpack.i.l.bf16 %v6560_v8 }
0x1666   :  { %v3795_v6 = vpop.f32.mrf.mxu3 }
0x1667   :  { %v8808_v18 = vmul.f32 0.35355338, %v3795_v6 }
0x1669   :  { %v3803_v63 = vsel %vm1104_vm10, %v8808_v18, -inf  ;;  %v8831_v13 = vpop.permute.xlu1 %6564 }
0x166a   :  { %3804 = vmax.xlane.f32.xlu1 %v3803_v63  ;;  %v4934_v63 = vpop.f32.mrf.mxu0 }
0x166b   :  { %v8855_v23 = vmul.f32 0.35355338, %v4934_v63 }
0x166e   :  { %v8812_v10 = vpop.f32.mrf.mxu3 }
0x166f   :  { %v8891_v63 = vmul.f32 0.35355338, %v8812_v10 }
0x1671   :  { %v3521_v20 = vpop.xlane.xlu1 %3520 }
0x1676   :  { %v3991_v60 = vpop.f32.mrf.mxu3 }
0x1677   :  { %v8814_v37 = vmul.f32 0.35355338, %v3991_v60  ;;  %v6552_v60 = vunpack.i.h.bf16 %v6550_v61 }
0x1679   :  { %v3999_v16 = vsel %vm1104_vm10, %v8814_v37, -inf }
0x167a   :  { %4000 = vmax.xlane.f32.xlu2 %v3999_v16  ;;  %v3518_v53 = vpop.xlane.xlu0 %3517 }
0x167b   :  { %6860 = vrcp.f32 %v3518_v53  ;;  %v4942_v53 = vsel %vm1104_vm10, %v8855_v23, -inf }
0x167c   :  { %6862 = vpow2.f32 %v4104_v34 }
0x167d   :  { %6864 = vrcp.f32 %v3521_v20 }
0x167e   :  { %v4252_v58 = vpop.f32.mrf.mxu3 }
0x167f   :  { %v8823_v15 = vmul.f32 0.35355338, %v4252_v58  ;;  %v6562_v58 = vunpack.i.h.bf16 %v6560_v8 }
0x1681   :  { %v4260_v48 = vsel %vm1104_vm10, %v8823_v15, -inf  ;;  %v6861_v45 = vpop.eup %6860 }
0x1682   :  { %4261 = vmax.xlane.f32.xlu2 %v4260_v48  ;;  %v8843_v30 = vpop.eup %6862  ;;  %v3524_v59 = vmul.f32 %v6861_v45, %v8752_v28  ;;  %v8859_v48 = vpop.xlane.xlu2 %4747 }
0x1683   :  { %4554 = vmax.xlane.f32.xlu0 %v4553_v62  ;;  %v4109_v6 = vsel %vm1104_vm10, %v8843_v30, 0.0  ;;  %v6865_v16 = vpop.eup %6864  ;;  %v4358_v62 = vsub.f32 %v8649_v52, %v8756_v14 }
0x1684   :  { %v3525_v34 = vmul.f32 %v6865_v16, %v8710_v57 }
0x1685   :  { %v4360_v8 = vmul.f32 1.442695, %v4358_v62  ;;  %v3996_v62 = vsel %vm1104_vm10, %v8891_v63, -inf }
0x1686   :  { %v4255_v46 = vpop.f32.mrf.mxu3 }
0x1687   :  { %v8837_v50 = vmul.f32 0.35355338, %v4255_v46  ;;  %v8870_v46 = vmul.f32 0.35355338, %v8798_v1  ;;  %6866 = vpow2.f32 %v4360_v8 }
0x1689   :  { %v4263_v36 = vsel %vm1104_vm10, %v8837_v50, -inf  ;;  %v3607_v57 = vsel %vm1104_vm10, %v8870_v46, -inf }
0x168a   :  { %4264 = vmax.xlane.f32.xlu2 %v4263_v36  ;;  %v3719_v14 = vpop.xlane.xlu2 %3718 }
0x168b   :  { %4107 = vadd.xlane.f32.xlu0 %v4106_v22 }
0x168d   :  { %v6540_v21 = vpop.permute.xlu0 %6539 }
0x168e   :  { %v6541_v25 = vunpack.i.l.bf16 %v6540_v21  ;;  %v4444_v7 = vpop.f32.mrf.mxu3  ;;  %v6542_v54 = vunpack.i.h.bf16 %v6540_v21  ;;  %v8878_v21 = vpop.eup %6866 }
0x168f   :  { %v8845_v32 = vmul.f32 0.35355338, %v4444_v7  ;;  %v4937_v7 = vpop.f32.mrf.mxu0 }
0x1690   :  { %3554 = vmatpush.msra.mxu1 %v6541_v25  ;;  %v4364_v25 = vsel %vm1104_vm10, %v8878_v21, 0.0 }
0x1691   :  { %v4452_v29 = vsel %vm1104_vm10, %v8845_v32, -inf }
0x1692   :  { %3555 = vmatpush.msra.mxu1 %v6542_v54  ;;  %4453 = vmax.xlane.f32.xlu2 %v4452_v29  ;;  %v3912_v54 = vpop.xlane.xlu2 %3911 }
0x1693   :  { %6303 = vmatmul.msk.f32.vlgmr.msra.gmra.mxu1 %vm1104_vm10, %v3524_v59  ;;  %4110 = vadd.xlane.f32.xlu0 %v4109_v6  ;;  %v8886_v59 = vmul.f32 0.35355338, %v4937_v7 }
0x1694   :  { %3750 = vmatpush.msrb.mxu1 %v6551_v31 }
0x1695   :  { %v4945_v31 = vsel %vm1104_vm10, %v8886_v59, -inf }
0x1696   :  { %3751 = vmatpush.msrb.mxu1 %v6552_v60  ;;  %v4447_v28 = vpop.f32.mrf.mxu3 }
0x1697   :  { %v8857_v24 = vmul.f32 0.35355338, %v4447_v28  ;;  %v4359_v28 = vsub.f32 %v8680_v49, %v8833_v3 }
0x1698   :  { %3946 = vmatpush.msra.mxu1 %v6561_v0 }
0x1699   :  { %v4455_v61 = vsel %vm1104_vm10, %v8857_v24, -inf }
0x169a   :  { %3947 = vmatpush.msra.mxu1 %v6562_v58  ;;  %4456 = vmax.xlane.f32.xlu2 %v4455_v61  ;;  %v3915_v6 = vpop.xlane.xlu2 %3914  ;;  %v4362_v61 = vmul.f32 1.442695, %v4359_v28 }
0x169b   :  { %6304 = vmatmul.msk.f32.gmra.mxu1 %vm1104_vm10, %v3525_v34  ;;  %4943 = vmax.xlane.f32.xlu0 %v4942_v53 }
0x169e   :  { %v4640_v36 = vpop.f32.mrf.mxu3 }
0x169f   :  { %v8872_v22 = vmul.f32 0.35355338, %v4640_v36 }
0x16a1   :  { %v4648_v52 = vsel %vm1104_vm10, %v8872_v22, -inf }
0x16a2   :  { %4649 = vmax.xlane.f32.xlu2 %v4648_v52  ;;  %v6570_v34 = vpop.permute.xlu2 %6569 }
0x16a3   :  { %3608 = vmax.xlane.f32.xlu0 %v3607_v57  ;;  %v6571_v36 = vunpack.i.l.bf16 %v6570_v34  ;;  %v6572_v3 = vunpack.i.h.bf16 %v6570_v34 }
0x16a6   :  { %v4643_v20 = vpop.f32.mrf.mxu3 }
0x16a7   :  { %v8880_v45 = vmul.f32 0.35355338, %v4643_v20 }
0x16a9   :  { %v4651_v1 = vsel %vm1104_vm10, %v8880_v45, -inf }
0x16aa   :  { %4652 = vmax.xlane.f32.xlu2 %v4651_v1 }
0x16ab   :  { %4365 = vadd.xlane.f32.xlu0 %v4364_v25 }
0x16ae   :  { %v4836_v29 = vpop.f32.mrf.mxu3 }
0x16af   :  { %v8901_v10 = vmul.f32 0.35355338, %v4836_v29 }
0x16b1   :  { %v4844_v49 = vsel %vm1104_vm10, %v8901_v10, -inf }
0x16b3   :  { %4946 = vmax.xlane.f32.xlu0 %v4945_v31 }
0x16b6   :  { %v4839_v60 = vpop.f32.mrf.mxu3 }
0x16b7   :  { %v8893_v0 = vmul.f32 0.35355338, %v4839_v60 }
0x16b8   :  { %v3716_v16 = vpop.xlane.xlu0 %3715 }
0x16b9   :  { %6868 = vrcp.f32 %v3716_v16  ;;  %v4847_v58 = vsel %vm1104_vm10, %v8893_v0, -inf }
0x16ba   :  { %4848 = vmax.xlane.f32.xlu2 %v4847_v58  ;;  %6870 = vrcp.f32 %v3719_v14 }
0x16bb   :  { %3997 = vmax.xlane.f32.xlu0 %v3996_v62  ;;  %6872 = vpow2.f32 %v4362_v61 }
0x16bc   :  { %6874 = vrcp.f32 %v3912_v54 }
0x16bf   :  { %v6869_v53 = vpop.eup %6868 }
0x16c0   :  { %v3722_v8 = vmul.f32 %v6869_v53, %v8786_v47  ;;  %v6871_v52 = vpop.eup %6870  ;;  %v8931_v53 = vadd.f32 %v8547_v26, %v8400_v4 }
0x16c1   :  { %v8908_v1 = vpop.eup %6872  ;;  %v3723_v47 = vmul.f32 %v6871_v52, %v8723_v41 }
0x16c2   :  { %6315 = vmatmul.msk.f32.vlgmr.msrb.gmra.mxu1 %vm1104_vm10, %v3722_v8  ;;  %v4367_v25 = vsel %vm1104_vm10, %v8908_v1, 0.0  ;;  %v6875_v31 = vpop.eup %6874 }
0x16c3   :  { %4142 = vmatpush.msrb.mxu1 %v6571_v36  ;;  %4845 = vmax.xlane.f32.xlu0 %v4844_v49  ;;  %v3918_v54 = vmul.f32 %v6875_v31, %v8733_v5 }
0x16c5   :  { %4143 = vmatpush.msrb.mxu1 %v6572_v3  ;;  %v3606_v57 = vpop.xlane.xlu1 %3605 }
0x16c6   :  { %v3610_v20 = vsub.f32 %v8792_v19, %v3606_v57 }
0x16c8   :  { %v3612_v14 = vmul.f32 1.442695, %v3610_v20 }
0x16ca   :  { %6876 = vpow2.f32 %v3612_v14  ;;  %6316 = vmatmul.msk.f32.gmra.mxu1 %vm1104_vm10, %v3723_v47 }
0x16cb   :  { %v6555_v7 = vpop.permute.xlu0 %6554  ;;  %4368 = vadd.xlane.f32.xlu0 %v4367_v25  ;;  %6878 = vrcp.f32 %v3915_v6 }
0x16cc   :  { %v6556_v29 = vunpack.i.l.bf16 %v6555_v7  ;;  %v6557_v60 = vunpack.i.h.bf16 %v6555_v7 }
0x16cd   :  { %v8952_v47 = vpop.xlane.xlu1 %4750 }
0x16ce   :  { %3848 = vmatpush.msra.mxu2 %v6556_v29 }
0x16d0   :  { %v8914_v19 = vpop.eup %6876  ;;  %3849 = vmatpush.msra.mxu2 %v6557_v60 }
0x16d1   :  { %v3616_v41 = vsel %vm1104_vm10, %v8914_v19, 0.0  ;;  %v6879_v16 = vpop.eup %6878 }
0x16d2   :  { %3617 = vadd.xlane.f32.xlu2 %v3616_v41  ;;  %6327 = vmatmul.msk.f32.vlgmr.msra.gmra.mxu1 %vm1104_vm10, %v3918_v54  ;;  %v3919_v61 = vmul.f32 %v6879_v16, %v8767_v17  ;;  %v8938_v17 = vadd.f32 %v8545_v40, %v8400_v4 }
0x16d4   :  { %v8942_v3 = vpack.i.bf16 %v8938_v17, %v8931_v53 }
0x16d5   :  { %v3802_v28 = vpop.xlane.xlu2 %3801 }
0x16d6   :  { %v3806_v58 = vsub.f32 %v8804_v42, %v3802_v28 }
0x16d8   :  { %v3808_v62 = vmul.f32 1.442695, %v3806_v58 }
0x16da   :  { %6880 = vpow2.f32 %v3808_v62  ;;  %6328 = vmatmul.msk.f32.gmra.mxu1 %vm1104_vm10, %v3919_v61 }
0x16dd   :  { %v3805_v60 = vpop.xlane.xlu1 %3804 }
0x16de   :  { %v3807_v28 = vsub.f32 %v8808_v18, %v3805_v60 }
0x16e0   :  { %v8923_v6 = vpop.eup %6880 }
0x16e1   :  { %v3812_v5 = vsel %vm1104_vm10, %v8923_v6, 0.0 }
0x16e2   :  { %3813 = vadd.xlane.f32.xlu1 %v3812_v5 }
0x16ed   :  { %v8927_v34 = vpop.xlane.xlu2 %4000 }
0x16f5   :  { %v4262_v8 = vpop.xlane.xlu2 %4261 }
0x16f6   :  { %v4266_v42 = vsub.f32 %v8823_v15, %v4262_v8  ;;  %v8934_v36 = vpop.xlane.xlu0 %4554 }
0x16f8   :  { %v4268_v49 = vmul.f32 1.442695, %v4266_v42 }
0x16fa   :  { %6882 = vpow2.f32 %v4268_v49 }
0x16fb   :  { %6574 = vrot.lane.b32.xlu1 %v8942_v3, %s7089_s30 }
0x16fd   :  { %v4265_v57 = vpop.xlane.xlu2 %4264 }
0x16fe   :  { %v4108_v26 = vpop.xlane.xlu0 %4107  ;;  %v4267_v31 = vsub.f32 %v8837_v50, %v4265_v57 }
0x16ff   :  { %6884 = vrcp.f32 %v4108_v26 }
0x1700   :  { %v8946_v52 = vpop.eup %6882  ;;  %v4270_v54 = vmul.f32 1.442695, %v4267_v31 }
0x1701   :  { %v4272_v15 = vsel %vm1104_vm10, %v8946_v52, 0.0 }
0x1702   :  { %4273 = vadd.xlane.f32.xlu0 %v4272_v15 }
0x1705   :  { %v6885_v4 = vpop.eup %6884  ;;  %v4454_v25 = vpop.xlane.xlu2 %4453 }
0x1706   :  { %v4114_v40 = vmul.f32 %v6885_v4, %v8835_v12  ;;  %v4111_v20 = vpop.xlane.xlu0 %4110  ;;  %v4458_v4 = vsub.f32 %v8845_v32, %v4454_v25  ;;  %v4556_v32 = vsub.f32 %v8689_v35, %v8847_v11 }
0x1707   :  { %6886 = vrcp.f32 %v4111_v20 }
0x1708   :  { %6339 = vmatmul.msk.f32.vlgmr.msrb.gmra.mxu1 %vm1104_vm10, %v4114_v40  ;;  %6888 = vpow2.f32 %v4270_v54  ;;  %v4460_v31 = vmul.f32 1.442695, %v4458_v4 }
0x170d   :  { %v6887_v14 = vpop.eup %6886  ;;  %v4457_v16 = vpop.xlane.xlu2 %4456 }
0x170e   :  { %v8954_v7 = vpop.xlane.xlu0 %4943  ;;  %v4115_v29 = vmul.f32 %v6887_v14, %v8843_v30  ;;  %v4459_v62 = vsub.f32 %v8857_v24, %v4457_v16  ;;  %v3810_v30 = vmul.f32 1.442695, %v3807_v28  ;;  %v8966_v5 = vpop.eup %6888  ;;  %v4003_v14 = vsub.f32 %v8814_v37, %v8927_v34 }
0x170f   :  { %v4275_v18 = vsel %vm1104_vm10, %v8966_v5, 0.0  ;;  %v4558_v34 = vmul.f32 1.442695, %v4556_v32  ;;  %v4752_v16 = vsub.f32 %v8718_v9, %v8859_v48 }
0x1710   :  { %6340 = vmatmul.msk.f32.gmra.mxu1 %vm1104_vm10, %v4115_v29  ;;  %v4462_v50 = vmul.f32 1.442695, %v4459_v62  ;;  %v4006_v60 = vmul.f32 1.442695, %v4003_v14 }
0x1711   :  { %v4754_v11 = vmul.f32 1.442695, %v4752_v16 }
0x1715   :  { %v8982_v15 = vpop.xlane.xlu2 %4649 }
0x1716   :  { %v3609_v41 = vpop.xlane.xlu0 %3608  ;;  %6579 = vrot.lane.b32.xlu0 %v8942_v3, %s7087_s28 }
0x1717   :  { %v3611_v12 = vsub.f32 %v8870_v46, %v3609_v41  ;;  %v4557_v41 = vsub.f32 %v8821_v27, %v8934_v36  ;;  %v9004_v36 = vpop.f32.mrf.mxu1 }
0x1719   :  { %v3614_v58 = vmul.f32 1.442695, %v3611_v12  ;;  %v4560_v25 = vmul.f32 1.442695, %v4557_v41 }
0x171b   :  { %6890 = vpow2.f32 %v3614_v58 }
0x171c   :  { %6892 = vpow2.f32 %v3810_v30 }
0x171d   :  { %6894 = vpow2.f32 %v4462_v50  ;;  %v4653_v54 = vpop.xlane.xlu2 %4652 }
0x171e   :  { %v8964_v61 = vpop.xlane.xlu0 %4365  ;;  %v4655_v48 = vsub.f32 %v8880_v45, %v4653_v54 }
0x1721   :  { %v8968_v8 = vpop.eup %6890 }
0x1722   :  { %v3619_v46 = vsel %vm1104_vm10, %v8968_v8, 0.0  ;;  %v8976_v42 = vpop.eup %6892 }
0x1723   :  { %3620 = vadd.xlane.f32.xlu2 %v3619_v46  ;;  %v8978_v49 = vpop.eup %6894  ;;  %v3815_v26 = vsel %vm1104_vm10, %v8976_v42, 0.0  ;;  %v3560_v46 = vpop.f32.mrf.mxu1 }
0x1724   :  { %v4467_v57 = vsel %vm1104_vm10, %v8978_v49, 0.0 }
0x1725   :  { %4276 = vadd.xlane.f32.xlu1 %v4275_v18  ;;  %v4658_v18 = vmul.f32 1.442695, %v4655_v48 }
0x1726   :  { %v8974_v24 = vpop.xlane.xlu0 %4946 }
0x172b   :  { %3816 = vadd.xlane.f32.xlu2 %v3815_v26 }
0x172d   :  { %4468 = vadd.xlane.f32.xlu1 %v4467_v57  ;;  %v4849_v28 = vpop.xlane.xlu2 %4848 }
0x172e   :  { %v3998_v40 = vpop.xlane.xlu0 %3997 }
0x172f   :  { %v4002_v20 = vsub.f32 %v8891_v63, %v3998_v40 }
0x1731   :  { %v4004_v29 = vmul.f32 1.442695, %v4002_v20  ;;  %v6566_v20 = vunpack.i.l.bf16 %v8831_v13 }
0x1733   :  { %6896 = vpow2.f32 %v4004_v29 }
0x1734   :  { %6898 = vpow2.f32 %v4460_v31  ;;  %v6567_v31 = vunpack.i.h.bf16 %v8831_v13 }
0x1735   :  { %6900 = vpow2.f32 %v4006_v60 }
0x1736   :  { %6902 = vpow2.f32 %v4560_v25  ;;  %v4846_v4 = vpop.xlane.xlu0 %4845 }
0x1737   :  { %6904 = vpow2.f32 %v4558_v34  ;;  %v4850_v14 = vsub.f32 %v8901_v10, %v4846_v4  ;;  %v4851_v10 = vsub.f32 %v8893_v0, %v4849_v28 }
0x1738   :  { %6906 = vpow2.f32 %v4754_v11 }
0x1739   :  { %v8992_v12 = vpop.eup %6896  ;;  %v4854_v32 = vmul.f32 1.442695, %v4851_v10 }
0x173a   :  { %v4008_v63 = vsel %vm1104_vm10, %v8992_v12, 0.0  ;;  %v8998_v37 = vpop.eup %6898 }
0x173b   :  { %4009 = vadd.xlane.f32.xlu2 %v4008_v63  ;;  %v9002_v27 = vpop.eup %6900  ;;  %v4464_v35 = vsel %vm1104_vm10, %v8998_v37, 0.0 }
0x173c   :  { %v4011_v58 = vsel %vm1104_vm10, %v9002_v27, 0.0  ;;  %v9010_v62 = vpop.eup %6902 }
0x173d   :  { %v9015_v30 = vpop.eup %6904  ;;  %v4565_v50 = vsel %vm1104_vm10, %v9010_v62, 0.0 }
0x173e   :  { %v4562_v26 = vsel %vm1104_vm10, %v9015_v30, 0.0  ;;  %v9021_v57 = vpop.eup %6906 }
0x173f   :  { %v4758_v29 = vsel %vm1104_vm10, %v9021_v57, 0.0  ;;  %v9032_v60 = vpop.f32.mrf.mxu1 }
0x1740   :  { %4465 = vadd.xlane.f32.xlu0 %v4464_v35  ;;  %v4369_v35 = vpop.xlane.xlu0 %4368 }
0x1743   :  { %4012 = vadd.xlane.f32.xlu2 %v4011_v58 }
0x1745   :  { %v3618_v9 = vpop.xlane.xlu2 %3617 }
0x1746   :  { %6908 = vrcp.f32 %v3618_v9  ;;  %6589 = vrot.lane.b32.xlu1 %v8942_v3, %s7093_s8 }
0x1747   :  { %6910 = vpow2.f32 %v4658_v18  ;;  %v3756_v13 = vpop.f32.mrf.mxu1 }
0x1748   :  { %4566 = vadd.xlane.f32.xlu0 %v4565_v50 }
0x174b   :  { %4563 = vadd.xlane.f32.xlu2 %v4562_v26  ;;  %v4654_v26 = vsub.f32 %v8872_v22, %v8982_v15  ;;  %v4948_v22 = vsub.f32 %v8855_v23, %v8954_v7 }
0x174c   :  { %v6909_v45 = vpop.eup %6908 }
0x174d   :  { %v3624_v40 = vmul.f32 %v6909_v45, %v8914_v19  ;;  %v4852_v19 = vmul.f32 1.442695, %v4850_v14  ;;  %v9034_v54 = vpop.eup %6910  ;;  %v4656_v4 = vmul.f32 1.442695, %v4654_v26 }
0x174e   :  { %6594 = vrot.lane.b32.xlu1 %v8942_v3, %s7090_s4  ;;  %v4663_v41 = vsel %vm1104_vm10, %v9034_v54, 0.0  ;;  %s6106_s4 = sshll.u32 %s9472_s3, 4  ;;  %s6107_s4 = int_to_ptr.hbm [resolvable:$true] %s6106_s4 }
0x174f   :  { %6309 = vmatmul.msk.f32.vlgmr.msrb.gmra.mxu2 %vm1104_vm10, %v3624_v40  ;;  %6912 = vpow2.f32 %v4852_v19  ;;  %v3949_v34 = vpop.f32.mrf.mxu1 }
0x1750   :  { %4044 = vmatpush.msrb.mxu2 %v6566_v20  ;;  %4759 = vadd.xlane.f32.xlu0 %v4758_v29  ;;  %6914 = vpow2.f32 %v4854_v32  ;;  %v4950_v20 = vmul.f32 1.442695, %v4948_v22 }
0x1751   :  { %6916 = vrcp.f32 %v8964_v61 }
0x1752   :  { %4045 = vmatpush.msrb.mxu2 %v6567_v31  ;;  %6918 = vrcp.f32 %v4369_v35 }
0x1753   :  { %6920 = vpow2.f32 %v4656_v4 }
0x1755   :  { %v9041_v25 = vpop.eup %6912  ;;  %v3814_v16 = vpop.xlane.xlu1 %3813 }
0x1756   :  { %6599 = vrot.lane.b32.xlu1 %v8942_v3, %s7084_s25  ;;  %v4856_v63 = vsel %vm1104_vm10, %v9041_v25, 0.0  ;;  %v9049_v0 = vpop.eup %6914 }
0x1757   :  { %v4859_v28 = vsel %vm1104_vm10, %v9049_v0, 0.0  ;;  %v6917_v58 = vpop.eup %6916  ;;  %v9063_v61 = vpop.f32.mrf.mxu1 }
0x1758   :  { %4664 = vadd.xlane.f32.xlu0 %v4663_v41  ;;  %v6919_v50 = vpop.eup %6918 }
0x1759   :  { %v4373_v18 = vmul.f32 %v6919_v50, %v8908_v1  ;;  %v9069_v1 = vpop.eup %6920 }
0x175a   :  { %v4660_v15 = vsel %vm1104_vm10, %v9069_v1, 0.0 }
0x175e   :  { %6604 = vrot.lane.b32.xlu1 %v8942_v3, %s7086_s27  ;;  %s7094_s27 = smov [#allocation5]  }
0x175f   :  { %s6104_s28 = sshll.u32 %s7094_s27, 4  ;;  %s6105_s28 = int_to_ptr.vmem [resolvable:$true] %s6104_s28 }
0x1760   :  { %4857 = vadd.xlane.f32.xlu0 %v4856_v63 }
0x1763   :  { %6584 = vrot.lane.b32.xlu2 %v8942_v3, %s7092_s7  ;;  %v4372_v3 = vmul.f32 %v6917_v58, %v8878_v21  ;;  %v4753_v21 = vsub.f32 %v8796_v56, %v8952_v47  ;;  %v4949_v47 = vsub.f32 %v8886_v59, %v8974_v24 }
0x1765   :  { %v4756_v40 = vmul.f32 1.442695, %v4753_v21  ;;  %v4952_v23 = vmul.f32 1.442695, %v4949_v47 }
0x1766   :  { %4185 = vrot.lane.b32.xlu1 %v3949_v34, %s7088_s29 }
0x1767   :  { %6922 = vpow2.f32 %v4756_v40 }
0x1768   :  { %4860 = vadd.xlane.f32.xlu0 %v4859_v28  ;;  %6924 = vpow2.f32 %v4950_v20 }
0x176d   :  { %v6575_v11 = vpop.permute.xlu1 %6574  ;;  %v9077_v56 = vpop.eup %6922 }
0x176e   :  { %v6576_v9 = vunpack.i.l.bf16 %v6575_v11  ;;  %v6577_v48 = vunpack.i.h.bf16 %v6575_v11  ;;  %v9083_v14 = vpop.eup %6924 }
0x176f   :  { %v4954_v29 = vsel %vm1104_vm10, %v9083_v14, 0.0 }
0x1770   :  { %4402 = vmatpush.msra.mxu1 %v6576_v9 }
0x1772   :  { %4403 = vmatpush.msra.mxu1 %v6577_v48 }
0x1773   :  { %6351 = vmatmul.msk.f32.vlgmr.msra.gmra.mxu1 %vm1104_vm10, %v4372_v3 }
0x1775   :  { %v4274_v63 = vpop.xlane.xlu0 %4273 }
0x177b   :  { %6352 = vmatmul.msk.f32.gmra.mxu1 %vm1104_vm10, %v4373_v18 }
0x177c   :  { %4153 = vrot.lane.b32.xlu0 %v9004_v36, %s7082_s23 }
0x1784   :  { %4155 = vrot.lane.b32.xlu0 %v3560_v46, %s7082_s23  ;;  %v4761_v46 = vsel %vm1104_vm10, %v9077_v56, 0.0 }
0x1785   :  { %v4145_v45 = vpop.f32.mrf.mxu1 }
0x1786   :  { %4201 = vrot.lane.b32.xlu1 %v4145_v45, %s7081_s22 }
0x1788   :  { %v6580_v35 = vpop.permute.xlu0 %6579 }
0x1789   :  { %v6581_v9 = vunpack.i.l.bf16 %v6580_v35 }
0x178c   :  { %4661 = vadd.xlane.f32.xlu2 %v4660_v15 }
0x178d   :  { %v4148_v36 = vpop.f32.mrf.mxu1 }
0x178e   :  { %4171 = vrot.lane.b32.xlu1 %v3756_v13, %s7085_s26  ;;  %4203 = vrot.lane.b32.xlu0 %v4148_v36, %s7081_s22 }
0x1794   :  { %4762 = vadd.xlane.f32.xlu2 %v4761_v46 }
0x1796   :  { %v3621_v7 = vpop.xlane.xlu2 %3620 }
0x1797   :  { %6926 = vrcp.f32 %v3621_v7 }
0x1798   :  { %6928 = vpow2.f32 %v4952_v23  ;;  %v4277_v13 = vpop.xlane.xlu1 %4276 }
0x1799   :  { %6930 = vrcp.f32 %v3814_v16 }
0x179c   :  { %4955 = vadd.xlane.f32.xlu2 %v4954_v29 }
0x179d   :  { %v6927_v31 = vpop.eup %6926 }
0x179e   :  { %v3625_v19 = vmul.f32 %v6927_v31, %v8968_v8  ;;  %v9088_v10 = vpop.eup %6928  ;;  %v3817_v59 = vpop.xlane.xlu2 %3816 }
0x179f   :  { %v6931_v24 = vpop.eup %6930  ;;  %v4957_v41 = vsel %vm1104_vm10, %v9088_v10, 0.0  ;;  %6932 = vrcp.f32 %v3817_v59 }
0x17a0   :  { %6310 = vmatmul.msk.f32.gmra.mxu2 %vm1104_vm10, %v3625_v19  ;;  %v3820_v32 = vmul.f32 %v6931_v24, %v8923_v6  ;;  %v4469_v28 = vpop.xlane.xlu1 %4468 }
0x17a4   :  { %4958 = vadd.xlane.f32.xlu2 %v4957_v41 }
0x17a5   :  { %v6933_v8 = vpop.eup %6932 }
0x17a6   :  { %v3821_v16 = vmul.f32 %v6933_v8, %v8976_v42 }
0x17a8   :  { %6321 = vmatmul.msk.f32.vlgmr.msra.gmra.mxu2 %vm1104_vm10, %v3820_v32 }
0x17a9   :  { %4302 = vmatpush.msra.mxu2 %v8931_v53  ;;  %v6582_v53 = vunpack.i.h.bf16 %v6580_v35 }
0x17ab   :  { %4303 = vmatpush.msra.mxu2 %v8938_v17 }
0x17ae   :  { %v4010_v34 = vpop.xlane.xlu2 %4009 }
0x17af   :  { %6934 = vrcp.f32 %v4010_v34 }
0x17b0   :  { %6322 = vmatmul.msk.f32.gmra.mxu2 %vm1104_vm10, %v3821_v16 }
0x17b3   :  { %v4466_v17 = vpop.xlane.xlu0 %4465 }
0x17b5   :  { %v6935_v11 = vpop.eup %6934 }
0x17b6   :  { %v4016_v6 = vmul.f32 %v6935_v11, %v8992_v12  ;;  %v4013_v58 = vpop.xlane.xlu2 %4012 }
0x17b7   :  { %6936 = vrcp.f32 %v4013_v58 }
0x17b8   :  { %v6590_v48 = vpop.permute.xlu1 %6589  ;;  %6333 = vmatmul.msk.f32.vlgmr.msrb.gmra.mxu2 %vm1104_vm10, %v4016_v6  ;;  %6938 = vrcp.f32 %v4274_v63 }
0x17b9   :  { %4500 = vmatpush.msrb.mxu2 %v6581_v9 }
0x17bb   :  { %4501 = vmatpush.msrb.mxu2 %v6582_v53  ;;  %v4567_v26 = vpop.xlane.xlu0 %4566 }
0x17bc   :  { %4169 = vrot.lane.b32.xlu2 %v9032_v60, %s7085_s26  ;;  %v6591_v60 = vunpack.i.l.bf16 %v6590_v48 }
0x17bd   :  { %v6937_v42 = vpop.eup %6936 }
0x17be   :  { %v4564_v3 = vpop.xlane.xlu2 %4563  ;;  %v4017_v50 = vmul.f32 %v6937_v42, %v9002_v27  ;;  %v6939_v12 = vpop.eup %6938  ;;  %v6592_v27 = vunpack.i.h.bf16 %v6590_v48 }
0x17bf   :  { %6940 = vrcp.f32 %v4564_v3  ;;  %v4280_v4 = vmul.f32 %v6939_v12, %v8946_v52 }
0x17c0   :  { %v6595_v18 = vpop.permute.xlu1 %6594  ;;  %6334 = vmatmul.msk.f32.gmra.mxu2 %vm1104_vm10, %v4017_v50  ;;  %6942 = vrcp.f32 %v4277_v13 }
0x17c1   :  { %6944 = vrcp.f32 %v4567_v26  ;;  %v6596_v47 = vunpack.i.l.bf16 %v6595_v18  ;;  %v6597_v52 = vunpack.i.h.bf16 %v6595_v18 }
0x17c2   :  { %6946 = vrcp.f32 %v4466_v17 }
0x17c4   :  { %4187 = vrot.lane.b32.xlu2 %v9063_v61, %s7088_s29  ;;  %v4760_v61 = vpop.xlane.xlu0 %4759 }
0x17c5   :  { %v6941_v45 = vpop.eup %6940  ;;  %6948 = vrcp.f32 %v4760_v61 }
0x17c6   :  { %v6585_v21 = vpop.permute.xlu2 %6584  ;;  %v4570_v36 = vmul.f32 %v6941_v45, %v9015_v30  ;;  %v6943_v20 = vpop.eup %6942  ;;  %6950 = vrcp.f32 %v4469_v28 }
0x17c7   :  { %v6586_v40 = vunpack.i.l.bf16 %v6585_v21  ;;  %v6587_v15 = vunpack.i.h.bf16 %v6585_v21  ;;  %v4281_v46 = vmul.f32 %v6943_v20, %v8966_v5  ;;  %v6945_v23 = vpop.eup %6944 }
0x17c8   :  { %v6600_v22 = vpop.permute.xlu1 %6599  ;;  %6345 = vmatmul.msk.f32.vlgmr.msra.gmra.mxu2 %vm1104_vm10, %v4280_v4  ;;  %v4571_v30 = vmul.f32 %v6945_v23, %v9010_v62  ;;  %v6947_v31 = vpop.eup %6946 }
0x17c9   :  { %4696 = vmatpush.msra.mxu2 %v6591_v60  ;;  %4598 = vmatpush.msrb.mxu1 %v6586_v40  ;;  %v4472_v59 = vmul.f32 %v6947_v31, %v8998_v37  ;;  %v6601_v5 = vunpack.i.l.bf16 %v6600_v22  ;;  %v6602_v41 = vunpack.i.h.bf16 %v6600_v22 }
0x17cb   :  { %4697 = vmatpush.msra.mxu2 %v6592_v27  ;;  %4599 = vmatpush.msrb.mxu1 %v6587_v15  ;;  %v6949_v24 = vpop.eup %6948 }
0x17cc   :  { %6363 = vmatmul.msk.f32.vlgmr.msrb.gmra.mxu1 %vm1104_vm10, %v4570_v36  ;;  %v4766_v32 = vmul.f32 %v6949_v24, %v9021_v57  ;;  %v6951_v13 = vpop.eup %6950  ;;  %v4665_v37 = vpop.xlane.xlu0 %4664  ;;  %v5072_v24 = vld [vmem:[#allocation2 + $0x5b0] sm:$0xff] }
0x17cd   :  { %4794 = vmatpush.msra.mxu1 %v6596_v47  ;;  %v4473_v62 = vmul.f32 %v6951_v13, %v8978_v49  ;;  %v5070_v13 = vld [vmem:[#allocation2 + $0x590] sm:$0xff] }
0x17cf   :  { %4795 = vmatpush.msra.mxu1 %v6597_v52 }
0x17d0   :  { %v6605_v7 = vpop.permute.xlu1 %6604  ;;  %6346 = vmatmul.msk.f32.gmra.mxu2 %vm1104_vm10, %v4281_v46 }
0x17d1   :  { %v6606_v29 = vunpack.i.l.bf16 %v6605_v7  ;;  %v6607_v19 = vunpack.i.h.bf16 %v6605_v7  ;;  %v5076_v7 = vld [vmem:[#allocation2 + $0x5f0] sm:$0xff] }
0x17d2   :  { %5098 = vmatpush.msra.mxu3 %v5076_v7 }
0x17d3   :  { %4990 = vmatpush.msrb.mxu1 %v6606_v29  ;;  %v5075_v29 = vld [vmem:[#allocation2 + $0x5e0] sm:$0xff] }
0x17d4   :  { %6364 = vmatmul.msk.f32.gmra.mxu1 %vm1104_vm10, %v4571_v30  ;;  %v4858_v57 = vpop.xlane.xlu0 %4857  ;;  %5099 = vmatpush.msra.mxu3 %v5075_v29 }
0x17d5   :  { %4991 = vmatpush.msrb.mxu1 %v6607_v19  ;;  %v5074_v19 = vld [vmem:[#allocation2 + $0x5d0] sm:$0xff] }
0x17d6   :  { %5100 = vmatpush.msra.mxu3 %v5074_v19 }
0x17d8   :  { %6357 = vmatmul.msk.f32.vlgmr.msrb.gmra.mxu2 %vm1104_vm10, %v4472_v59  ;;  %v4186_v46 = vpop.permute.xlu1 %4185  ;;  %v5073_v59 = vld [vmem:[#allocation2 + $0x5c0] sm:$0xff] }
0x17d9   :  { %4892 = vmatpush.msrb.mxu2 %v6601_v5  ;;  %5101 = vmatpush.msra.mxu3 %v5073_v59  ;;  %v5071_v5 = vld [vmem:[#allocation2 + $0x5a0] sm:$0xff]  ;;  %v5077_v59 = vld [vmem:[%s9471_s2 + $0x30] ss:$0 sm:$0xff] }
0x17db   :  { %4893 = vmatpush.msrb.mxu2 %v6602_v41  ;;  %5102 = vmatpush.msra.mxu3 %v5072_v24 }
0x17dc   :  { %6375 = vmatmul.msk.f32.vlgmr.msra.gmra.mxu1 %vm1104_vm10, %v4766_v32  ;;  %v4861_v9 = vpop.xlane.xlu0 %4860 }
0x17dd   :  { %5103 = vmatpush.msra.mxu3 %v5071_v5 }
0x17df   :  { %5104 = vmatpush.msra.mxu3 %v5070_v13 }
0x17e0   :  { %6358 = vmatmul.msk.f32.gmra.mxu2 %vm1104_vm10, %v4473_v62  ;;  %v5069_v62 = vld [vmem:[#allocation2 + $0x580] sm:$0xff] }
0x17e1   :  { %5105 = vmatpush.msra.mxu3 %v5069_v62 }
0x17ee   :  { %v4154_v30 = vpop.permute.xlu0 %4153 }
0x17f0   :  { %v4405_v63 = vpop.f32.mrf.mxu1 }
0x17f1   :  { %5001 = vrot.lane.b32.xlu2 %v4405_v63, %s7082_s23 }
0x17f6   :  { %v4156_v41 = vpop.permute.xlu0 %4155 }
0x17f8   :  { %v4408_v4 = vpop.f32.mrf.mxu1  ;;  %v4202_v31 = vpop.permute.xlu1 %4201 }
0x17ff   :  { %v4662_v8 = vpop.xlane.xlu2 %4661 }
0x1800   :  { %6952 = vrcp.f32 %v4662_v8  ;;  %v4172_v32 = vpop.permute.xlu1 %4171  ;;  %v4204_v63 = vpop.permute.xlu0 %4203 }
0x1801   :  { %6954 = vrcp.f32 %v4665_v37 }
0x1806   :  { %v6953_v34 = vpop.eup %6952 }
0x1807   :  { %v4668_v16 = vmul.f32 %v6953_v34, %v9069_v1  ;;  %v4763_v28 = vpop.xlane.xlu2 %4762  ;;  %v6955_v35 = vpop.eup %6954 }
0x1808   :  { %6956 = vrcp.f32 %v4763_v28  ;;  %v4669_v6 = vmul.f32 %v6955_v35, %v9034_v54  ;;  %v3655_v54 = vpop.f32.mrf.mxu2  ;;  %v4207_v35 = vsel %vm315_vm4, %v8784_v44, %v4154_v30 }
0x1809   :  { %6369 = vmatmul.msk.f32.vlgmr.msra.gmra.mxu2 %vm1104_vm10, %v4668_v16  ;;  %6958 = vrcp.f32 %v4858_v57 }
0x180e   :  { %v6957_v11 = vpop.eup %6956 }
0x180f   :  { %v4956_v49 = vpop.xlane.xlu2 %4955  ;;  %v4767_v58 = vmul.f32 %v6957_v11, %v9077_v56  ;;  %v6959_v1 = vpop.eup %6958 }
0x1810   :  { %6960 = vrcp.f32 %v4956_v49  ;;  %v4864_v53 = vmul.f32 %v6959_v1, %v9041_v25 }
0x1811   :  { %6370 = vmatmul.msk.f32.gmra.mxu2 %vm1104_vm10, %v4669_v6  ;;  %6376 = vmatmul.msk.f32.gmra.mxu1 %vm1104_vm10, %v4767_v58  ;;  %6962 = vrcp.f32 %v4861_v9 }
0x1816   :  { %v6961_v48 = vpop.eup %6960 }
0x1817   :  { %v4962_v17 = vmul.f32 %v6961_v48, %v9083_v14  ;;  %v4959_v42 = vpop.xlane.xlu2 %4958  ;;  %v6963_v56 = vpop.eup %6962 }
0x1818   :  { %6964 = vrcp.f32 %v4959_v42  ;;  %v4865_v50 = vmul.f32 %v6963_v56, %v9049_v0  ;;  %v4208_v56 = vsel %vm315_vm4, %v8790_v2, %v4156_v41 }
0x1819   :  { %6381 = vmatmul.msk.f32.vlgmr.msrb.gmra.mxu2 %vm1104_vm10, %v4864_v53  ;;  %6387 = vmatmul.msk.f32.vlgmr.msrb.gmra.mxu1 %vm1104_vm10, %v4962_v17 }
0x181e   :  { %v6965_v3 = vpop.eup %6964 }
0x181f   :  { %v4963_v18 = vmul.f32 %v6965_v3, %v9088_v10  ;;  %v4170_v16 = vpop.permute.xlu2 %4169 }
0x1821   :  { %6382 = vmatmul.msk.f32.gmra.mxu2 %vm1104_vm10, %v4865_v50  ;;  %6388 = vmatmul.msk.f32.gmra.mxu1 %vm1104_vm10, %v4963_v18 }
0x1823   :  { %v3658_v25 = vpop.f32.mrf.mxu2 }
0x1827   :  { %v4188_v11 = vpop.permute.xlu2 %4187 }
0x182b   :  { %v3851_v12 = vpop.f32.mrf.mxu2 }
0x1833   :  { %v3854_v14 = vpop.f32.mrf.mxu2 }
0x183b   :  { %v4047_v26 = vpop.f32.mrf.mxu2 }
0x1843   :  { %v4050_v21 = vpop.f32.mrf.mxu2 }
0x1849   :  { %v4601_v45 = vpop.f32.mrf.mxu1 }
0x184a   :  { %5017 = vrot.lane.b32.xlu0 %v4601_v45, %s7085_s26 }
0x184b   :  { %v9137_v60 = vpop.f32.mrf.mxu2  ;;  %v5002_v42 = vpop.permute.xlu2 %5001 }
0x1851   :  { %v4604_v40 = vpop.f32.mrf.mxu1 }
0x1852   :  { %4179 = vrot.lane.b32.xlu0 %v3854_v14, %s7091_s5  ;;  %v5055_v14 = vsel %vm315_vm4, %v9137_v60, %v5002_v42 }
0x1853   :  { %v9140_v0 = vpop.f32.mrf.mxu2 }
0x1859   :  { %v4797_v10 = vpop.f32.mrf.mxu1 }
0x185a   :  { %4193 = vrot.lane.b32.xlu0 %v4047_v26, %s7083_s24  ;;  %5033 = vrot.lane.b32.xlu1 %v4797_v10, %s7088_s29 }
0x185b   :  { %v4503_v22 = vpop.f32.mrf.mxu2 }
0x1862   :  { %5003 = vrot.lane.b32.xlu1 %v4408_v4, %s7082_s23 }
0x1863   :  { %v4506_v27 = vpop.f32.mrf.mxu2 }
0x1864   :  { %5011 = vrot.lane.b32.xlu0 %v4506_v27, %s7075_s18 }
0x186a   :  { %4161 = vrot.lane.b32.xlu1 %v3655_v54, %s7075_s18 }
0x1872   :  { %4177 = vrot.lane.b32.xlu1 %v3851_v12, %s7091_s5 }
0x187a   :  { %4195 = vrot.lane.b32.xlu1 %v4050_v21, %s7083_s24 }
0x1882   :  { %5009 = vrot.lane.b32.xlu1 %v4503_v22, %s7075_s18 }
0x188c   :  { %v4699_v15 = vpop.f32.mrf.mxu2 }
0x188e   :  { %v4800_v36 = vpop.f32.mrf.mxu1 }
0x1894   :  { %v4702_v20 = vpop.f32.mrf.mxu2 }
0x1895   :  { %5027 = vrot.lane.b32.xlu1 %v4702_v20, %s7091_s5 }
0x1896   :  { %v4993_v47 = vpop.f32.mrf.mxu1 }
0x1897   :  { %5049 = vrot.lane.b32.xlu2 %v4993_v47, %s7081_s22 }
0x189c   :  { %v4895_v52 = vpop.f32.mrf.mxu2 }
0x189d   :  { %5041 = vrot.lane.b32.xlu0 %v4895_v52, %s7083_s24 }
0x189e   :  { %v4996_v61 = vpop.f32.mrf.mxu1 }
0x189f   :  { %4163 = vrot.lane.b32.xlu2 %v3658_v25, %s7075_s18  ;;  %5051 = vrot.lane.b32.xlu1 %v4996_v61, %s7081_s22 }
0x18a4   :  { %v4898_v23 = vpop.f32.mrf.mxu2 }
0x18a5   :  { %5035 = vrot.lane.b32.xlu0 %v4800_v36, %s7088_s29 }
0x18a7   :  { %5025 = vrot.lane.b32.xlu2 %v4699_v15, %s7091_s5  ;;  %s7095_s5 = smov 128  }
0x18af   :  { %5019 = vrot.lane.b32.xlu2 %v4604_v40, %s7085_s26 }
0x18b7   :  { %5043 = vrot.lane.b32.xlu2 %v4898_v23, %s7083_s24 }
0x18bc   :  { %v5018_v8 = vpop.permute.xlu0 %5017 }
0x18c4   :  { %v4180_v28 = vpop.permute.xlu0 %4179 }
0x18cc   :  { %v5034_v37 = vpop.permute.xlu1 %5033  ;;  %v4194_v1 = vpop.permute.xlu0 %4193 }
0x18d4   :  { %v5004_v34 = vpop.permute.xlu1 %5003 }
0x18d5   :  { %v5056_v36 = vsel %vm315_vm4, %v9140_v0, %v5004_v34 }
0x18d6   :  { %v5012_v27 = vpop.permute.xlu0 %5011 }
0x18d7   :  { %v5058_v61 = vsel %vm1104_vm10, %v5056_v36, %v5012_v27 }
0x18dc   :  { %v4162_v57 = vpop.permute.xlu1 %4161 }
0x18dd   :  { %v4209_v49 = vsel %vm1104_vm10, %v4207_v35, %v4162_v57 }
0x18de   :  { %v4211_v6 = vsel %vm1904_vm11, %v4209_v49, %v4170_v16 }
0x18e4   :  { %v4178_v58 = vpop.permute.xlu1 %4177 }
0x18e5   :  { %v4213_v9 = vsel %vm147_vm3, %v4211_v6, %v4178_v58 }
0x18e6   :  { %v4215_v48 = vsel %vm1909_vm12, %v4213_v9, %v4186_v46 }
0x18e7   :  { %v4217_v53 = vsel %vm1912_vm13, %v4215_v48, %v4194_v1 }
0x18e8   :  { %v4219_v17 = vsel %vm1915_vm14, %v4217_v53, %v4202_v31 }
0x18e9   :  { %6389 = vmatmul.msk.f32.vlgmr.msra.gmra.mxu3 %vm56_vm0, %v4219_v17 }
0x18ec   :  { %v4196_v54 = vpop.permute.xlu1 %4195 }
0x18f1   :  { %v5050_v44 = vpop.permute.xlu2 %5049 }
0x18f4   :  { %v5010_v18 = vpop.permute.xlu1 %5009 }
0x18f5   :  { %v5057_v4 = vsel %vm1104_vm10, %v5055_v14, %v5010_v18  ;;  %v5228_v14 = vld [vmem:[#allocation2 + $0x670] sm:$0xff] }
0x18f6   :  { %v5059_v2 = vsel %vm1904_vm11, %v5057_v4, %v5018_v8  ;;  %5250 = vmatpush.msra.mxu2 %v5228_v14  ;;  %v5226_v4 = vld [vmem:[#allocation2 + $0x650] sm:$0xff] }
0x18f9   :  { %v4164_v3 = vpop.permute.xlu2 %4163 }
0x18fa   :  { %v4210_v50 = vsel %vm1104_vm10, %v4208_v56, %v4164_v3 }
0x18fb   :  { %v4212_v25 = vsel %vm1904_vm11, %v4210_v50, %v4172_v32 }
0x18fc   :  { %v4214_v12 = vsel %vm147_vm3, %v4212_v25, %v4180_v28 }
0x18fd   :  { %v4216_v26 = vsel %vm1909_vm12, %v4214_v12, %v4188_v11 }
0x18fe   :  { %v4218_v21 = vsel %vm1912_vm13, %v4216_v26, %v4196_v54  ;;  %v5227_v26 = vld [vmem:[#allocation2 + $0x660] sm:$0xff] }
0x18ff   :  { %v4220_v45 = vsel %vm1915_vm14, %v4218_v21, %v4204_v63  ;;  %5251 = vmatpush.msra.mxu2 %v5227_v26  ;;  %v5225_v21 = vld [vmem:[#allocation2 + $0x640] sm:$0xff] }
0x1900   :  { %6390 = vmatmul.msk.f32.gmra.mxu3 %vm56_vm0, %v4220_v45  ;;  %v5224_v45 = vld [vmem:[#allocation2 + $0x630] sm:$0xff] }
0x1901   :  { %v5026_v40 = vpop.permute.xlu2 %5025  ;;  %5252 = vmatpush.msra.mxu2 %v5226_v4 }
0x1902   :  { %v5061_v10 = vsel %vm147_vm3, %v5059_v2, %v5026_v40  ;;  %v5223_v2 = vld [vmem:[#allocation2 + $0x620] sm:$0xff]  ;;  %v5222_v40 = vld [vmem:[#allocation2 + $0x610] sm:$0xff] }
0x1903   :  { %v5063_v22 = vsel %vm1909_vm12, %v5061_v10, %v5034_v37  ;;  %5253 = vmatpush.msra.mxu2 %v5225_v21  ;;  %v5221_v10 = vld [vmem:[#allocation2 + $0x600] sm:$0xff] }
0x1905   :  { %5254 = vmatpush.msra.mxu2 %v5224_v45 }
0x1907   :  { %v5028_v47 = vpop.permute.xlu1 %5027  ;;  %5255 = vmatpush.msra.mxu2 %v5223_v2 }
0x1909   :  { %v5020_v15 = vpop.permute.xlu2 %5019  ;;  %5256 = vmatpush.msra.mxu2 %v5222_v40 }
0x190a   :  { %v5060_v46 = vsel %vm1904_vm11, %v5058_v61, %v5020_v15 }
0x190b   :  { %v5062_v7 = vsel %vm147_vm3, %v5060_v46, %v5028_v47  ;;  %5257 = vmatpush.msra.mxu2 %v5221_v10  ;;  %v5123_v46 = vld [vmem:[%s9471_s2 + $0x25] ss:$0 sm:$0xff] }
0x190f   :  { %v5042_v60 = vpop.permute.xlu0 %5041 }
0x1910   :  { %v5065_v20 = vsel %vm1912_vm13, %v5063_v22, %v5042_v60 }
0x1911   :  { %v5067_v52 = vsel %vm1915_vm14, %v5065_v20, %v5050_v44  ;;  %v5044_v29 = vpop.permute.xlu2 %5043  ;;  %v5052_v31 = vpop.permute.xlu1 %5051 }
0x1912   :  { %6391 = vmatmul.msk.f32.gmra.mxu3 %vm56_vm0, %v5067_v52 }
0x1917   :  { %v5036_v23 = vpop.permute.xlu0 %5035 }
0x1918   :  { %v5064_v30 = vsel %vm1909_vm12, %v5062_v7, %v5036_v23 }
0x1919   :  { %v5066_v0 = vsel %vm1912_vm13, %v5064_v30, %v5044_v29  ;;  %v5124_v30 = vld [vmem:[%s9471_s2 + $0x26] ss:$0 sm:$0xff] }
0x191a   :  { %v5068_v19 = vsel %vm1915_vm14, %v5066_v0, %v5052_v31 }
0x191b   :  { %6392 = vmatmul.msk.f32.gmra.mxu3 %vm56_vm0, %v5068_v19 }
0x196c   :  { %v5107_v24 = vpop.f32.mrf.mxu3 }
0x196d   :  { %v5108_v5 = vadd.f32 %v5107_v24, %v5077_v59 }
0x196f   :  { %v9199_v41 = vadd.f32 %v5108_v5, %v8316_v33 }
0x1971   :  { %v5125_v32 = vsel %vm56_vm0, %v9199_v41, 0.0 }
0x1972   :  { %5126 = vadd.xlane.f32.xlu0 %v5125_v32 }
0x1983   :  { %v5110_v13 = vpop.f32.mrf.mxu3 }
0x1984   :  { %v5111_v62 = vadd.f32 %v5110_v13, %v5077_v59 }
0x1986   :  { %v9204_v63 = vadd.f32 %v5111_v62, %v8323_v51 }
0x1988   :  { %v5128_v37 = vsel %vm56_vm0, %v9204_v63, 0.0 }
0x1989   :  { %5129 = vadd.xlane.f32.xlu2 %v5128_v37 }
0x1995   :  { %v5113_v8 = vpop.f32.mrf.mxu3 }
0x1996   :  { %v5114_v34 = vadd.f32 %v5113_v8, %v5077_v59 }
0x1998   :  { %v9209_v16 = vadd.f32 %v5114_v34, %v8412_v43 }
0x199a   :  { %v5131_v33 = vsel %vm56_vm0, %v9209_v16, 0.0 }
0x199b   :  { %5132 = vadd.xlane.f32.xlu1 %v5131_v33 }
0x199e   :  { %v5116_v28 = vpop.f32.mrf.mxu3 }
0x199f   :  { %v5117_v57 = vadd.f32 %v5116_v28, %v5077_v59 }
0x19a1   :  { %v9214_v35 = vadd.f32 %v5117_v57, %v8421_v55 }
0x19a3   :  { %v5134_v51 = vsel %vm56_vm0, %v9214_v35, 0.0 }
0x19a4   :  { %5135 = vadd.xlane.f32.xlu2 %v5134_v51 }
0x19e5   :  { %v5127_v11 = vpop.xlane.xlu0 %5126 }
0x19e6   :  { %v5137_v49 = vmul.f32 %v5127_v11, %v7139_v39 }
0x19e8   :  { %v5141_v6 = vsub.f32 %v9199_v41, %v5137_v49 }
0x19ea   :  { %v5145_v43 = vmul.f32 %v5141_v6, %v5141_v6 }
0x19ec   :  { %v5149_v58 = vsel %vm56_vm0, %v5145_v43, 0.0 }
0x19ed   :  { %5150 = vadd.xlane.f32.xlu0 %v5149_v58 }
0x19fc   :  { %v5130_v9 = vpop.xlane.xlu2 %5129 }
0x19fd   :  { %v5138_v1 = vmul.f32 %v5130_v9, %v7139_v39 }
0x19ff   :  { %v9223_v48 = vsub.f32 %v9204_v63, %v5138_v1 }
0x1a01   :  { %v5146_v55 = vmul.f32 %v9223_v48, %v9223_v48 }
0x1a03   :  { %v5152_v53 = vsel %vm56_vm0, %v5146_v55, 0.0 }
0x1a04   :  { %5153 = vadd.xlane.f32.xlu1 %v5152_v53 }
0x1a0e   :  { %v5133_v17 = vpop.xlane.xlu1 %5132 }
0x1a0f   :  { %v5139_v42 = vmul.f32 %v5133_v17, %v7139_v39 }
0x1a11   :  { %v9230_v54 = vsub.f32 %v9209_v16, %v5139_v42 }
0x1a13   :  { %v5147_v44 = vmul.f32 %v9230_v54, %v9230_v54 }
0x1a15   :  { %v5155_v56 = vsel %vm56_vm0, %v5147_v44, 0.0 }
0x1a16   :  { %5156 = vadd.xlane.f32.xlu2 %v5155_v56 }
0x1a17   :  { %v5136_v3 = vpop.xlane.xlu2 %5135 }
0x1a18   :  { %v5140_v50 = vmul.f32 %v5136_v3, %v7139_v39 }
0x1a1a   :  { %v9237_v18 = vsub.f32 %v9214_v35, %v5140_v50 }
0x1a1c   :  { %v5148_v25 = vmul.f32 %v9237_v18, %v9237_v18 }
0x1a1e   :  { %v5158_v12 = vsel %vm56_vm0, %v5148_v25, 0.0 }
0x1a1f   :  { %5159 = vadd.xlane.f32.xlu0 %v5158_v12 }
0x1a60   :  { %v5151_v22 = vpop.xlane.xlu0 %5150 }
0x1a61   :  { %v5161_v27 = vmul.f32 %v5151_v22, %v7139_v39 }
0x1a63   :  { %v5165_v15 = vadd.f32 1e-05, %v5161_v27 }
0x1a65   :  { %6966 = vrsqrt.f32 %v5165_v15  ;;  %vm5175_vm11 = vweird.f32 %v5165_v15 }
0x1a6b   :  { %v6967_v60 = vpop.eup %6966 }
0x1a6c   :  { %v5170_v36 = vmul.f32 %v6967_v60, %v5165_v15  ;;  %vm5176_vm4 = vweird.f32 %v6967_v60 }
0x1a6d   :  { %vm5177_vm12 = vmor %vm5175_vm11, %vm5176_vm4 }
0x1a6e   :  { %v5171_v20 = vmul.f32 %v6967_v60, %v5170_v36  ;;  %v5437_v36 = vld [vmem:[#allocation2 + $0x6e0] sm:$0xff] }
0x1a70   :  { %v5172_v47 = vmul.f32 0.5, %v5171_v20  ;;  %v5436_v20 = vld [vmem:[#allocation2 + $0x6d0] sm:$0xff] }
0x1a72   :  { %v5173_v52 = vsub.f32 1.5, %v5172_v47  ;;  %v5435_v47 = vld [vmem:[#allocation2 + $0x6c0] sm:$0xff] }
0x1a74   :  { %v5174_v61 = vmul.f32 %v6967_v60, %v5173_v52 }
0x1a76   :  { %v5178_v23 = vsel %vm5177_vm12, %v6967_v60, %v5174_v61  ;;  %v5438_v60 = vld [vmem:[#allocation2 + $0x6f0] sm:$0xff] }
0x1a77   :  { %v5209_v7 = vmul.f32 %v5178_v23, %v5141_v6  ;;  %v5154_v29 = vpop.xlane.xlu1 %5153  ;;  %5460 = vmatpush.msra.mxu0 %v5438_v60 }
0x1a78   :  { %v5162_v31 = vmul.f32 %v5154_v29, %v7139_v39  ;;  %v5433_v29 = vld [vmem:[#allocation2 + $0x6a0] sm:$0xff] }
0x1a79   :  { %v5213_v0 = vmul.f32 %v5209_v7, %v5123_v46  ;;  %5461 = vmatpush.msra.mxu0 %v5437_v36 }
0x1a7a   :  { %v5166_v19 = vadd.f32 1e-05, %v5162_v31 }
0x1a7b   :  { %v5217_v59 = vadd.f32 %v5213_v0, %v5124_v30  ;;  %5462 = vmatpush.msra.mxu0 %v5436_v20 }
0x1a7c   :  { %6968 = vrsqrt.f32 %v5166_v19  ;;  %vm5185_vm14 = vweird.f32 %v5166_v19 }
0x1a7d   :  { %6393 = vmatmul.msk.f32.vlgmr.msra.gmra.mxu2 %vm56_vm0, %v5217_v59  ;;  %5463 = vmatpush.msra.mxu0 %v5435_v47 }
0x1a82   :  { %v6969_v24 = vpop.eup %6968 }
0x1a83   :  { %v5180_v5 = vmul.f32 %v6969_v24, %v5166_v19  ;;  %vm5186_vm13 = vweird.f32 %v6969_v24  ;;  %v5432_v19 = vld [vmem:[#allocation2 + $0x690] sm:$0xff] }
0x1a84   :  { %vm5187_vm6 = vmor %vm5185_vm14, %vm5186_vm13 }
0x1a85   :  { %v5181_v32 = vmul.f32 %v6969_v24, %v5180_v5 }
0x1a87   :  { %v5182_v13 = vmul.f32 0.5, %v5181_v32  ;;  %v5431_v32 = vld [vmem:[#allocation2 + $0x680] sm:$0xff] }
0x1a89   :  { %v5183_v62 = vsub.f32 1.5, %v5182_v13  ;;  %v5157_v37 = vpop.xlane.xlu2 %5156 }
0x1a8a   :  { %v5163_v8 = vmul.f32 %v5157_v37, %v7139_v39 }
0x1a8b   :  { %v5184_v34 = vmul.f32 %v6969_v24, %v5183_v62 }
0x1a8c   :  { %v5167_v33 = vadd.f32 1e-05, %v5163_v8 }
0x1a8d   :  { %v5188_v28 = vsel %vm5187_vm6, %v6969_v24, %v5184_v34 }
0x1a8e   :  { %v5210_v57 = vmul.f32 %v5188_v28, %v9223_v48  ;;  %6970 = vrsqrt.f32 %v5167_v33  ;;  %vm5195_vm8 = vweird.f32 %v5167_v33 }
0x1a90   :  { %v5214_v51 = vmul.f32 %v5210_v57, %v5123_v46 }
0x1a92   :  { %v5160_v11 = vpop.xlane.xlu0 %5159  ;;  %v5218_v49 = vadd.f32 %v5214_v51, %v5124_v30 }
0x1a93   :  { %v5164_v6 = vmul.f32 %v5160_v11, %v7139_v39 }
0x1a94   :  { %v6971_v43 = vpop.eup %6970  ;;  %6394 = vmatmul.msk.f32.gmra.mxu2 %vm56_vm0, %v5218_v49 }
0x1a95   :  { %v5190_v58 = vmul.f32 %v6971_v43, %v5167_v33  ;;  %v5168_v9 = vadd.f32 1e-05, %v5164_v6  ;;  %vm5196_vm7 = vweird.f32 %v6971_v43 }
0x1a96   :  { %vm5197_vm9 = vmor %vm5195_vm8, %vm5196_vm7 }
0x1a97   :  { %v5191_v1 = vmul.f32 %v6971_v43, %v5190_v58  ;;  %6972 = vrsqrt.f32 %v5168_v9  ;;  %vm5205_vm1 = vweird.f32 %v5168_v9 }
0x1a99   :  { %v5192_v55 = vmul.f32 0.5, %v5191_v1 }
0x1a9b   :  { %v5193_v53 = vsub.f32 1.5, %v5192_v55 }
0x1a9d   :  { %v6973_v17 = vpop.eup %6972  ;;  %v5194_v42 = vmul.f32 %v6971_v43, %v5193_v53 }
0x1a9e   :  { %v5200_v48 = vmul.f32 %v6973_v17, %v5168_v9  ;;  %vm5206_vm15 = vweird.f32 %v6973_v17 }
0x1a9f   :  { %v5198_v44 = vsel %vm5197_vm9, %v6971_v43, %v5194_v42  ;;  %vm5207_vm2 = vmor %vm5205_vm1, %vm5206_vm15 }
0x1aa0   :  { %v5211_v56 = vmul.f32 %v5198_v44, %v9230_v54  ;;  %v5201_v3 = vmul.f32 %v6973_v17, %v5200_v48  ;;  %v9262_v54 = vld [vmem:[%s9471_s2 + $0x31] ss:$0 sm:$0xff] }
0x1aa2   :  { %v5202_v50 = vmul.f32 0.5, %v5201_v3  ;;  %v5215_v25 = vmul.f32 %v5211_v56, %v5123_v46 }
0x1aa4   :  { %v5203_v12 = vsub.f32 1.5, %v5202_v50  ;;  %v5219_v14 = vadd.f32 %v5215_v25, %v5124_v30 }
0x1aa6   :  { %v5204_v26 = vmul.f32 %v6973_v17, %v5203_v12  ;;  %6395 = vmatmul.msk.f32.gmra.mxu2 %vm56_vm0, %v5219_v14 }
0x1aa8   :  { %v5208_v4 = vsel %vm5207_vm2, %v6973_v17, %v5204_v26 }
0x1aa9   :  { %v5212_v21 = vmul.f32 %v5208_v4, %v9237_v18 }
0x1aab   :  { %v5216_v45 = vmul.f32 %v5212_v21, %v5123_v46  ;;  %v5434_v46 = vld [vmem:[#allocation2 + $0x6b0] sm:$0xff] }
0x1aac   :  { %5464 = vmatpush.msra.mxu0 %v5434_v46 }
0x1aad   :  { %v5220_v2 = vadd.f32 %v5216_v45, %v5124_v30 }
0x1aae   :  { %5465 = vmatpush.msra.mxu0 %v5433_v29 }
0x1aaf   :  { %6396 = vmatmul.msk.f32.gmra.mxu2 %vm56_vm0, %v5220_v2 }
0x1ab0   :  { %5466 = vmatpush.msra.mxu0 %v5432_v19 }
0x1ab2   :  { %5467 = vmatpush.msra.mxu0 %v5431_v32 }
0x1b00   :  { %v5259_v40 = vpop.f32.mrf.mxu2 }
0x1b01   :  { %v9265_v10 = vadd.f32 %v5259_v40, %v9262_v54 }
0x1b03   :  { %v9268_v22 = vmul.f32 0.70710677, %v9265_v10  ;;  %v5271_v46 = vmul.f32 0.5, %v9265_v10 }
0x1b05   :  { %v5279_v27 = vand.u32 2147483647, %v9268_v22  ;;  %vm5411_vm8 = vcmp.ge.f32.partialorder %v9268_v22, 0.0 }
0x1b07   :  { %v5283_v15 = vmul.f32 0.3275911, %v5279_v27  ;;  %v5387_v8 = vsub.f32 0.0, %v5279_v27 }
0x1b09   :  { %v5287_v18 = vadd.f32 1.0, %v5283_v15  ;;  %v5391_v51 = vmul.f32 %v5387_v8, %v5279_v27 }
0x1b0b   :  { %6974 = vrcp.f32 %v5287_v18  ;;  %v5302_v7 = vand.u32 2147483648, %v5287_v18  ;;  %v5300_v31 = vand.u32 2147483647, %v5287_v18  ;;  %vm5296_vm4 = vweird.f32 %v5287_v18 }
0x1b0c   :  { %v5395_v43 = vmul.f32 1.442695, %v5391_v51 }
0x1b0d   :  { %v5303_v5 = vor.u32 1.1754944e-38, %v5302_v7  ;;  %vm5301_vm12 = vcmp.eq.f32.partialorder %v5300_v31, 8.507059e+37 }
0x1b11   :  { %v6975_v52 = vpop.eup %6974 }
0x1b12   :  { %v5292_v61 = vmul.f32 %v6975_v52, %v5287_v18  ;;  %vm5297_vm5 = vweird.f32 %v6975_v52 }
0x1b13   :  { %vm5298_vm11 = vmor %vm5296_vm4, %vm5297_vm5 }
0x1b14   :  { %v5293_v23 = vsub.f32 1.0, %v5292_v61 }
0x1b16   :  { %v5294_v30 = vmul.f32 %v6975_v52, %v5293_v23 }
0x1b17   :  { %v5262_v0 = vpop.f32.mrf.mxu2 }
0x1b18   :  { %v5295_v59 = vadd.f32 %v6975_v52, %v5294_v30  ;;  %v9272_v24 = vadd.f32 %v5262_v0, %v9262_v54 }
0x1b1a   :  { %v5299_v13 = vsel %vm5298_vm11, %v6975_v52, %v5295_v59  ;;  %v9275_v62 = vmul.f32 0.70710677, %v9272_v24 }
0x1b1b   :  { %v5304_v37 = vsel %vm5301_vm12, %v5303_v5, %v5299_v13 }
0x1b1c   :  { %v5351_v34 = vmul.f32 1.0614054, %v5304_v37  ;;  %v5280_v33 = vand.u32 2147483647, %v9275_v62  ;;  %vm5412_vm4 = vcmp.ge.f32.partialorder %v9275_v62, 0.0 }
0x1b1e   :  { %v6397_v28 = vadd.f32 -1.4531521, %v5351_v34  ;;  %v5284_v57 = vmul.f32 0.3275911, %v5280_v33  ;;  %v5388_v15 = vsub.f32 0.0, %v5280_v33 }
0x1b20   :  { %v5359_v11 = vmul.f32 %v6397_v28, %v5304_v37  ;;  %v5288_v49 = vadd.f32 1.0, %v5284_v57  ;;  %v5392_v29 = vmul.f32 %v5388_v15, %v5280_v33 }
0x1b22   :  { %v5363_v6 = vadd.f32 1.4214138, %v5359_v11  ;;  %6976 = vrcp.f32 %v5288_v49  ;;  %v5317_v3 = vand.u32 2147483648, %v5288_v49  ;;  %v5315_v14 = vand.u32 2147483647, %v5288_v49 }
0x1b23   :  { %6978 = vpow2.f32 %v5395_v43  ;;  %vm5311_vm14 = vweird.f32 %v5288_v49  ;;  %v5397_v59 = vmul.f32 1.442695, %v5392_v29 }
0x1b24   :  { %v5367_v58 = vmul.f32 %v5363_v6, %v5304_v37  ;;  %v5318_v2 = vor.u32 1.1754944e-38, %v5317_v3  ;;  %vm5316_vm7 = vcmp.eq.f32.partialorder %v5315_v14, 8.507059e+37 }
0x1b26   :  { %v6401_v9 = vadd.f32 -0.28449672, %v5367_v58 }
0x1b28   :  { %v6977_v1 = vpop.eup %6976  ;;  %v5375_v55 = vmul.f32 %v6401_v9, %v5304_v37 }
0x1b29   :  { %v5307_v53 = vmul.f32 %v6977_v1, %v5288_v49  ;;  %v5265_v17 = vpop.f32.mrf.mxu2  ;;  %v6979_v25 = vpop.eup %6978  ;;  %vm5312_vm13 = vweird.f32 %v6977_v1  ;;  %v9301_v49 = vld [vmem:[#allocation2 + $0x80] sm:$0xff] }
0x1b2a   :  { %v5379_v42 = vadd.f32 0.2548296, %v5375_v55  ;;  %v9279_v48 = vadd.f32 %v5265_v17, %v9262_v54  ;;  %vm5313_vm6 = vmor %vm5311_vm14, %vm5312_vm13  ;;  %v5487_v6 = vsel %vm147_vm3, %v9301_v49, 0.0 }
0x1b2b   :  { %v5308_v44 = vsub.f32 1.0, %v5307_v53  ;;  %5488 = vadd.xlane.f32.xlu1 %v5487_v6 }
0x1b2c   :  { %v5383_v56 = vmul.f32 %v5379_v42, %v5304_v37  ;;  %v9282_v50 = vmul.f32 0.70710677, %v9279_v48 }
0x1b2d   :  { %v5309_v12 = vmul.f32 %v6977_v1, %v5308_v44 }
0x1b2e   :  { %v5403_v26 = vmul.f32 %v6979_v25, %v5383_v56  ;;  %v9285_v4 = vand.u32 2147483647, %v9282_v50  ;;  %vm5413_vm14 = vcmp.ge.f32.partialorder %v9282_v50, 0.0 }
0x1b2f   :  { %v5310_v21 = vadd.f32 %v6977_v1, %v5309_v12 }
0x1b30   :  { %v5407_v45 = vsub.f32 1.0, %v5403_v26  ;;  %v5285_v40 = vmul.f32 0.3275911, %v9285_v4  ;;  %v5389_v17 = vsub.f32 0.0, %v9285_v4 }
0x1b31   :  { %v5314_v27 = vsel %vm5313_vm6, %v6977_v1, %v5310_v21 }
0x1b32   :  { %v5415_v18 = vsub.f32 0.0, %v5407_v45  ;;  %v5319_v60 = vsel %vm5316_vm7, %v5318_v2, %v5314_v27  ;;  %v5289_v36 = vadd.f32 1.0, %v5285_v40  ;;  %v5268_v20 = vpop.f32.mrf.mxu2  ;;  %v5393_v14 = vmul.f32 %v5389_v17, %v9285_v4 }
0x1b33   :  { %v5352_v47 = vmul.f32 1.0614054, %v5319_v60  ;;  %v9290_v52 = vadd.f32 %v5268_v20, %v9262_v54 }
0x1b34   :  { %v5419_v61 = vsel %vm5411_vm8, %v5407_v45, %v5415_v18  ;;  %6980 = vrcp.f32 %v5289_v36  ;;  %v5332_v34 = vand.u32 2147483648, %v5289_v36  ;;  %v5330_v57 = vand.u32 2147483647, %v5289_v36 }
0x1b35   :  { %v5423_v23 = vadd.f32 1.0, %v5419_v61  ;;  %v6398_v7 = vadd.f32 -1.4531521, %v5352_v47  ;;  %v9294_v30 = vmul.f32 0.70710677, %v9290_v52  ;;  %6982 = vpow2.f32 %v5397_v59 }
0x1b36   :  { %vm5326_vm15 = vweird.f32 %v5289_v36  ;;  %v5333_v43 = vor.u32 1.1754944e-38, %v5332_v34  ;;  %vm5331_vm2 = vcmp.eq.f32.partialorder %v5330_v57, 8.507059e+37  ;;  %v5399_v20 = vmul.f32 1.442695, %v5393_v14 }
0x1b37   :  { %v5427_v31 = vmul.f32 %v5423_v23, %v5271_v46  ;;  %v5360_v0 = vmul.f32 %v6398_v7, %v5319_v60  ;;  %v9297_v19 = vand.u32 2147483647, %v9294_v30  ;;  %vm5414_vm6 = vcmp.ge.f32.partialorder %v9294_v30, 0.0 }
0x1b38   :  { %v5274_v17 = vmul.f32 0.5, %v9290_v52 }
0x1b39   :  { %v5364_v22 = vadd.f32 1.4214138, %v5360_v0  ;;  %6405 = vmatmul.msk.f32.vlgmr.msra.gmra.mxu0 %vm56_vm0, %v5427_v31  ;;  %v5286_v5 = vmul.f32 0.3275911, %v9297_v19  ;;  %v5390_v7 = vsub.f32 0.0, %v9297_v19 }
0x1b3a   :  { %v6981_v54 = vpop.eup %6980 }
0x1b3b   :  { %v5368_v32 = vmul.f32 %v5364_v22, %v5319_v60  ;;  %v5322_v10 = vmul.f32 %v6981_v54, %v5289_v36  ;;  %v5290_v13 = vadd.f32 1.0, %v5286_v5  ;;  %vm5327_vm9 = vweird.f32 %v6981_v54  ;;  %v6983_v58 = vpop.eup %6982 }
0x1b3c   :  { %vm5328_vm1 = vmor %vm5326_vm15, %vm5327_vm9 }
0x1b3d   :  { %v6402_v37 = vadd.f32 -0.28449672, %v5368_v32  ;;  %v5323_v8 = vsub.f32 1.0, %v5322_v10  ;;  %6984 = vrcp.f32 %v5290_v13  ;;  %v5345_v26 = vand.u32 2147483647, %v5290_v13 }
0x1b3e   :  { %v5347_v21 = vand.u32 2147483648, %v5290_v13  ;;  %vm5341_vm11 = vweird.f32 %v5290_v13  ;;  %6986 = vpow2.f32 %v5399_v20 }
0x1b3f   :  { %v5376_v33 = vmul.f32 %v6402_v37, %v5319_v60  ;;  %v5324_v28 = vmul.f32 %v6981_v54, %v5323_v8  ;;  %vm5346_vm13 = vcmp.eq.f32.partialorder %v5345_v26, 8.507059e+37 }
0x1b40   :  { %v5348_v47 = vor.u32 1.1754944e-38, %v5347_v21 }
0x1b41   :  { %v5380_v51 = vadd.f32 0.2548296, %v5376_v33  ;;  %v5325_v11 = vadd.f32 %v6981_v54, %v5324_v28 }
0x1b43   :  { %v5384_v9 = vmul.f32 %v5380_v51, %v5319_v60  ;;  %v5329_v1 = vsel %vm5328_vm1, %v6981_v54, %v5325_v11  ;;  %v6985_v55 = vpop.eup %6984  ;;  %v5272_v60 = vmul.f32 0.5, %v9272_v24  ;;  %v5394_v24 = vmul.f32 %v5390_v7, %v9297_v19 }
0x1b44   :  { %v5334_v53 = vsel %vm5331_vm2, %v5333_v43, %v5329_v1  ;;  %v5337_v56 = vmul.f32 %v6985_v55, %v5290_v13  ;;  %vm5342_vm5 = vweird.f32 %v6985_v55  ;;  %v6987_v32 = vpop.eup %6986  ;;  %v5273_v11 = vmul.f32 0.5, %v9279_v48  ;;  %v5439_v48 = vld [vmem:[%s9471_s2 + $0x32] ss:$0 sm:$0xff] }
0x1b45   :  { %v5404_v42 = vmul.f32 %v6983_v58, %v5384_v9  ;;  %v5353_v44 = vmul.f32 1.0614054, %v5334_v53  ;;  %vm5343_vm12 = vmor %vm5341_vm11, %vm5342_vm5  ;;  %v5401_v10 = vmul.f32 1.442695, %v5394_v24 }
0x1b46   :  { %v5338_v12 = vsub.f32 1.0, %v5337_v56 }
0x1b47   :  { %v5408_v3 = vsub.f32 1.0, %v5404_v42  ;;  %v6399_v25 = vadd.f32 -1.4531521, %v5353_v44  ;;  %6988 = vpow2.f32 %v5401_v10 }
0x1b48   :  { %v5339_v40 = vmul.f32 %v6985_v55, %v5338_v12 }
0x1b49   :  { %v5416_v45 = vsub.f32 0.0, %v5408_v3  ;;  %v5361_v2 = vmul.f32 %v6399_v25, %v5334_v53 }
0x1b4a   :  { %v5340_v18 = vadd.f32 %v6985_v55, %v5339_v40 }
0x1b4b   :  { %v5420_v27 = vsel %vm5412_vm4, %v5408_v3, %v5416_v45  ;;  %v5365_v15 = vadd.f32 1.4214138, %v5361_v2 }
0x1b4c   :  { %v5424_v36 = vadd.f32 1.0, %v5420_v27  ;;  %v5344_v4 = vsel %vm5343_vm12, %v6985_v55, %v5340_v18 }
0x1b4d   :  { %v5369_v61 = vmul.f32 %v5365_v15, %v5334_v53  ;;  %v5349_v23 = vsel %vm5346_vm13, %v5348_v47, %v5344_v4  ;;  %v6989_v43 = vpop.eup %6988 }
0x1b4e   :  { %v5428_v46 = vmul.f32 %v5424_v36, %v5272_v60  ;;  %v5354_v31 = vmul.f32 1.0614054, %v5349_v23 }
0x1b4f   :  { %v6403_v29 = vadd.f32 -0.28449672, %v5369_v61 }
0x1b50   :  { %6406 = vmatmul.msk.f32.gmra.mxu0 %vm56_vm0, %v5428_v46  ;;  %v6400_v0 = vadd.f32 -1.4531521, %v5354_v31  ;;  %v5612_v46 = vld [vmem:[#allocation2 + $0x730] sm:$0xff] }
0x1b51   :  { %v5377_v62 = vmul.f32 %v6403_v29, %v5334_v53  ;;  %5629 = vmatpush.msra.mxu1 %v5612_v46  ;;  %v5610_v31 = vld [vmem:[#allocation2 + $0x710] sm:$0xff] }
0x1b52   :  { %v5362_v59 = vmul.f32 %v6400_v0, %v5349_v23 }
0x1b53   :  { %v5381_v22 = vadd.f32 0.2548296, %v5377_v62  ;;  %v5609_v62 = vld [vmem:[#allocation2 + $0x700] sm:$0xff] }
0x1b54   :  { %v5366_v5 = vadd.f32 1.4214138, %v5362_v59 }
0x1b55   :  { %v5385_v54 = vmul.f32 %v5381_v22, %v5334_v53 }
0x1b56   :  { %v5370_v37 = vmul.f32 %v5366_v5, %v5349_v23 }
0x1b57   :  { %v5405_v13 = vmul.f32 %v6987_v32, %v5385_v54 }
0x1b58   :  { %v6404_v34 = vadd.f32 -0.28449672, %v5370_v37 }
0x1b59   :  { %v5409_v8 = vsub.f32 1.0, %v5405_v13 }
0x1b5a   :  { %v5378_v28 = vmul.f32 %v6404_v34, %v5349_v23 }
0x1b5b   :  { %v5417_v33 = vsub.f32 0.0, %v5409_v8 }
0x1b5c   :  { %v5382_v51 = vadd.f32 0.2548296, %v5378_v28 }
0x1b5d   :  { %v5421_v57 = vsel %vm5413_vm14, %v5409_v8, %v5417_v33 }
0x1b5e   :  { %v5425_v19 = vadd.f32 1.0, %v5421_v57  ;;  %v5386_v6 = vmul.f32 %v5382_v51, %v5349_v23 }
0x1b60   :  { %v5429_v58 = vmul.f32 %v5425_v19, %v5273_v11  ;;  %v5406_v9 = vmul.f32 %v6989_v43, %v5386_v6  ;;  %v5485_v6 = vld [vmem:[%s9471_s2 + $0x33] ss:$0 sm:$0xff] }
0x1b62   :  { %6407 = vmatmul.msk.f32.gmra.mxu0 %vm56_vm0, %v5429_v58  ;;  %v5410_v1 = vsub.f32 1.0, %v5406_v9 }
0x1b64   :  { %v5418_v55 = vsub.f32 0.0, %v5410_v1 }
0x1b66   :  { %v5422_v53 = vsel %vm5414_vm6, %v5410_v1, %v5418_v55  ;;  %v5486_v1 = vld [vmem:[%s9471_s2 + $0x34] ss:$0 sm:$0xff] }
0x1b67   :  { %v5426_v42 = vadd.f32 1.0, %v5422_v53 }
0x1b69   :  { %v5430_v50 = vmul.f32 %v5426_v42, %v5274_v17 }
0x1b6b   :  { %6408 = vmatmul.msk.f32.gmra.mxu0 %vm56_vm0, %v5430_v50  ;;  %v5647_v50 = vld [vmem:[#allocation2 + $0x7b0] sm:$0xff] }
0x1b9e   :  { %v5489_v12 = vpop.xlane.xlu1 %5488 }
0x1b9f   :  { %v5490_v30 = vmul.f32 %v5489_v12, %v7137_v38  ;;  %v5641_v12 = vld [vmem:[#allocation2 + $0x750] sm:$0xff] }
0x1ba1   :  { %v5491_v21 = vsub.f32 %v9301_v49, %v5490_v30  ;;  %v5640_v30 = vld [vmem:[#allocation2 + $0x740] sm:$0xff] }
0x1ba3   :  { %v5492_v2 = vmul.f32 %v5491_v21, %v5491_v21 }
0x1ba5   :  { %v5493_v40 = vsel %vm147_vm3, %v5492_v2, 0.0 }
0x1bb6   :  { %v5469_v44 = vpop.f32.mrf.mxu0 }
0x1bb7   :  { %v5470_v56 = vadd.f32 %v5469_v44, %v5439_v48  ;;  %v5645_v44 = vld [vmem:[#allocation2 + $0x790] sm:$0xff] }
0x1bb9   :  { %v5481_v3 = vadd.f32 %v5470_v56, %v9199_v41  ;;  %v5644_v56 = vld [vmem:[#allocation2 + $0x780] sm:$0xff] }
0x1bbb   :  { %v5513_v25 = vsel %vm56_vm0, %v5481_v3, 0.0 }
0x1bbc   :  { %5514 = vadd.xlane.f32.xlu2 %v5513_v25  ;;  %v5642_v25 = vld [vmem:[#allocation2 + $0x760] sm:$0xff] }
0x1bcd   :  { %v5472_v14 = vpop.f32.mrf.mxu0 }
0x1bce   :  { %v5473_v52 = vadd.f32 %v5472_v14, %v5439_v48 }
0x1bd0   :  { %v5482_v26 = vadd.f32 %v5473_v52, %v9204_v63 }
0x1bd2   :  { %v5516_v45 = vsel %vm56_vm0, %v5482_v26, 0.0 }
0x1bd3   :  { %5517 = vadd.xlane.f32.xlu0 %v5516_v45 }
0x1bdb   :  { %5494 = vadd.xlane.f32.xlu0 %v5493_v40 }
0x1bdf   :  { %v5475_v41 = vpop.f32.mrf.mxu0 }
0x1be0   :  { %v5476_v27 = vadd.f32 %v5475_v41, %v5439_v48 }
0x1be2   :  { %v5483_v15 = vadd.f32 %v5476_v27, %v9209_v16 }
0x1be4   :  { %v5519_v18 = vsel %vm56_vm0, %v5483_v15, 0.0 }
0x1be5   :  { %5520 = vadd.xlane.f32.xlu1 %v5519_v18 }
0x1be8   :  { %v5478_v60 = vpop.f32.mrf.mxu0 }
0x1be9   :  { %v5479_v36 = vadd.f32 %v5478_v60, %v5439_v48  ;;  %v5646_v48 = vld [vmem:[#allocation2 + $0x7a0] sm:$0xff] }
0x1beb   :  { %v5484_v63 = vadd.f32 %v5479_v36, %v9214_v35  ;;  %v5611_v35 = vld [vmem:[#allocation2 + $0x720] sm:$0xff] }
0x1bec   :  { %5630 = vmatpush.msra.mxu1 %v5611_v35 }
0x1bed   :  { %v5522_v49 = vsel %vm56_vm0, %v5484_v63, 0.0 }
0x1bee   :  { %5523 = vadd.xlane.f32.xlu2 %v5522_v49  ;;  %5631 = vmatpush.msra.mxu1 %v5610_v31 }
0x1bf0   :  { %5632 = vmatpush.msra.mxu1 %v5609_v62 }
0x1bf2   :  { %5669 = vmatpush.msrb.mxu1 %v5647_v50 }
0x1bf4   :  { %5670 = vmatpush.msrb.mxu1 %v5646_v48 }
0x1bf6   :  { %5671 = vmatpush.msrb.mxu1 %v5645_v44 }
0x1bf8   :  { %5672 = vmatpush.msrb.mxu1 %v5644_v56  ;;  %v5648_v56 = vld [vmem:[%s9471_s2 + $0x42] ss:$0 sm:$0xff] }
0x1c2f   :  { %v5515_v20 = vpop.xlane.xlu2 %5514 }
0x1c30   :  { %v5525_v47 = vmul.f32 %v5515_v20, %v7139_v39 }
0x1c32   :  { %v9333_v61 = vsub.f32 %v5481_v3, %v5525_v47  ;;  %v5643_v3 = vld [vmem:[#allocation2 + $0x770] sm:$0xff] }
0x1c33   :  { %5673 = vmatpush.msrb.mxu1 %v5643_v3 }
0x1c34   :  { %v5533_v4 = vmul.f32 %v9333_v61, %v9333_v61 }
0x1c35   :  { %5674 = vmatpush.msrb.mxu1 %v5642_v25 }
0x1c36   :  { %v5537_v16 = vsel %vm56_vm0, %v5533_v4, 0.0 }
0x1c37   :  { %5538 = vadd.xlane.f32.xlu1 %v5537_v16  ;;  %5675 = vmatpush.msrb.mxu1 %v5641_v12 }
0x1c39   :  { %5676 = vmatpush.msrb.mxu1 %v5640_v30 }
0x1c46   :  { %v5518_v23 = vpop.xlane.xlu0 %5517 }
0x1c47   :  { %v5526_v7 = vmul.f32 %v5518_v23, %v7139_v39 }
0x1c49   :  { %v9339_v29 = vsub.f32 %v5482_v26, %v5526_v7 }
0x1c4b   :  { %v5534_v0 = vmul.f32 %v9339_v29, %v9339_v29 }
0x1c4d   :  { %v5540_v24 = vsel %vm56_vm0, %v5534_v0, 0.0 }
0x1c4e   :  { %5541 = vadd.xlane.f32.xlu2 %v5540_v24  ;;  %v5495_v22 = vpop.xlane.xlu0 %5494 }
0x1c4f   :  { %v5496_v59 = vmul.f32 %v5495_v22, %v7137_v38 }
0x1c51   :  { %v5497_v54 = vadd.f32 1e-05, %v5496_v59 }
0x1c53   :  { %6990 = vrsqrt.f32 %v5497_v54  ;;  %vm5504_vm7 = vweird.f32 %v5497_v54 }
0x1c58   :  { %v5521_v5 = vpop.xlane.xlu1 %5520 }
0x1c59   :  { %v6991_v32 = vpop.eup %6990  ;;  %v5527_v10 = vmul.f32 %v5521_v5, %v7139_v39 }
0x1c5a   :  { %v5499_v13 = vmul.f32 %v6991_v32, %v5497_v54  ;;  %vm5505_vm8 = vweird.f32 %v6991_v32 }
0x1c5b   :  { %v9346_v37 = vsub.f32 %v5483_v15, %v5527_v10  ;;  %vm5506_vm9 = vmor %vm5504_vm7, %vm5505_vm8  ;;  %v5511_v15 = vld [vmem:[%s9471_s2 + $0x35] ss:$0 sm:$0xff] }
0x1c5c   :  { %v5500_v8 = vmul.f32 %v6991_v32, %v5499_v13 }
0x1c5d   :  { %v5535_v34 = vmul.f32 %v9346_v37, %v9346_v37 }
0x1c5e   :  { %v5501_v33 = vmul.f32 0.5, %v5500_v8 }
0x1c5f   :  { %v5543_v28 = vsel %vm56_vm0, %v5535_v34, 0.0 }
0x1c60   :  { %v5502_v57 = vsub.f32 1.5, %v5501_v33  ;;  %5544 = vadd.xlane.f32.xlu0 %v5543_v28 }
0x1c61   :  { %v5524_v11 = vpop.xlane.xlu2 %5523 }
0x1c62   :  { %v5503_v51 = vmul.f32 %v6991_v32, %v5502_v57  ;;  %v5528_v19 = vmul.f32 %v5524_v11, %v7139_v39 }
0x1c64   :  { %v5507_v43 = vsel %vm5506_vm9, %v6991_v32, %v5503_v51  ;;  %v9355_v9 = vsub.f32 %v5484_v63, %v5528_v19  ;;  %v5512_v63 = vld [vmem:[%s9471_s2 + $0x36] ss:$0 sm:$0xff] }
0x1c65   :  { %v5508_v58 = vmul.f32 %v5507_v43, %v5491_v21 }
0x1c66   :  { %v5536_v53 = vmul.f32 %v9355_v9, %v9355_v9 }
0x1c67   :  { %v5509_v55 = vmul.f32 %v5508_v58, %v5485_v6 }
0x1c68   :  { %v5546_v42 = vsel %vm56_vm0, %v5536_v53, 0.0 }
0x1c69   :  { %v5510_v17 = vadd.f32 %v5509_v55, %v5486_v1  ;;  %5547 = vadd.xlane.f32.xlu1 %v5546_v42 }
0x1c6b   :  { %6409 = vmatmul.msk.f32.vlgmr.msra.gmra.mxu1 %vm147_vm3, %v5510_v17 }
0x1c73   :  { %6410 = vmatmul.msk.f32.gmra.mxu1 %vm147_vm3, %v5510_v17 }
0x1caa   :  { %v5539_v14 = vpop.xlane.xlu1 %5538 }
0x1cab   :  { %v5549_v52 = vmul.f32 %v5539_v14, %v7139_v39 }
0x1cad   :  { %v5553_v26 = vadd.f32 1e-05, %v5549_v52 }
0x1caf   :  { %6992 = vrsqrt.f32 %v5553_v26  ;;  %vm5563_vm1 = vweird.f32 %v5553_v26 }
0x1cb5   :  { %v6993_v21 = vpop.eup %6992 }
0x1cb6   :  { %v5558_v45 = vmul.f32 %v6993_v21, %v5553_v26  ;;  %vm5564_vm15 = vweird.f32 %v6993_v21 }
0x1cb7   :  { %vm5565_vm2 = vmor %vm5563_vm1, %vm5564_vm15 }
0x1cb8   :  { %v5559_v2 = vmul.f32 %v6993_v21, %v5558_v45 }
0x1cba   :  { %v5560_v40 = vmul.f32 0.5, %v5559_v2 }
0x1cbc   :  { %v5561_v41 = vsub.f32 1.5, %v5560_v40 }
0x1cbe   :  { %v5562_v27 = vmul.f32 %v6993_v21, %v5561_v41 }
0x1cc0   :  { %v5566_v18 = vsel %vm5565_vm2, %v6993_v21, %v5562_v27 }
0x1cc1   :  { %v5597_v60 = vmul.f32 %v5566_v18, %v9333_v61  ;;  %v5542_v36 = vpop.xlane.xlu2 %5541 }
0x1cc2   :  { %v5550_v49 = vmul.f32 %v5542_v36, %v7139_v39 }
0x1cc3   :  { %v5601_v20 = vmul.f32 %v5597_v60, %v5511_v15 }
0x1cc4   :  { %v5554_v47 = vadd.f32 1e-05, %v5550_v49 }
0x1cc5   :  { %v5605_v4 = vadd.f32 %v5601_v20, %v5512_v63 }
0x1cc6   :  { %6994 = vrsqrt.f32 %v5554_v47  ;;  %vm5573_vm4 = vweird.f32 %v5554_v47 }
0x1cc7   :  { %6411 = vmatmul.msk.f32.vlgmr.msrb.gmra.mxu1 %vm56_vm0, %v5605_v4 }
0x1ccc   :  { %v6995_v16 = vpop.eup %6994 }
0x1ccd   :  { %v5568_v46 = vmul.f32 %v6995_v16, %v5554_v47  ;;  %vm5574_vm5 = vweird.f32 %v6995_v16 }
0x1cce   :  { %vm5575_vm11 = vmor %vm5573_vm4, %vm5574_vm5 }
0x1ccf   :  { %v5569_v23 = vmul.f32 %v6995_v16, %v5568_v46 }
0x1cd1   :  { %v5570_v7 = vmul.f32 0.5, %v5569_v23 }
0x1cd3   :  { %v5571_v35 = vsub.f32 1.5, %v5570_v7  ;;  %v5545_v61 = vpop.xlane.xlu0 %5544 }
0x1cd4   :  { %v5551_v31 = vmul.f32 %v5545_v61, %v7139_v39 }
0x1cd5   :  { %v5572_v62 = vmul.f32 %v6995_v16, %v5571_v35 }
0x1cd6   :  { %v5555_v0 = vadd.f32 1e-05, %v5551_v31 }
0x1cd7   :  { %v5576_v24 = vsel %vm5575_vm11, %v6995_v16, %v5572_v62 }
0x1cd8   :  { %v5598_v22 = vmul.f32 %v5576_v24, %v9339_v29  ;;  %6996 = vrsqrt.f32 %v5555_v0  ;;  %vm5583_vm13 = vweird.f32 %v5555_v0  ;;  %v5833_v24 = vld [vmem:[#allocation2 + $0x7f0] sm:$0xff] }
0x1cda   :  { %v5602_v59 = vmul.f32 %v5598_v22, %v5511_v15  ;;  %v5832_v22 = vld [vmem:[#allocation2 + $0x7e0] sm:$0xff] }
0x1cdc   :  { %v5606_v54 = vadd.f32 %v5602_v59, %v5512_v63  ;;  %v5548_v5 = vpop.xlane.xlu1 %5547 }
0x1cdd   :  { %v5552_v10 = vmul.f32 %v5548_v5, %v7139_v39  ;;  %v5831_v5 = vld [vmem:[#allocation2 + $0x7d0] sm:$0xff] }
0x1cde   :  { %v6997_v32 = vpop.eup %6996  ;;  %6412 = vmatmul.msk.f32.gmra.mxu1 %vm56_vm0, %v5606_v54 }
0x1cdf   :  { %v5578_v13 = vmul.f32 %v6997_v32, %v5555_v0  ;;  %v5556_v8 = vadd.f32 1e-05, %v5552_v10  ;;  %vm5584_vm12 = vweird.f32 %v6997_v32 }
0x1ce0   :  { %vm5585_vm14 = vmor %vm5583_vm13, %vm5584_vm12 }
0x1ce1   :  { %v5579_v34 = vmul.f32 %v6997_v32, %v5578_v13  ;;  %6998 = vrsqrt.f32 %v5556_v8  ;;  %vm5593_vm7 = vweird.f32 %v5556_v8 }
0x1ce3   :  { %v5580_v33 = vmul.f32 0.5, %v5579_v34 }
0x1ce5   :  { %v5581_v28 = vsub.f32 1.5, %v5580_v33 }
0x1ce7   :  { %v5582_v57 = vmul.f32 %v6997_v32, %v5581_v28  ;;  %v6999_v51 = vpop.eup %6998  ;;  %v5830_v28 = vld [vmem:[#allocation2 + $0x7c0] sm:$0xff] }
0x1ce8   :  { %v5588_v11 = vmul.f32 %v6999_v51, %v5556_v8  ;;  %vm5594_vm6 = vweird.f32 %v6999_v51  ;;  %v5634_v48 = vpop.f32.mrf.mxu1 }
0x1ce9   :  { %v5586_v29 = vsel %vm5585_vm14, %v6997_v32, %v5582_v57  ;;  %vm5595_vm8 = vmor %vm5593_vm7, %vm5594_vm6 }
0x1cea   :  { %v5599_v19 = vmul.f32 %v5586_v29, %v9346_v37  ;;  %v5589_v6 = vmul.f32 %v6999_v51, %v5588_v11  ;;  %v5834_v29 = vld [vmem:[%s9471_s2 + $0x43] ss:$0 sm:$0xff] }
0x1cec   :  { %v5603_v43 = vmul.f32 %v5599_v19, %v5511_v15  ;;  %v5590_v39 = vmul.f32 0.5, %v5589_v6 }
0x1cee   :  { %v5607_v58 = vadd.f32 %v5603_v43, %v5512_v63  ;;  %v5591_v1 = vsub.f32 1.5, %v5590_v39 }
0x1cf0   :  { %6413 = vmatmul.msk.f32.gmra.mxu1 %vm56_vm0, %v5607_v58  ;;  %v5592_v55 = vmul.f32 %v6999_v51, %v5591_v1  ;;  %v5637_v37 = vpop.f32.mrf.mxu1 }
0x1cf2   :  { %v5596_v53 = vsel %vm5595_vm8, %v6999_v51, %v5592_v55 }
0x1cf3   :  { %v5600_v17 = vmul.f32 %v5596_v53, %v9355_v9  ;;  %v5613_v9 = vld [vmem:[%s9471_s2 + $0x41] ss:$0 sm:$0xff] }
0x1cf4   :  { %v5635_v14 = vadd.f32 %v5634_v48, %v5613_v9  ;;  %v5638_v40 = vadd.f32 %v5637_v37, %v5613_v9 }
0x1cf5   :  { %v5604_v42 = vmul.f32 %v5600_v17, %v5511_v15 }
0x1cf7   :  { %v5608_v50 = vadd.f32 %v5604_v42, %v5512_v63 }
0x1cf9   :  { %6414 = vmatmul.msk.f32.gmra.mxu1 %vm56_vm0, %v5608_v50 }
0x1d44   :  { %v5678_v44 = vpop.f32.mrf.mxu1 }
0x1d45   :  { %v5679_v25 = vadd.f32 %v5678_v44, %v5648_v56 }
0x1d5b   :  { %v5681_v3 = vpop.f32.mrf.mxu1 }
0x1d5c   :  { %v5682_v12 = vadd.f32 %v5681_v3, %v5648_v56  ;;  %v5917_v3 = vld [vmem:[#allocation2 + $0x830] sm:$0xff] }
0x1d5e   :  { %v6608_v30 = vpack.i.bf16 %v5679_v25, %v5682_v12  ;;  %6415 = vmatpush.xpose.msk.msrb.mxu3 %vm147_vm3, %v5682_v12  ;;  %v5915_v12 = vld [vmem:[#allocation2 + $0x810] sm:$0xff] }
0x1d62   :  { %6416 = vmatpush.xpose.msk.msrb.mxu3 %vm147_vm3, %v5679_v25  ;;  %v5916_v25 = vld [vmem:[#allocation2 + $0x820] sm:$0xff] }
0x1d65   :  { %6417 = vmatmul.msk.f32.vlgmr.msrb.gmra.mxu3 %vm147_vm3, %v5635_v14 }
0x1d6d   :  { %v5684_v52 = vpop.f32.mrf.mxu1 }
0x1d6e   :  { %v5685_v21 = vadd.f32 %v5684_v52, %v5648_v56 }
0x1d76   :  { %v5687_v26 = vpop.f32.mrf.mxu1 }
0x1d77   :  { %v5688_v45 = vadd.f32 %v5687_v26, %v5648_v56 }
0x1d79   :  { %v6613_v2 = vpack.i.bf16 %v5685_v21, %v5688_v45  ;;  %6419 = vmatpush.xpose.msk.msra.mxu3 %vm147_vm3, %v5688_v45 }
0x1d7d   :  { %6420 = vmatpush.xpose.msk.msra.mxu3 %vm147_vm3, %v5685_v21 }
0x1d80   :  { %6421 = vmatmul.msk.f32.vlgmr.msra.gmra.mxu3 %vm147_vm3, %v5638_v40 }
0x1d81   :  { %5937 = vmatpush.msrb.mxu3 %v5917_v3 }
0x1d83   :  { %5938 = vmatpush.msrb.mxu3 %v5916_v25 }
0x1d85   :  { %5939 = vmatpush.msrb.mxu3 %v5915_v12 }
0x1de8   :  { %v5716_v41 = vpop.f32.mrf.mxu3 }
0x1de9   :  { %v5719_v27 = vmul.f32 0.17677669, %v5716_v41 }
0x1deb   :  { %v5720_v15 = vsel %vm1104_vm10, %v5719_v27, -inf }
0x1dec   :  { %5721 = vmax.xlane.f32.xlu2 %v5720_v15 }
0x1e03   :  { %v5786_v18 = vpop.f32.mrf.mxu3 }
0x1e04   :  { %6609 = vrot.lane.b32.xlu2 %v6608_v30, %s7093_s8  ;;  %v5789_v60 = vmul.f32 0.17677669, %v5786_v18  ;;  %v5914_v30 = vld [vmem:[#allocation2 + $0x800] sm:$0xff] }
0x1e05   :  { %5940 = vmatpush.msrb.mxu3 %v5914_v30 }
0x1e06   :  { %v5790_v36 = vsel %vm1104_vm10, %v5789_v60, -inf }
0x1e07   :  { %5791 = vmax.xlane.f32.xlu0 %v5790_v36 }
0x1e5f   :  { %v5722_v63 = vpop.xlane.xlu2 %5721 }
0x1e60   :  { %v5723_v49 = vsub.f32 %v5719_v27, %v5722_v63  ;;  %v5864_v27 = vld [vmem:[%s9471_s2 + $0x37] ss:$0 sm:$0xff]  ;;  %v5865_v63 = vld [vmem:[%s9471_s2 + $0x40] ss:$0 sm:$0xff] }
0x1e62   :  { %v5724_v20 = vmul.f32 1.442695, %v5723_v49 }
0x1e64   :  { %7000 = vpow2.f32 %v5724_v20 }
0x1e67   :  { %v6610_v47 = vpop.permute.xlu2 %6609 }
0x1e68   :  { %v6611_v4 = vunpack.i.l.bf16 %v6610_v47  ;;  %v6612_v46 = vunpack.i.h.bf16 %v6610_v47 }
0x1e6a   :  { %v7001_v16 = vpop.eup %7000  ;;  %5754 = vmatpush.msrb.mxu2 %v6611_v4 }
0x1e6b   :  { %v5726_v23 = vsel %vm1104_vm10, %v7001_v16, 0.0 }
0x1e6c   :  { %5727 = vadd.xlane.f32.xlu1 %v5726_v23  ;;  %5755 = vmatpush.msrb.mxu2 %v6612_v46 }
0x1e6e   :  { %5853 = vmatpush.msra.mxu2 %v5833_v24 }
0x1e70   :  { %5854 = vmatpush.msra.mxu2 %v5832_v22 }
0x1e72   :  { %5855 = vmatpush.msra.mxu2 %v5831_v5 }
0x1e74   :  { %5856 = vmatpush.msra.mxu2 %v5830_v28  ;;  %v6030_v28 = vld [vmem:[#allocation2 + $0x860] sm:$0xff] }
0x1e7a   :  { %v5792_v7 = vpop.xlane.xlu0 %5791 }
0x1e7b   :  { %v5793_v35 = vsub.f32 %v5789_v60, %v5792_v7 }
0x1e7d   :  { %v5794_v61 = vmul.f32 1.442695, %v5793_v35 }
0x1e7f   :  { %7002 = vpow2.f32 %v5794_v61 }
0x1e85   :  { %6614 = vrot.lane.b32.xlu1 %v6613_v2, %s7093_s8  ;;  %v7003_v31 = vpop.eup %7002 }
0x1e86   :  { %v5796_v62 = vsel %vm1104_vm10, %v7003_v31, 0.0 }
0x1e87   :  { %5797 = vadd.xlane.f32.xlu0 %v5796_v62 }
0x1edf   :  { %v5728_v0 = vpop.xlane.xlu1 %5727 }
0x1ee0   :  { %7004 = vrcp.f32 %v5728_v0  ;;  %v5918_v0 = vld [vmem:[%s9471_s2 + $0x44] ss:$0 sm:$0xff] }
0x1ee6   :  { %v7005_v59 = vpop.eup %7004 }
0x1ee7   :  { %v5730_v54 = vmul.f32 %v7005_v59, %v7001_v16 }
0x1ee9   :  { %6418 = vmatmul.msk.f32.vlgmr.msrb.gmra.mxu2 %vm1104_vm10, %v5730_v54 }
0x1ef7   :  { %v6615_v32 = vpop.permute.xlu1 %6614 }
0x1ef8   :  { %v6616_v10 = vunpack.i.l.bf16 %v6615_v32  ;;  %v6617_v13 = vunpack.i.h.bf16 %v6615_v32 }
0x1efa   :  { %5824 = vmatpush.msrb.mxu0 %v6616_v10  ;;  %v5798_v8 = vpop.xlane.xlu0 %5797 }
0x1efb   :  { %7006 = vrcp.f32 %v5798_v8  ;;  %v6031_v8 = vld [vmem:[#allocation2 + $0x870] sm:$0xff] }
0x1efc   :  { %5825 = vmatpush.msrb.mxu0 %v6617_v13 }
0x1efe   :  { %6051 = vmatpush.msra.mxu0 %v6031_v8 }
0x1f00   :  { %6052 = vmatpush.msra.mxu0 %v6030_v28 }
0x1f01   :  { %v7007_v34 = vpop.eup %7006 }
0x1f02   :  { %v5800_v33 = vmul.f32 %v7007_v34, %v7003_v31 }
0x1f04   :  { %6422 = vmatmul.msk.f32.vlgmr.msrb.gmra.mxu0 %vm1104_vm10, %v5800_v33 }
0x1f6c   :  { %v5757_v57 = vpop.f32.mrf.mxu2 }
0x1f6d   :  { %6423 = vmatmul.msk.f32.vlgmr.msra.gmra.mxu2 %vm147_vm3, %v5757_v57 }
0x1f81   :  { %v5827_v51 = vpop.f32.mrf.mxu0 }
0x1f82   :  { %6424 = vmatmul.msk.f32.gmra.mxu2 %vm147_vm3, %v5827_v51 }
0x1ff0   :  { %v5858_v11 = vpop.f32.mrf.mxu2 }
0x1ff1   :  { %v9408_v19 = vadd.f32 %v5858_v11, %v5834_v29 }
0x1ff3   :  { %v5866_v6 = vsel %vm147_vm3, %v9408_v19, 0.0 }
0x1ff4   :  { %5867 = vadd.xlane.f32.xlu0 %v5866_v6  ;;  %v6029_v6 = vld [vmem:[#allocation2 + $0x850] sm:$0xff] }
0x1ff5   :  { %6053 = vmatpush.msra.mxu0 %v6029_v6  ;;  %v6066_v6 = vld [vmem:[#allocation2 + $0x8a0] sm:$0xff] }
0x2005   :  { %v5861_v43 = vpop.f32.mrf.mxu2 }
0x2006   :  { %v9412_v39 = vadd.f32 %v5861_v43, %v5834_v29 }
0x2008   :  { %v5869_v58 = vsel %vm147_vm3, %v9412_v39, 0.0 }
0x2009   :  { %5870 = vadd.xlane.f32.xlu0 %v5869_v58 }
0x2067   :  { %v5868_v1 = vpop.xlane.xlu0 %5867 }
0x2068   :  { %v5872_v55 = vmul.f32 %v5868_v1, %v7137_v38 }
0x206a   :  { %v5874_v53 = vsub.f32 %v9408_v19, %v5872_v55  ;;  %v6028_v55 = vld [vmem:[#allocation2 + $0x840] sm:$0xff] }
0x206b   :  { %6054 = vmatpush.msra.mxu0 %v6028_v55  ;;  %v6032_v55 = vld [vmem:[%s9471_s2 + $0x45] ss:$0 sm:$0xff] }
0x206c   :  { %v5876_v17 = vmul.f32 %v5874_v53, %v5874_v53 }
0x206e   :  { %v5878_v42 = vsel %vm147_vm3, %v5876_v17, 0.0 }
0x206f   :  { %5879 = vadd.xlane.f32.xlu2 %v5878_v42 }
0x207c   :  { %v5871_v50 = vpop.xlane.xlu0 %5870 }
0x207d   :  { %v5873_v48 = vmul.f32 %v5871_v50, %v7137_v38 }
0x207f   :  { %v5875_v37 = vsub.f32 %v9412_v39, %v5873_v48 }
0x2081   :  { %v5877_v44 = vmul.f32 %v5875_v37, %v5875_v37 }
0x2083   :  { %v5881_v56 = vsel %vm147_vm3, %v5877_v44, 0.0 }
0x2084   :  { %5882 = vadd.xlane.f32.xlu0 %v5881_v56 }
0x20e2   :  { %v5880_v9 = vpop.xlane.xlu2 %5879 }
0x20e3   :  { %v5884_v14 = vmul.f32 %v5880_v9, %v7137_v38 }
0x20e5   :  { %v5886_v52 = vadd.f32 1e-05, %v5884_v14 }
0x20e7   :  { %7008 = vrsqrt.f32 %v5886_v52  ;;  %vm5894_vm9 = vweird.f32 %v5886_v52 }
0x20ed   :  { %v7009_v26 = vpop.eup %7008 }
0x20ee   :  { %v5889_v21 = vmul.f32 %v7009_v26, %v5886_v52  ;;  %vm5895_vm10 = vweird.f32 %v7009_v26 }
0x20ef   :  { %vm5896_vm15 = vmor %vm5894_vm9, %vm5895_vm10 }
0x20f0   :  { %v5890_v45 = vmul.f32 %v7009_v26, %v5889_v21 }
0x20f2   :  { %v5891_v2 = vmul.f32 0.5, %v5890_v45 }
0x20f4   :  { %v5892_v40 = vsub.f32 1.5, %v5891_v2 }
0x20f6   :  { %v5893_v41 = vmul.f32 %v7009_v26, %v5892_v40 }
0x20f7   :  { %v5883_v18 = vpop.xlane.xlu0 %5882 }
0x20f8   :  { %v5897_v15 = vsel %vm5896_vm15, %v7009_v26, %v5893_v41  ;;  %v5885_v36 = vmul.f32 %v5883_v18, %v7137_v38 }
0x20f9   :  { %v5908_v60 = vmul.f32 %v5897_v15, %v5874_v53 }
0x20fa   :  { %v5887_v20 = vadd.f32 1e-05, %v5885_v36 }
0x20fb   :  { %v5910_v49 = vmul.f32 %v5908_v60, %v5864_v27 }
0x20fc   :  { %7010 = vrsqrt.f32 %v5887_v20  ;;  %vm5904_vm2 = vweird.f32 %v5887_v20 }
0x20fd   :  { %v5912_v47 = vadd.f32 %v5910_v49, %v5865_v63  ;;  %v6067_v49 = vld [vmem:[#allocation2 + $0x8b0] sm:$0xff] }
0x20fe   :  { %6087 = vmatpush.msra.mxu1 %v6067_v49 }
0x20ff   :  { %6425 = vmatmul.msk.f32.vlgmr.msrb.gmra.mxu3 %vm147_vm3, %v5912_v47 }
0x2100   :  { %6088 = vmatpush.msra.mxu1 %v6066_v6 }
0x2102   :  { %v7011_v4 = vpop.eup %7010 }
0x2103   :  { %v5899_v16 = vmul.f32 %v7011_v4, %v5887_v20  ;;  %vm5905_vm1 = vweird.f32 %v7011_v4 }
0x2104   :  { %vm5906_vm5 = vmor %vm5904_vm2, %vm5905_vm1 }
0x2105   :  { %v5900_v46 = vmul.f32 %v7011_v4, %v5899_v16 }
0x2107   :  { %v5901_v23 = vmul.f32 0.5, %v5900_v46 }
0x2109   :  { %v5902_v7 = vsub.f32 1.5, %v5901_v23 }
0x210b   :  { %v5903_v35 = vmul.f32 %v7011_v4, %v5902_v7 }
0x210d   :  { %v5907_v38 = vsel %vm5906_vm5, %v7011_v4, %v5903_v35 }
0x210e   :  { %v5909_v61 = vmul.f32 %v5907_v38, %v5875_v37 }
0x2110   :  { %v5911_v31 = vmul.f32 %v5909_v61, %v5864_v27 }
0x2112   :  { %v5913_v62 = vadd.f32 %v5911_v31, %v5865_v63 }
0x2114   :  { %6426 = vmatmul.msk.f32.gmra.mxu3 %vm147_vm3, %v5913_v62 }
0x2182   :  { %v5942_v24 = vpop.f32.mrf.mxu3 }
0x2183   :  { %v9435_v22 = vadd.f32 %v5942_v24, %v5918_v0 }
0x2185   :  { %v9438_v59 = vmul.f32 0.70710677, %v9435_v22  ;;  %v5948_v38 = vmul.f32 0.5, %v9435_v22 }
0x2187   :  { %v5952_v54 = vand.u32 2147483647, %v9438_v59  ;;  %vm6018_vm10 = vcmp.ge.f32.partialorder %v9438_v59, 0.0 }
0x2189   :  { %v5954_v5 = vmul.f32 0.3275911, %v5952_v54  ;;  %v6006_v42 = vsub.f32 0.0, %v5952_v54 }
0x218b   :  { %v5956_v32 = vadd.f32 1.0, %v5954_v5  ;;  %v6008_v56 = vmul.f32 %v6006_v42, %v5952_v54 }
0x218d   :  { %7012 = vrcp.f32 %v5956_v32  ;;  %v5969_v33 = vand.u32 2147483648, %v5956_v32  ;;  %v5967_v51 = vand.u32 2147483647, %v5956_v32  ;;  %vm5963_vm11 = vweird.f32 %v5956_v32 }
0x218e   :  { %v6010_v30 = vmul.f32 1.442695, %v6008_v56 }
0x218f   :  { %v5970_v58 = vor.u32 1.1754944e-38, %v5969_v33  ;;  %vm5968_vm13 = vcmp.eq.f32.partialorder %v5967_v51, 8.507059e+37 }
0x2193   :  { %v7013_v10 = vpop.eup %7012 }
0x2194   :  { %v5959_v13 = vmul.f32 %v7013_v10, %v5956_v32  ;;  %vm5964_vm4 = vweird.f32 %v7013_v10 }
0x2195   :  { %vm5965_vm12 = vmor %vm5963_vm11, %vm5964_vm4 }
0x2196   :  { %v5960_v34 = vsub.f32 1.0, %v5959_v13 }
0x2197   :  { %v5945_v29 = vpop.f32.mrf.mxu3 }
0x2198   :  { %v5961_v57 = vmul.f32 %v7013_v10, %v5960_v34  ;;  %v9441_v11 = vadd.f32 %v5945_v29, %v5918_v0 }
0x219a   :  { %v5962_v43 = vadd.f32 %v7013_v10, %v5961_v57  ;;  %v9444_v1 = vmul.f32 0.70710677, %v9441_v11  ;;  %v5949_v57 = vmul.f32 0.5, %v9441_v11 }
0x219c   :  { %v5966_v53 = vsel %vm5965_vm12, %v7013_v10, %v5962_v43  ;;  %v5953_v50 = vand.u32 2147483647, %v9444_v1  ;;  %vm6019_vm9 = vcmp.ge.f32.partialorder %v9444_v1, 0.0  ;;  %v6065_v43 = vld [vmem:[#allocation2 + $0x890] sm:$0xff] }
0x219d   :  { %v5971_v17 = vsel %vm5968_vm13, %v5970_v58, %v5966_v53  ;;  %v6064_v58 = vld [vmem:[#allocation2 + $0x880] sm:$0xff]  ;;  %6089 = vmatpush.msra.mxu1 %v6065_v43 }
0x219e   :  { %v5988_v48 = vmul.f32 1.0614054, %v5971_v17  ;;  %v5955_v37 = vmul.f32 0.3275911, %v5953_v50  ;;  %v6007_v16 = vsub.f32 0.0, %v5953_v50 }
0x219f   :  { %6090 = vmatpush.msra.mxu1 %v6064_v58 }
0x21a0   :  { %v6427_v44 = vadd.f32 -1.4531521, %v5988_v48  ;;  %v5957_v3 = vadd.f32 1.0, %v5955_v37  ;;  %v6009_v31 = vmul.f32 %v6007_v16, %v5953_v50  ;;  %v6068_v48 = vld [vmem:[%s9471_s2 + $0x46] ss:$0 sm:$0xff] }
0x21a2   :  { %v5992_v25 = vmul.f32 %v6427_v44, %v5971_v17  ;;  %7014 = vrcp.f32 %v5957_v3  ;;  %v5984_v40 = vand.u32 2147483648, %v5957_v3  ;;  %v5982_v15 = vand.u32 2147483647, %v5957_v3 }
0x21a3   :  { %7016 = vpow2.f32 %v6010_v30  ;;  %vm5978_vm6 = vweird.f32 %v5957_v3  ;;  %v6012_v54 = vmul.f32 1.442695, %v6009_v31 }
0x21a4   :  { %v5994_v12 = vadd.f32 1.4214138, %v5992_v25  ;;  %v5985_v63 = vor.u32 1.1754944e-38, %v5984_v40  ;;  %vm5983_vm8 = vcmp.eq.f32.partialorder %v5982_v15, 8.507059e+37 }
0x21a5   :  { %7018 = vpow2.f32 %v6012_v54 }
0x21a6   :  { %v5996_v9 = vmul.f32 %v5994_v12, %v5971_v17 }
0x21a8   :  { %v6429_v14 = vadd.f32 -0.28449672, %v5996_v9  ;;  %v7015_v52 = vpop.eup %7014 }
0x21a9   :  { %v5974_v21 = vmul.f32 %v7015_v52, %v5957_v3  ;;  %vm5979_vm14 = vweird.f32 %v7015_v52  ;;  %v7017_v18 = vpop.eup %7016 }
0x21aa   :  { %v6000_v26 = vmul.f32 %v6429_v14, %v5971_v17  ;;  %vm5980_vm7 = vmor %vm5978_vm6, %vm5979_vm14 }
0x21ab   :  { %v5975_v2 = vsub.f32 1.0, %v5974_v21  ;;  %v7019_v34 = vpop.eup %7018 }
0x21ac   :  { %v6002_v45 = vadd.f32 0.2548296, %v6000_v26 }
0x21ad   :  { %v5976_v27 = vmul.f32 %v7015_v52, %v5975_v2 }
0x21ae   :  { %v6004_v41 = vmul.f32 %v6002_v45, %v5971_v17 }
0x21af   :  { %v5977_v36 = vadd.f32 %v7015_v52, %v5976_v27 }
0x21b0   :  { %v6014_v60 = vmul.f32 %v7017_v18, %v6004_v41 }
0x21b1   :  { %v5981_v47 = vsel %vm5980_vm7, %v7015_v52, %v5977_v36 }
0x21b2   :  { %v6016_v20 = vsub.f32 1.0, %v6014_v60  ;;  %v5986_v4 = vsel %vm5983_vm8, %v5985_v63, %v5981_v47 }
0x21b3   :  { %v5989_v23 = vmul.f32 1.0614054, %v5986_v4 }
0x21b4   :  { %v6020_v46 = vsub.f32 0.0, %v6016_v20 }
0x21b5   :  { %v6428_v35 = vadd.f32 -1.4531521, %v5989_v23 }
0x21b6   :  { %v6022_v7 = vsel %vm6018_vm10, %v6016_v20, %v6020_v46 }
0x21b7   :  { %v6024_v61 = vadd.f32 1.0, %v6022_v7  ;;  %v5993_v62 = vmul.f32 %v6428_v35, %v5986_v4 }
0x21b9   :  { %v6026_v0 = vmul.f32 %v6024_v61, %v5948_v38  ;;  %v5995_v24 = vadd.f32 1.4214138, %v5993_v62 }
0x21bb   :  { %6431 = vmatmul.msk.f32.vlgmr.msra.gmra.mxu0 %vm147_vm3, %v6026_v0  ;;  %v5997_v5 = vmul.f32 %v5995_v24, %v5986_v4 }
0x21bd   :  { %v6430_v32 = vadd.f32 -0.28449672, %v5997_v5 }
0x21bf   :  { %v6001_v10 = vmul.f32 %v6430_v32, %v5986_v4 }
0x21c1   :  { %v6003_v13 = vadd.f32 0.2548296, %v6001_v10 }
0x21c3   :  { %v6005_v8 = vmul.f32 %v6003_v13, %v5986_v4 }
0x21c5   :  { %v6015_v59 = vmul.f32 %v7019_v34, %v6005_v8 }
0x21c7   :  { %v6017_v33 = vsub.f32 1.0, %v6015_v59 }
0x21c9   :  { %v6021_v28 = vsub.f32 0.0, %v6017_v33 }
0x21cb   :  { %v6023_v22 = vsel %vm6019_vm9, %v6017_v33, %v6021_v28 }
0x21cc   :  { %v6025_v51 = vadd.f32 1.0, %v6023_v22 }
0x21ce   :  { %v6027_v29 = vmul.f32 %v6025_v51, %v5949_v57 }
0x21d0   :  { %6432 = vmatmul.msk.f32.gmra.mxu0 %vm147_vm3, %v6027_v29 }
0x2238   :  { %v6056_v53 = vpop.f32.mrf.mxu0 }
0x2239   :  { %v6057_v17 = vadd.f32 %v6056_v53, %v6032_v55 }
0x223b   :  { %v6062_v1 = vadd.f32 %v6057_v17, %v9408_v19 }
0x223d   :  { %6433 = vmatmul.msk.f32.vlgmr.msra.gmra.mxu1 %vm147_vm3, %v6062_v1 }
0x224d   :  { %v6059_v11 = vpop.f32.mrf.mxu0 }
0x224e   :  { %v6060_v42 = vadd.f32 %v6059_v11, %v6032_v55 }
0x2250   :  { %v6063_v50 = vadd.f32 %v6060_v42, %v9412_v39 }
0x2252   :  { %6434 = vmatmul.msk.f32.gmra.mxu1 %vm147_vm3, %v6063_v50 }
0x22ba   :  { %v6092_v37 = vpop.f32.mrf.mxu1 }
0x22bb   :  { %v6093_v44 = vadd.f32 %v6092_v37, %v6068_v48 }
0x22bd   :  { %6098 = vst.msk [vmem:[#allocation5] sm:$0xff] %vm56_vm0, %v6093_v44 }
0x22cf   :  { %v6095_v19 = vpop.f32.mrf.mxu1 }
0x22d0   :  { %v6096_v56 = vadd.f32 %v6095_v19, %v6068_v48 }
0x22d2   :  { %6099 = vst.msk [vmem:[#allocation5 + $0x8] sm:$0xff] %vm56_vm0, %v6096_v56 }
0x22d3   :  { %6112 = dma.vmem_to_hbm [thread:$0]  %s6105_s28, 256, %s6107_s4, [#allocation4], %s7095_s5, %s7095_s5, %s7082_s23  }
0x22d4   :  { %7071 = dma.done.wait [#allocation4], 256  }
0x22d5   :  { %7072 = vsyncadd [#allocation4], 4294967040 }
0x22d6   :  { %6117 = vsyncpa [#allocation3], 1 }
0x22d7   :  { %6118 = vsyncpa [#allocation4], 1 }

</bundles_post_ra>
